<compile_context>
chip_gen: v5e
topology: v5e:2x2
jax: 0.10.0
libtpu: 0.0.40
codegen_flags: <defaults>
</compile_context>

<pallas_src>
import functools

import jax
import jax.numpy as jnp
from jax.experimental import pallas as pl
from jax.experimental.pallas import tpu as pltpu

EPS = 1e-5
K = 5          # ConvTranspose2d kernel size
LANE = 128     # TPU lane width


# --------------------------- l1: Linear + BN1d + ReLU ------------------------

def _linear_bn_relu_kernel(x_ref, w_ref, g_ref, b_ref, o_ref):
    y = jnp.dot(x_ref[...], w_ref[...], preferred_element_type=jnp.float32)
    n = y.shape[0]
    mean = jnp.sum(y, axis=0, keepdims=True) * (1.0 / n)
    d = y - mean
    var = jnp.sum(d * d, axis=0, keepdims=True) * (1.0 / n)   # biased (PyTorch)
    out = d * jax.lax.rsqrt(var + EPS) * g_ref[...] + b_ref[...]
    o_ref[...] = jnp.maximum(out, 0.0).astype(o_ref.dtype)


def pallas_linear_bn_relu(x, w, gamma, beta):
    """x:(N,in) bf16, w:(in,F) bf16 -> bf16 (N,F), fully fused (M is tiny)."""
    N, in_dim = x.shape
    F = w.shape[1]
    return pl.pallas_call(
        _linear_bn_relu_kernel,
        out_shape=jax.ShapeDtypeStruct((N, F), jnp.bfloat16),
        grid=(1,),
        in_specs=[pl.BlockSpec((N, in_dim), lambda i: (0, 0)),
                  pl.BlockSpec((in_dim, F), lambda i: (0, 0)),
                  pl.BlockSpec((1, F), lambda i: (0, 0)),
                  pl.BlockSpec((1, F), lambda i: (0, 0))],
        out_specs=pl.BlockSpec((N, F), lambda i: (0, 0)),
    )(x, w, gamma.reshape(1, F), beta.reshape(1, F))


# ------------------- phase-decomposed transposed convolution -----------------
#
# Kernel input: (rows, 9*Cin) bf16 im2col'd activation (rows = N*H*W, all
# batch samples folded into M).  Weight: (9*Cin, C128) bf16 where
# C128 = 4*Cout zero-padded to a multiple of 128 lanes; column
# (py*2+px)*Cout+co holds output pixel (2j+py, 2i+px, co) for GEMM row j*W+i.

def _mm_stats_kernel(x_ref, w_ref, y_ref, s_ref):
    acc = jnp.dot(x_ref[...], w_ref[...], preferred_element_type=jnp.float32)
    y_ref[...] = acc.astype(y_ref.dtype)
    s_ref[0, 0:1, :] = jnp.sum(acc, axis=0, keepdims=True)          # BN sum
    s_ref[0, 1:2, :] = jnp.sum(acc * acc, axis=0, keepdims=True)    # BN sum sq


def _mm_bias_tanh_kernel(x_ref, w_ref, b_ref, y_ref):
    acc = jnp.dot(x_ref[...], w_ref[...], preferred_element_type=jnp.float32)
    y_ref[...] = jnp.tanh(acc + b_ref[...])


def _num_groups(rows):
    """2-way 'parallel' row split on dual-TC chips (v7x); 1 step elsewhere
    (per-step overhead dominates on single-TC v5e/v6e)."""
    try:
        kind = jax.devices()[0].device_kind.lower()
    except Exception:
        kind = ""
    g = 2 if "v7" in kind else 1
    if rows % (8 * g):          # keep row blocks sublane-aligned
        g = 1
    return g


def pallas_deconv_gemm(cols, w, bias=None):
    """cols:(rows, 9*Cin) bf16, w:(9*Cin, C128) bf16.
    Returns (y, stats): y is (rows, C128); stats is (G,2,C128) f32 per-group
    sums / sums-of-squares (None for the final bias+tanh layer)."""
    rows, kdim = cols.shape
    c128 = w.shape[1]
    g = _num_groups(rows)
    rb = rows // g
    cparams = pltpu.CompilerParams(dimension_semantics=("parallel",))
    # NOTE: at large `dim` the resident (9*Cin, C128) weight grows quadratically;
    # split it over a Cout tile axis / raise vmem_limit_bytes before scaling.

    if bias is None:
        y, stats = pl.pallas_call(
            _mm_stats_kernel,
            out_shape=(jax.ShapeDtypeStruct((rows, c128), jnp.bfloat16),
                       jax.ShapeDtypeStruct((g, 2, c128), jnp.float32)),
            grid=(g,),
            in_specs=[pl.BlockSpec((rb, kdim), lambda i: (i, 0)),
                      pl.BlockSpec((kdim, c128), lambda i: (0, 0))],
            out_specs=(pl.BlockSpec((rb, c128), lambda i: (i, 0)),
                       pl.BlockSpec((1, 2, c128), lambda i: (i, 0, 0))),
            compiler_params=cparams,
        )(cols, w)
        return y, stats

    y = pl.pallas_call(
        _mm_bias_tanh_kernel,
        out_shape=jax.ShapeDtypeStruct((rows, c128), jnp.float32),
        grid=(g,),
        in_specs=[pl.BlockSpec((rb, kdim), lambda i: (i, 0)),
                  pl.BlockSpec((kdim, c128), lambda i: (0, 0)),
                  pl.BlockSpec((1, c128), lambda i: (0, 0))],
        out_specs=pl.BlockSpec((rb, c128), lambda i: (i, 0)),
        compiler_params=cparams,
    )(cols, w, bias.reshape(1, c128))
    return y, None


# ------------------------------ XLA glue (1x pass) ---------------------------

def _im2col_3x3(x_nhwc):
    """Spatial 1-pad + gather the 3x3 window into channels (tap-major) and
    flatten rows -> (N*H*W, 9*C) bf16.  Row pitch W keeps every kernel load
    contiguous and sublane-aligned; no garbage columns are produced."""
    N, H, W, C = x_nhwc.shape
    xp = jnp.pad(x_nhwc, ((0, 0), (1, 1), (1, 1), (0, 0)))
    taps = [xp[:, dy:dy + H, dx:dx + W, :] for dy in range(3) for dx in range(3)]
    cols = jnp.concatenate(taps, axis=-1)
    return cols.reshape(N * H * W, 9 * C).astype(jnp.bfloat16)


def _bn_relu_shuffle(y, stats, gamma, beta, N, H, W, cout):
    """Training-mode BN (stats from the kernel epilogue) + ReLU + 2x2 pixel
    shuffle; emits bf16 for the next layer's im2col."""
    cnt = N * H * W * 4
    c4 = 4 * cout
    s = jnp.sum(stats[:, 0, :c4], axis=0).reshape(4, cout).sum(axis=0)
    s2 = jnp.sum(stats[:, 1, :c4], axis=0).reshape(4, cout).sum(axis=0)
    mean = s / cnt
    var = jnp.maximum(s2 / cnt - mean * mean, 0.0)
    scale = gamma * jax.lax.rsqrt(var + EPS)
    shift = beta - mean * scale
    y = y[:, :c4].astype(jnp.float32).reshape(N, H, W, 2, 2, cout)
    y = jnp.maximum(y * scale + shift, 0.0).astype(jnp.bfloat16)
    return y.transpose(0, 1, 3, 2, 4, 5).reshape(N, 2 * H, 2 * W, cout)


# --------------------------------- forward -----------------------------------

def generator_forward(x, params, dim):
    n = x.shape[0]
    c0 = dim * 8

    # l1: Linear(no bias) + BatchNorm1d + ReLU; columns pre-permuted -> NHWC
    y = pallas_linear_bn_relu(x.astype(jnp.bfloat16), params["l1_w_t"],
                              params["l1_bn_g"], params["l1_bn_b"])
    y = y.reshape(n, 4, 4, c0)                       # already NHWC order

    out_ch = [dim * 4, dim * 2, dim]
    h = w = 4
    for i in range(3):
        cols = _im2col_3x3(y)
        yp, stats = pallas_deconv_gemm(cols, params[f"dc{i}_w"])
        y = _bn_relu_shuffle(yp, stats, params[f"dc{i}_bn_g"],
                             params[f"dc{i}_bn_b"], n, h, w, out_ch[i])
        h, w = 2 * h, 2 * w

    # dc3: ConvTranspose2d(dim, 3) with bias + Tanh fused in the kernel
    cols = _im2col_3x3(y)
    yp, _ = pallas_deconv_gemm(cols, params["dc3_w"], bias=params["dc3_b"])
    yp = yp[:, :12].reshape(n, h, w, 2, 2, 3)
    return yp.transpose(0, 5, 1, 3, 2, 4).reshape(n, 3, 2 * h, 2 * w)   # NCHW


# ------------------------------ parameters -----------------------------------

def init_params(key, in_dim, dim):
    """Raw parameters in PyTorch layouts / init distributions (weights_init)."""
    ks = jax.random.split(key, 16)
    feat = dim * 8 * 4 * 4
    p = {}
    bound = 1.0 / (in_dim ** 0.5)                 # Linear keeps default init
    p["l1_w"] = jax.random.uniform(ks[0], (feat, in_dim), jnp.float32,
                                   -bound, bound)
    p["l1_bn_g"] = 1.0 + 0.02 * jax.random.normal(ks[1], (feat,), jnp.float32)
    p["l1_bn_b"] = jnp.zeros((feat,), jnp.float32)
    chans = [dim * 8, dim * 4, dim * 2, dim, 3]
    for i in range(4):
        cin, cout = chans[i], chans[i + 1]
        p[f"dc{i}_w"] = 0.02 * jax.random.normal(
            ks[2 + 3 * i], (cin, cout, K, K), jnp.float32)     # N(0, 0.02)
        if i < 3:
            p[f"dc{i}_bn_g"] = 1.0 + 0.02 * jax.random.normal(
                ks[3 + 3 * i], (cout,), jnp.float32)           # N(1, 0.02)
            p[f"dc{i}_bn_b"] = jnp.zeros((cout,), jnp.float32)
    bb = 1.0 / ((chans[3] * K * K) ** 0.5)
    p["dc3_b"] = jax.random.uniform(ks[14], (3,), jnp.float32, -bb, bb)
    return p


def _phase_tap(parity, d):
    """5-tap kernel index hit by padded-input offset d for an output parity."""
    if parity == 0:
        return 4 - 2 * d                       # d = 0,1,2 -> k = 4,2,0
    return 5 - 2 * d if d >= 1 else None       # d = 1,2   -> k = 3,1


def build_phase_weight(w):
    """(Cin, Cout, 5, 5) ConvTranspose2d weight -> (9*Cin, C128) GEMM weight:
    rows are tap-major (dy*3+dx, ci) matching the 3x3 im2col channel order,
    columns are phase-major (py*2+px, co) zero-padded to a multiple of 128."""
    cin, cout = w.shape[0], w.shape[1]
    taps = []
    for dy in range(3):
        for dx in range(3):
            cols = []
            for py in range(2):
                for px in range(2):
                    ky, kx = _phase_tap(py, dy), _phase_tap(px, dx)
                    if ky is None or kx is None:
                        cols.append(jnp.zeros((cin, cout), w.dtype))
                    else:
                        cols.append(w[:, :, ky, kx])
            taps.append(jnp.concatenate(cols, axis=1))
    wk = jnp.concatenate(taps, axis=0)                         # (9*Cin, 4*Cout)
    c4 = 4 * cout
    cpad = -(-c4 // LANE) * LANE
    if cpad != c4:
        wk = jnp.pad(wk, ((0, 0), (0, cpad - c4)))             # lane-dense out
    return wk


def prepare_params(raw, dim):
    """One-time weight re-layout, done OUTSIDE the jitted forward."""
    feat = dim * 8 * 4 * 4
    c0 = dim * 8
    # Permute l1 columns (and BN params) from (C,h,w) order to NHWC (h,w,C).
    perm = jnp.arange(feat).reshape(c0, 4, 4).transpose(1, 2, 0).reshape(-1)
    p = {"l1_w_t": raw["l1_w"].T[:, perm].astype(jnp.bfloat16),
         "l1_bn_g": raw["l1_bn_g"][perm],
         "l1_bn_b": raw["l1_bn_b"][perm]}
    for i in range(4):
        p[f"dc{i}_w"] = build_phase_weight(raw[f"dc{i}_w"]).astype(jnp.bfloat16)
        if i < 3:
            p[f"dc{i}_bn_g"] = raw[f"dc{i}_bn_g"]
            p[f"dc{i}_bn_b"] = raw[f"dc{i}_bn_b"]
    b4 = jnp.tile(raw["dc3_b"], 4)                             # phase-major (12,)
    p["dc3_b"] = jnp.pad(b4, (0, LANE - b4.shape[0]))          # pad to 128 lanes
    return p


if __name__ == "__main__":
    in_dim, dim, batch = 32, 16, 2
    key = jax.random.PRNGKey(0)
    kx, kp = jax.random.split(key)
    x = jax.random.normal(kx, (batch, in_dim), jnp.float32)
    params = prepare_params(init_params(kp, in_dim, dim), dim)

    fwd = jax.jit(functools.partial(generator_forward, dim=dim))
    out = fwd(x, params)
    jax.block_until_ready(out)

    assert out.shape == (batch, 3, 64, 64), out.shape
    assert bool(jnp.all(jnp.isfinite(out)))
    print("KERNEL_OK")
</pallas_src>

<mosaic_0001>
module attributes {stable_mosaic.version = 11 : i64} {
  func.func @_linear_bn_relu_kernel(%arg0: i32, %arg1: memref<2x32xbf16, #tpu.memory_space<vmem>>, %arg2: memref<32x2048xbf16, #tpu.memory_space<vmem>>, %arg3: memref<1x2048xf32, #tpu.memory_space<vmem>>, %arg4: memref<1x2048xf32, #tpu.memory_space<vmem>>, %arg5: memref<2x2048xbf16, #tpu.memory_space<vmem>>) attributes {dimension_semantics = [#tpu.dimension_semantics<arbitrary>], iteration_bounds = array<i64: 1>, scalar_prefetch = 0 : i64, scratch_operands = 0 : i64, tpu.core_type = #tpu.core_type<tc>, window_params = [{pipeline_mode = #tpu.pipeline_mode<synchronous>, transform_indices = @transform_0, window_bounds = array<i64: 2, 32>}, {pipeline_mode = #tpu.pipeline_mode<synchronous>, transform_indices = @transform_1, window_bounds = array<i64: 32, 2048>}, {pipeline_mode = #tpu.pipeline_mode<synchronous>, transform_indices = @transform_2, window_bounds = array<i64: 1, 2048>}, {pipeline_mode = #tpu.pipeline_mode<synchronous>, transform_indices = @transform_3, window_bounds = array<i64: 1, 2048>}, {pipeline_mode = #tpu.pipeline_mode<synchronous>, transform_indices = @transform_4, window_bounds = array<i64: 2, 2048>}]} {
    %c0 = arith.constant 0 : index
    %c0_0 = arith.constant 0 : index
    %0 = vector.load %arg1[%c0, %c0_0] : memref<2x32xbf16, #tpu.memory_space<vmem>>, vector<2x32xbf16>
    %c0_1 = arith.constant 0 : index
    %c0_2 = arith.constant 0 : index
    %1 = vector.load %arg2[%c0_1, %c0_2] : memref<32x2048xbf16, #tpu.memory_space<vmem>>, vector<32x2048xbf16>
    %cst = arith.constant dense<0.000000e+00> : vector<2x2048xf32>
    %2 = tpu.matmul %0, %1, %cst {dimension_numbers = #tpu.dot_dimension_numbers<[1], [0], [0], [1], [0, 0, 1, 1], [], []>} : vector<2x32xbf16>, vector<32x2048xbf16>, vector<2x2048xf32> -> vector<2x2048xf32>
    %cst_3 = arith.constant dense<0.000000e+00> : vector<2048xf32>
    %3 = vector.multi_reduction <add>, %2, %cst_3 [0] : vector<2x2048xf32> to vector<2048xf32>
    %4 = vector.shape_cast %3 : vector<2048xf32> to vector<1x2048xf32>
    %cst_4 = arith.constant 5.000000e-01 : f32
    %5 = vector.broadcast %cst_4 : f32 to vector<1x2048xf32>
    %6 = arith.mulf %4, %5 : vector<1x2048xf32>
    %7 = vector.broadcast %6 : vector<1x2048xf32> to vector<2x2048xf32>
    %8 = arith.subf %2, %7 : vector<2x2048xf32>
    %9 = arith.mulf %8, %8 : vector<2x2048xf32>
    %cst_5 = arith.constant dense<0.000000e+00> : vector<2048xf32>
    %10 = vector.multi_reduction <add>, %9, %cst_5 [0] : vector<2x2048xf32> to vector<2048xf32>
    %11 = vector.shape_cast %10 : vector<2048xf32> to vector<1x2048xf32>
    %cst_6 = arith.constant 5.000000e-01 : f32
    %12 = vector.broadcast %cst_6 : f32 to vector<1x2048xf32>
    %13 = arith.mulf %11, %12 : vector<1x2048xf32>
    %cst_7 = arith.constant 9.99999974E-6 : f32
    %14 = vector.broadcast %cst_7 : f32 to vector<1x2048xf32>
    %15 = arith.addf %13, %14 : vector<1x2048xf32>
    %16 = math.rsqrt %15 : vector<1x2048xf32>
    %17 = vector.broadcast %16 : vector<1x2048xf32> to vector<2x2048xf32>
    %18 = arith.mulf %8, %17 : vector<2x2048xf32>
    %c0_8 = arith.constant 0 : index
    %c0_9 = arith.constant 0 : index
    %19 = vector.load %arg3[%c0_8, %c0_9] : memref<1x2048xf32, #tpu.memory_space<vmem>>, vector<1x2048xf32>
    %20 = vector.broadcast %19 : vector<1x2048xf32> to vector<2x2048xf32>
    %21 = arith.mulf %18, %20 : vector<2x2048xf32>
    %c0_10 = arith.constant 0 : index
    %c0_11 = arith.constant 0 : index
    %22 = vector.load %arg4[%c0_10, %c0_11] : memref<1x2048xf32, #tpu.memory_space<vmem>>, vector<1x2048xf32>
    %23 = vector.broadcast %22 : vector<1x2048xf32> to vector<2x2048xf32>
    %24 = arith.addf %21, %23 : vector<2x2048xf32>
    %cst_12 = arith.constant 0.000000e+00 : f32
    %25 = vector.broadcast %cst_12 : f32 to vector<2x2048xf32>
    %26 = arith.maximumf %24, %25 : vector<2x2048xf32>
    %27 = arith.truncf %26 : vector<2x2048xf32> to vector<2x2048xbf16>
    %c0_13 = arith.constant 0 : index
    %c0_14 = arith.constant 0 : index
    %28 = vector.load %arg5[%c0_13, %c0_14] : memref<2x2048xbf16, #tpu.memory_space<vmem>>, vector<2x2048xbf16>
    tpu.vector_store %arg5[%c0_13, %c0_14], %27 {strides = array<i32>} : memref<2x2048xbf16, #tpu.memory_space<vmem>>, vector<2x2048xbf16>,
    return
  }
  func.func @transform_0(%arg0: i32) -> (i32, i32) {
    %c0_i32 = arith.constant 0 : i32
    %c0_i32_0 = arith.constant 0 : i32
    %c0_i32_1 = arith.constant 0 : i32
    return %c0_i32, %c0_i32_0 : i32, i32
  }
  func.func @transform_1(%arg0: i32) -> (i32, i32) {
    %c0_i32 = arith.constant 0 : i32
    %c0_i32_0 = arith.constant 0 : i32
    %c0_i32_1 = arith.constant 0 : i32
    return %c0_i32, %c0_i32_0 : i32, i32
  }
  func.func @transform_2(%arg0: i32) -> (i32, i32) {
    %c0_i32 = arith.constant 0 : i32
    %c0_i32_0 = arith.constant 0 : i32
    %c0_i32_1 = arith.constant 0 : i32
    return %c0_i32, %c0_i32_0 : i32, i32
  }
  func.func @transform_3(%arg0: i32) -> (i32, i32) {
    %c0_i32 = arith.constant 0 : i32
    %c0_i32_0 = arith.constant 0 : i32
    %c0_i32_1 = arith.constant 0 : i32
    return %c0_i32, %c0_i32_0 : i32, i32
  }
  func.func @transform_4(%arg0: i32) -> (i32, i32) {
    %c0_i32 = arith.constant 0 : i32
    %c0_i32_0 = arith.constant 0 : i32
    %c0_i32_1 = arith.constant 0 : i32
    return %c0_i32, %c0_i32_0 : i32, i32
  }
}

module attributes {stable_mosaic.version = 11 : i64} {
  func.func @_mm_stats_kernel(%arg0: i32, %arg1: memref<32x1152xbf16, #tpu.memory_space<vmem>>, %arg2: memref<1152x256xbf16, #tpu.memory_space<vmem>>, %arg3: memref<32x256xbf16, #tpu.memory_space<vmem>>, %arg4: memref<1x2x256xf32, #tpu.memory_space<vmem>>) attributes {dimension_semantics = [#tpu.dimension_semantics<parallel>], iteration_bounds = array<i64: 1>, scalar_prefetch = 0 : i64, scratch_operands = 0 : i64, tpu.core_type = #tpu.core_type<tc>, window_params = [{transform_indices = @transform_0, window_bounds = array<i64: 32, 1152>}, {pipeline_mode = #tpu.pipeline_mode<synchronous>, transform_indices = @transform_1, window_bounds = array<i64: 1152, 256>}, {transform_indices = @transform_2, window_bounds = array<i64: 32, 256>}, {transform_indices = @transform_3, window_bounds = array<i64: 1, 2, 256>}]} {
    %c0 = arith.constant 0 : index
    %c0_0 = arith.constant 0 : index
    %0 = vector.load %arg1[%c0, %c0_0] : memref<32x1152xbf16, #tpu.memory_space<vmem>>, vector<32x1152xbf16>
    %c0_1 = arith.constant 0 : index
    %c0_2 = arith.constant 0 : index
    %1 = vector.load %arg2[%c0_1, %c0_2] : memref<1152x256xbf16, #tpu.memory_space<vmem>>, vector<1152x256xbf16>
    %cst = arith.constant dense<0.000000e+00> : vector<32x256xf32>
    %2 = tpu.matmul %0, %1, %cst {dimension_numbers = #tpu.dot_dimension_numbers<[1], [0], [0], [1], [0, 0, 1, 1], [], []>} : vector<32x1152xbf16>, vector<1152x256xbf16>, vector<32x256xf32> -> vector<32x256xf32>
    %3 = arith.truncf %2 : vector<32x256xf32> to vector<32x256xbf16>
    %c0_3 = arith.constant 0 : index
    %c0_4 = arith.constant 0 : index
    %4 = vector.load %arg3[%c0_3, %c0_4] : memref<32x256xbf16, #tpu.memory_space<vmem>>, vector<32x256xbf16>
    tpu.vector_store %arg3[%c0_3, %c0_4], %3 {strides = array<i32>} : memref<32x256xbf16, #tpu.memory_space<vmem>>, vector<32x256xbf16>,
    %cst_5 = arith.constant dense<0.000000e+00> : vector<256xf32>
    %5 = vector.multi_reduction <add>, %2, %cst_5 [0] : vector<32x256xf32> to vector<256xf32>
    %6 = vector.shape_cast %5 : vector<256xf32> to vector<1x256xf32>
    %c0_6 = arith.constant 0 : index
    %c0_7 = arith.constant 0 : index
    %c0_8 = arith.constant 0 : index
    %7 = vector.load %arg4[%c0_6, %c0_7, %c0_8] : memref<1x2x256xf32, #tpu.memory_space<vmem>>, vector<1x1x256xf32>
    %8 = vector.shape_cast %7 : vector<1x1x256xf32> to vector<1x256xf32>
    %9 = vector.shape_cast %6 : vector<1x256xf32> to vector<1x1x256xf32>
    tpu.vector_store %arg4[%c0_6, %c0_7, %c0_8], %9 {strides = array<i32>} : memref<1x2x256xf32, #tpu.memory_space<vmem>>, vector<1x1x256xf32>,
    %10 = arith.mulf %2, %2 : vector<32x256xf32>
    %cst_9 = arith.constant dense<0.000000e+00> : vector<256xf32>
    %11 = vector.multi_reduction <add>, %10, %cst_9 [0] : vector<32x256xf32> to vector<256xf32>
    %12 = vector.shape_cast %11 : vector<256xf32> to vector<1x256xf32>
    %c0_10 = arith.constant 0 : index
    %c1 = arith.constant 1 : index
    %c0_11 = arith.constant 0 : index
    %13 = vector.load %arg4[%c0_10, %c1, %c0_11] : memref<1x2x256xf32, #tpu.memory_space<vmem>>, vector<1x1x256xf32>
    %14 = vector.shape_cast %13 : vector<1x1x256xf32> to vector<1x256xf32>
    %15 = vector.shape_cast %12 : vector<1x256xf32> to vector<1x1x256xf32>
    tpu.vector_store %arg4[%c0_10, %c1, %c0_11], %15 {strides = array<i32>} : memref<1x2x256xf32, #tpu.memory_space<vmem>>, vector<1x1x256xf32>,
    return
  }
  func.func @transform_0(%arg0: i32) -> (i32, i32) {
    %c0_i32 = arith.constant 0 : i32
    %c0_i32_0 = arith.constant 0 : i32
    return %arg0, %c0_i32 : i32, i32
  }
  func.func @transform_1(%arg0: i32) -> (i32, i32) {
    %c0_i32 = arith.constant 0 : i32
    %c0_i32_0 = arith.constant 0 : i32
    %c0_i32_1 = arith.constant 0 : i32
    return %c0_i32, %c0_i32_0 : i32, i32
  }
  func.func @transform_2(%arg0: i32) -> (i32, i32) {
    %c0_i32 = arith.constant 0 : i32
    %c0_i32_0 = arith.constant 0 : i32
    return %arg0, %c0_i32 : i32, i32
  }
  func.func @transform_3(%arg0: i32) -> (i32, i32, i32) {
    %c0_i32 = arith.constant 0 : i32
    %c0_i32_0 = arith.constant 0 : i32
    %c0_i32_1 = arith.constant 0 : i32
    return %arg0, %c0_i32, %c0_i32_0 : i32, i32, i32
  }
}

module attributes {stable_mosaic.version = 11 : i64} {
  func.func @_mm_stats_kernel(%arg0: i32, %arg1: memref<128x576xbf16, #tpu.memory_space<vmem>>, %arg2: memref<576x128xbf16, #tpu.memory_space<vmem>>, %arg3: memref<128x128xbf16, #tpu.memory_space<vmem>>, %arg4: memref<1x2x128xf32, #tpu.memory_space<vmem>>) attributes {dimension_semantics = [#tpu.dimension_semantics<parallel>], iteration_bounds = array<i64: 1>, scalar_prefetch = 0 : i64, scratch_operands = 0 : i64, tpu.core_type = #tpu.core_type<tc>, window_params = [{transform_indices = @transform_0, window_bounds = array<i64: 128, 576>}, {pipeline_mode = #tpu.pipeline_mode<synchronous>, transform_indices = @transform_1, window_bounds = array<i64: 576, 128>}, {transform_indices = @transform_2, window_bounds = array<i64: 128, 128>}, {transform_indices = @transform_3, window_bounds = array<i64: 1, 2, 128>}]} {
    %c0 = arith.constant 0 : index
    %c0_0 = arith.constant 0 : index
    %0 = vector.load %arg1[%c0, %c0_0] : memref<128x576xbf16, #tpu.memory_space<vmem>>, vector<128x576xbf16>
    %c0_1 = arith.constant 0 : index
    %c0_2 = arith.constant 0 : index
    %1 = vector.load %arg2[%c0_1, %c0_2] : memref<576x128xbf16, #tpu.memory_space<vmem>>, vector<576x128xbf16>
    %cst = arith.constant dense<0.000000e+00> : vector<128x128xf32>
    %2 = tpu.matmul %0, %1, %cst {dimension_numbers = #tpu.dot_dimension_numbers<[1], [0], [0], [1], [0, 0, 1, 1], [], []>} : vector<128x576xbf16>, vector<576x128xbf16>, vector<128x128xf32> -> vector<128x128xf32>
    %3 = arith.truncf %2 : vector<128x128xf32> to vector<128x128xbf16>
    %c0_3 = arith.constant 0 : index
    %c0_4 = arith.constant 0 : index
    %4 = vector.load %arg3[%c0_3, %c0_4] : memref<128x128xbf16, #tpu.memory_space<vmem>>, vector<128x128xbf16>
    tpu.vector_store %arg3[%c0_3, %c0_4], %3 {strides = array<i32>} : memref<128x128xbf16, #tpu.memory_space<vmem>>, vector<128x128xbf16>,
    %cst_5 = arith.constant dense<0.000000e+00> : vector<128xf32>
    %5 = vector.multi_reduction <add>, %2, %cst_5 [0] : vector<128x128xf32> to vector<128xf32>
    %6 = vector.shape_cast %5 : vector<128xf32> to vector<1x128xf32>
    %c0_6 = arith.constant 0 : index
    %c0_7 = arith.constant 0 : index
    %c0_8 = arith.constant 0 : index
    %7 = vector.load %arg4[%c0_6, %c0_7, %c0_8] : memref<1x2x128xf32, #tpu.memory_space<vmem>>, vector<1x1x128xf32>
    %8 = vector.shape_cast %7 : vector<1x1x128xf32> to vector<1x128xf32>
    %9 = vector.shape_cast %6 : vector<1x128xf32> to vector<1x1x128xf32>
    tpu.vector_store %arg4[%c0_6, %c0_7, %c0_8], %9 {strides = array<i32>} : memref<1x2x128xf32, #tpu.memory_space<vmem>>, vector<1x1x128xf32>,
    %10 = arith.mulf %2, %2 : vector<128x128xf32>
    %cst_9 = arith.constant dense<0.000000e+00> : vector<128xf32>
    %11 = vector.multi_reduction <add>, %10, %cst_9 [0] : vector<128x128xf32> to vector<128xf32>
    %12 = vector.shape_cast %11 : vector<128xf32> to vector<1x128xf32>
    %c0_10 = arith.constant 0 : index
    %c1 = arith.constant 1 : index
    %c0_11 = arith.constant 0 : index
    %13 = vector.load %arg4[%c0_10, %c1, %c0_11] : memref<1x2x128xf32, #tpu.memory_space<vmem>>, vector<1x1x128xf32>
    %14 = vector.shape_cast %13 : vector<1x1x128xf32> to vector<1x128xf32>
    %15 = vector.shape_cast %12 : vector<1x128xf32> to vector<1x1x128xf32>
    tpu.vector_store %arg4[%c0_10, %c1, %c0_11], %15 {strides = array<i32>} : memref<1x2x128xf32, #tpu.memory_space<vmem>>, vector<1x1x128xf32>,
    return
  }
  func.func @transform_0(%arg0: i32) -> (i32, i32) {
    %c0_i32 = arith.constant 0 : i32
    %c0_i32_0 = arith.constant 0 : i32
    return %arg0, %c0_i32 : i32, i32
  }
  func.func @transform_1(%arg0: i32) -> (i32, i32) {
    %c0_i32 = arith.constant 0 : i32
    %c0_i32_0 = arith.constant 0 : i32
    %c0_i32_1 = arith.constant 0 : i32
    return %c0_i32, %c0_i32_0 : i32, i32
  }
  func.func @transform_2(%arg0: i32) -> (i32, i32) {
    %c0_i32 = arith.constant 0 : i32
    %c0_i32_0 = arith.constant 0 : i32
    return %arg0, %c0_i32 : i32, i32
  }
  func.func @transform_3(%arg0: i32) -> (i32, i32, i32) {
    %c0_i32 = arith.constant 0 : i32
    %c0_i32_0 = arith.constant 0 : i32
    %c0_i32_1 = arith.constant 0 : i32
    return %arg0, %c0_i32, %c0_i32_0 : i32, i32, i32
  }
}

module attributes {stable_mosaic.version = 11 : i64} {
  func.func @_mm_stats_kernel(%arg0: i32, %arg1: memref<512x288xbf16, #tpu.memory_space<vmem>>, %arg2: memref<288x128xbf16, #tpu.memory_space<vmem>>, %arg3: memref<512x128xbf16, #tpu.memory_space<vmem>>, %arg4: memref<1x2x128xf32, #tpu.memory_space<vmem>>) attributes {dimension_semantics = [#tpu.dimension_semantics<parallel>], iteration_bounds = array<i64: 1>, scalar_prefetch = 0 : i64, scratch_operands = 0 : i64, tpu.core_type = #tpu.core_type<tc>, window_params = [{transform_indices = @transform_0, window_bounds = array<i64: 512, 288>}, {pipeline_mode = #tpu.pipeline_mode<synchronous>, transform_indices = @transform_1, window_bounds = array<i64: 288, 128>}, {transform_indices = @transform_2, window_bounds = array<i64: 512, 128>}, {transform_indices = @transform_3, window_bounds = array<i64: 1, 2, 128>}]} {
    %c0 = arith.constant 0 : index
    %c0_0 = arith.constant 0 : index
    %0 = vector.load %arg1[%c0, %c0_0] : memref<512x288xbf16, #tpu.memory_space<vmem>>, vector<512x288xbf16>
    %c0_1 = arith.constant 0 : index
    %c0_2 = arith.constant 0 : index
    %1 = vector.load %arg2[%c0_1, %c0_2] : memref<288x128xbf16, #tpu.memory_space<vmem>>, vector<288x128xbf16>
    %cst = arith.constant dense<0.000000e+00> : vector<512x128xf32>
    %2 = tpu.matmul %0, %1, %cst {dimension_numbers = #tpu.dot_dimension_numbers<[1], [0], [0], [1], [0, 0, 1, 1], [], []>} : vector<512x288xbf16>, vector<288x128xbf16>, vector<512x128xf32> -> vector<512x128xf32>
    %3 = arith.truncf %2 : vector<512x128xf32> to vector<512x128xbf16>
    %c0_3 = arith.constant 0 : index
    %c0_4 = arith.constant 0 : index
    %4 = vector.load %arg3[%c0_3, %c0_4] : memref<512x128xbf16, #tpu.memory_space<vmem>>, vector<512x128xbf16>
    tpu.vector_store %arg3[%c0_3, %c0_4], %3 {strides = array<i32>} : memref<512x128xbf16, #tpu.memory_space<vmem>>, vector<512x128xbf16>,
    %cst_5 = arith.constant dense<0.000000e+00> : vector<128xf32>
    %5 = vector.multi_reduction <add>, %2, %cst_5 [0] : vector<512x128xf32> to vector<128xf32>
    %6 = vector.shape_cast %5 : vector<128xf32> to vector<1x128xf32>
    %c0_6 = arith.constant 0 : index
    %c0_7 = arith.constant 0 : index
    %c0_8 = arith.constant 0 : index
    %7 = vector.load %arg4[%c0_6, %c0_7, %c0_8] : memref<1x2x128xf32, #tpu.memory_space<vmem>>, vector<1x1x128xf32>
    %8 = vector.shape_cast %7 : vector<1x1x128xf32> to vector<1x128xf32>
    %9 = vector.shape_cast %6 : vector<1x128xf32> to vector<1x1x128xf32>
    tpu.vector_store %arg4[%c0_6, %c0_7, %c0_8], %9 {strides = array<i32>} : memref<1x2x128xf32, #tpu.memory_space<vmem>>, vector<1x1x128xf32>,
    %10 = arith.mulf %2, %2 : vector<512x128xf32>
    %cst_9 = arith.constant dense<0.000000e+00> : vector<128xf32>
    %11 = vector.multi_reduction <add>, %10, %cst_9 [0] : vector<512x128xf32> to vector<128xf32>
    %12 = vector.shape_cast %11 : vector<128xf32> to vector<1x128xf32>
    %c0_10 = arith.constant 0 : index
    %c1 = arith.constant 1 : index
    %c0_11 = arith.constant 0 : index
    %13 = vector.load %arg4[%c0_10, %c1, %c0_11] : memref<1x2x128xf32, #tpu.memory_space<vmem>>, vector<1x1x128xf32>
    %14 = vector.shape_cast %13 : vector<1x1x128xf32> to vector<1x128xf32>
    %15 = vector.shape_cast %12 : vector<1x128xf32> to vector<1x1x128xf32>
    tpu.vector_store %arg4[%c0_10, %c1, %c0_11], %15 {strides = array<i32>} : memref<1x2x128xf32, #tpu.memory_space<vmem>>, vector<1x1x128xf32>,
    return
  }
  func.func @transform_0(%arg0: i32) -> (i32, i32) {
    %c0_i32 = arith.constant 0 : i32
    %c0_i32_0 = arith.constant 0 : i32
    return %arg0, %c0_i32 : i32, i32
  }
  func.func @transform_1(%arg0: i32) -> (i32, i32) {
    %c0_i32 = arith.constant 0 : i32
    %c0_i32_0 = arith.constant 0 : i32
    %c0_i32_1 = arith.constant 0 : i32
    return %c0_i32, %c0_i32_0 : i32, i32
  }
  func.func @transform_2(%arg0: i32) -> (i32, i32) {
    %c0_i32 = arith.constant 0 : i32
    %c0_i32_0 = arith.constant 0 : i32
    return %arg0, %c0_i32 : i32, i32
  }
  func.func @transform_3(%arg0: i32) -> (i32, i32, i32) {
    %c0_i32 = arith.constant 0 : i32
    %c0_i32_0 = arith.constant 0 : i32
    %c0_i32_1 = arith.constant 0 : i32
    return %arg0, %c0_i32, %c0_i32_0 : i32, i32, i32
  }
}

module attributes {stable_mosaic.version = 11 : i64} {
  func.func @_mm_bias_tanh_kernel(%arg0: i32, %arg1: memref<2048x144xbf16, #tpu.memory_space<vmem>>, %arg2: memref<144x128xbf16, #tpu.memory_space<vmem>>, %arg3: memref<1x128xf32, #tpu.memory_space<vmem>>, %arg4: memref<2048x128xf32, #tpu.memory_space<vmem>>) attributes {dimension_semantics = [#tpu.dimension_semantics<parallel>], iteration_bounds = array<i64: 1>, scalar_prefetch = 0 : i64, scratch_operands = 0 : i64, tpu.core_type = #tpu.core_type<tc>, window_params = [{transform_indices = @transform_0, window_bounds = array<i64: 2048, 144>}, {pipeline_mode = #tpu.pipeline_mode<synchronous>, transform_indices = @transform_1, window_bounds = array<i64: 144, 128>}, {pipeline_mode = #tpu.pipeline_mode<synchronous>, transform_indices = @transform_2, window_bounds = array<i64: 1, 128>}, {transform_indices = @transform_3, window_bounds = array<i64: 2048, 128>}]} {
    %c0 = arith.constant 0 : index
    %c0_0 = arith.constant 0 : index
    %0 = vector.load %arg1[%c0, %c0_0] : memref<2048x144xbf16, #tpu.memory_space<vmem>>, vector<2048x144xbf16>
    %c0_1 = arith.constant 0 : index
    %c0_2 = arith.constant 0 : index
    %1 = vector.load %arg2[%c0_1, %c0_2] : memref<144x128xbf16, #tpu.memory_space<vmem>>, vector<144x128xbf16>
    %cst = arith.constant dense<0.000000e+00> : vector<2048x128xf32>
    %2 = tpu.matmul %0, %1, %cst {dimension_numbers = #tpu.dot_dimension_numbers<[1], [0], [0], [1], [0, 0, 1, 1], [], []>} : vector<2048x144xbf16>, vector<144x128xbf16>, vector<2048x128xf32> -> vector<2048x128xf32>
    %c0_3 = arith.constant 0 : index
    %c0_4 = arith.constant 0 : index
    %3 = vector.load %arg3[%c0_3, %c0_4] : memref<1x128xf32, #tpu.memory_space<vmem>>, vector<1x128xf32>
    %4 = vector.broadcast %3 : vector<1x128xf32> to vector<2048x128xf32>
    %5 = arith.addf %2, %4 : vector<2048x128xf32>
    %6 = math.tanh %5 : vector<2048x128xf32>
    %c0_5 = arith.constant 0 : index
    %c0_6 = arith.constant 0 : index
    %7 = vector.load %arg4[%c0_5, %c0_6] : memref<2048x128xf32, #tpu.memory_space<vmem>>, vector<2048x128xf32>
    tpu.vector_store %arg4[%c0_5, %c0_6], %6 {strides = array<i32>} : memref<2048x128xf32, #tpu.memory_space<vmem>>, vector<2048x128xf32>,
    return
  }
  func.func @transform_0(%arg0: i32) -> (i32, i32) {
    %c0_i32 = arith.constant 0 : i32
    %c0_i32_0 = arith.constant 0 : i32
    return %arg0, %c0_i32 : i32, i32
  }
  func.func @transform_1(%arg0: i32) -> (i32, i32) {
    %c0_i32 = arith.constant 0 : i32
    %c0_i32_0 = arith.constant 0 : i32
    %c0_i32_1 = arith.constant 0 : i32
    return %c0_i32, %c0_i32_0 : i32, i32
  }
  func.func @transform_2(%arg0: i32) -> (i32, i32) {
    %c0_i32 = arith.constant 0 : i32
    %c0_i32_0 = arith.constant 0 : i32
    %c0_i32_1 = arith.constant 0 : i32
    return %c0_i32, %c0_i32_0 : i32, i32
  }
  func.func @transform_3(%arg0: i32) -> (i32, i32) {
    %c0_i32 = arith.constant 0 : i32
    %c0_i32_0 = arith.constant 0 : i32
    return %arg0, %c0_i32 : i32, i32
  }
}

</mosaic_0001>

<bundles_post_ra>
// kernel: generator_forward.5
= control target key start
LH: loop header
LB: loop body
LE: loop exit
PB: predicated region body
PF: predicated region fallthrough
CT: control target
= control target key end

     0   :  { %9 = vsyncpa [#allocation3], 0  ;;  %s1889_s0 = inlined_call_operand.vmem [shape: bf16[2,32], index: 0, kind: input, shape index: {}]   ;;  %s1890_s1 = inlined_call_operand.hbm [shape: bf16[32,2048], index: 1, kind: input, shape index: {}]   ;;  %s1891_s2 = inlined_call_operand.hbm [shape: f32[1,2048], index: 2, kind: input, shape index: {}]   ;;  %s1892_s3 = inlined_call_operand.hbm [shape: f32[1,2048], index: 3, kind: input, shape index: {}]   ;;  %s1893_s4 = inlined_call_operand.vmem [shape: bf16[2,2048], index: 4, kind: output, shape index: {}]  }
   0x1   :  { %10 = vsyncpa [#allocation5], 0  ;;  %s31_s17 = sshll.u32 %s1891_s2, 4  ;;  %s1432_s18 = smov [#allocation4]   ;;  %s32_s17 = int_to_ptr.hbm [resolvable:$true] %s31_s17 }
   0x2   :  { %s33_s19 = sshll.u32 %s1432_s18, 4  ;;  %s17_s22 = sshll.u32 %s1890_s1, 4  ;;  %s34_s19 = int_to_ptr.vmem [resolvable:$true] %s33_s19  ;;  %s18_s22 = int_to_ptr.hbm [resolvable:$true] %s17_s22 }
   0x3   :  { %36 = dma.hbm_to_vmem [thread:$0]  %s32_s17, 256, %s34_s19, [#allocation5]  }
   0x4   :  { %s1433_s23 = smov [#allocation2]   ;;  %s1434_s25 = smov 1024  }
   0x5   :  { %s19_s24 = sshll.u32 %s1433_s23, 4  ;;  %s1435_s26 = smov 64   ;;  %s20_s24 = int_to_ptr.vmem [resolvable:$true] %s19_s24 }
   0x6   :  { %25 = dma.hbm_to_vmem [thread:$0]  %s18_s22, 4096, %s20_s24, [#allocation3], %s1434_s25, %s1434_s25, %s1435_s26  }
   0x7   :  { %s42_s2 = sshll.u32 %s1892_s3, 4  ;;  %s1436_s29 = smov [#allocation6]   ;;  %s43_s2 = int_to_ptr.hbm [resolvable:$true] %s42_s2 }
   0x8   :  { %s44_s30 = sshll.u32 %s1436_s29, 4  ;;  %s45_s30 = int_to_ptr.vmem [resolvable:$true] %s44_s30 }
   0x9   :  { %47 = dma.hbm_to_vmem [thread:$0]  %s43_s2, 256, %s45_s30, [#allocation5]  }
   0xa   :  { %1428 = dma.done.wait [#allocation3], 4096  }
   0xb   :  { %1429 = vsyncadd [#allocation3], 4294963200 }
   0xc   :  { %1430 = dma.done.wait [#allocation5], 512  }
   0xd   :  { %1431 = vsyncadd [#allocation5], 4294966784  ;;  %vm254_vm0 = vcmask 261120   ;;  %v1209_v0 = vld [vmem:[#allocation2 + $0x80] sm:$0xf]  ;;  %vm466_vm1 = vcmask 1041408  }
   0xe   :  { %v1311_v1 = vld [vmem:[#allocation2 + $0xbc] sm:$0xf0]  ;;  %v1303_v2 = vld [vmem:[#allocation2 + $0x84] sm:$0xf]  ;;  %v1217_v5 = vld [vmem:[#allocation2 + $0x88] sm:$0xf] }
   0xf   :  { %v1210_v3 = vor.u32 %v1311_v1, %v1209_v0  ;;  %v1211_v4 = vld [vmem:[#allocation2 + $0xc0] sm:$0xf0]  ;;  %v1312_v6 = vld [vmem:[#allocation2 + $0xc4] sm:$0xf0]  ;;  %v1304_v9 = vld [vmem:[#allocation2 + $0x8c] sm:$0xf] }
  0x10   :  { %v1214_v7 = vor.u32 %v1303_v2, %v1211_v4  ;;  %v1218_v8 = vor.u32 %v1312_v6, %v1217_v5  ;;  %v1219_v10 = vld [vmem:[#allocation2 + $0xc8] sm:$0xf0]  ;;  %v1145_v11 = vld [vmem:[#allocation2] sm:$0xf]  ;;  %v1287_v14 = vld [vmem:[#allocation2 + $0x4] sm:$0xf] }
  0x11   :  { %264 = vmatpush.bf16.msra.mxu0 %v1210_v3  ;;  %v1222_v12 = vor.u32 %v1304_v9, %v1219_v10  ;;  %v1295_v13 = vld [vmem:[#allocation2 + $0x3c] sm:$0xf0]  ;;  %v1147_v15 = vld [vmem:[#allocation2 + $0x40] sm:$0xf0]  ;;  %v1153_v18 = vld [vmem:[#allocation2 + $0x8] sm:$0xf] }
  0x12   :  { %277 = vmatpush.bf16.msra.mxu1 %v1214_v7  ;;  %290 = vmatpush.bf16.msra.mxu2 %v1218_v8  ;;  %v1146_v16 = vor.u32 %v1295_v13, %v1145_v11  ;;  %v1150_v17 = vor.u32 %v1287_v14, %v1147_v15  ;;  %v1296_v19 = vld [vmem:[#allocation2 + $0x44] sm:$0xf0]  ;;  %v1288_v20 = vld [vmem:[#allocation2 + $0xc] sm:$0xf]  ;;  %v1474_v23 = vld [vmem:[%s1889_s0] sm:$0x1] }
  0x13   :  { %303 = vmatpush.bf16.msra.mxu3 %v1222_v12  ;;  %v1154_v21 = vor.u32 %v1296_v19, %v1153_v18  ;;  %v1155_v22 = vld [vmem:[#allocation2 + $0x48] sm:$0xf0]  ;;  %v1233_v24 = vld [vmem:[#allocation2 + $0x98] sm:$0xf]  ;;  %v1306_v27 = vld [vmem:[#allocation2 + $0x9c] sm:$0xf] }
  0x14   :  { %v1158_v25 = vor.u32 %v1288_v20, %v1155_v22  ;;  %v1314_v26 = vld [vmem:[#allocation2 + $0xd4] sm:$0xf0]  ;;  %v1235_v28 = vld [vmem:[#allocation2 + $0xd8] sm:$0xf0]  ;;  %v1225_v31 = vld [vmem:[#allocation2 + $0x90] sm:$0xf] }
  0x15   :  { %265 = vmatpush.bf16.msra.mxu0 %v1146_v16  ;;  %v1234_v29 = vor.u32 %v1314_v26, %v1233_v24  ;;  %v1238_v30 = vor.u32 %v1306_v27, %v1235_v28  ;;  %v1313_v32 = vld [vmem:[#allocation2 + $0xcc] sm:$0xf0]  ;;  %v1305_v33 = vld [vmem:[#allocation2 + $0x94] sm:$0xf]  ;;  %v1169_v36 = vld [vmem:[#allocation2 + $0x18] sm:$0xf] }
  0x16   :  { %278 = vmatpush.bf16.msra.mxu1 %v1150_v17  ;;  %291 = vmatpush.bf16.msra.mxu2 %v1154_v21  ;;  %v1226_v34 = vor.u32 %v1313_v32, %v1225_v31  ;;  %v1227_v35 = vld [vmem:[#allocation2 + $0xd0] sm:$0xf0]  ;;  %v1298_v37 = vld [vmem:[#allocation2 + $0x54] sm:$0xf0]  ;;  %v1290_v40 = vld [vmem:[#allocation2 + $0x1c] sm:$0xf] }
  0x17   :  { %304 = vmatpush.bf16.msra.mxu3 %v1158_v25  ;;  %v1230_v38 = vor.u32 %v1305_v33, %v1227_v35  ;;  %v1170_v39 = vor.u32 %v1298_v37, %v1169_v36  ;;  %v1171_v41 = vld [vmem:[#allocation2 + $0x58] sm:$0xf0]  ;;  %v1161_v42 = vld [vmem:[#allocation2 + $0x10] sm:$0xf]  ;;  %v1289_v45 = vld [vmem:[#allocation2 + $0x14] sm:$0xf] }
  0x18   :  { %1271 = vmatmul.msk.bf16.vlgmr.msra.gmra.mxu0 %vm254_vm0, %v1474_v23  ;;  %v1174_v43 = vor.u32 %v1290_v40, %v1171_v41  ;;  %v1297_v44 = vld [vmem:[#allocation2 + $0x4c] sm:$0xf0]  ;;  %v1163_v46 = vld [vmem:[#allocation2 + $0x50] sm:$0xf0]  ;;  %v1249_v47 = vld [vmem:[#allocation2 + $0xa8] sm:$0xf] }
  0x19   :  { %1272 = vmatmul.msk.bf16.vlgmr.msra.gmra.mxu1 %vm254_vm0, %v1474_v23  ;;  %1273 = vmatmul.msk.bf16.vlgmr.msra.gmra.mxu2 %vm254_vm0, %v1474_v23  ;;  %v1316_v48 = vld [vmem:[#allocation2 + $0xe4] sm:$0xf0]  ;;  %v1308_v49 = vld [vmem:[#allocation2 + $0xac] sm:$0xf]  ;;  %v1162_v50 = vor.u32 %v1297_v44, %v1161_v42  ;;  %v1241_v53 = vld [vmem:[#allocation2 + $0xa0] sm:$0xf]  ;;  %v1166_v55 = vor.u32 %v1289_v45, %v1163_v46 }
  0x1a   :  { %342 = vmatpush.bf16.msrb.mxu2 %v1234_v29  ;;  %1274 = vmatmul.msk.bf16.vlgmr.msra.gmra.mxu3 %vm254_vm0, %v1474_v23  ;;  %v1250_v51 = vor.u32 %v1316_v48, %v1249_v47  ;;  %v1251_v52 = vld [vmem:[#allocation2 + $0xe8] sm:$0xf0]  ;;  %v1315_v54 = vld [vmem:[#allocation2 + $0xdc] sm:$0xf0]  ;;  %v1307_v58 = vld [vmem:[#allocation2 + $0xa4] sm:$0xf] }
  0x1b   :  { %355 = vmatpush.bf16.msrb.mxu3 %v1238_v30  ;;  %316 = vmatpush.bf16.msrb.mxu0 %v1226_v34  ;;  %v1254_v56 = vor.u32 %v1308_v49, %v1251_v52  ;;  %v1242_v57 = vor.u32 %v1315_v54, %v1241_v53  ;;  %v1243_v59 = vld [vmem:[#allocation2 + $0xe0] sm:$0xf0]  ;;  %v1185_v60 = vld [vmem:[#allocation2 + $0x28] sm:$0xf]  ;;  %v1292_v63 = vld [vmem:[#allocation2 + $0x2c] sm:$0xf] }
  0x1c   :  { %329 = vmatpush.bf16.msrb.mxu1 %v1230_v38  ;;  %v1246_v61 = vor.u32 %v1307_v58, %v1243_v59  ;;  %v1300_v62 = vld [vmem:[#allocation2 + $0x64] sm:$0xf0]  ;;  %v1187_v0 = vld [vmem:[#allocation2 + $0x68] sm:$0xf0]  ;;  %v1177_v3 = vld [vmem:[#allocation2 + $0x20] sm:$0xf] }
  0x1d   :  { %v1186_v1 = vor.u32 %v1300_v62, %v1185_v60  ;;  %v1190_v2 = vor.u32 %v1292_v63, %v1187_v0  ;;  %v1299_v4 = vld [vmem:[#allocation2 + $0x5c] sm:$0xf0]  ;;  %v1291_v5 = vld [vmem:[#allocation2 + $0x24] sm:$0xf]  ;;  %v1265_v9 = vld [vmem:[#allocation2 + $0xb8] sm:$0xf] }
  0x1e   :  { %343 = vmatpush.bf16.msrb.mxu2 %v1170_v39  ;;  %v1179_v6 = vld [vmem:[#allocation2 + $0x60] sm:$0xf0]  ;;  %v1178_v7 = vor.u32 %v1299_v4, %v1177_v3  ;;  %v1318_v10 = vld [vmem:[#allocation2 + $0xf4] sm:$0xf0]  ;;  %v1310_v11 = vld [vmem:[#allocation2 + $0xbc] sm:$0xf] }
  0x1f   :  { %356 = vmatpush.bf16.msrb.mxu3 %v1174_v43  ;;  %317 = vmatpush.bf16.msrb.mxu0 %v1162_v50  ;;  %v1182_v8 = vor.u32 %v1291_v5, %v1179_v6  ;;  %v1267_v12 = vld [vmem:[#allocation2 + $0xf8] sm:$0xf0]  ;;  %v1257_v13 = vld [vmem:[#allocation2 + $0xb0] sm:$0xf]  ;;  %v1309_v15 = vld [vmem:[#allocation2 + $0xb4] sm:$0xf]  ;;  %v1266_v17 = vor.u32 %v1318_v10, %v1265_v9 }
  0x20   :  { %330 = vmatpush.bf16.msrb.mxu1 %v1166_v55  ;;  %v1317_v14 = vld [vmem:[#allocation2 + $0xec] sm:$0xf0]  ;;  %v1259_v16 = vld [vmem:[#allocation2 + $0xf0] sm:$0xf0]  ;;  %v1270_v18 = vor.u32 %v1310_v11, %v1267_v12  ;;  %v1201_v20 = vld [vmem:[#allocation2 + $0x38] sm:$0xf] }
  0x21   :  { %v1258_v19 = vor.u32 %v1317_v14, %v1257_v13  ;;  %v1302_v21 = vld [vmem:[#allocation2 + $0x74] sm:$0xf0]  ;;  %v1294_v22 = vld [vmem:[#allocation2 + $0x3c] sm:$0xf]  ;;  %v1262_v24 = vor.u32 %v1309_v15, %v1259_v16  ;;  %v1193_v26 = vld [vmem:[#allocation2 + $0x30] sm:$0xf] }
  0x22   :  { %394 = vmatpush.bf16.msra.mxu2 %v1250_v51  ;;  %v1203_v25 = vld [vmem:[#allocation2 + $0x78] sm:$0xf0]  ;;  %v1301_v27 = vld [vmem:[#allocation2 + $0x6c] sm:$0xf0]  ;;  %v1293_v28 = vld [vmem:[#allocation2 + $0x34] sm:$0xf]  ;;  %v1202_v30 = vor.u32 %v1302_v21, %v1201_v20 }
  0x23   :  { %407 = vmatpush.bf16.msra.mxu3 %v1254_v56  ;;  %368 = vmatpush.bf16.msra.mxu0 %v1242_v57  ;;  %v1195_v29 = vld [vmem:[#allocation2 + $0x70] sm:$0xf0]  ;;  %v1206_v31 = vor.u32 %v1294_v22, %v1203_v25  ;;  %v1194_v32 = vor.u32 %v1301_v27, %v1193_v26  ;;  %vm1101_vm14 = vcmask 1042434  }
  0x24   :  { %381 = vmatpush.bf16.msra.mxu1 %v1246_v61  ;;  %v1198_v33 = vor.u32 %v1293_v28, %v1195_v29 }
  0x26   :  { %395 = vmatpush.bf16.msra.mxu2 %v1186_v1 }
  0x27   :  { %408 = vmatpush.bf16.msra.mxu3 %v1190_v2  ;;  %369 = vmatpush.bf16.msra.mxu0 %v1178_v7 }
  0x28   :  { %382 = vmatpush.bf16.msra.mxu1 %v1182_v8  ;;  %1275 = vmatmul.msk.bf16.vlgmr.msrb.gmra.mxu0 %vm254_vm0, %v1474_v23 }
  0x29   :  { %1276 = vmatmul.msk.bf16.vlgmr.msrb.gmra.mxu1 %vm254_vm0, %v1474_v23  ;;  %1277 = vmatmul.msk.bf16.vlgmr.msrb.gmra.mxu2 %vm254_vm0, %v1474_v23 }
  0x2a   :  { %1278 = vmatmul.msk.bf16.vlgmr.msrb.gmra.mxu3 %vm254_vm0, %v1474_v23  ;;  %446 = vmatpush.bf16.msrb.mxu2 %v1266_v17 }
  0x2b   :  { %459 = vmatpush.bf16.msrb.mxu3 %v1270_v18  ;;  %420 = vmatpush.bf16.msrb.mxu0 %v1258_v19 }
  0x2c   :  { %433 = vmatpush.bf16.msrb.mxu1 %v1262_v24 }
  0x2e   :  { %447 = vmatpush.bf16.msrb.mxu2 %v1202_v30 }
  0x2f   :  { %460 = vmatpush.bf16.msrb.mxu3 %v1206_v31  ;;  %421 = vmatpush.bf16.msrb.mxu0 %v1194_v32 }
  0x30   :  { %434 = vmatpush.bf16.msrb.mxu1 %v1198_v33 }
  0x38   :  { %1279 = vmatmul.msk.bf16.vlgmr.msra.gmra.mxu0 %vm254_vm0, %v1474_v23 }
  0x39   :  { %1280 = vmatmul.msk.bf16.vlgmr.msra.gmra.mxu1 %vm254_vm0, %v1474_v23  ;;  %1281 = vmatmul.msk.bf16.vlgmr.msra.gmra.mxu2 %vm254_vm0, %v1474_v23 }
  0x3a   :  { %1282 = vmatmul.msk.bf16.vlgmr.msra.gmra.mxu3 %vm254_vm0, %v1474_v23 }
  0x48   :  { %1283 = vmatmul.msk.bf16.vlgmr.msrb.gmra.mxu0 %vm254_vm0, %v1474_v23 }
  0x49   :  { %1284 = vmatmul.msk.bf16.vlgmr.msrb.gmra.mxu1 %vm254_vm0, %v1474_v23  ;;  %1285 = vmatmul.msk.bf16.vlgmr.msrb.gmra.mxu2 %vm254_vm0, %v1474_v23 }
  0x4a   :  { %1286 = vmatmul.msk.bf16.vlgmr.msrb.gmra.mxu3 %vm254_vm0, %v1474_v23  ;;  %vm1097_vm0 = vcmask 1040384  }
  0x95   :  { %v267_v34 = vpop.f32.mrf.mxu0 }
  0x96   :  { %v467_v35 = vsel %vm466_vm1, %v267_v34, 0.0  ;;  %v280_v36 = vpop.f32.mrf.mxu1 }
  0x97   :  { %v468_v37 = vrot.slane %v467_v35, 4  ;;  %v474_v38 = vsel %vm466_vm1, %v280_v36, 0.0 }
  0x98   :  { %v475_v39 = vrot.slane %v474_v38, 4 }
  0x99   :  { %v469_v40 = vadd.f32 %v468_v37, %v467_v35 }
  0x9a   :  { %v476_v41 = vadd.f32 %v475_v39, %v474_v38 }
  0x9b   :  { %v470_v42 = vrot.slane %v469_v40, 2 }
  0x9c   :  { %v477_v43 = vrot.slane %v476_v41, 2  ;;  %v293_v44 = vpop.f32.mrf.mxu2 }
  0x9d   :  { %v471_v45 = vadd.f32 %v470_v42, %v469_v40  ;;  %v481_v46 = vsel %vm466_vm1, %v293_v44, 0.0  ;;  %v306_v47 = vpop.f32.mrf.mxu3  ;;  %v269_v48 = vpop.f32.mrf.mxu0 }
  0x9e   :  { %v478_v23 = vadd.f32 %v477_v43, %v476_v41  ;;  %v482_v49 = vrot.slane %v481_v46, 4  ;;  %v488_v50 = vsel %vm466_vm1, %v306_v47, 0.0  ;;  %v282_v51 = vpop.f32.mrf.mxu1 }
  0x9f   :  { %v472_v52 = vrot.slane %v471_v45, 1  ;;  %v489_v53 = vrot.slane %v488_v50, 4 }
  0xa0   :  { %v479_v54 = vrot.slane %v478_v23, 1  ;;  %v483_v55 = vadd.f32 %v482_v49, %v481_v46 }
  0xa1   :  { %v473_v56 = vadd.f32 %v472_v52, %v471_v45  ;;  %v490_v57 = vadd.f32 %v489_v53, %v488_v50 }
  0xa2   :  { %v480_v58 = vadd.f32 %v479_v54, %v478_v23  ;;  %v484_v59 = vrot.slane %v483_v55, 2 }
  0xa3   :  { %v579_v60 = vmul.f32 0.5, %v473_v56  ;;  %v491_v61 = vrot.slane %v490_v57, 2 }
  0xa4   :  { %v580_v62 = vmul.f32 0.5, %v480_v58  ;;  %v485_v63 = vadd.f32 %v484_v59, %v483_v55  ;;  %v295_v0 = vpop.f32.mrf.mxu2 }
  0xa5   :  { %v1512_v1 = vsub.f32 %v267_v34, %v579_v60  ;;  %v492_v2 = vadd.f32 %v491_v61, %v490_v57  ;;  %v308_v3 = vpop.f32.mrf.mxu3  ;;  %v319_v4 = vpop.f32.mrf.mxu0 }
  0xa6   :  { %v1514_v5 = vsub.f32 %v280_v36, %v580_v62  ;;  %v486_v6 = vrot.slane %v485_v63, 1  ;;  %v495_v7 = vsel %vm466_vm1, %v319_v4, 0.0  ;;  %v1517_v8 = vpop.f32.mrf.mxu1 }
  0xa7   :  { %v611_v9 = vmul.f32 %v1512_v1, %v1512_v1  ;;  %v493_v10 = vrot.slane %v492_v2, 1  ;;  %v496_v11 = vrot.slane %v495_v7, 4  ;;  %v502_v12 = vsel %vm466_vm1, %v1517_v8, 0.0 }
  0xa8   :  { %v612_v13 = vmul.f32 %v1514_v5, %v1514_v5  ;;  %v487_v14 = vadd.f32 %v486_v6, %v485_v63  ;;  %v503_v15 = vrot.slane %v502_v12, 4 }
  0xa9   :  { %v627_v16 = vsel %vm466_vm1, %v611_v9, 0.0  ;;  %v494_v17 = vadd.f32 %v493_v10, %v492_v2  ;;  %v497_v18 = vadd.f32 %v496_v11, %v495_v7 }
  0xaa   :  { %v628_v19 = vrot.slane %v627_v16, 4  ;;  %v634_v20 = vsel %vm466_vm1, %v612_v13, 0.0  ;;  %v581_v21 = vmul.f32 0.5, %v487_v14  ;;  %v504_v22 = vadd.f32 %v503_v15, %v502_v12 }
  0xab   :  { %v635_v24 = vrot.slane %v634_v20, 4  ;;  %v582_v25 = vmul.f32 0.5, %v494_v17  ;;  %v498_v26 = vrot.slane %v497_v18, 2 }
  0xac   :  { %v629_v27 = vadd.f32 %v628_v19, %v627_v16  ;;  %v1527_v28 = vsub.f32 %v293_v44, %v581_v21  ;;  %v505_v29 = vrot.slane %v504_v22, 2  ;;  %v1529_v30 = vpop.f32.mrf.mxu2  ;;  %v1562_v19 = vld [vmem:[#allocation4] sm:$0xff] }
  0xad   :  { %v636_v31 = vadd.f32 %v635_v24, %v634_v20  ;;  %v1531_v32 = vsub.f32 %v306_v47, %v582_v25  ;;  %v499_v33 = vadd.f32 %v498_v26, %v497_v18  ;;  %v1533_v34 = vpop.f32.mrf.mxu3  ;;  %v321_v35 = vpop.f32.mrf.mxu0  ;;  %v509_v52 = vsel %vm466_vm1, %v1529_v30, 0.0  ;;  %v1567_v24 = vld [vmem:[#allocation6] sm:$0xff] }
  0xae   :  { %v630_v36 = vrot.slane %v629_v27, 2  ;;  %v613_v37 = vmul.f32 %v1527_v28, %v1527_v28  ;;  %v506_v38 = vadd.f32 %v505_v29, %v504_v22  ;;  %v334_v39 = vpop.f32.mrf.mxu1  ;;  %v510_v58 = vrot.slane %v509_v52, 4 }
  0xaf   :  { %v637_v40 = vrot.slane %v636_v31, 2  ;;  %v614_v41 = vmul.f32 %v1531_v32, %v1531_v32  ;;  %v500_v42 = vrot.slane %v499_v33, 1  ;;  %v516_v18 = vsel %vm466_vm1, %v1533_v34, 0.0 }
  0xb0   :  { %v631_v43 = vadd.f32 %v630_v36, %v629_v27  ;;  %v641_v44 = vsel %vm466_vm1, %v613_v37, 0.0  ;;  %v507_v45 = vrot.slane %v506_v38, 1  ;;  %v517_v29 = vrot.slane %v516_v18, 4 }
  0xb1   :  { %v638_v46 = vadd.f32 %v637_v40, %v636_v31  ;;  %v642_v47 = vrot.slane %v641_v44, 4  ;;  %v648_v48 = vsel %vm466_vm1, %v614_v41, 0.0  ;;  %v501_v23 = vadd.f32 %v500_v42, %v499_v33 }
  0xb2   :  { %v632_v49 = vrot.slane %v631_v43, 1  ;;  %v649_v50 = vrot.slane %v648_v48, 4  ;;  %v508_v51 = vadd.f32 %v507_v45, %v506_v38  ;;  %v951_v31 = vperm.slane %v1562_v19, 0 }
  0xb3   :  { %v639_v53 = vrot.slane %v638_v46, 1  ;;  %v643_v54 = vadd.f32 %v642_v47, %v641_v44  ;;  %v583_v55 = vmul.f32 0.5, %v501_v23  ;;  %v952_v37 = vperm.slane %v1562_v19, 1 }
  0xb4   :  { %v633_v56 = vadd.f32 %v632_v49, %v631_v43  ;;  %v650_v57 = vadd.f32 %v649_v50, %v648_v48  ;;  %v347_v59 = vpop.f32.mrf.mxu2  ;;  %v584_v63 = vmul.f32 0.5, %v508_v51  ;;  %v1003_v42 = vperm.slane %v1567_v24, 0 }
  0xb5   :  { %v640_v60 = vadd.f32 %v639_v53, %v638_v46  ;;  %v644_v61 = vrot.slane %v643_v54, 2  ;;  %v1543_v62 = vsub.f32 %v319_v4, %v583_v55  ;;  %v360_v0 = vpop.f32.mrf.mxu3  ;;  %v1545_v2 = vpop.f32.mrf.mxu0  ;;  %v511_v4 = vadd.f32 %v510_v58, %v509_v52 }
  0xb6   :  { %v739_v3 = vmul.f32 0.5, %v633_v56  ;;  %v651_v6 = vrot.slane %v650_v57, 2  ;;  %v1547_v7 = vpop.f32.mrf.mxu1  ;;  %v1554_v14 = vsub.f32 %v1517_v8, %v584_v63  ;;  %v523_v40 = vsel %vm466_vm1, %v1545_v2, 0.0 }
  0xb7   :  { %v740_v9 = vmul.f32 0.5, %v640_v60  ;;  %v645_v10 = vadd.f32 %v644_v61, %v643_v54  ;;  %v615_v11 = vmul.f32 %v1543_v62, %v1543_v62  ;;  %v512_v27 = vrot.slane %v511_v4, 2 }
  0xb8   :  { %v1551_v12 = vadd.f32 1e-05, %v739_v3  ;;  %v652_v13 = vadd.f32 %v651_v6, %v650_v57  ;;  %v616_v8 = vmul.f32 %v1554_v14, %v1554_v14  ;;  %v1004_v47 = vperm.slane %v1567_v24, 1 }
  0xb9   :  { %v1556_v15 = vadd.f32 1e-05, %v740_v9  ;;  %v646_v16 = vrot.slane %v645_v10, 1  ;;  %v655_v17 = vsel %vm466_vm1, %v615_v11, 0.0  ;;  %v513_v45 = vadd.f32 %v512_v27, %v511_v4 }
  0xba   :  { %1324 = vrsqrt.f32 %v1551_v12  ;;  %v653_v20 = vrot.slane %v652_v13, 1  ;;  %v656_v21 = vrot.slane %v655_v17, 4  ;;  %v662_v35 = vsel %vm466_vm1, %v616_v8, 0.0 }
  0xbb   :  { %1326 = vrsqrt.f32 %v1556_v15  ;;  %v647_v22 = vadd.f32 %v646_v16, %v645_v10  ;;  %v663_v44 = vrot.slane %v662_v35, 4  ;;  %v518_v49 = vadd.f32 %v517_v29, %v516_v18 }
  0xbc   :  { %v654_v25 = vadd.f32 %v653_v20, %v652_v13  ;;  %v657_v26 = vadd.f32 %v656_v21, %v655_v17  ;;  %v1580_v50 = vpop.f32.mrf.mxu2  ;;  %v953_v53 = vperm.slane %v1562_v19, 2  ;;  %v524_v54 = vrot.slane %v523_v40, 4 }
  0xbd   :  { %v741_v33 = vmul.f32 0.5, %v647_v22  ;;  %v373_v36 = vpop.f32.mrf.mxu0  ;;  %v1005_v56 = vperm.slane %v1567_v24, 2  ;;  %v954_v57 = vperm.slane %v1562_v19, 3  ;;  %v664_v60 = vadd.f32 %v663_v44, %v662_v35  ;;  %v1595_v16 = vpop.f32.mrf.mxu3 }
  0xbe   :  { %v742_v38 = vmul.f32 0.5, %v654_v25  ;;  %v658_v39 = vrot.slane %v657_v26, 2  ;;  %v386_v41 = vpop.f32.mrf.mxu1  ;;  %v514_v61 = vrot.slane %v513_v45, 1  ;;  %vm777_vm2 = vweird.f32 %v1551_v12 }
  0xbf   :  { %v1575_v43 = vadd.f32 1e-05, %v741_v33  ;;  %vm787_vm3 = vweird.f32 %v1556_v15  ;;  %v519_v0 = vrot.slane %v518_v49, 2  ;;  %v665_v9 = vrot.slane %v664_v60, 2 }
  0xc0   :  { %v1325_v46 = vpop.eup %1324  ;;  %v1578_v48 = vadd.f32 1e-05, %v742_v38  ;;  %v659_v23 = vadd.f32 %v658_v39, %v657_v26  ;;  %v525_v10 = vadd.f32 %v524_v54, %v523_v40  ;;  %v515_v13 = vadd.f32 %v514_v61, %v513_v45 }
  0xc1   :  { %v1327_v51 = vpop.eup %1326  ;;  %v772_v52 = vmul.f32 %v1325_v46, %v1551_v12  ;;  %1328 = vrsqrt.f32 %v1575_v43  ;;  %vm778_vm4 = vweird.f32 %v1325_v46  ;;  %v1593_v4 = vsel %vm466_vm1, %v1547_v7, 0.0 }
  0xc2   :  { %v782_v55 = vmul.f32 %v1327_v51, %v1556_v15  ;;  %1330 = vrsqrt.f32 %v1578_v48  ;;  %v660_v59 = vrot.slane %v659_v23, 1  ;;  %vm788_vm5 = vweird.f32 %v1327_v51  ;;  %vm779_vm7 = vmor %vm777_vm2, %vm778_vm4 }
  0xc3   :  { %v773_v58 = vmul.f32 %v1325_v46, %v772_v52  ;;  %v666_v21 = vadd.f32 %v665_v9, %v664_v60  ;;  %vm797_vm6 = vweird.f32 %v1575_v43  ;;  %v585_v26 = vmul.f32 0.5, %v515_v13  ;;  %vm789_vm8 = vmor %vm787_vm3, %vm788_vm5 }
  0xc4   :  { %v783_v63 = vmul.f32 %v1327_v51, %v782_v55  ;;  %v661_v6 = vadd.f32 %v660_v59, %v659_v23  ;;  %v520_v27 = vadd.f32 %v519_v0, %v518_v49  ;;  %v399_v29 = vpop.f32.mrf.mxu2  ;;  %v526_v38 = vrot.slane %v525_v10, 2 }
  0xc5   :  { %v774_v3 = vmul.f32 0.5, %v773_v58  ;;  %v667_v41 = vrot.slane %v666_v21, 1  ;;  %v1606_v44 = vsub.f32 %v1529_v30, %v585_v26  ;;  %vm807_vm12 = vweird.f32 %v1578_v48 }
  0xc6   :  { %v784_v11 = vmul.f32 0.5, %v783_v63  ;;  %v743_v20 = vmul.f32 0.5, %v661_v6  ;;  %v527_v61 = vadd.f32 %v526_v38, %v525_v10  ;;  %v412_v63 = vpop.f32.mrf.mxu3  ;;  %v1006_v26 = vperm.slane %v1567_v24, 3 }
  0xc7   :  { %v1329_v17 = vpop.eup %1328  ;;  %v775_v18 = vsub.f32 1.5, %v774_v3  ;;  %v668_v54 = vadd.f32 %v667_v41, %v666_v21  ;;  %v617_v30 = vmul.f32 %v1606_v44, %v1606_v44  ;;  %v1007_v63 = vperm.slane %v1567_v24, 4 }
  0xc8   :  { %v1331_v22 = vpop.eup %1330  ;;  %v785_v8 = vsub.f32 1.5, %v784_v11  ;;  %v792_v25 = vmul.f32 %v1329_v17, %v1575_v43  ;;  %v1600_v36 = vadd.f32 1e-05, %v743_v20  ;;  %vm798_vm9 = vweird.f32 %v1329_v17  ;;  %v1639_v43 = vpop.f32.mrf.mxu1 }
  0xc9   :  { %v776_v33 = vmul.f32 %v1325_v46, %v775_v18  ;;  %v802_v35 = vmul.f32 %v1331_v22, %v1578_v48  ;;  %v744_v60 = vmul.f32 0.5, %v668_v54  ;;  %vm808_vm10 = vweird.f32 %v1331_v22  ;;  %vm799_vm11 = vmor %vm797_vm6, %vm798_vm9 }
  0xca   :  { %v786_v39 = vmul.f32 %v1327_v51, %v785_v8  ;;  %v793_v40 = vmul.f32 %v1329_v17, %v792_v25  ;;  %1332 = vrsqrt.f32 %v1600_v36  ;;  %v669_v0 = vsel %vm466_vm1, %v617_v30, 0.0  ;;  %vm809_vm13 = vmor %vm807_vm12, %vm808_vm10 }
  0xcb   :  { %v780_v45 = vsel %vm779_vm7, %v1325_v46, %v776_v33  ;;  %v803_v23 = vmul.f32 %v1331_v22, %v802_v35  ;;  %v521_v46 = vrot.slane %v520_v27, 1  ;;  %v1623_v6 = vadd.f32 1e-05, %v744_v60 }
  0xcc   :  { %v931_v49 = vmul.f32 %v780_v45, %v1512_v1  ;;  %v790_v52 = vsel %vm789_vm8, %v1327_v51, %v786_v39  ;;  %v794_v12 = vmul.f32 0.5, %v793_v40  ;;  %v670_v9 = vrot.slane %v669_v0, 4 }
  0xcd   :  { %v932_v55 = vmul.f32 %v790_v52, %v1514_v5  ;;  %v804_v58 = vmul.f32 0.5, %v803_v23  ;;  %v522_v10 = vadd.f32 %v521_v46, %v520_v27  ;;  %v528_v20 = vrot.slane %v527_v61, 1 }
  0xce   :  { %v983_v15 = vmul.f32 %v951_v31, %v931_v49  ;;  %v795_v59 = vsub.f32 1.5, %v794_v12  ;;  %1334 = vrsqrt.f32 %v1623_v6  ;;  %v671_v27 = vadd.f32 %v670_v9, %v669_v0 }
  0xcf   :  { %v984_v1 = vmul.f32 %v952_v37, %v932_v55  ;;  %v805_v51 = vsub.f32 1.5, %v804_v58  ;;  %v529_v40 = vadd.f32 %v528_v20, %v527_v61  ;;  %v955_v60 = vperm.slane %v1562_v19, 4 }
  0xd0   :  { %v1035_v5 = vadd.f32 %v1003_v42, %v983_v15  ;;  %v796_v3 = vmul.f32 %v1329_v17, %v795_v59  ;;  %v1625_v11 = vpop.eup %1332  ;;  %v672_v39 = vrot.slane %v671_v27, 2  ;;  %v438_v59 = vpop.f32.mrf.mxu1  ;;  %vm817_vm2 = vweird.f32 %v1600_v36 }
  0xd1   :  { %v1036_v31 = vadd.f32 %v1004_v47, %v984_v1  ;;  %v806_v37 = vmul.f32 %v1331_v22, %v805_v51  ;;  %v812_v42 = vmul.f32 %v1625_v11, %v1600_v36  ;;  %v1637_v47 = vpop.f32.mrf.mxu0  ;;  %v587_v49 = vmul.f32 0.5, %v529_v40 }
  0xd2   :  { %v1051_v13 = vmax.f32 %v1035_v5, 0.0  ;;  %v800_v18 = vsel %vm799_vm11, %v1329_v17, %v796_v3  ;;  %v673_v23 = vadd.f32 %v672_v39, %v671_v27  ;;  %v956_v1 = vperm.slane %v1562_v19, 5 }
  0xd3   :  { %v1052_v21 = vmax.f32 %v1036_v31, 0.0  ;;  %v933_v8 = vmul.f32 %v800_v18, %v1527_v28  ;;  %v810_v25 = vsel %vm809_vm13, %v1331_v22, %v806_v37  ;;  %v813_v17 = vmul.f32 %v1625_v11, %v812_v42 }
  0xd4   :  { %v934_v48 = vmul.f32 %v810_v25, %v1531_v32  ;;  %v586_v28 = vmul.f32 0.5, %v522_v10  ;;  %v531_v22 = vrot.slane %v1593_v4, 4  ;;  %v1656_v52 = vpop.eup %1334  ;;  %v1665_v30 = vsub.f32 %v1545_v2, %v587_v49 }
  0xd5   :  { %v1644_v29 = vpack.c.bf16 %v1052_v21, %v1051_v13  ;;  %v985_v33 = vmul.f32 %v953_v53, %v933_v8  ;;  %v814_v38 = vmul.f32 0.5, %v813_v17  ;;  %v822_v58 = vmul.f32 %v1656_v52, %v1623_v6  ;;  %v1676_v13 = vpop.f32.mrf.mxu2 }
  0xd6   :  { %v986_v35 = vmul.f32 %v954_v57, %v934_v48  ;;  %v1654_v41 = vsub.f32 %v1533_v34, %v586_v28  ;;  %v532_v12 = vadd.f32 %v531_v22, %v1593_v4  ;;  %v619_v0 = vmul.f32 %v1665_v30, %v1665_v30  ;;  %v1743_v22 = vld [vmem:[#allocation4 + $0x8] sm:$0xff] }
  0xd7   :  { %v1037_v32 = vadd.f32 %v1005_v56, %v985_v33  ;;  %v815_v55 = vsub.f32 1.5, %v814_v38  ;;  %v674_v56 = vrot.slane %v673_v23, 1  ;;  %v823_v61 = vmul.f32 %v1656_v52, %v822_v58 }
  0xd8   :  { %v1038_v45 = vadd.f32 %v1006_v26, %v986_v35  ;;  %v618_v53 = vmul.f32 %v1654_v41, %v1654_v41  ;;  %v533_v46 = vrot.slane %v532_v12, 2  ;;  %vm818_vm15 = vweird.f32 %v1625_v11 }
  0xd9   :  { %v1053_v57 = vmax.f32 %v1037_v32, 0.0  ;;  %v425_v15 = vpop.f32.mrf.mxu0  ;;  %v675_v51 = vadd.f32 %v674_v56, %v673_v23  ;;  %v824_v2 = vmul.f32 0.5, %v823_v61  ;;  %v816_v31 = vmul.f32 %v1625_v11, %v815_v55  ;;  %vm1686_vm5 = vmor %vm817_vm2, %vm818_vm15 }
  0xda   :  { %v1054_v54 = vmax.f32 %v1038_v45, 0.0  ;;  %v676_v34 = vsel %vm466_vm1, %v618_v53, 0.0  ;;  %v534_v3 = vadd.f32 %v533_v46, %v532_v12  ;;  %v683_v10 = vsel %vm466_vm1, %v619_v0, 0.0  ;;  %v1717_v0 = vpop.f32.mrf.mxu3 }
  0xdb   :  { %v677_v4 = vrot.slane %v676_v34, 4  ;;  %v745_v37 = vmul.f32 0.5, %v675_v51  ;;  %v825_v18 = vsub.f32 1.5, %v824_v2  ;;  %v1008_v42 = vperm.slane %v1567_v24, 5 }
  0xdc   :  { %v1068_v9 = vpack.c.bf16 %v1054_v54, %v1053_v57  ;;  %vm827_vm3 = vweird.f32 %v1623_v6  ;;  %vm828_vm4 = vweird.f32 %v1656_v52  ;;  %v684_v8 = vrot.slane %v683_v10, 4 }
  0xdd   :  { %v678_v5 = vadd.f32 %v677_v4, %v676_v34  ;;  %v1682_v21 = vadd.f32 1e-05, %v745_v37  ;;  %v826_v48 = vmul.f32 %v1656_v52, %v825_v18  ;;  %v535_v26 = vrot.slane %v534_v3, 1  ;;  %vm1697_vm6 = vmor %vm827_vm3, %vm828_vm4  ;;  %v451_v56 = vpop.f32.mrf.mxu2 }
  0xde   :  { %v537_v17 = vsel %vm466_vm1, %v1580_v50, 0.0  ;;  %v1084_v27 = vrot.slane %v1068_v9, 6  ;;  %v820_v6 = vsel %vm1686_vm5, %v1625_v11, %v816_v31  ;;  %v685_v33 = vadd.f32 %v684_v8, %v683_v10 }
  0xdf   :  { %v679_v20 = vrot.slane %v678_v5, 2  ;;  %1336 = vrsqrt.f32 %v1682_v21  ;;  %v1085_v28 = vrot.slane %v1068_v9, 1  ;;  %v536_v38 = vadd.f32 %v535_v26, %v534_v3 }
  0xe0   :  { %v538_v39 = vrot.slane %v537_v17, 4  ;;  %v1083_v40 = vrot.slane %v1644_v29, 3  ;;  %v830_v32 = vsel %vm1697_vm6, %v1656_v52, %v826_v48  ;;  %v686_v45 = vrot.slane %v685_v33, 2 }
  0xe1   :  { %v680_v36 = vadd.f32 %v679_v20, %v678_v5  ;;  %v544_v11 = vsel %vm466_vm1, %v1595_v16, 0.0  ;;  %v588_v49 = vmul.f32 0.5, %v536_v38  ;;  %v935_v57 = vmul.f32 %v820_v6, %v1543_v62 }
  0xe2   :  { %v539_v53 = vadd.f32 %v538_v39, %v537_v17  ;;  %v545_v12 = vrot.slane %v544_v11, 4  ;;  %v957_v54 = vperm.slane %v1562_v19, 6  ;;  %v687_v55 = vadd.f32 %v686_v45, %v685_v33 }
  0xe3   :  { %v681_v35 = vrot.slane %v680_v36, 1  ;;  %v551_v58 = vsel %vm466_vm1, %v1637_v47, 0.0  ;;  %v1104_v34 = vsel %vm1101_vm14, %v1084_v27, %v1085_v28  ;;  %v1009_v52 = vperm.slane %v1567_v24, 6 }
  0xe4   :  { %v1714_v15 = vsub.f32 %v1547_v7, %v588_v49  ;;  %v936_v61 = vmul.f32 %v830_v32, %v1554_v14  ;;  %v688_v4 = vrot.slane %v687_v55, 1  ;;  %v540_v62 = vrot.slane %v539_v53, 2  ;;  %v464_v32 = vpop.f32.mrf.mxu3 }
  0xe5   :  { %v682_v23 = vadd.f32 %v681_v35, %v680_v36  ;;  %v1337_v59 = vpop.eup %1336  ;;  %v546_v51 = vadd.f32 %v545_v12, %v544_v11  ;;  %v1100_v2 = vsel %vm1097_vm0, %v1644_v29, %v1083_v40  ;;  %v552_v9 = vrot.slane %v551_v58, 4 }
  0xe6   :  { %v832_v5 = vmul.f32 %v1337_v59, %v1682_v21  ;;  %v987_v7 = vmul.f32 %v955_v60, %v935_v57  ;;  %v958_v31 = vperm.slane %v1562_v19, 7  ;;  %v1010_v14 = vperm.slane %v1567_v24, 7 }
  0xe7   :  { %v746_v46 = vmul.f32 0.5, %v682_v23  ;;  %v689_v37 = vadd.f32 %v688_v4, %v687_v55  ;;  %v1729_v10 = vsel %vm466_vm1, %v1100_v2, %v1104_v34  ;;  %v620_v29 = vmul.f32 %v1714_v15, %v1714_v15 }
  0xe8   :  { %v833_v18 = vmul.f32 %v1337_v59, %v832_v5  ;;  %v988_v20 = vmul.f32 %v956_v1, %v936_v61  ;;  %v541_v25 = vadd.f32 %v540_v62, %v539_v53  ;;  %v547_v60 = vrot.slane %v546_v51, 2 }
  0xe9   :  { %v1722_v3 = vadd.f32 1e-05, %v746_v46  ;;  %v747_v8 = vmul.f32 0.5, %v689_v37  ;;  %v690_v36 = vsel %vm466_vm1, %v620_v29, 0.0  ;;  %v553_v26 = vadd.f32 %v552_v9, %v551_v58 }
  0xea   :  { %v834_v48 = vmul.f32 0.5, %v833_v18  ;;  %v558_v17 = vsel %vm466_vm1, %v1639_v43, 0.0  ;;  %v1039_v27 = vadd.f32 %v1007_v63, %v987_v7  ;;  %vm838_vm7 = vweird.f32 %v1337_v59 }
  0xeb   :  { %1338 = vrsqrt.f32 %v1722_v3  ;;  %v1741_v6 = vadd.f32 1e-05, %v747_v8  ;;  %v691_v33 = vrot.slane %v690_v36, 4  ;;  %v542_v1 = vrot.slane %v541_v25, 1 }
  0xec   :  { %v835_v28 = vsub.f32 1.5, %v834_v48  ;;  %v548_v35 = vadd.f32 %v547_v60, %v546_v51  ;;  %v554_v38 = vrot.slane %v553_v26, 2  ;;  %vm837_vm8 = vweird.f32 %v1682_v21 }
  0xed   :  { %1340 = vrsqrt.f32 %v1741_v6  ;;  %v692_v39 = vadd.f32 %v691_v33, %v690_v36  ;;  %v559_v40 = vrot.slane %v558_v17, 4  ;;  %v1040_v63 = vadd.f32 %v1008_v42, %v988_v20  ;;  %vm839_vm9 = vmor %vm837_vm8, %vm838_vm7 }
  0xee   :  { %v836_v11 = vmul.f32 %v1337_v59, %v835_v28  ;;  %v543_v23 = vadd.f32 %v542_v1, %v541_v25  ;;  %v549_v49 = vrot.slane %v548_v35, 1  ;;  %v1055_v53 = vmax.f32 %v1039_v27, 0.0 }
  0xef   :  { %v959_v57 = vperm.slane %v1743_v22, 0  ;;  %v693_v21 = vrot.slane %v692_v39, 2  ;;  %v555_v34 = vadd.f32 %v554_v38, %v553_v26  ;;  %v560_v42 = vadd.f32 %v559_v40, %v558_v17 }
  0xf0   :  { %v840_v55 = vsel %vm839_vm9, %v1337_v59, %v836_v11  ;;  %v589_v58 = vmul.f32 0.5, %v543_v23  ;;  %v550_v56 = vadd.f32 %v549_v49, %v548_v35  ;;  %v1056_v62 = vmax.f32 %v1040_v63, 0.0 }
  0xf1   :  { %v1339_v45 = vpop.eup %1338  ;;  %v937_v46 = vmul.f32 %v840_v55, %v1606_v44  ;;  %v694_v4 = vadd.f32 %v693_v21, %v692_v39  ;;  %v556_v5 = vrot.slane %v555_v34, 1  ;;  %vm847_vm10 = vweird.f32 %v1722_v3 }
  0xf2   :  { %v842_v12 = vmul.f32 %v1339_v45, %v1722_v3  ;;  %v1754_v51 = vsub.f32 %v1580_v50, %v589_v58  ;;  %v590_v2 = vmul.f32 0.5, %v550_v56  ;;  %v561_v37 = vrot.slane %v560_v42, 2 }
  0xf3   :  { %v1756_v9 = vpop.eup %1340  ;;  %v695_v59 = vrot.slane %v694_v4, 1  ;;  %v989_v18 = vmul.f32 %v957_v54, %v937_v46  ;;  %vm848_vm11 = vweird.f32 %v1339_v45  ;;  %v557_v25 = vadd.f32 %v556_v5, %v555_v34  ;;  %v1793_v34 = vld [vmem:[#allocation6 + $0x8] sm:$0xff] }
  0xf4   :  { %v843_v61 = vmul.f32 %v1339_v45, %v842_v12  ;;  %v852_v44 = vmul.f32 %v1756_v9, %v1741_v6  ;;  %v621_v29 = vmul.f32 %v1754_v51, %v1754_v51  ;;  %v1766_v50 = vsub.f32 %v1595_v16, %v590_v2  ;;  %vm849_vm13 = vmor %vm847_vm10, %vm848_vm11 }
  0xf5   :  { %v696_v8 = vadd.f32 %v695_v59, %v694_v4  ;;  %v562_v36 = vadd.f32 %v561_v37, %v560_v42  ;;  %v1069_v26 = vpack.c.bf16 %v1056_v62, %v1055_v53  ;;  %vm1106_vm12 = vcmask 1044484  }
  0xf6   :  { %v844_v7 = vmul.f32 0.5, %v843_v61  ;;  %v853_v60 = vmul.f32 %v1756_v9, %v852_v44  ;;  %v697_v48 = vsel %vm466_vm1, %v621_v29, 0.0  ;;  %v622_v54 = vmul.f32 %v1766_v50, %v1766_v50 }
  0xf7   :  { %v748_v27 = vmul.f32 0.5, %v696_v8  ;;  %v698_v33 = vrot.slane %v697_v48, 4  ;;  %v1041_v16 = vadd.f32 %v1009_v52, %v989_v18  ;;  %v591_v35 = vmul.f32 0.5, %v557_v25 }
  0xf8   :  { %v845_v20 = vsub.f32 1.5, %v844_v7  ;;  %v854_v28 = vmul.f32 0.5, %v853_v60  ;;  %v704_v1 = vsel %vm466_vm1, %v622_v54, 0.0  ;;  %v563_v32 = vrot.slane %v562_v36, 1 }
  0xf9   :  { %v1777_v39 = vadd.f32 1e-05, %v748_v27  ;;  %v699_v40 = vadd.f32 %v698_v33, %v697_v48  ;;  %v705_v23 = vrot.slane %v704_v1, 4  ;;  %v1781_v49 = vsub.f32 %v1637_v47, %v591_v35 }
  0xfa   :  { %v846_v17 = vmul.f32 %v1339_v45, %v845_v20  ;;  %v855_v11 = vsub.f32 1.5, %v854_v28  ;;  %v1086_v52 = vrot.slane %v1069_v26, 4  ;;  %v1087_v53 = vrot.slane %v1069_v26, 7 }
  0xfb   :  { %vm1110_vm15 = vcmask 1046534   ;;  %1342 = vrsqrt.f32 %v1777_v39  ;;  %v700_v3 = vrot.slane %v699_v40, 2  ;;  %vm1114_vm2 = vcmask 1045508  }
  0xfc   :  { %v850_v38 = vsel %vm849_vm13, %v1339_v45, %v846_v17  ;;  %v856_v12 = vmul.f32 %v1756_v9, %v855_v11  ;;  %vm858_vm3 = vweird.f32 %v1756_v9  ;;  %vm857_vm4 = vweird.f32 %v1741_v6 }
  0xfd   :  { %v938_v63 = vmul.f32 %v850_v38, %v1654_v41  ;;  %v706_v41 = vadd.f32 %v705_v23, %v704_v1  ;;  %v701_v21 = vadd.f32 %v700_v3, %v699_v40  ;;  %v623_v47 = vmul.f32 %v1781_v49, %v1781_v49  ;;  %vm1797_vm6 = vmor %vm857_vm4, %vm858_vm3 }
  0xfe   :  { %v564_v55 = vadd.f32 %v563_v32, %v562_v36  ;;  %v1057_v58 = vmax.f32 %v1041_v16, 0.0  ;;  %vm1116_vm5 = vcmask 1043456   ;;  %v860_v24 = vsel %vm1797_vm6, %v1756_v9, %v856_v12 }
  0xff   :  { %v990_v45 = vmul.f32 %v958_v31, %v938_v63  ;;  %v707_v19 = vrot.slane %v706_v41, 2  ;;  %v565_v31 = vsel %vm466_vm1, %v1676_v13, 0.0  ;;  %v702_v6 = vrot.slane %v701_v21, 1 }
 0x100   :  { %v711_v61 = vsel %vm466_vm1, %v623_v47, 0.0  ;;  %v592_v4 = vmul.f32 0.5, %v564_v55  ;;  %v1011_v5 = vperm.slane %v1793_v34, 0  ;;  %v566_v37 = vrot.slane %v565_v31, 4 }
 0x101   :  { %v1042_v56 = vadd.f32 %v1010_v14, %v990_v45  ;;  %v708_v14 = vadd.f32 %v707_v19, %v706_v41  ;;  %v712_v62 = vrot.slane %v711_v61, 4  ;;  %v1343_v2 = vpop.eup %1342  ;;  %v703_v7 = vadd.f32 %v702_v6, %v701_v21 }
 0x102   :  { %v1807_v59 = vsub.f32 %v1639_v43, %v592_v4  ;;  %v1109_v18 = vsel %vm1106_vm12, %v1086_v52, %v1087_v53  ;;  %v862_v29 = vmul.f32 %v1343_v2, %v1777_v39  ;;  %v939_v8 = vmul.f32 %v860_v24, %v1665_v30 }
 0x103   :  { %v1058_v42 = vmax.f32 %v1042_v56, 0.0  ;;  %v709_v20 = vrot.slane %v708_v14, 1  ;;  %v749_v25 = vmul.f32 0.5, %v703_v7  ;;  %v713_v9 = vadd.f32 %v712_v62, %v711_v61 }
 0x104   :  { %v624_v60 = vmul.f32 %v1807_v59, %v1807_v59  ;;  %v863_v36 = vmul.f32 %v1343_v2, %v862_v29  ;;  %v567_v27 = vadd.f32 %v566_v37, %v565_v31  ;;  %v572_v33 = vsel %vm466_vm1, %v1717_v0, 0.0 }
 0x105   :  { %v1070_v44 = vpack.c.bf16 %v1058_v42, %v1057_v58  ;;  %v710_v26 = vadd.f32 %v709_v20, %v708_v14  ;;  %v1814_v43 = vadd.f32 1e-05, %v749_v25  ;;  %v714_v17 = vrot.slane %v713_v9, 2 }
 0x106   :  { %v864_v28 = vmul.f32 0.5, %v863_v36  ;;  %v718_v1 = vsel %vm466_vm1, %v624_v60, 0.0  ;;  %v991_v38 = vmul.f32 %v959_v57, %v939_v8  ;;  %vm868_vm7 = vweird.f32 %v1343_v2 }
 0x107   :  { %v1088_v48 = vrot.slane %v1070_v44, 2  ;;  %v1089_v54 = vrot.slane %v1070_v44, 5  ;;  %v750_v30 = vmul.f32 0.5, %v710_v26  ;;  %1344 = vrsqrt.f32 %v1814_v43 }
 0x108   :  { %v715_v40 = vadd.f32 %v714_v17, %v713_v9  ;;  %v865_v63 = vsub.f32 1.5, %v864_v28  ;;  %v719_v52 = vrot.slane %v718_v1, 4  ;;  %v568_v53 = vrot.slane %v567_v27, 2 }
 0x109   :  { %v1113_v16 = vsel %vm1110_vm15, %v1088_v48, %v1089_v54  ;;  %v1826_v11 = vadd.f32 1e-05, %v750_v30  ;;  %v573_v3 = vrot.slane %v572_v33, 4  ;;  %vm867_vm8 = vweird.f32 %v1777_v39 }
 0x10a   :  { %v1115_v35 = vsel %vm1114_vm2, %v1109_v18, %v1113_v16  ;;  %v716_v23 = vrot.slane %v715_v40, 1  ;;  %v866_v45 = vmul.f32 %v1343_v2, %v865_v63  ;;  %v960_v57 = vperm.slane %v1743_v22, 1  ;;  %vm869_vm9 = vmor %vm867_vm8, %vm868_vm7 }
 0x10b   :  { %v1117_v32 = vsel %vm1116_vm5, %v1729_v10, %v1115_v35  ;;  %1346 = vrsqrt.f32 %v1826_v11  ;;  %v720_v12 = vadd.f32 %v719_v52, %v718_v1  ;;  %v569_v41 = vadd.f32 %v568_v53, %v567_v27 }
 0x10c   :  { %1135 = vst [vmem:[%s1893_s4] sm:$0xff] %v1117_v32  ;;  %v717_v10 = vadd.f32 %v716_v23, %v715_v40  ;;  %v574_v21 = vadd.f32 %v573_v3, %v572_v33  ;;  %v1043_v47 = vadd.f32 %v1011_v5, %v991_v38  ;;  %v870_v55 = vsel %vm869_vm9, %v1343_v2, %v866_v45 }
 0x10d   :  { %v1012_v58 = vperm.slane %v1793_v34, 1  ;;  %v1345_v56 = vpop.eup %1344  ;;  %v940_v19 = vmul.f32 %v870_v55, %v1714_v15  ;;  %v721_v46 = vrot.slane %v720_v12, 2  ;;  %v570_v6 = vrot.slane %v569_v41, 1 }
 0x10e   :  { %v751_v31 = vmul.f32 0.5, %v717_v10  ;;  %v872_v39 = vmul.f32 %v1345_v56, %v1814_v43  ;;  %v575_v61 = vrot.slane %v574_v21, 2  ;;  %v1059_v2 = vmax.f32 %v1043_v47, 0.0 }
 0x10f   :  { %v992_v4 = vmul.f32 %v960_v57, %v940_v19  ;;  %v722_v24 = vadd.f32 %v721_v46, %v720_v12  ;;  %v571_v14 = vadd.f32 %v570_v6, %v569_v41  ;;  %vm878_vm10 = vweird.f32 %v1345_v56 }
 0x110   :  { %v1837_v42 = vadd.f32 1e-05, %v751_v31  ;;  %v873_v7 = vmul.f32 %v1345_v56, %v872_v39  ;;  %v576_v5 = vadd.f32 %v575_v61, %v574_v21  ;;  %vm877_vm11 = vweird.f32 %v1814_v43 }
 0x111   :  { %v1347_v62 = vpop.eup %1346  ;;  %v1044_v37 = vadd.f32 %v1012_v58, %v992_v4  ;;  %v723_v44 = vrot.slane %v722_v24, 1  ;;  %v593_v29 = vmul.f32 0.5, %v571_v14  ;;  %vm879_vm13 = vmor %vm877_vm11, %vm878_vm10  ;;  %v961_v28 = vperm.slane %v1743_v22, 2 }
 0x112   :  { %v882_v18 = vmul.f32 %v1347_v62, %v1826_v11  ;;  %1348 = vrsqrt.f32 %v1837_v42  ;;  %v874_v15 = vmul.f32 0.5, %v873_v7  ;;  %v577_v25 = vrot.slane %v576_v5, 1 }
 0x113   :  { %v1060_v20 = vmax.f32 %v1044_v37, 0.0  ;;  %v724_v60 = vadd.f32 %v723_v44, %v722_v24  ;;  %v1842_v48 = vsub.f32 %v1676_v13, %v593_v29  ;;  %vm888_vm3 = vweird.f32 %v1347_v62 }
 0x114   :  { %v883_v8 = vmul.f32 %v1347_v62, %v882_v18  ;;  %v875_v9 = vsub.f32 1.5, %v874_v15  ;;  %v578_v26 = vadd.f32 %v577_v25, %v576_v5  ;;  %v1013_v35 = vperm.slane %v1793_v34, 2 }
 0x115   :  { %v1844_v54 = vpack.c.bf16 %v1060_v20, %v1059_v2  ;;  %v752_v27 = vmul.f32 0.5, %v724_v60  ;;  %v625_v33 = vmul.f32 %v1842_v48, %v1842_v48  ;;  %vm887_vm4 = vweird.f32 %v1826_v11 }
 0x116   :  { %v884_v36 = vmul.f32 0.5, %v883_v8  ;;  %v876_v17 = vmul.f32 %v1345_v56, %v875_v9  ;;  %v594_v1 = vmul.f32 0.5, %v578_v26  ;;  %vm889_vm6 = vmor %vm887_vm4, %vm888_vm3  ;;  %v962_v23 = vperm.slane %v1743_v22, 3 }
 0x117   :  { %v768_v40 = vadd.f32 1e-05, %v752_v27  ;;  %v725_v63 = vsel %vm466_vm1, %v625_v33, 0.0  ;;  %vm897_vm8 = vweird.f32 %v1837_v42  ;;  %v963_v7 = vperm.slane %v1743_v22, 4 }
 0x118   :  { %v1349_v16 = vpop.eup %1348  ;;  %v885_v30 = vsub.f32 1.5, %v884_v36  ;;  %v880_v13 = vsel %vm879_vm13, %v1345_v56, %v876_v17  ;;  %v726_v53 = vrot.slane %v725_v63, 4  ;;  %v1857_v57 = vsub.f32 %v1717_v0, %v594_v1 }
 0x119   :  { %v892_v38 = vmul.f32 %v1349_v16, %v1837_v42  ;;  %v941_v32 = vmul.f32 %v880_v13, %v1754_v51  ;;  %1350 = vrsqrt.f32 %v768_v40  ;;  %v1014_v51 = vperm.slane %v1793_v34, 3 }
 0x11a   :  { %v886_v43 = vmul.f32 %v1347_v62, %v885_v30  ;;  %v727_v41 = vadd.f32 %v726_v53, %v725_v63  ;;  %v626_v21 = vmul.f32 %v1857_v57, %v1857_v57  ;;  %vm898_vm7 = vweird.f32 %v1349_v16 }
 0x11b   :  { %v893_v52 = vmul.f32 %v1349_v16, %v892_v38  ;;  %v993_v3 = vmul.f32 %v961_v28, %v941_v32  ;;  %vm899_vm9 = vmor %vm897_vm8, %vm898_vm7  ;;  %v1015_v9 = vperm.slane %v1793_v34, 4  ;;  %vm907_vm11 = vweird.f32 %v768_v40 }
 0x11c   :  { %v890_v45 = vsel %vm889_vm6, %v1347_v62, %v886_v43  ;;  %v728_v58 = vrot.slane %v727_v41, 2  ;;  %v732_v0 = vsel %vm466_vm1, %v626_v21, 0.0  ;;  %v1090_v62 = vrot.slane %v1844_v54, 3 }
 0x11d   :  { %v942_v10 = vmul.f32 %v890_v45, %v1766_v50  ;;  %v894_v12 = vmul.f32 0.5, %v893_v52  ;;  %v1045_v11 = vadd.f32 %v1013_v35, %v993_v3  ;;  %v733_v6 = vrot.slane %v732_v0, 4 }
 0x11e   :  { %v729_v46 = vadd.f32 %v728_v58, %v727_v41  ;;  %v1120_v25 = vsel %vm1097_vm0, %v1844_v54, %v1090_v62  ;;  %v1016_v13 = vperm.slane %v1793_v34, 5 }
 0x11f   :  { %v994_v47 = vmul.f32 %v962_v23, %v942_v10  ;;  %v895_v55 = vsub.f32 1.5, %v894_v12  ;;  %v1061_v56 = vmax.f32 %v1045_v11, 0.0  ;;  %v1351_v19 = vpop.eup %1350  ;;  %v734_v14 = vadd.f32 %v733_v6, %v732_v0 }
 0x120   :  { %v902_v39 = vmul.f32 %v1351_v19, %v768_v40  ;;  %v730_v24 = vrot.slane %v729_v46, 1  ;;  %vm908_vm10 = vweird.f32 %v1351_v19  ;;  %v965_v11 = vperm.slane %v1743_v22, 6 }
 0x121   :  { %v1046_v31 = vadd.f32 %v1014_v51, %v994_v47  ;;  %v896_v50 = vmul.f32 %v1349_v16, %v895_v55  ;;  %v735_v18 = vrot.slane %v734_v14, 2  ;;  %vm909_vm13 = vmor %vm907_vm11, %vm908_vm10  ;;  %v1017_v0 = vperm.slane %v1793_v34, 6 }
 0x122   :  { %v903_v5 = vmul.f32 %v1351_v19, %v902_v39  ;;  %v731_v37 = vadd.f32 %v730_v24, %v729_v46  ;;  %v1018_v39 = vperm.slane %v1793_v34, 7 }
 0x123   :  { %v1062_v61 = vmax.f32 %v1046_v31, 0.0  ;;  %v900_v4 = vsel %vm899_vm9, %v1349_v16, %v896_v50  ;;  %v736_v8 = vadd.f32 %v735_v18, %v734_v14  ;;  %v964_v16 = vperm.slane %v1743_v22, 5 }
 0x124   :  { %v943_v42 = vmul.f32 %v900_v4, %v1781_v49  ;;  %v904_v15 = vmul.f32 0.5, %v903_v5  ;;  %v753_v20 = vmul.f32 0.5, %v731_v37  ;;  %v966_v31 = vperm.slane %v1743_v22, 7 }
 0x125   :  { %v1072_v2 = vpack.c.bf16 %v1062_v61, %v1061_v56  ;;  %v737_v27 = vrot.slane %v736_v8, 1 }
 0x126   :  { %v905_v60 = vsub.f32 1.5, %v904_v15  ;;  %v995_v26 = vmul.f32 %v963_v7, %v943_v42  ;;  %v769_v17 = vadd.f32 1e-05, %v753_v20 }
 0x127   :  { %v1091_v44 = vrot.slane %v1072_v2, 6  ;;  %v1092_v29 = vrot.slane %v1072_v2, 1  ;;  %v738_v28 = vadd.f32 %v737_v27, %v736_v8 }
 0x128   :  { %v906_v33 = vmul.f32 %v1351_v19, %v905_v60  ;;  %1352 = vrsqrt.f32 %v769_v17  ;;  %v1047_v54 = vadd.f32 %v1015_v9, %v995_v26 }
 0x129   :  { %v1123_v36 = vsel %vm1101_vm14, %v1091_v44, %v1092_v29  ;;  %v754_v35 = vmul.f32 0.5, %v738_v28  ;;  %vm917_vm14 = vweird.f32 %v769_v17 }
 0x12a   :  { %v1124_v49 = vsel %vm466_vm1, %v1120_v25, %v1123_v36  ;;  %v910_v30 = vsel %vm909_vm13, %v1351_v19, %v906_v33  ;;  %v1063_v63 = vmax.f32 %v1047_v54, 0.0 }
 0x12b   :  { %v944_v1 = vmul.f32 %v910_v30, %v1807_v59  ;;  %v770_v32 = vadd.f32 1e-05, %v754_v35 }
 0x12d   :  { %v996_v38 = vmul.f32 %v964_v16, %v944_v1  ;;  %1354 = vrsqrt.f32 %v770_v32  ;;  %vm927_vm4 = vweird.f32 %v770_v32 }
 0x12e   :  { %v1353_v43 = vpop.eup %1352 }
 0x12f   :  { %v1048_v23 = vadd.f32 %v1016_v13, %v996_v38  ;;  %v912_v52 = vmul.f32 %v1353_v43, %v769_v17  ;;  %vm918_vm1 = vweird.f32 %v1353_v43 }
 0x130   :  { %vm919_vm0 = vmor %vm917_vm14, %vm918_vm1 }
 0x131   :  { %v1064_v40 = vmax.f32 %v1048_v23, 0.0  ;;  %v913_v53 = vmul.f32 %v1353_v43, %v912_v52 }
 0x133   :  { %v1073_v3 = vpack.c.bf16 %v1064_v40, %v1063_v63  ;;  %v914_v45 = vmul.f32 0.5, %v913_v53  ;;  %v1355_v10 = vpop.eup %1354 }
 0x134   :  { %v922_v12 = vmul.f32 %v1355_v10, %v770_v32  ;;  %vm928_vm3 = vweird.f32 %v1355_v10 }
 0x135   :  { %v915_v51 = vsub.f32 1.5, %v914_v45  ;;  %vm929_vm6 = vmor %vm927_vm4, %vm928_vm3  ;;  %v1093_v14 = vrot.slane %v1073_v3, 4  ;;  %v1094_v62 = vrot.slane %v1073_v3, 7 }
 0x136   :  { %v923_v59 = vmul.f32 %v1355_v10, %v922_v12 }
 0x137   :  { %v916_v41 = vmul.f32 %v1353_v43, %v915_v51  ;;  %v1127_v42 = vsel %vm1106_vm12, %v1093_v14, %v1094_v62 }
 0x138   :  { %v924_v47 = vmul.f32 0.5, %v923_v59 }
 0x139   :  { %v920_v21 = vsel %vm919_vm0, %v1353_v43, %v916_v41 }
 0x13a   :  { %v945_v55 = vmul.f32 %v920_v21, %v1842_v48  ;;  %v925_v58 = vsub.f32 1.5, %v924_v47 }
 0x13c   :  { %v997_v56 = vmul.f32 %v965_v11, %v945_v55  ;;  %v926_v19 = vmul.f32 %v1355_v10, %v925_v58 }
 0x13e   :  { %v930_v50 = vsel %vm929_vm6, %v1355_v10, %v926_v19  ;;  %v1049_v46 = vadd.f32 %v1017_v0, %v997_v56 }
 0x13f   :  { %v946_v6 = vmul.f32 %v930_v50, %v1857_v57 }
 0x140   :  { %v1065_v4 = vmax.f32 %v1049_v46, 0.0 }
 0x141   :  { %v998_v61 = vmul.f32 %v966_v31, %v946_v6 }
 0x143   :  { %v1050_v24 = vadd.f32 %v1018_v39, %v998_v61 }
 0x145   :  { %v1066_v48 = vmax.f32 %v1050_v24, 0.0 }
 0x147   :  { %v1074_v7 = vpack.c.bf16 %v1066_v48, %v1065_v4 }
 0x149   :  { %v1095_v5 = vrot.slane %v1074_v7, 2  ;;  %v1096_v2 = vrot.slane %v1074_v7, 5 }
 0x14b   :  { %v1130_v37 = vsel %vm1110_vm15, %v1095_v5, %v1096_v2 }
 0x14c   :  { %v1131_v22 = vsel %vm1114_vm2, %v1127_v42, %v1130_v37 }
 0x14d   :  { %v1132_v18 = vsel %vm1116_vm5, %v1124_v49, %v1131_v22 }
 0x14e   :  { %1136 = vst [vmem:[%s1893_s4 + $0x8] sm:$0xff] %v1132_v18 }
 0x14f   :  { %1141 = vsyncpa [#allocation3], 1 }
 0x150   :  { %1142 = vsyncpa [#allocation5], 1 }

// kernel: generator_forward.6
= control target key start
LH: loop header
LB: loop body
LE: loop exit
PB: predicated region body
PF: predicated region fallthrough
CT: control target
= control target key end

     0   :  { %9 = vsyncpa [#allocation3], 0  ;;  %s2282_s15 = smov [#allocation2]   ;;  %s2283_s17 = smov 128   ;;  %s2538_s0 = inlined_call_operand.vmem [shape: bf16[32,1152], index: 0, kind: input, shape index: {}]   ;;  %s2539_s1 = inlined_call_operand.hbm [shape: bf16[1152,256], index: 1, kind: input, shape index: {}]   ;;  %s2540_s2 = inlined_call_operand.vmem [shape: bf16[32,256], index: 2, kind: output, shape index: {0}]   ;;  %s2541_s3 = inlined_call_operand.vmem [shape: f32[1,2,256], index: 3, kind: output, shape index: {1}]  }
   0x1   :  { %s16_s14 = sshll.u32 %s2539_s1, 4  ;;  %s18_s16 = sshll.u32 %s2282_s15, 4  ;;  %s17_s14 = int_to_ptr.hbm [resolvable:$true] %s16_s14  ;;  %s19_s16 = int_to_ptr.vmem [resolvable:$true] %s18_s16 }
   0x2   :  { %s2284_s18 = smov 8  }
   0x3   :  { %24 = dma.hbm_to_vmem [thread:$0]  %s17_s14, 18432, %s19_s16, [#allocation3], %s2283_s17, %s2283_s17, %s2284_s18  }
   0x4   :  { %2280 = dma.done.wait [#allocation3], 18432  }
   0x5   :  { %2281 = vsyncadd [#allocation3], 4294948864  ;;  %v1556_v0 = vld [vmem:[#allocation2 + $0x70] sm:$0xf]  ;;  %v2108_v1 = vld [vmem:[#allocation2 + $0x74] sm:$0xf0] }
   0x6   :  { %v1620_v2 = vld [vmem:[#allocation2 + $0xf0] sm:$0xf]  ;;  %v1557_v3 = vor.u32 %v2108_v1, %v1556_v0  ;;  %v2124_v4 = vld [vmem:[#allocation2 + $0xf4] sm:$0xf0]  ;;  %v1548_v11 = vld [vmem:[#allocation2 + $0x60] sm:$0xf] }
   0x7   :  { %v1684_v5 = vld [vmem:[#allocation2 + $0x170] sm:$0xf]  ;;  %v2140_v6 = vld [vmem:[#allocation2 + $0x174] sm:$0xf0]  ;;  %v1621_v7 = vor.u32 %v2124_v4, %v1620_v2  ;;  %v2106_v13 = vld [vmem:[#allocation2 + $0x64] sm:$0xf0] }
   0x8   :  { %v1685_v8 = vor.u32 %v2140_v6, %v1684_v5  ;;  %v1748_v9 = vld [vmem:[#allocation2 + $0x1f0] sm:$0xf]  ;;  %v2156_v10 = vld [vmem:[#allocation2 + $0x1f4] sm:$0xf0]  ;;  %1005 = vmatpush.bf16.msra.mxu0 %v1557_v3  ;;  %v1612_v14 = vld [vmem:[#allocation2 + $0xe0] sm:$0xf]  ;;  %v1549_v16 = vor.u32 %v2106_v13, %v1548_v11 }
   0x9   :  { %v1749_v12 = vor.u32 %v2156_v10, %v1748_v9  ;;  %v2122_v15 = vld [vmem:[#allocation2 + $0xe4] sm:$0xf0]  ;;  %1024 = vmatpush.bf16.msra.mxu1 %v1621_v7  ;;  %v1676_v18 = vld [vmem:[#allocation2 + $0x160] sm:$0xf]  ;;  %v1540_v23 = vld [vmem:[#allocation2 + $0x50] sm:$0xf] }
   0xa   :  { %1043 = vmatpush.bf16.msra.mxu2 %v1685_v8  ;;  %v1613_v17 = vor.u32 %v2122_v15, %v1612_v14  ;;  %v2138_v19 = vld [vmem:[#allocation2 + $0x164] sm:$0xf0]  ;;  %v1740_v20 = vld [vmem:[#allocation2 + $0x1e0] sm:$0xf]  ;;  %v2104_v24 = vld [vmem:[#allocation2 + $0x54] sm:$0xf0] }
   0xb   :  { %1062 = vmatpush.bf16.msra.mxu3 %v1749_v12  ;;  %v1677_v21 = vor.u32 %v2138_v19, %v1676_v18  ;;  %v2154_v22 = vld [vmem:[#allocation2 + $0x1e4] sm:$0xf0]  ;;  %v1604_v26 = vld [vmem:[#allocation2 + $0xd0] sm:$0xf]  ;;  %v2120_v27 = vld [vmem:[#allocation2 + $0xd4] sm:$0xf0]  ;;  %v1541_v29 = vor.u32 %v2104_v24, %v1540_v23 }
   0xc   :  { %v1741_v25 = vor.u32 %v2154_v22, %v1740_v20  ;;  %v1668_v28 = vld [vmem:[#allocation2 + $0x150] sm:$0xf]  ;;  %1006 = vmatpush.bf16.msra.mxu0 %v1549_v16  ;;  %v2136_v30 = vld [vmem:[#allocation2 + $0x154] sm:$0xf0]  ;;  %v1605_v33 = vor.u32 %v2120_v27, %v1604_v26  ;;  %v1532_v35 = vld [vmem:[#allocation2 + $0x40] sm:$0xf] }
   0xd   :  { %v1732_v31 = vld [vmem:[#allocation2 + $0x1d0] sm:$0xf]  ;;  %v2152_v32 = vld [vmem:[#allocation2 + $0x1d4] sm:$0xf0]  ;;  %1025 = vmatpush.bf16.msra.mxu1 %v1613_v17  ;;  %v1669_v34 = vor.u32 %v2136_v30, %v1668_v28  ;;  %v2102_v36 = vld [vmem:[#allocation2 + $0x44] sm:$0xf0] }
   0xe   :  { %1044 = vmatpush.bf16.msra.mxu2 %v1677_v21  ;;  %v1596_v37 = vld [vmem:[#allocation2 + $0xc0] sm:$0xf]  ;;  %v1733_v38 = vor.u32 %v2152_v32, %v1732_v31  ;;  %v2118_v39 = vld [vmem:[#allocation2 + $0xc4] sm:$0xf0]  ;;  %v1533_v44 = vor.u32 %v2102_v36, %v1532_v35  ;;  %v1524_v47 = vld [vmem:[#allocation2 + $0x30] sm:$0xf] }
   0xf   :  { %1063 = vmatpush.bf16.msra.mxu3 %v1741_v25  ;;  %v1660_v40 = vld [vmem:[#allocation2 + $0x140] sm:$0xf]  ;;  %v2134_v41 = vld [vmem:[#allocation2 + $0x144] sm:$0xf0]  ;;  %v1597_v45 = vor.u32 %v2118_v39, %v1596_v37  ;;  %v2100_v48 = vld [vmem:[#allocation2 + $0x34] sm:$0xf0] }
  0x10   :  { %v1724_v42 = vld [vmem:[#allocation2 + $0x1c0] sm:$0xf]  ;;  %v2150_v43 = vld [vmem:[#allocation2 + $0x1c4] sm:$0xf0]  ;;  %1007 = vmatpush.bf16.msra.mxu0 %v1541_v29  ;;  %v1661_v46 = vor.u32 %v2134_v41, %v1660_v40  ;;  %v1588_v49 = vld [vmem:[#allocation2 + $0xb0] sm:$0xf]  ;;  %v1525_v56 = vor.u32 %v2100_v48, %v1524_v47 }
  0x11   :  { %1026 = vmatpush.bf16.msra.mxu1 %v1605_v33  ;;  %v1725_v50 = vor.u32 %v2150_v43, %v1724_v42  ;;  %v2116_v51 = vld [vmem:[#allocation2 + $0xb4] sm:$0xf0]  ;;  %v1652_v52 = vld [vmem:[#allocation2 + $0x130] sm:$0xf]  ;;  %v1516_v59 = vld [vmem:[#allocation2 + $0x20] sm:$0xf] }
  0x12   :  { %1045 = vmatpush.bf16.msra.mxu2 %v1669_v34  ;;  %v2132_v53 = vld [vmem:[#allocation2 + $0x134] sm:$0xf0]  ;;  %v1716_v54 = vld [vmem:[#allocation2 + $0x1b0] sm:$0xf]  ;;  %v1589_v57 = vor.u32 %v2116_v51, %v1588_v49  ;;  %v2098_v60 = vld [vmem:[#allocation2 + $0x24] sm:$0xf0] }
  0x13   :  { %1064 = vmatpush.bf16.msra.mxu3 %v1733_v38  ;;  %v2148_v55 = vld [vmem:[#allocation2 + $0x1b4] sm:$0xf0]  ;;  %v1653_v58 = vor.u32 %v2132_v53, %v1652_v52  ;;  %v1580_v61 = vld [vmem:[#allocation2 + $0xa0] sm:$0xf]  ;;  %v2114_v63 = vld [vmem:[#allocation2 + $0xa4] sm:$0xf0]  ;;  %v1517_v4 = vor.u32 %v2098_v60, %v1516_v59 }
  0x14   :  { %1008 = vmatpush.bf16.msra.mxu0 %v1533_v44  ;;  %v1717_v62 = vor.u32 %v2148_v55, %v1716_v54  ;;  %v1644_v0 = vld [vmem:[#allocation2 + $0x120] sm:$0xf]  ;;  %v2130_v1 = vld [vmem:[#allocation2 + $0x124] sm:$0xf0]  ;;  %v1581_v5 = vor.u32 %v2114_v63, %v1580_v61  ;;  %v1508_v7 = vld [vmem:[#allocation2 + $0x10] sm:$0xf] }
  0x15   :  { %1027 = vmatpush.bf16.msra.mxu1 %v1597_v45  ;;  %v1708_v2 = vld [vmem:[#allocation2 + $0x1a0] sm:$0xf]  ;;  %v2146_v3 = vld [vmem:[#allocation2 + $0x1a4] sm:$0xf0]  ;;  %v1645_v6 = vor.u32 %v2130_v1, %v1644_v0  ;;  %v2096_v8 = vld [vmem:[#allocation2 + $0x14] sm:$0xf0] }
  0x16   :  { %1046 = vmatpush.bf16.msra.mxu2 %v1661_v46  ;;  %v1572_v9 = vld [vmem:[#allocation2 + $0x90] sm:$0xf]  ;;  %v1709_v10 = vor.u32 %v2146_v3, %v1708_v2  ;;  %v2112_v11 = vld [vmem:[#allocation2 + $0x94] sm:$0xf0]  ;;  %v1500_v16 = vld [vmem:[#allocation2] sm:$0xf]  ;;  %v1509_v17 = vor.u32 %v2096_v8, %v1508_v7 }
  0x17   :  { %1065 = vmatpush.bf16.msra.mxu3 %v1725_v50  ;;  %v1636_v12 = vld [vmem:[#allocation2 + $0x110] sm:$0xf]  ;;  %v2128_v13 = vld [vmem:[#allocation2 + $0x114] sm:$0xf0]  ;;  %v2094_v18 = vld [vmem:[#allocation2 + $0x4] sm:$0xf0]  ;;  %v1573_v21 = vor.u32 %v2112_v11, %v1572_v9 }
  0x18   :  { %1009 = vmatpush.bf16.msra.mxu0 %v1525_v56  ;;  %v1700_v14 = vld [vmem:[#allocation2 + $0x190] sm:$0xf]  ;;  %v2144_v15 = vld [vmem:[#allocation2 + $0x194] sm:$0xf0]  ;;  %v1564_v19 = vld [vmem:[#allocation2 + $0x80] sm:$0xf]  ;;  %v1637_v22 = vor.u32 %v2128_v13, %v1636_v12  ;;  %v1501_v34 = vor.u32 %v2094_v18, %v1500_v16 }
  0x19   :  { %1028 = vmatpush.bf16.msra.mxu1 %v1589_v57  ;;  %v2110_v20 = vld [vmem:[#allocation2 + $0x84] sm:$0xf0]  ;;  %v1628_v23 = vld [vmem:[#allocation2 + $0x100] sm:$0xf]  ;;  %v1701_v26 = vor.u32 %v2144_v15, %v1700_v14  ;;  %v2079_v29 = vld [vmem:[%s2538_s0 + $0x20] sm:$0xf0] }
  0x1a   :  { %1047 = vmatpush.bf16.msra.mxu2 %v1653_v58  ;;  %v2126_v24 = vld [vmem:[#allocation2 + $0x104] sm:$0xf0]  ;;  %v1692_v25 = vld [vmem:[#allocation2 + $0x180] sm:$0xf]  ;;  %v2075_v30 = vld [vmem:[%s2538_s0 + $0x4] sm:$0xf]  ;;  %v1565_v38 = vor.u32 %v2110_v20, %v1564_v19 }
  0x1b   :  { %1066 = vmatpush.bf16.msra.mxu3 %v1717_v62  ;;  %v2142_v27 = vld [vmem:[#allocation2 + $0x184] sm:$0xf0]  ;;  %v1428_v28 = vld [vmem:[%s2538_s0] sm:$0xf]  ;;  %v1940_v32 = vld [vmem:[#allocation2 + $0x370] sm:$0xf]  ;;  %v1629_v39 = vor.u32 %v2126_v24, %v1628_v23 }
  0x1c   :  { %1010 = vmatpush.bf16.msra.mxu0 %v1517_v4  ;;  %v1430_v31 = vld [vmem:[%s2538_s0 + $0x24] sm:$0xf0]  ;;  %v2204_v33 = vld [vmem:[#allocation2 + $0x374] sm:$0xf0]  ;;  %v1876_v36 = vld [vmem:[#allocation2 + $0x2f0] sm:$0xf]  ;;  %v1693_v43 = vor.u32 %v2142_v27, %v1692_v25  ;;  %v2332_v48 = vor.u32 %v2079_v29, %v1428_v28 }
  0x1d   :  { %1029 = vmatpush.bf16.msra.mxu1 %v1581_v5  ;;  %v1436_v35 = vld [vmem:[%s2538_s0 + $0x8] sm:$0xf]  ;;  %v2188_v37 = vld [vmem:[#allocation2 + $0x2f4] sm:$0xf0]  ;;  %v2080_v40 = vld [vmem:[%s2538_s0 + $0x28] sm:$0xf0]  ;;  %v1941_v44 = vor.u32 %v2204_v33, %v1940_v32  ;;  %v2334_v53 = vor.u32 %v2075_v30, %v1430_v31 }
  0x1e   :  { %1048 = vmatpush.bf16.msra.mxu2 %v1645_v6  ;;  %v2076_v41 = vld [vmem:[%s2538_s0 + $0xc] sm:$0xf]  ;;  %v1438_v42 = vld [vmem:[%s2538_s0 + $0x2c] sm:$0xf0]  ;;  %v2172_v46 = vld [vmem:[#allocation2 + $0x274] sm:$0xf0]  ;;  %v1877_v49 = vor.u32 %v2188_v37, %v1876_v36  ;;  %v2336_v54 = vor.u32 %v2080_v40, %v1436_v35 }
  0x1f   :  { %1067 = vmatpush.bf16.msra.mxu3 %v1709_v10  ;;  %v1812_v45 = vld [vmem:[#allocation2 + $0x270] sm:$0xf]  ;;  %v2220_v50 = vld [vmem:[#allocation2 + $0x3f4] sm:$0xf0]  ;;  %v1932_v51 = vld [vmem:[#allocation2 + $0x360] sm:$0xf]  ;;  %v2338_v57 = vor.u32 %v2076_v41, %v1438_v42 }
  0x20   :  { %1011 = vmatpush.bf16.msra.mxu0 %v1509_v17  ;;  %v2004_v47 = vld [vmem:[#allocation2 + $0x3f0] sm:$0xf]  ;;  %v2202_v52 = vld [vmem:[#allocation2 + $0x364] sm:$0xf0]  ;;  %v1868_v55 = vld [vmem:[#allocation2 + $0x2e0] sm:$0xf]  ;;  %v1813_v58 = vor.u32 %v2172_v46, %v1812_v45 }
  0x21   :  { %1030 = vmatpush.bf16.msra.mxu1 %v1573_v21  ;;  %v2186_v56 = vld [vmem:[#allocation2 + $0x2e4] sm:$0xf0]  ;;  %v2005_v59 = vor.u32 %v2220_v50, %v2004_v47  ;;  %v1933_v60 = vor.u32 %v2202_v52, %v1932_v51  ;;  %v1804_v61 = vld [vmem:[#allocation2 + $0x260] sm:$0xf]  ;;  %v1924_v2 = vld [vmem:[#allocation2 + $0x350] sm:$0xf] }
  0x22   :  { %1049 = vmatpush.bf16.msra.mxu2 %v1637_v22  ;;  %v2170_v62 = vld [vmem:[#allocation2 + $0x264] sm:$0xf0]  ;;  %v1996_v63 = vld [vmem:[#allocation2 + $0x3e0] sm:$0xf]  ;;  %v1869_v0 = vor.u32 %v2186_v56, %v1868_v55  ;;  %v2200_v3 = vld [vmem:[#allocation2 + $0x354] sm:$0xf0] }
  0x23   :  { %1068 = vmatpush.bf16.msra.mxu3 %v1701_v26  ;;  %v2218_v1 = vld [vmem:[#allocation2 + $0x3e4] sm:$0xf0]  ;;  %v1860_v4 = vld [vmem:[#allocation2 + $0x2d0] sm:$0xf]  ;;  %v2184_v5 = vld [vmem:[#allocation2 + $0x2d4] sm:$0xf0]  ;;  %v1805_v6 = vor.u32 %v2170_v62, %v1804_v61  ;;  %v1925_v8 = vor.u32 %v2200_v3, %v1924_v2 }
  0x24   :  { %1012 = vmatpush.bf16.msra.mxu0 %v1501_v34  ;;  %v1997_v7 = vor.u32 %v2218_v1, %v1996_v63  ;;  %v1796_v9 = vld [vmem:[#allocation2 + $0x250] sm:$0xf]  ;;  %v2168_v10 = vld [vmem:[#allocation2 + $0x254] sm:$0xf0]  ;;  %v1861_v12 = vor.u32 %v2184_v5, %v1860_v4  ;;  %v1916_v14 = vld [vmem:[#allocation2 + $0x340] sm:$0xf] }
  0x25   :  { %1031 = vmatpush.bf16.msra.mxu1 %v1565_v38  ;;  %v1988_v11 = vld [vmem:[#allocation2 + $0x3d0] sm:$0xf]  ;;  %v2216_v13 = vld [vmem:[#allocation2 + $0x3d4] sm:$0xf0]  ;;  %v2198_v15 = vld [vmem:[#allocation2 + $0x344] sm:$0xf0]  ;;  %v1797_v18 = vor.u32 %v2168_v10, %v1796_v9 }
  0x26   :  { %1050 = vmatpush.bf16.msra.mxu2 %v1629_v39  ;;  %v1852_v16 = vld [vmem:[#allocation2 + $0x2c0] sm:$0xf]  ;;  %v2182_v17 = vld [vmem:[#allocation2 + $0x2c4] sm:$0xf0]  ;;  %v1989_v22 = vor.u32 %v2216_v13, %v1988_v11  ;;  %v1917_v23 = vor.u32 %v2198_v15, %v1916_v14  ;;  %v2088_v26 = vld [vmem:[%s2538_s0 + $0x68] sm:$0xf0] }
  0x27   :  { %1069 = vmatpush.bf16.msra.mxu3 %v1693_v43  ;;  %1013 = vmatmul.bf16.vlgmr.msra.gmra.mxu0 %v2332_v48  ;;  %v1788_v19 = vld [vmem:[#allocation2 + $0x240] sm:$0xf]  ;;  %v2166_v20 = vld [vmem:[#allocation2 + $0x244] sm:$0xf0]  ;;  %v1853_v27 = vor.u32 %v2182_v17, %v1852_v16  ;;  %v2084_v28 = vld [vmem:[%s2538_s0 + $0x4c] sm:$0xf] }
  0x28   :  { %1032 = vmatmul.bf16.vlgmr.msra.gmra.mxu1 %v2334_v53  ;;  %1081 = vmatpush.bf16.msrb.mxu0 %v1813_v58  ;;  %v1980_v21 = vld [vmem:[#allocation2 + $0x3c0] sm:$0xf]  ;;  %v2214_v24 = vld [vmem:[#allocation2 + $0x3c4] sm:$0xf0]  ;;  %v1466_v29 = vld [vmem:[%s2538_s0 + $0x6c] sm:$0xf0]  ;;  %v1789_v35 = vor.u32 %v2166_v20, %v1788_v19 }
  0x29   :  { %1100 = vmatpush.bf16.msrb.mxu1 %v1877_v49  ;;  %1051 = vmatmul.bf16.vlgmr.msra.gmra.mxu2 %v2336_v54  ;;  %v1464_v25 = vld [vmem:[%s2538_s0 + $0x48] sm:$0xf]  ;;  %v1908_v30 = vld [vmem:[#allocation2 + $0x330] sm:$0xf]  ;;  %v2196_v31 = vld [vmem:[#allocation2 + $0x334] sm:$0xf0]  ;;  %v1981_v39 = vor.u32 %v2214_v24, %v1980_v21  ;;  %v2370_v50 = vor.u32 %v2084_v28, %v1466_v29 }
  0x2a   :  { %1119 = vmatpush.bf16.msrb.mxu2 %v1941_v44  ;;  %1070 = vmatmul.bf16.vlgmr.msra.gmra.mxu3 %v2338_v57  ;;  %v1472_v32 = vld [vmem:[%s2538_s0 + $0x50] sm:$0xf]  ;;  %v2180_v34 = vld [vmem:[#allocation2 + $0x2b4] sm:$0xf0]  ;;  %v2089_v36 = vld [vmem:[%s2538_s0 + $0x70] sm:$0xf0]  ;;  %v1909_v40 = vor.u32 %v2196_v31, %v1908_v30  ;;  %v2368_v44 = vor.u32 %v2088_v26, %v1464_v25 }
  0x2b   :  { %1138 = vmatpush.bf16.msrb.mxu3 %v2005_v59  ;;  %v1844_v33 = vld [vmem:[#allocation2 + $0x2b0] sm:$0xf]  ;;  %v2085_v37 = vld [vmem:[%s2538_s0 + $0x54] sm:$0xf]  ;;  %v1474_v38 = vld [vmem:[%s2538_s0 + $0x74] sm:$0xf0]  ;;  %v2372_v51 = vor.u32 %v2089_v36, %v1472_v32 }
  0x2c   :  { %1082 = vmatpush.bf16.msrb.mxu0 %v1805_v6  ;;  %v1780_v41 = vld [vmem:[#allocation2 + $0x230] sm:$0xf]  ;;  %v2164_v42 = vld [vmem:[#allocation2 + $0x234] sm:$0xf0]  ;;  %v1845_v45 = vor.u32 %v2180_v34, %v1844_v33  ;;  %v1900_v47 = vld [vmem:[#allocation2 + $0x320] sm:$0xf]  ;;  %v2374_v56 = vor.u32 %v2085_v37, %v1474_v38 }
  0x2d   :  { %1101 = vmatpush.bf16.msrb.mxu1 %v1869_v0  ;;  %v1972_v43 = vld [vmem:[#allocation2 + $0x3b0] sm:$0xf]  ;;  %v2212_v46 = vld [vmem:[#allocation2 + $0x3b4] sm:$0xf0]  ;;  %v2194_v49 = vld [vmem:[#allocation2 + $0x324] sm:$0xf0]  ;;  %v1781_v58 = vor.u32 %v2164_v42, %v1780_v41 }
  0x2e   :  { %1120 = vmatpush.bf16.msrb.mxu2 %v1933_v60  ;;  %v1836_v52 = vld [vmem:[#allocation2 + $0x2a0] sm:$0xf]  ;;  %v2178_v55 = vld [vmem:[#allocation2 + $0x2a4] sm:$0xf0]  ;;  %v1973_v59 = vor.u32 %v2212_v46, %v1972_v43  ;;  %v1901_v60 = vor.u32 %v2194_v49, %v1900_v47  ;;  %v1892_v2 = vld [vmem:[#allocation2 + $0x310] sm:$0xf] }
  0x2f   :  { %1139 = vmatpush.bf16.msrb.mxu3 %v1997_v7  ;;  %v1772_v61 = vld [vmem:[#allocation2 + $0x220] sm:$0xf]  ;;  %v2162_v62 = vld [vmem:[#allocation2 + $0x224] sm:$0xf0]  ;;  %v1837_v0 = vor.u32 %v2178_v55, %v1836_v52  ;;  %v2192_v3 = vld [vmem:[#allocation2 + $0x314] sm:$0xf0] }
  0x30   :  { %1083 = vmatpush.bf16.msrb.mxu0 %v1797_v18  ;;  %v1964_v63 = vld [vmem:[#allocation2 + $0x3a0] sm:$0xf]  ;;  %v2210_v1 = vld [vmem:[#allocation2 + $0x3a4] sm:$0xf0]  ;;  %v1828_v4 = vld [vmem:[#allocation2 + $0x290] sm:$0xf]  ;;  %v1773_v6 = vor.u32 %v2162_v62, %v1772_v61  ;;  %v1893_v9 = vor.u32 %v2192_v3, %v1892_v2 }
  0x31   :  { %1102 = vmatpush.bf16.msrb.mxu1 %v1861_v12  ;;  %v2176_v5 = vld [vmem:[#allocation2 + $0x294] sm:$0xf0]  ;;  %v1764_v7 = vld [vmem:[#allocation2 + $0x210] sm:$0xf]  ;;  %v1884_v14 = vld [vmem:[#allocation2 + $0x300] sm:$0xf] }
  0x32   :  { %1121 = vmatpush.bf16.msrb.mxu2 %v1925_v8  ;;  %v1965_v8 = vor.u32 %v2210_v1, %v1964_v63  ;;  %v2160_v10 = vld [vmem:[#allocation2 + $0x214] sm:$0xf0]  ;;  %v1956_v11 = vld [vmem:[#allocation2 + $0x390] sm:$0xf]  ;;  %v1829_v13 = vor.u32 %v2176_v5, %v1828_v4  ;;  %v2190_v15 = vld [vmem:[#allocation2 + $0x304] sm:$0xf0] }
  0x33   :  { %1140 = vmatpush.bf16.msrb.mxu3 %v1989_v22  ;;  %v2208_v12 = vld [vmem:[#allocation2 + $0x394] sm:$0xf0]  ;;  %v1820_v16 = vld [vmem:[#allocation2 + $0x280] sm:$0xf]  ;;  %v2174_v17 = vld [vmem:[#allocation2 + $0x284] sm:$0xf0]  ;;  %v1765_v20 = vor.u32 %v2160_v10, %v1764_v7  ;;  %v1885_v25 = vor.u32 %v2190_v15, %v1884_v14 }
  0x34   :  { %1084 = vmatpush.bf16.msrb.mxu0 %v1789_v35  ;;  %v2123_v18 = vld [vmem:[#allocation2 + $0xf4] sm:$0xf]  ;;  %v1622_v19 = vld [vmem:[#allocation2 + $0xf8] sm:$0xf0]  ;;  %v1756_v21 = vld [vmem:[#allocation2 + $0x200] sm:$0xf]  ;;  %v1957_v24 = vor.u32 %v2208_v12, %v1956_v11  ;;  %v1821_v29 = vor.u32 %v2174_v17, %v1820_v16 }
  0x35   :  { %1103 = vmatpush.bf16.msrb.mxu1 %v1853_v27  ;;  %v2107_v22 = vld [vmem:[#allocation2 + $0x74] sm:$0xf]  ;;  %v2158_v26 = vld [vmem:[#allocation2 + $0x204] sm:$0xf0]  ;;  %v1948_v27 = vld [vmem:[#allocation2 + $0x380] sm:$0xf]  ;;  %v1625_v34 = vor.u32 %v2123_v18, %v1622_v19 }
  0x36   :  { %1122 = vmatpush.bf16.msrb.mxu2 %v1917_v23  ;;  %v1558_v23 = vld [vmem:[#allocation2 + $0x78] sm:$0xf0]  ;;  %v2206_v28 = vld [vmem:[#allocation2 + $0x384] sm:$0xf0]  ;;  %v1444_v30 = vld [vmem:[%s2538_s0 + $0x10] sm:$0xf]  ;;  %v1757_v42 = vor.u32 %v2158_v26, %v1756_v21 }
  0x37   :  { %1141 = vmatpush.bf16.msrb.mxu3 %v1981_v39  ;;  %1018 = vmatmul.bf16.gmra.mxu0 %v2368_v44  ;;  %v2081_v31 = vld [vmem:[%s2538_s0 + $0x30] sm:$0xf0]  ;;  %v1446_v33 = vld [vmem:[%s2538_s0 + $0x34] sm:$0xf0]  ;;  %v2068_v35 = vld [vmem:[#allocation2 + $0x470] sm:$0xf]  ;;  %v1561_v38 = vor.u32 %v2107_v22, %v1558_v23  ;;  %v1949_v47 = vor.u32 %v2206_v28, %v1948_v27 }
  0x38   :  { %1037 = vmatmul.bf16.gmra.mxu1 %v2370_v50  ;;  %1085 = vmatpush.bf16.msrb.mxu0 %v1781_v58  ;;  %v2077_v32 = vld [vmem:[%s2538_s0 + $0x14] sm:$0xf]  ;;  %v2236_v36 = vld [vmem:[#allocation2 + $0x474] sm:$0xf0]  ;;  %v1686_v39 = vld [vmem:[#allocation2 + $0x178] sm:$0xf0] }
  0x39   :  { %1104 = vmatpush.bf16.msrb.mxu1 %v1845_v45  ;;  %1056 = vmatmul.bf16.gmra.mxu2 %v2372_v51  ;;  %v2139_v37 = vld [vmem:[#allocation2 + $0x174] sm:$0xf]  ;;  %v1614_v41 = vld [vmem:[#allocation2 + $0xe8] sm:$0xf0]  ;;  %v1452_v43 = vld [vmem:[%s2538_s0 + $0x18] sm:$0xf]  ;;  %v2069_v52 = vor.u32 %v2236_v36, %v2068_v35  ;;  %v2406_v1 = vor.u32 %v2077_v32, %v1446_v33 }
  0x3a   :  { %1123 = vmatpush.bf16.msrb.mxu2 %v1909_v40  ;;  %1075 = vmatmul.bf16.gmra.mxu3 %v2374_v56  ;;  %v2121_v40 = vld [vmem:[#allocation2 + $0xe4] sm:$0xf]  ;;  %v2082_v45 = vld [vmem:[%s2538_s0 + $0x38] sm:$0xf0]  ;;  %v1454_v49 = vld [vmem:[%s2538_s0 + $0x3c] sm:$0xf0] }
  0x3b   :  { %1142 = vmatpush.bf16.msrb.mxu3 %v1973_v59  ;;  %v2078_v46 = vld [vmem:[%s2538_s0 + $0x1c] sm:$0xf]  ;;  %v2060_v55 = vld [vmem:[#allocation2 + $0x460] sm:$0xf]  ;;  %v2234_v58 = vld [vmem:[#allocation2 + $0x464] sm:$0xf0]  ;;  %v1689_v59 = vor.u32 %v2139_v37, %v1686_v39  ;;  %v2408_v5 = vor.u32 %v2082_v45, %v1452_v43 }
  0x3c   :  { %1086 = vmatpush.bf16.msrb.mxu0 %v1773_v6  ;;  %v2105_v61 = vld [vmem:[#allocation2 + $0x64] sm:$0xf]  ;;  %v1550_v62 = vld [vmem:[#allocation2 + $0x68] sm:$0xf0]  ;;  %v2119_v3 = vld [vmem:[#allocation2 + $0xd4] sm:$0xf]  ;;  %v2410_v6 = vor.u32 %v2078_v46, %v1454_v49  ;;  %v2061_v7 = vor.u32 %v2234_v58, %v2060_v55 }
  0x3d   :  { %1105 = vmatpush.bf16.msrb.mxu1 %v1837_v0  ;;  %v2137_v63 = vld [vmem:[#allocation2 + $0x164] sm:$0xf]  ;;  %v2404_v0 = vor.u32 %v2081_v31, %v1444_v30  ;;  %v1678_v2 = vld [vmem:[#allocation2 + $0x168] sm:$0xf0]  ;;  %v1606_v4 = vld [vmem:[#allocation2 + $0xd8] sm:$0xf0] }
  0x3e   :  { %1124 = vmatpush.bf16.msrb.mxu2 %v1901_v60  ;;  %v1617_v60 = vor.u32 %v2121_v40, %v1614_v41  ;;  %v2232_v10 = vld [vmem:[#allocation2 + $0x454] sm:$0xf0]  ;;  %v1681_v11 = vor.u32 %v2137_v63, %v1678_v2  ;;  %v1609_v12 = vor.u32 %v2119_v3, %v1606_v4  ;;  %v1542_v14 = vld [vmem:[#allocation2 + $0x58] sm:$0xf0]  ;;  %v2135_v15 = vld [vmem:[#allocation2 + $0x154] sm:$0xf] }
  0x3f   :  { %1143 = vmatpush.bf16.msrb.mxu3 %v1965_v8  ;;  %v1553_v8 = vor.u32 %v2105_v61, %v1550_v62  ;;  %v1670_v16 = vld [vmem:[#allocation2 + $0x158] sm:$0xf0]  ;;  %v2117_v17 = vld [vmem:[#allocation2 + $0xc4] sm:$0xf]  ;;  %v1598_v18 = vld [vmem:[#allocation2 + $0xc8] sm:$0xf0] }
  0x40   :  { %1087 = vmatpush.bf16.msrb.mxu0 %v1765_v20  ;;  %v2044_v21 = vld [vmem:[#allocation2 + $0x440] sm:$0xf]  ;;  %v2230_v22 = vld [vmem:[#allocation2 + $0x444] sm:$0xf0]  ;;  %v1673_v23 = vor.u32 %v2135_v15, %v1670_v16  ;;  %v1534_v26 = vld [vmem:[#allocation2 + $0x48] sm:$0xf0] }
  0x41   :  { %1106 = vmatpush.bf16.msrb.mxu1 %v1829_v13  ;;  %v2103_v13 = vld [vmem:[#allocation2 + $0x54] sm:$0xf]  ;;  %v2133_v27 = vld [vmem:[#allocation2 + $0x144] sm:$0xf]  ;;  %v1662_v28 = vld [vmem:[#allocation2 + $0x148] sm:$0xf0]  ;;  %v2045_v31 = vor.u32 %v2230_v22, %v2044_v21 }
  0x42   :  { %1125 = vmatpush.bf16.msrb.mxu2 %v1893_v9  ;;  %v2052_v9 = vld [vmem:[#allocation2 + $0x450] sm:$0xf]  ;;  %v1545_v20 = vor.u32 %v2103_v13, %v1542_v14  ;;  %v1590_v30 = vld [vmem:[#allocation2 + $0xb8] sm:$0xf0]  ;;  %v1665_v35 = vor.u32 %v2133_v27, %v1662_v28  ;;  %v1480_v36 = vld [vmem:[%s2538_s0 + $0x58] sm:$0xf] }
  0x43   :  { %1144 = vmatpush.bf16.msrb.mxu3 %v1957_v24  ;;  %v2053_v19 = vor.u32 %v2232_v10, %v2052_v9  ;;  %v1601_v24 = vor.u32 %v2117_v17, %v1598_v18  ;;  %v2036_v33 = vld [vmem:[#allocation2 + $0x430] sm:$0xf]  ;;  %v2090_v37 = vld [vmem:[%s2538_s0 + $0x78] sm:$0xf0]  ;;  %v1482_v39 = vld [vmem:[%s2538_s0 + $0x7c] sm:$0xf0] }
  0x44   :  { %1088 = vmatpush.bf16.msrb.mxu0 %v1757_v42  ;;  %v2099_v41 = vld [vmem:[#allocation2 + $0x34] sm:$0xf]  ;;  %v1526_v42 = vld [vmem:[#allocation2 + $0x38] sm:$0xf0]  ;;  %v2113_v46 = vld [vmem:[#allocation2 + $0xa4] sm:$0xf] }
  0x45   :  { %1107 = vmatpush.bf16.msrb.mxu1 %v1821_v29  ;;  %v2115_v29 = vld [vmem:[#allocation2 + $0xb4] sm:$0xf]  ;;  %v1654_v45 = vld [vmem:[#allocation2 + $0x138] sm:$0xf0]  ;;  %v1488_v49 = vld [vmem:[%s2538_s0 + $0x60] sm:$0xf] }
  0x46   :  { %1126 = vmatpush.bf16.msrb.mxu2 %v1885_v25  ;;  %v2101_v25 = vld [vmem:[#allocation2 + $0x44] sm:$0xf]  ;;  %v1593_v40 = vor.u32 %v2115_v29, %v1590_v30  ;;  %v2131_v43 = vld [vmem:[#allocation2 + $0x134] sm:$0xf]  ;;  %v1490_v58 = vld [vmem:[%s2538_s0 + $0x84] sm:$0xf0] }
  0x47   :  { %1145 = vmatpush.bf16.msrb.mxu3 %v1949_v47  ;;  %1089 = vmatmul.bf16.vlgmr.msrb.gmra.mxu0 %v2404_v0  ;;  %v1537_v32 = vor.u32 %v2101_v25, %v1534_v26  ;;  %v1582_v47 = vld [vmem:[#allocation2 + $0xa8] sm:$0xf0]  ;;  %v2087_v55 = vld [vmem:[%s2538_s0 + $0x64] sm:$0xf]  ;;  %v2028_v61 = vld [vmem:[#allocation2 + $0x420] sm:$0xf]  ;;  %v1657_v63 = vor.u32 %v2131_v43, %v1654_v45 }
  0x48   :  { %1157 = vmatpush.bf16.msra.mxu0 %v2069_v52  ;;  %1108 = vmatmul.bf16.vlgmr.msrb.gmra.mxu1 %v2406_v1  ;;  %v2091_v52 = vld [vmem:[%s2538_s0 + $0x80] sm:$0xf0]  ;;  %v2226_v62 = vld [vmem:[#allocation2 + $0x424] sm:$0xf0]  ;;  %v1585_v2 = vor.u32 %v2113_v46, %v1582_v47  ;;  %v1518_v4 = vld [vmem:[#allocation2 + $0x28] sm:$0xf0]  ;;  %v2446_v14 = vor.u32 %v2087_v55, %v1490_v58 }
  0x49   :  { %1176 = vmatpush.bf16.msra.mxu1 %v1561_v38  ;;  %1127 = vmatmul.bf16.vlgmr.msrb.gmra.mxu2 %v2408_v5  ;;  %v2086_v38 = vld [vmem:[%s2538_s0 + $0x5c] sm:$0xf]  ;;  %v2097_v3 = vld [vmem:[#allocation2 + $0x24] sm:$0xf]  ;;  %v1646_v10 = vld [vmem:[#allocation2 + $0x128] sm:$0xf0]  ;;  %v2444_v13 = vor.u32 %v2091_v52, %v1488_v49  ;;  %v2029_v15 = vor.u32 %v2226_v62, %v2028_v61 }
  0x4a   :  { %1195 = vmatpush.bf16.msra.mxu2 %v1625_v34  ;;  %1146 = vmatmul.bf16.vlgmr.msrb.gmra.mxu3 %v2410_v6  ;;  %v2228_v34 = vld [vmem:[#allocation2 + $0x434] sm:$0xf0]  ;;  %v2442_v9 = vor.u32 %v2086_v38, %v1482_v39  ;;  %v1521_v16 = vor.u32 %v2097_v3, %v1518_v4  ;;  %v2020_v17 = vld [vmem:[#allocation2 + $0x410] sm:$0xf]  ;;  %v2095_v21 = vld [vmem:[#allocation2 + $0x14] sm:$0xf] }
  0x4b   :  { %1214 = vmatpush.bf16.msra.mxu3 %v1689_v59  ;;  %v2037_v59 = vor.u32 %v2228_v34, %v2036_v33  ;;  %v2224_v18 = vld [vmem:[#allocation2 + $0x414] sm:$0xf0]  ;;  %v1510_v22 = vld [vmem:[#allocation2 + $0x18] sm:$0xf0]  ;;  %v2109_v25 = vld [vmem:[#allocation2 + $0x84] sm:$0xf] }
  0x4c   :  { %1158 = vmatpush.bf16.msra.mxu0 %v2061_v7  ;;  %v2129_v7 = vld [vmem:[#allocation2 + $0x124] sm:$0xf]  ;;  %v1566_v26 = vld [vmem:[#allocation2 + $0x88] sm:$0xf0]  ;;  %v2187_v27 = vld [vmem:[#allocation2 + $0x2f4] sm:$0xf]  ;;  %v2021_v29 = vor.u32 %v2224_v18, %v2020_v17  ;;  %v1513_v30 = vor.u32 %v2095_v21, %v1510_v22 }
  0x4d   :  { %1177 = vmatpush.bf16.msra.mxu1 %v1553_v8  ;;  %v2440_v8 = vor.u32 %v2090_v37, %v1480_v36  ;;  %v1878_v28 = vld [vmem:[#allocation2 + $0x2f8] sm:$0xf0]  ;;  %v2093_v33 = vld [vmem:[#allocation2 + $0x4] sm:$0xf]  ;;  %v1502_v36 = vld [vmem:[#allocation2 + $0x8] sm:$0xf0] }
  0x4e   :  { %1196 = vmatpush.bf16.msra.mxu2 %v1617_v60  ;;  %v1529_v60 = vor.u32 %v2099_v41, %v1526_v42  ;;  %v2125_v37 = vld [vmem:[#allocation2 + $0x104] sm:$0xf]  ;;  %v1630_v38 = vld [vmem:[#allocation2 + $0x108] sm:$0xf0]  ;;  %v1881_v39 = vor.u32 %v2187_v27, %v1878_v28  ;;  %v1750_v41 = vld [vmem:[#allocation2 + $0x1f8] sm:$0xf0]  ;;  %v1505_v49 = vor.u32 %v2093_v33, %v1502_v36 }
  0x4f   :  { %1215 = vmatpush.bf16.msra.mxu3 %v1681_v11  ;;  %v2111_v11 = vld [vmem:[#allocation2 + $0x94] sm:$0xf]  ;;  %v1814_v43 = vld [vmem:[#allocation2 + $0x278] sm:$0xf0]  ;;  %v2185_v52 = vld [vmem:[#allocation2 + $0x2e4] sm:$0xf]  ;;  %v1633_v58 = vor.u32 %v2125_v37, %v1630_v38 }
  0x50   :  { %1159 = vmatpush.bf16.msra.mxu0 %v2053_v19  ;;  %v1649_v19 = vor.u32 %v2129_v7, %v1646_v10  ;;  %v2171_v42 = vld [vmem:[#allocation2 + $0x274] sm:$0xf]  ;;  %v1942_v46 = vld [vmem:[#allocation2 + $0x378] sm:$0xf0]  ;;  %v1870_v55 = vld [vmem:[#allocation2 + $0x2e8] sm:$0xf0] }
  0x51   :  { %1178 = vmatpush.bf16.msra.mxu1 %v1545_v20  ;;  %v2203_v45 = vld [vmem:[#allocation2 + $0x374] sm:$0xf]  ;;  %v2153_v62 = vld [vmem:[#allocation2 + $0x1e4] sm:$0xf]  ;;  %v1873_v4 = vor.u32 %v2185_v52, %v1870_v55  ;;  %v1806_v10 = vld [vmem:[#allocation2 + $0x268] sm:$0xf0] }
  0x52   :  { %1197 = vmatpush.bf16.msra.mxu2 %v1609_v12  ;;  %v1574_v12 = vld [vmem:[#allocation2 + $0x98] sm:$0xf0]  ;;  %v1945_v61 = vor.u32 %v2203_v45, %v1942_v46  ;;  %v2083_v3 = vld [vmem:[%s2538_s0 + $0x40] sm:$0xf0]  ;;  %v2199_v27 = vld [vmem:[#allocation2 + $0x354] sm:$0xf] }
  0x53   :  { %1216 = vmatpush.bf16.msra.mxu3 %v1673_v23  ;;  %v1577_v20 = vor.u32 %v2111_v11, %v1574_v12  ;;  %v2127_v23 = vld [vmem:[#allocation2 + $0x114] sm:$0xf]  ;;  %v2169_v7 = vld [vmem:[#allocation2 + $0x264] sm:$0xf]  ;;  %v1862_v18 = vld [vmem:[#allocation2 + $0x2d8] sm:$0xf0] }
  0x54   :  { %1160 = vmatpush.bf16.msra.mxu0 %v2045_v31  ;;  %v2012_v31 = vld [vmem:[#allocation2 + $0x400] sm:$0xf]  ;;  %v2201_v12 = vld [vmem:[#allocation2 + $0x364] sm:$0xf]  ;;  %v1809_v21 = vor.u32 %v2169_v7, %v1806_v10  ;;  %v1926_v28 = vld [vmem:[#allocation2 + $0x358] sm:$0xf0] }
  0x55   :  { %1179 = vmatpush.bf16.msra.mxu1 %v1537_v32  ;;  %v2222_v32 = vld [vmem:[#allocation2 + $0x404] sm:$0xf0]  ;;  %v1790_v36 = vld [vmem:[#allocation2 + $0x248] sm:$0xf0]  ;;  %v2163_v45 = vld [vmem:[#allocation2 + $0x234] sm:$0xf] }
  0x56   :  { %1198 = vmatpush.bf16.msra.mxu2 %v1601_v24  ;;  %v1638_v24 = vld [vmem:[#allocation2 + $0x118] sm:$0xf0]  ;;  %v2013_v47 = vor.u32 %v2222_v32, %v2012_v31  ;;  %v2149_v31 = vld [vmem:[#allocation2 + $0x1c4] sm:$0xf]  ;;  %v1726_v32 = vld [vmem:[#allocation2 + $0x1c8] sm:$0xf0] }
  0x57   :  { %1217 = vmatpush.bf16.msra.mxu3 %v1665_v35  ;;  %1094 = vmatmul.bf16.gmra.mxu0 %v2440_v8  ;;  %v1641_v34 = vor.u32 %v2127_v23, %v1638_v24  ;;  %v1569_v35 = vor.u32 %v2109_v25, %v1566_v26  ;;  %v2167_v23 = vld [vmem:[#allocation2 + $0x254] sm:$0xf]  ;;  %v1798_v24 = vld [vmem:[#allocation2 + $0x258] sm:$0xf0]  ;;  %v1729_v38 = vor.u32 %v2149_v31, %v1726_v32  ;;  %v1774_v7 = vld [vmem:[#allocation2 + $0x228] sm:$0xf0] }
  0x58   :  { %1161 = vmatpush.bf16.msra.mxu0 %v2037_v59  ;;  %1113 = vmatmul.bf16.gmra.mxu1 %v2442_v9  ;;  %v1801_v33 = vor.u32 %v2167_v23, %v1798_v24  ;;  %v1782_v46 = vld [vmem:[#allocation2 + $0x238] sm:$0xf0]  ;;  %v2195_v52 = vld [vmem:[#allocation2 + $0x334] sm:$0xf]  ;;  %v1822_v31 = vld [vmem:[#allocation2 + $0x288] sm:$0xf0] }
  0x59   :  { %1180 = vmatpush.bf16.msra.mxu1 %v1529_v60  ;;  %1132 = vmatmul.bf16.gmra.mxu2 %v2444_v13  ;;  %v1817_v60 = vor.u32 %v2171_v42, %v1814_v43  ;;  %v2147_v42 = vld [vmem:[#allocation2 + $0x1b4] sm:$0xf]  ;;  %v1718_v43 = vld [vmem:[#allocation2 + $0x1b8] sm:$0xf0]  ;;  %v2141_v32 = vld [vmem:[#allocation2 + $0x184] sm:$0xf] }
  0x5a   :  { %1199 = vmatpush.bf16.msra.mxu2 %v1593_v40  ;;  %1151 = vmatmul.bf16.gmra.mxu3 %v2446_v14  ;;  %v2155_v40 = vld [vmem:[#allocation2 + $0x1f4] sm:$0xf]  ;;  %v1910_v55 = vld [vmem:[#allocation2 + $0x338] sm:$0xf0]  ;;  %vm1376_vm0 = vcmask 1040384  }
  0x5b   :  { %1218 = vmatpush.bf16.msra.mxu3 %v1657_v63  ;;  %v1753_v59 = vor.u32 %v2155_v40, %v1750_v41  ;;  %v1742_v63 = vld [vmem:[#allocation2 + $0x1e8] sm:$0xf0]  ;;  %v1846_v41 = vld [vmem:[#allocation2 + $0x2b8] sm:$0xf0]  ;;  %v2159_v24 = vld [vmem:[#allocation2 + $0x214] sm:$0xf] }
  0x5c   :  { %1162 = vmatpush.bf16.msra.mxu0 %v2029_v15  ;;  %v1745_v11 = vor.u32 %v2153_v62, %v1742_v63  ;;  %v1934_v15 = vld [vmem:[#allocation2 + $0x368] sm:$0xf0]  ;;  %v1496_v62 = vld [vmem:[%s2538_s0 + $0x68] sm:$0xf] }
  0x5d   :  { %1181 = vmatpush.bf16.msra.mxu1 %v1521_v16  ;;  %v2183_v16 = vld [vmem:[#allocation2 + $0x2d4] sm:$0xf]  ;;  %v1937_v22 = vor.u32 %v2201_v12, %v1934_v15  ;;  %v1918_v40 = vld [vmem:[#allocation2 + $0x348] sm:$0xf0]  ;;  %v2193_v12 = vld [vmem:[#allocation2 + $0x324] sm:$0xf] }
  0x5e   :  { %1200 = vmatpush.bf16.msra.mxu2 %v1585_v2  ;;  %v1460_v2 = vld [vmem:[%s2538_s0 + $0x20] sm:$0xf]  ;;  %v1865_v25 = vor.u32 %v2183_v16, %v1862_v18  ;;  %v2092_v63 = vld [vmem:[%s2538_s0 + $0x88] sm:$0xf0]  ;;  %v2175_v16 = vld [vmem:[#allocation2 + $0x294] sm:$0xf] }
  0x5f   :  { %1219 = vmatpush.bf16.msra.mxu3 %v1649_v19  ;;  %v2458_v17 = vor.u32 %v2083_v3, %v1460_v2  ;;  %v2151_v19 = vld [vmem:[#allocation2 + $0x1d4] sm:$0xf]  ;;  %v1785_v2 = vor.u32 %v2163_v45, %v1782_v46  ;;  %v1913_v3 = vor.u32 %v2195_v52, %v1910_v55  ;;  %v1902_v15 = vld [vmem:[#allocation2 + $0x328] sm:$0xf0]  ;;  %v2470_v18 = vor.u32 %v2092_v63, %v1496_v62 }
  0x60   :  { %1163 = vmatpush.bf16.msra.mxu0 %v2021_v29  ;;  %v2181_v29 = vld [vmem:[#allocation2 + $0x2c4] sm:$0xf]  ;;  %v1905_v23 = vor.u32 %v2193_v12, %v1902_v15  ;;  %v2062_v52 = vld [vmem:[#allocation2 + $0x468] sm:$0xf0]  ;;  %v2211_v12 = vld [vmem:[#allocation2 + $0x3b4] sm:$0xf] }
  0x61   :  { %1182 = vmatpush.bf16.msra.mxu1 %v1513_v30  ;;  %v1854_v30 = vld [vmem:[#allocation2 + $0x2c8] sm:$0xf0]  ;;  %v1974_v15 = vld [vmem:[#allocation2 + $0x3b8] sm:$0xf0] }
  0x62   :  { %1201 = vmatpush.bf16.msra.mxu2 %v1577_v20  ;;  %v1734_v20 = vld [vmem:[#allocation2 + $0x1d8] sm:$0xf0]  ;;  %v1857_v37 = vor.u32 %v2181_v29, %v1854_v30  ;;  %v2173_v30 = vld [vmem:[#allocation2 + $0x284] sm:$0xf] }
  0x63   :  { %1220 = vmatpush.bf16.msra.mxu3 %v1641_v34  ;;  %v1737_v26 = vor.u32 %v2151_v19, %v1734_v20  ;;  %v1929_v34 = vor.u32 %v2199_v27, %v1926_v28  ;;  %v1830_v19 = vld [vmem:[#allocation2 + $0x298] sm:$0xf0]  ;;  %v2143_v20 = vld [vmem:[#allocation2 + $0x194] sm:$0xf] }
  0x64   :  { %1164 = vmatpush.bf16.msra.mxu0 %v2013_v47  ;;  %v2191_v28 = vld [vmem:[#allocation2 + $0x314] sm:$0xf]  ;;  %v1894_v29 = vld [vmem:[#allocation2 + $0x318] sm:$0xf0] }
  0x65   :  { %1183 = vmatpush.bf16.msra.mxu1 %v1505_v49  ;;  %v1721_v49 = vor.u32 %v2147_v42, %v1718_v43  ;;  %v2235_v43 = vld [vmem:[#allocation2 + $0x474] sm:$0xf] }
  0x66   :  { %1202 = vmatpush.bf16.msra.mxu2 %v1569_v35  ;;  %v2165_v35 = vld [vmem:[#allocation2 + $0x244] sm:$0xf] }
  0x67   :  { %1221 = vmatpush.bf16.msra.mxu3 %v1633_v58  ;;  %1165 = vmatmul.bf16.vlgmr.msra.gmra.mxu0 %v2458_v17  ;;  %v2177_v58 = vld [vmem:[#allocation2 + $0x2a4] sm:$0xf] }
  0x68   :  { %1233 = vmatpush.bf16.msrb.mxu0 %v1753_v59  ;;  %1184 = vmatmul.bf16.vlgmr.msra.gmra.mxu1 %v2332_v48  ;;  %v2179_v48 = vld [vmem:[#allocation2 + $0x2b4] sm:$0xf]  ;;  %v1838_v59 = vld [vmem:[#allocation2 + $0x2a8] sm:$0xf0] }
  0x69   :  { %1252 = vmatpush.bf16.msrb.mxu1 %v1817_v60  ;;  %1203 = vmatmul.bf16.vlgmr.msra.gmra.mxu2 %v2334_v53  ;;  %v1793_v53 = vor.u32 %v2165_v35, %v1790_v36  ;;  %v1849_v47 = vor.u32 %v2179_v48, %v1846_v41  ;;  %v2145_v60 = vld [vmem:[#allocation2 + $0x1a4] sm:$0xf]  ;;  %v1841_v10 = vor.u32 %v2177_v58, %v1838_v59  ;;  %v2006_v35 = vld [vmem:[#allocation2 + $0x3f8] sm:$0xf0]  ;;  %v1758_v48 = vld [vmem:[#allocation2 + $0x208] sm:$0xf0] }
  0x6a   :  { %1271 = vmatpush.bf16.msrb.mxu2 %v1881_v39  ;;  %1222 = vmatmul.bf16.vlgmr.msra.gmra.mxu3 %v2336_v54  ;;  %v2197_v39 = vld [vmem:[#allocation2 + $0x344] sm:$0xf]  ;;  %v1886_v41 = vld [vmem:[#allocation2 + $0x308] sm:$0xf0]  ;;  %v2215_v58 = vld [vmem:[#allocation2 + $0x3d4] sm:$0xf] }
  0x6b   :  { %1290 = vmatpush.bf16.msrb.mxu3 %v1945_v61  ;;  %v1921_v54 = vor.u32 %v2197_v39, %v1918_v40  ;;  %v1710_v61 = vld [vmem:[#allocation2 + $0x1a8] sm:$0xf0]  ;;  %v1825_v39 = vor.u32 %v2173_v30, %v1822_v31  ;;  %v1990_v59 = vld [vmem:[#allocation2 + $0x3d8] sm:$0xf0]  ;;  %v2205_v30 = vld [vmem:[#allocation2 + $0x384] sm:$0xf] }
  0x6c   :  { %1234 = vmatpush.bf16.msrb.mxu0 %v1745_v11  ;;  %v1713_v11 = vor.u32 %v2145_v60, %v1710_v61  ;;  %v2231_v60 = vld [vmem:[#allocation2 + $0x454] sm:$0xf]  ;;  %v2054_v61 = vld [vmem:[#allocation2 + $0x458] sm:$0xf0]  ;;  %v1993_v62 = vor.u32 %v2215_v58, %v1990_v59  ;;  %v1950_v31 = vld [vmem:[#allocation2 + $0x388] sm:$0xf0] }
  0x6d   :  { %1253 = vmatpush.bf16.msrb.mxu1 %v1809_v21  ;;  %v1702_v21 = vld [vmem:[#allocation2 + $0x198] sm:$0xf0]  ;;  %v2057_v63 = vor.u32 %v2231_v60, %v2054_v61 }
  0x6e   :  { %1272 = vmatpush.bf16.msrb.mxu2 %v1873_v4  ;;  %v2161_v4 = vld [vmem:[#allocation2 + $0x224] sm:$0xf]  ;;  %v1705_v27 = vor.u32 %v2143_v20, %v1702_v21 }
  0x6f   :  { %1291 = vmatpush.bf16.msrb.mxu3 %v1937_v22  ;;  %v1777_v22 = vor.u32 %v2161_v4, %v1774_v7  ;;  %v2229_v4 = vld [vmem:[#allocation2 + $0x444] sm:$0xf]  ;;  %v2046_v7 = vld [vmem:[#allocation2 + $0x448] sm:$0xf0] }
  0x70   :  { %1235 = vmatpush.bf16.msrb.mxu0 %v1737_v26  ;;  %v1833_v26 = vor.u32 %v2175_v16, %v1830_v19  ;;  %v2227_v16 = vld [vmem:[#allocation2 + $0x434] sm:$0xf]  ;;  %v2038_v19 = vld [vmem:[#allocation2 + $0x438] sm:$0xf0]  ;;  %v2209_v20 = vld [vmem:[#allocation2 + $0x3a4] sm:$0xf] }
  0x71   :  { %1254 = vmatpush.bf16.msrb.mxu1 %v1801_v33  ;;  %v1694_v33 = vld [vmem:[#allocation2 + $0x188] sm:$0xf0]  ;;  %v2225_v21 = vld [vmem:[#allocation2 + $0x424] sm:$0xf] }
  0x72   :  { %1273 = vmatpush.bf16.msrb.mxu2 %v1865_v25  ;;  %v1766_v25 = vld [vmem:[#allocation2 + $0x218] sm:$0xf0]  ;;  %v1697_v40 = vor.u32 %v2141_v32, %v1694_v33  ;;  %v2221_v32 = vld [vmem:[#allocation2 + $0x404] sm:$0xf]  ;;  %v2014_v33 = vld [vmem:[#allocation2 + $0x408] sm:$0xf0] }
  0x73   :  { %1292 = vmatpush.bf16.msrb.mxu3 %v1929_v34  ;;  %v2219_v34 = vld [vmem:[#allocation2 + $0x3f4] sm:$0xf]  ;;  %v1769_v36 = vor.u32 %v2159_v24, %v1766_v25  ;;  %v1958_v25 = vld [vmem:[#allocation2 + $0x398] sm:$0xf0] }
  0x74   :  { %1236 = vmatpush.bf16.msrb.mxu0 %v1729_v38  ;;  %v2157_v38 = vld [vmem:[#allocation2 + $0x204] sm:$0xf]  ;;  %v2009_v42 = vor.u32 %v2219_v34, %v2006_v35  ;;  %v2207_v24 = vld [vmem:[#allocation2 + $0x394] sm:$0xf]  ;;  %v1953_v34 = vor.u32 %v2205_v30, %v1950_v31  ;;  %v2017_v35 = vor.u32 %v2221_v32, %v2014_v33 }
  0x75   :  { %1255 = vmatpush.bf16.msrb.mxu1 %v1793_v53  ;;  %v2070_v53 = vld [vmem:[#allocation2 + $0x478] sm:$0xf0] }
  0x76   :  { %1274 = vmatpush.bf16.msrb.mxu2 %v1857_v37  ;;  %v1897_v37 = vor.u32 %v2191_v28, %v1894_v29  ;;  %v2073_v46 = vor.u32 %v2235_v43, %v2070_v53  ;;  %v1961_v28 = vor.u32 %v2207_v24, %v1958_v25 }
  0x77   :  { %1293 = vmatpush.bf16.msrb.mxu3 %v1921_v54  ;;  %1170 = vmatmul.bf16.gmra.mxu0 %v2470_v18  ;;  %v1998_v54 = vld [vmem:[#allocation2 + $0x3e8] sm:$0xf0] }
  0x78   :  { %1237 = vmatpush.bf16.msrb.mxu0 %v1721_v49  ;;  %1189 = vmatmul.bf16.gmra.mxu1 %v2368_v44  ;;  %v2189_v44 = vld [vmem:[#allocation2 + $0x304] sm:$0xf] }
  0x79   :  { %1256 = vmatpush.bf16.msrb.mxu1 %v1785_v2  ;;  %1208 = vmatmul.bf16.gmra.mxu2 %v2370_v50  ;;  %v2217_v50 = vld [vmem:[#allocation2 + $0x3e4] sm:$0xf]  ;;  %v1889_v45 = vor.u32 %v2189_v44, %v1886_v41 }
  0x7a   :  { %1275 = vmatpush.bf16.msrb.mxu2 %v1849_v47  ;;  %1227 = vmatmul.bf16.gmra.mxu3 %v2372_v51  ;;  %v1761_v51 = vor.u32 %v2157_v38, %v1758_v48  ;;  %v2001_v47 = vor.u32 %v2217_v50, %v1998_v54  ;;  %v2233_v49 = vld [vmem:[#allocation2 + $0x464] sm:$0xf] }
  0x7b   :  { %1294 = vmatpush.bf16.msrb.mxu3 %v1913_v3  ;;  %v2065_v55 = vor.u32 %v2233_v49, %v2062_v52  ;;  %v2213_v2 = vld [vmem:[#allocation2 + $0x3c4] sm:$0xf]  ;;  %v1982_v3 = vld [vmem:[#allocation2 + $0x3c8] sm:$0xf0] }
  0x7c   :  { %1238 = vmatpush.bf16.msrb.mxu0 %v1713_v11  ;;  %v2049_v11 = vor.u32 %v2229_v4, %v2046_v7 }
  0x7d   :  { %1257 = vmatpush.bf16.msrb.mxu1 %v1777_v22 }
  0x7e   :  { %1276 = vmatpush.bf16.msrb.mxu2 %v1841_v10  ;;  %v1985_v10 = vor.u32 %v2213_v2, %v1982_v3 }
  0x7f   :  { %1295 = vmatpush.bf16.msrb.mxu3 %v1905_v23 }
  0x80   :  { %1239 = vmatpush.bf16.msrb.mxu0 %v1705_v27  ;;  %v2022_v27 = vld [vmem:[#allocation2 + $0x418] sm:$0xf0] }
  0x81   :  { %1258 = vmatpush.bf16.msrb.mxu1 %v1769_v36 }
  0x82   :  { %1277 = vmatpush.bf16.msrb.mxu2 %v1833_v26  ;;  %v2223_v26 = vld [vmem:[#allocation2 + $0x414] sm:$0xf] }
  0x83   :  { %1296 = vmatpush.bf16.msrb.mxu3 %v1897_v37  ;;  %v2025_v29 = vor.u32 %v2223_v26, %v2022_v27 }
  0x84   :  { %1240 = vmatpush.bf16.msrb.mxu0 %v1697_v40 }
  0x85   :  { %1259 = vmatpush.bf16.msrb.mxu1 %v1761_v51 }
  0x86   :  { %1278 = vmatpush.bf16.msrb.mxu2 %v1825_v39 }
  0x87   :  { %1297 = vmatpush.bf16.msrb.mxu3 %v1889_v45  ;;  %1241 = vmatmul.bf16.vlgmr.msrb.gmra.mxu0 %v2338_v57  ;;  %v1977_v57 = vor.u32 %v2211_v12, %v1974_v15 }
  0x88   :  { %1309 = vmatpush.bf16.msra.mxu0 %v2009_v42  ;;  %1260 = vmatmul.bf16.vlgmr.msrb.gmra.mxu1 %v2404_v0  ;;  %v2041_v0 = vor.u32 %v2227_v16, %v2038_v19 }
  0x89   :  { %1328 = vmatpush.bf16.msra.mxu1 %v2073_v46  ;;  %1279 = vmatmul.bf16.vlgmr.msrb.gmra.mxu2 %v2406_v1  ;;  %v1966_v1 = vld [vmem:[#allocation2 + $0x3a8] sm:$0xf0] }
  0x8a   :  { %2237 = vmatpush.bf16.msra.mxu2 %v2009_v42  ;;  %1298 = vmatmul.bf16.vlgmr.msrb.gmra.mxu3 %v2408_v5  ;;  %v2030_v5 = vld [vmem:[#allocation2 + $0x428] sm:$0xf0]  ;;  %v1969_v22 = vor.u32 %v2209_v20, %v1966_v1 }
  0x8b   :  { %2245 = vmatpush.bf16.msra.mxu3 %v2073_v46  ;;  %v2033_v23 = vor.u32 %v2225_v21, %v2030_v5 }
  0x8c   :  { %1310 = vmatpush.bf16.msra.mxu0 %v2001_v47 }
  0x8d   :  { %1329 = vmatpush.bf16.msra.mxu1 %v2065_v55 }
  0x8e   :  { %2238 = vmatpush.bf16.msra.mxu2 %v2001_v47 }
  0x8f   :  { %2246 = vmatpush.bf16.msra.mxu3 %v2065_v55 }
  0x90   :  { %1311 = vmatpush.bf16.msra.mxu0 %v1993_v62 }
  0x91   :  { %1330 = vmatpush.bf16.msra.mxu1 %v2057_v63 }
  0x92   :  { %2239 = vmatpush.bf16.msra.mxu2 %v1993_v62 }
  0x93   :  { %2247 = vmatpush.bf16.msra.mxu3 %v2057_v63 }
  0x94   :  { %1312 = vmatpush.bf16.msra.mxu0 %v1985_v10 }
  0x95   :  { %1331 = vmatpush.bf16.msra.mxu1 %v2049_v11 }
  0x96   :  { %2240 = vmatpush.bf16.msra.mxu2 %v1985_v10 }
  0x97   :  { %2248 = vmatpush.bf16.msra.mxu3 %v2049_v11  ;;  %1246 = vmatmul.bf16.gmra.mxu0 %v2374_v56 }
  0x98   :  { %1313 = vmatpush.bf16.msra.mxu0 %v1977_v57  ;;  %1265 = vmatmul.bf16.gmra.mxu1 %v2440_v8 }
  0x99   :  { %1332 = vmatpush.bf16.msra.mxu1 %v2041_v0  ;;  %1284 = vmatmul.bf16.gmra.mxu2 %v2442_v9 }
  0x9a   :  { %2241 = vmatpush.bf16.msra.mxu2 %v1977_v57  ;;  %1303 = vmatmul.bf16.gmra.mxu3 %v2444_v13 }
  0x9b   :  { %2249 = vmatpush.bf16.msra.mxu3 %v2041_v0 }
  0x9c   :  { %1314 = vmatpush.bf16.msra.mxu0 %v1969_v22 }
  0x9d   :  { %1333 = vmatpush.bf16.msra.mxu1 %v2033_v23 }
  0x9e   :  { %2242 = vmatpush.bf16.msra.mxu2 %v1969_v22 }
  0x9f   :  { %2250 = vmatpush.bf16.msra.mxu3 %v2033_v23 }
  0xa0   :  { %1315 = vmatpush.bf16.msra.mxu0 %v1961_v28 }
  0xa1   :  { %1334 = vmatpush.bf16.msra.mxu1 %v2025_v29 }
  0xa2   :  { %2243 = vmatpush.bf16.msra.mxu2 %v1961_v28 }
  0xa3   :  { %2251 = vmatpush.bf16.msra.mxu3 %v2025_v29 }
  0xa4   :  { %1316 = vmatpush.bf16.msra.mxu0 %v1953_v34  ;;  %v1014_v36 = vpop.f32.mrf.mxu0 }
  0xa5   :  { %1335 = vmatpush.bf16.msra.mxu1 %v2017_v35  ;;  %v1033_v56 = vpop.f32.mrf.mxu1 }
  0xa6   :  { %2244 = vmatpush.bf16.msra.mxu2 %v1953_v34  ;;  %v1034_v37 = vadd.f32 %v1033_v56, %v1014_v36 }
  0xa7   :  { %2252 = vmatpush.bf16.msra.mxu3 %v2017_v35  ;;  %1317 = vmatmul.bf16.vlgmr.msra.gmra.mxu0 %v2410_v6 }
  0xa8   :  { %1336 = vmatmul.bf16.vlgmr.msra.gmra.mxu1 %v2458_v17 }
  0xa9   :  { %1322 = vmatmul.bf16.vlgmr.msra.gmra.mxu2 %v2446_v14 }
  0xaa   :  { %1341 = vmatmul.bf16.vlgmr.msra.gmra.mxu3 %v2470_v18 }
  0xac   :  { %v1052_v8 = vpop.f32.mrf.mxu2  ;;  %v1016_v38 = vpop.f32.mrf.mxu0 }
  0xad   :  { %v1053_v9 = vadd.f32 %v1052_v8, %v1034_v37  ;;  %v1071_v13 = vpop.f32.mrf.mxu3  ;;  %v1035_v39 = vpop.f32.mrf.mxu1 }
  0xae   :  { %v1036_v48 = vadd.f32 %v1035_v39, %v1016_v38 }
  0xaf   :  { %v1072_v40 = vadd.f32 %v1071_v13, %v1053_v9 }
  0xb4   :  { %v1054_v44 = vpop.f32.mrf.mxu2  ;;  %v1019_v43 = vpop.f32.mrf.mxu0 }
  0xb5   :  { %v1055_v41 = vadd.f32 %v1054_v44, %v1036_v48  ;;  %v1073_v42 = vpop.f32.mrf.mxu3  ;;  %v1038_v53 = vpop.f32.mrf.mxu1 }
  0xb6   :  { %v1039_v6 = vadd.f32 %v1038_v53, %v1019_v43 }
  0xb7   :  { %v1074_v50 = vadd.f32 %v1073_v42, %v1055_v41 }
  0xbc   :  { %v1057_v54 = vpop.f32.mrf.mxu2  ;;  %v1021_v14 = vpop.f32.mrf.mxu0 }
  0xbd   :  { %v1058_v17 = vadd.f32 %v1057_v54, %v1039_v6  ;;  %v1076_v51 = vpop.f32.mrf.mxu3  ;;  %v1040_v45 = vpop.f32.mrf.mxu1 }
  0xbe   :  { %v1041_v46 = vadd.f32 %v1040_v45, %v1021_v14 }
  0xbf   :  { %v1077_v18 = vadd.f32 %v1076_v51, %v1058_v17 }
  0xc4   :  { %v1059_v47 = vpop.f32.mrf.mxu2  ;;  %v1090_v55 = vpop.f32.mrf.mxu0 }
  0xc5   :  { %v1060_v49 = vadd.f32 %v1059_v47, %v1041_v46  ;;  %v1078_v52 = vpop.f32.mrf.mxu3  ;;  %v1109_v58 = vpop.f32.mrf.mxu1  ;;  %v1091_v60 = vadd.f32 %v1090_v55, %v1072_v40 }
  0xc7   :  { %v1079_v59 = vadd.f32 %v1078_v52, %v1060_v49  ;;  %v1110_v61 = vadd.f32 %v1109_v58, %v1091_v60 }
  0xcc   :  { %v1128_v62 = vpop.f32.mrf.mxu2  ;;  %v1092_v3 = vpop.f32.mrf.mxu0 }
  0xcd   :  { %v1147_v63 = vpop.f32.mrf.mxu3  ;;  %v1129_v2 = vadd.f32 %v1128_v62, %v1110_v61  ;;  %v1111_v4 = vpop.f32.mrf.mxu1  ;;  %v1093_v7 = vadd.f32 %v1092_v3, %v1074_v50 }
  0xcf   :  { %v1148_v10 = vadd.f32 %v1147_v63, %v1129_v2  ;;  %v1112_v11 = vadd.f32 %v1111_v4, %v1093_v7 }
  0xd4   :  { %v1130_v12 = vpop.f32.mrf.mxu2  ;;  %v1095_v19 = vpop.f32.mrf.mxu0 }
  0xd5   :  { %v1149_v15 = vpop.f32.mrf.mxu3  ;;  %v1131_v16 = vadd.f32 %v1130_v12, %v1112_v11  ;;  %v1114_v57 = vpop.f32.mrf.mxu1  ;;  %v1096_v0 = vadd.f32 %v1095_v19, %v1077_v18 }
  0xd7   :  { %v1150_v20 = vadd.f32 %v1149_v15, %v1131_v16  ;;  %v1115_v1 = vadd.f32 %v1114_v57, %v1096_v0 }
  0xdc   :  { %v1133_v21 = vpop.f32.mrf.mxu2  ;;  %v1097_v23 = vpop.f32.mrf.mxu0 }
  0xdd   :  { %v1152_v5 = vpop.f32.mrf.mxu3  ;;  %v1134_v22 = vadd.f32 %v1133_v21, %v1115_v1  ;;  %v1116_v24 = vpop.f32.mrf.mxu1  ;;  %v1098_v25 = vadd.f32 %v1097_v23, %v1079_v59 }
  0xdf   :  { %v1153_v26 = vadd.f32 %v1152_v5, %v1134_v22  ;;  %v1117_v27 = vadd.f32 %v1116_v24, %v1098_v25 }
  0xe4   :  { %v1135_v28 = vpop.f32.mrf.mxu2  ;;  %v1166_v31 = vpop.f32.mrf.mxu0 }
  0xe5   :  { %v1154_v29 = vpop.f32.mrf.mxu3  ;;  %v1136_v30 = vadd.f32 %v1135_v28, %v1117_v27  ;;  %v1185_v32 = vpop.f32.mrf.mxu1  ;;  %v2488_v33 = vadd.f32 %v1166_v31, %v1148_v10 }
  0xe7   :  { %v1155_v34 = vadd.f32 %v1154_v29, %v1136_v30  ;;  %v1384_v9 = vmul.f32 %v2488_v33, %v2488_v33 }
  0xec   :  { %v1204_v35 = vpop.f32.mrf.mxu2  ;;  %v1168_v56 = vpop.f32.mrf.mxu0 }
  0xed   :  { %v1223_v36 = vpop.f32.mrf.mxu3  ;;  %v1187_v37 = vpop.f32.mrf.mxu1  ;;  %v2490_v8 = vadd.f32 %v1168_v56, %v1150_v20  ;;  %v1205_v62 = vadd.f32 %v1204_v35, %v1185_v32 }
  0xef   :  { %v1355_v13 = vadd.f32 %v2490_v8, %v2488_v33  ;;  %v1386_v38 = vmul.f32 %v2490_v8, %v2490_v8  ;;  %v1224_v7 = vadd.f32 %v1223_v36, %v1205_v62 }
  0xf1   :  { %v1392_v39 = vadd.f32 %v1386_v38, %v1384_v9 }
  0xf4   :  { %v1206_v40 = vpop.f32.mrf.mxu2  ;;  %v1171_v44 = vpop.f32.mrf.mxu0 }
  0xf5   :  { %v1225_v48 = vpop.f32.mrf.mxu3  ;;  %v1190_v41 = vpop.f32.mrf.mxu1  ;;  %v2498_v42 = vadd.f32 %v1171_v44, %v1153_v26  ;;  %v1207_v12 = vadd.f32 %v1206_v40, %v1187_v37 }
  0xf7   :  { %v1356_v43 = vadd.f32 %v1355_v13, %v2498_v42  ;;  %v1388_v53 = vmul.f32 %v2498_v42, %v2498_v42  ;;  %v1226_v1 = vadd.f32 %v1225_v48, %v1207_v12 }
  0xf9   :  { %v1393_v50 = vadd.f32 %v1392_v39, %v1388_v53 }
  0xfc   :  { %v1209_v6 = vpop.f32.mrf.mxu2  ;;  %v1173_v17 = vpop.f32.mrf.mxu0 }
  0xfd   :  { %v1228_v54 = vpop.f32.mrf.mxu3  ;;  %v1192_v51 = vpop.f32.mrf.mxu1  ;;  %v2503_v14 = vadd.f32 %v1173_v17, %v1155_v34  ;;  %v1210_v11 = vadd.f32 %v1209_v6, %v1190_v41 }
  0xff   :  { %v2506_v45 = vadd.f32 %v1356_v43, %v2503_v14  ;;  %v1390_v18 = vmul.f32 %v2503_v14, %v2503_v14  ;;  %v1229_v20 = vadd.f32 %v1228_v54, %v1210_v11 }
 0x101   :  { %v2510_v46 = vadd.f32 %v1393_v50, %v1390_v18 }
 0x104   :  { %v1211_v47 = vpop.f32.mrf.mxu2  ;;  %v1242_v52 = vpop.f32.mrf.mxu0 }
 0x105   :  { %v1230_v49 = vpop.f32.mrf.mxu3  ;;  %v1261_v55 = vpop.f32.mrf.mxu1  ;;  %v1243_v10 = vadd.f32 %v1242_v52, %v1224_v7  ;;  %v1212_v23 = vadd.f32 %v1211_v47, %v1192_v51  ;;  %v1358_v51 = vrot.slane %v2506_v45, 4  ;;  %v1395_v52 = vrot.slane %v2510_v46, 4 }
 0x107   :  { %v1262_v0 = vadd.f32 %v1261_v55, %v1243_v10  ;;  %v1231_v32 = vadd.f32 %v1230_v49, %v1212_v23 }
 0x10c   :  { %v1280_v58 = vpop.f32.mrf.mxu2  ;;  %v1244_v60 = vpop.f32.mrf.mxu0 }
 0x10d   :  { %v1299_v59 = vpop.f32.mrf.mxu3  ;;  %v1263_v61 = vpop.f32.mrf.mxu1  ;;  %v1281_v21 = vadd.f32 %v1280_v58, %v1262_v0  ;;  %v1245_v22 = vadd.f32 %v1244_v60, %v1226_v1 }
 0x10f   :  { %v1300_v24 = vadd.f32 %v1299_v59, %v1281_v21  ;;  %v1264_v30 = vadd.f32 %v1263_v61, %v1245_v22  ;;  %v1359_v59 = vadd.f32 %v1358_v51, %v2506_v45 }
 0x111   :  { %v1360_v10 = vrot.slane %v1359_v59, 2 }
 0x114   :  { %v1282_v63 = vpop.f32.mrf.mxu2  ;;  %v1247_v3 = vpop.f32.mrf.mxu0 }
 0x115   :  { %v1301_v2 = vpop.f32.mrf.mxu3  ;;  %v1266_v4 = vpop.f32.mrf.mxu1  ;;  %v1248_v5 = vadd.f32 %v1247_v3, %v1229_v20  ;;  %v1283_v35 = vadd.f32 %v1282_v63, %v1264_v30  ;;  %v1396_v63 = vadd.f32 %v1395_v52, %v2510_v46 }
 0x117   :  { %v1267_v27 = vadd.f32 %v1266_v4, %v1248_v5  ;;  %v1302_v13 = vadd.f32 %v1301_v2, %v1283_v35  ;;  %v1379_v5 = vlaneseq }
 0x119   :  { %vm1381_vm1 = vcmp.lt.s32.totalorder %v1379_v5, 256 }
 0x11c   :  { %v1285_v15 = vpop.f32.mrf.mxu2  ;;  %v1249_v19 = vpop.f32.mrf.mxu0 }
 0x11d   :  { %v1304_v16 = vpop.f32.mrf.mxu3  ;;  %v1268_v57 = vpop.f32.mrf.mxu1  ;;  %v1286_v34 = vadd.f32 %v1285_v15, %v1267_v27  ;;  %v1250_v56 = vadd.f32 %v1249_v19, %v1231_v32  ;;  %v1397_v15 = vrot.slane %v1396_v63, 2  ;;  %v1361_v19 = vadd.f32 %v1360_v10, %v1359_v59 }
 0x11f   :  { %v1305_v9 = vadd.f32 %v1304_v16, %v1286_v34  ;;  %v1269_v40 = vadd.f32 %v1268_v57, %v1250_v56  ;;  %v1398_v20 = vadd.f32 %v1397_v15, %v1396_v63 }
 0x121   :  { %v1399_v23 = vrot.slane %v1398_v20, 1 }
 0x124   :  { %v1287_v25 = vpop.f32.mrf.mxu2  ;;  %v1318_v28 = vpop.f32.mrf.mxu0 }
 0x125   :  { %v1306_v26 = vpop.f32.mrf.mxu3  ;;  %v1337_v29 = vpop.f32.mrf.mxu1  ;;  %v1319_v31 = vadd.f32 %v1318_v28, %v1300_v24  ;;  %v1288_v43 = vadd.f32 %v1287_v25, %v1269_v40 }
 0x127   :  { %v1338_v36 = vadd.f32 %v1337_v29, %v1319_v31  ;;  %v1307_v18 = vadd.f32 %v1306_v26, %v1288_v43  ;;  %v1400_v29 = vadd.f32 %v1399_v23, %v1398_v20 }
 0x129   :  { %v1347_v37 = vpack.c.bf16 %v1338_v36, %v2488_v33  ;;  %v1385_v47 = vmul.f32 %v1338_v36, %v1338_v36 }
 0x12b   :  { %1351 = vst [vmem:[%s2540_s2] sm:$0xff] %v1347_v37 }
 0x12c   :  { %v1323_v38 = vpop.f32.mrf.mxu2  ;;  %v1320_v44 = vpop.f32.mrf.mxu0 }
 0x12d   :  { %v1342_v39 = vpop.f32.mrf.mxu3  ;;  %v1324_v48 = vadd.f32 %v1323_v38, %v1305_v9  ;;  %v1321_v41 = vadd.f32 %v1320_v44, %v1302_v13  ;;  %v1339_v50 = vpop.f32.mrf.mxu1 }
 0x12f   :  { %v1343_v53 = vadd.f32 %v1342_v39, %v1324_v48  ;;  %v1340_v6 = vadd.f32 %v1339_v50, %v1321_v41 }
 0x131   :  { %v1349_v54 = vpack.c.bf16 %v1343_v53, %v2498_v42  ;;  %v1348_v33 = vpack.c.bf16 %v1340_v6, %v2490_v8  ;;  %v1387_v17 = vmul.f32 %v1340_v6, %v1340_v6  ;;  %v1364_v49 = vadd.f32 %v1340_v6, %v1338_v36 }
 0x132   :  { %v1389_v60 = vmul.f32 %v1343_v53, %v1343_v53 }
 0x133   :  { %1353 = vst [vmem:[%s2540_s2 + $0x10] sm:$0xff] %v1349_v54  ;;  %v1401_v42 = vadd.f32 %v1387_v17, %v1385_v47  ;;  %v1365_v62 = vadd.f32 %v1364_v49, %v1343_v53 }
 0x134   :  { %1352 = vst [vmem:[%s2540_s2 + $0x8] sm:$0xff] %v1348_v33  ;;  %v1325_v55 = vpop.f32.mrf.mxu2 }
 0x135   :  { %v1326_v58 = vadd.f32 %v1325_v55, %v1307_v18  ;;  %v1344_v8 = vpop.f32.mrf.mxu3  ;;  %v1402_v7 = vadd.f32 %v1401_v42, %v1389_v60 }
 0x137   :  { %v1345_v61 = vadd.f32 %v1344_v8, %v1326_v58 }
 0x139   :  { %v1350_v2 = vpack.c.bf16 %v1345_v61, %v2503_v14  ;;  %v1366_v3 = vadd.f32 %v1365_v62, %v1345_v61  ;;  %v1391_v4 = vmul.f32 %v1345_v61, %v1345_v61  ;;  %v1362_v14 = vrot.slane %v1361_v19, 1 }
 0x13b   :  { %1354 = vst [vmem:[%s2540_s2 + $0x18] sm:$0xff] %v1350_v2  ;;  %v1367_v11 = vrot.slane %v1366_v3, 4  ;;  %v1403_v12 = vadd.f32 %v1402_v7, %v1391_v4  ;;  %v1363_v26 = vadd.f32 %v1362_v14, %v1361_v19 }
 0x13d   :  { %v1368_v16 = vadd.f32 %v1367_v11, %v1366_v3  ;;  %v1404_v45 = vrot.slane %v1403_v12, 4 }
 0x13f   :  { %v1369_v57 = vrot.slane %v1368_v16, 2  ;;  %v1405_v0 = vadd.f32 %v1404_v45, %v1403_v12 }
 0x141   :  { %v1370_v46 = vadd.f32 %v1369_v57, %v1368_v16  ;;  %v1406_v1 = vrot.slane %v1405_v0, 2 }
 0x143   :  { %v1371_v21 = vrot.slane %v1370_v46, 1  ;;  %v1407_v22 = vadd.f32 %v1406_v1, %v1405_v0 }
 0x145   :  { %v1372_v24 = vadd.f32 %v1371_v21, %v1370_v46  ;;  %v1408_v25 = vrot.slane %v1407_v22, 1 }
 0x147   :  { %v1375_v27 = vrot.slane %v1372_v24, 7  ;;  %v1409_v28 = vadd.f32 %v1408_v25, %v1407_v22 }
 0x149   :  { %v1377_v30 = vsel %vm1376_vm0, %v1363_v26, %v1375_v27  ;;  %v1412_v31 = vrot.slane %v1409_v28, 7 }
 0x14a   :  { %1383 = vst.msk [vmem:[%s2541_s3] ss:$2 sm:$0x3] %vm1381_vm1, %v1377_v30 }
 0x14b   :  { %v1413_v32 = vsel %vm1376_vm0, %v1400_v29, %v1412_v31 }
 0x14c   :  { %2074 = vst.msk [vmem:[%s2541_s3 + $0x1] ss:$2 sm:$0x3] %vm1381_vm1, %v1413_v32 }
 0x14d   :  { %1425 = vsyncpa [#allocation3], 1 }

// kernel: generator_forward.7
= control target key start
LH: loop header
LB: loop body
LE: loop exit
PB: predicated region body
PF: predicated region fallthrough
CT: control target
= control target key end

     0   :  { %9 = vsyncpa [#allocation3], 0  ;;  %s1425_s15 = smov [#allocation2]   ;;  %s1426_s17 = smov 64   ;;  %s1765_s0 = inlined_call_operand.vmem [shape: bf16[128,576], index: 0, kind: input, shape index: {}]   ;;  %s1766_s1 = inlined_call_operand.hbm [shape: bf16[576,128], index: 1, kind: input, shape index: {}]   ;;  %s1767_s2 = inlined_call_operand.vmem [shape: bf16[128,128], index: 2, kind: output, shape index: {0}]   ;;  %s1768_s3 = inlined_call_operand.vmem [shape: f32[1,2,128], index: 3, kind: output, shape index: {1}]  }
   0x1   :  { %s16_s14 = sshll.u32 %s1766_s1, 4  ;;  %s18_s16 = sshll.u32 %s1425_s15, 4  ;;  %s17_s14 = int_to_ptr.hbm [resolvable:$true] %s16_s14  ;;  %s19_s16 = int_to_ptr.vmem [resolvable:$true] %s18_s16 }
   0x2   :  { %s1427_s18 = smov 4  }
   0x3   :  { %24 = dma.hbm_to_vmem [thread:$0]  %s17_s14, 4608, %s19_s16, [#allocation3], %s1426_s17, %s1426_s17, %s1427_s18  }
   0x4   :  { %1423 = dma.done.wait [#allocation3], 4608  }
   0x5   :  { %1424 = vsyncadd [#allocation3], 4294962688  ;;  %v1296_v0 = vld [vmem:[#allocation2 + $0x38] sm:$0xff]  ;;  %v1295_v1 = vld [vmem:[#allocation2 + $0x30] sm:$0xff]  ;;  %vm566_vm0 = vcmask 523264  }
   0x6   :  { %1372 = vmatpush.bf16.msra.mxu1 %v1296_v0  ;;  %1373 = vmatpush.bf16.msra.mxu2 %v1296_v0  ;;  %v1294_v2 = vld [vmem:[#allocation2 + $0x28] sm:$0xff]  ;;  %v1293_v3 = vld [vmem:[#allocation2 + $0x20] sm:$0xff]  ;;  %v1292_v4 = vld [vmem:[#allocation2 + $0x18] sm:$0xff] }
   0x7   :  { %1374 = vmatpush.bf16.msra.mxu3 %v1296_v0  ;;  %591 = vmatpush.bf16.msra.mxu0 %v1296_v0  ;;  %v1291_v5 = vld [vmem:[#allocation2 + $0x10] sm:$0xff]  ;;  %v1290_v6 = vld [vmem:[#allocation2 + $0x8] sm:$0xff]  ;;  %v1289_v7 = vld [vmem:[#allocation2] sm:$0xff] }
   0x8   :  { %v979_v8 = vld [vmem:[%s1765_s0 + $0x50] sm:$0xf]  ;;  %v1261_v9 = vld [vmem:[%s1765_s0 + $0x60] sm:$0xf0]  ;;  %v1019_v10 = vld [vmem:[%s1765_s0 + $0xa0] sm:$0xf] }
   0x9   :  { %v1271_v11 = vld [vmem:[%s1765_s0 + $0xb0] sm:$0xf0]  ;;  %v1059_v12 = vld [vmem:[%s1765_s0 + $0xf0] sm:$0xf]  ;;  %v1281_v13 = vld [vmem:[%s1765_s0 + $0x100] sm:$0xf0]  ;;  %v980_v18 = vor.u32 %v1261_v9, %v979_v8 }
   0xa   :  { %1375 = vmatpush.bf16.msra.mxu1 %v1295_v1  ;;  %1376 = vmatpush.bf16.msra.mxu2 %v1295_v1  ;;  %v939_v14 = vld [vmem:[%s1765_s0] sm:$0xf]  ;;  %v1251_v15 = vld [vmem:[%s1765_s0 + $0x10] sm:$0xf0]  ;;  %v1312_v16 = vld [vmem:[#allocation2 + $0xb8] sm:$0xff]  ;;  %v1020_v19 = vor.u32 %v1271_v11, %v1019_v10  ;;  %v1060_v20 = vor.u32 %v1281_v13, %v1059_v12 }
   0xb   :  { %1377 = vmatpush.bf16.msra.mxu3 %v1295_v1  ;;  %592 = vmatpush.bf16.msra.mxu0 %v1295_v1  ;;  %v1304_v17 = vld [vmem:[#allocation2 + $0x78] sm:$0xff]  ;;  %v940_v21 = vor.u32 %v1251_v15, %v939_v14  ;;  %v1311_v24 = vld [vmem:[#allocation2 + $0xb0] sm:$0xff]  ;;  %v1310_v28 = vld [vmem:[#allocation2 + $0xa8] sm:$0xff] }
   0xc   :  { %v1320_v22 = vld [vmem:[#allocation2 + $0xf8] sm:$0xff]  ;;  %v1303_v25 = vld [vmem:[#allocation2 + $0x70] sm:$0xff]  ;;  %v1302_v29 = vld [vmem:[#allocation2 + $0x68] sm:$0xff] }
   0xd   :  { %v1324_v23 = vld [vmem:[#allocation2 + $0x118] sm:$0xff]  ;;  %v1319_v26 = vld [vmem:[#allocation2 + $0xf0] sm:$0xff]  ;;  %v1318_v30 = vld [vmem:[#allocation2 + $0xe8] sm:$0xff] }
   0xe   :  { %1378 = vmatpush.bf16.msra.mxu1 %v1294_v2  ;;  %1379 = vmatpush.bf16.msra.mxu2 %v1294_v2  ;;  %v1323_v27 = vld [vmem:[#allocation2 + $0x110] sm:$0xff]  ;;  %v1322_v31 = vld [vmem:[#allocation2 + $0x108] sm:$0xff]  ;;  %v1309_v32 = vld [vmem:[#allocation2 + $0xa0] sm:$0xff] }
   0xf   :  { %1380 = vmatpush.bf16.msra.mxu3 %v1294_v2  ;;  %593 = vmatpush.bf16.msra.mxu0 %v1294_v2  ;;  %v1301_v33 = vld [vmem:[#allocation2 + $0x60] sm:$0xff]  ;;  %v999_v35 = vld [vmem:[%s1765_s0 + $0x78] sm:$0xf]  ;;  %v1266_v36 = vld [vmem:[%s1765_s0 + $0x88] sm:$0xf0] }
  0x10   :  { %v1317_v34 = vld [vmem:[#allocation2 + $0xe0] sm:$0xff]  ;;  %v1039_v37 = vld [vmem:[%s1765_s0 + $0xc8] sm:$0xf]  ;;  %v1276_v38 = vld [vmem:[%s1765_s0 + $0xd8] sm:$0xf0]  ;;  %v1000_v46 = vor.u32 %v1266_v36, %v999_v35 }
  0x11   :  { %v1079_v39 = vld [vmem:[%s1765_s0 + $0x118] sm:$0xf]  ;;  %v1286_v40 = vld [vmem:[%s1765_s0 + $0x128] sm:$0xf0]  ;;  %v959_v41 = vld [vmem:[%s1765_s0 + $0x28] sm:$0xf]  ;;  %v1040_v47 = vor.u32 %v1276_v38, %v1039_v37 }
  0x12   :  { %1381 = vmatpush.bf16.msra.mxu1 %v1293_v3  ;;  %1382 = vmatpush.bf16.msra.mxu2 %v1293_v3  ;;  %v1256_v42 = vld [vmem:[%s1765_s0 + $0x38] sm:$0xf0]  ;;  %v1321_v43 = vld [vmem:[#allocation2 + $0x100] sm:$0xff]  ;;  %v1080_v48 = vor.u32 %v1286_v40, %v1079_v39  ;;  %v1307_v51 = vld [vmem:[#allocation2 + $0x90] sm:$0xff] }
  0x13   :  { %1383 = vmatpush.bf16.msra.mxu3 %v1293_v3  ;;  %594 = vmatpush.bf16.msra.mxu0 %v1293_v3  ;;  %v1308_v44 = vld [vmem:[#allocation2 + $0x98] sm:$0xff]  ;;  %v960_v49 = vor.u32 %v1256_v42, %v959_v41  ;;  %v1299_v52 = vld [vmem:[#allocation2 + $0x50] sm:$0xff]  ;;  %v1306_v54 = vld [vmem:[#allocation2 + $0x88] sm:$0xff] }
  0x14   :  { %v1300_v45 = vld [vmem:[#allocation2 + $0x58] sm:$0xff]  ;;  %v1315_v53 = vld [vmem:[#allocation2 + $0xd0] sm:$0xff]  ;;  %v1298_v55 = vld [vmem:[#allocation2 + $0x48] sm:$0xff] }
  0x15   :  { %v1316_v50 = vld [vmem:[#allocation2 + $0xd8] sm:$0xff]  ;;  %v1314_v56 = vld [vmem:[#allocation2 + $0xc8] sm:$0xff]  ;;  %v1305_v57 = vld [vmem:[#allocation2 + $0x80] sm:$0xff] }
  0x16   :  { %1384 = vmatpush.bf16.msra.mxu1 %v1292_v4  ;;  %1385 = vmatpush.bf16.msra.mxu2 %v1292_v4  ;;  %v1297_v58 = vld [vmem:[#allocation2 + $0x40] sm:$0xff]  ;;  %v941_v61 = vld [vmem:[%s1765_s0 + $0x14] sm:$0xf0]  ;;  %v947_v62 = vld [vmem:[%s1765_s0 + $0x8] sm:$0xf] }
  0x17   :  { %1386 = vmatpush.bf16.msra.mxu3 %v1292_v4  ;;  %595 = vmatpush.bf16.msra.mxu0 %v1292_v4  ;;  %v1313_v59 = vld [vmem:[#allocation2 + $0xc0] sm:$0xff]  ;;  %v1252_v63 = vld [vmem:[%s1765_s0 + $0x18] sm:$0xf0]  ;;  %v1250_v0 = vld [vmem:[%s1765_s0 + $0xc] sm:$0xf] }
  0x18   :  { %v1249_v60 = vld [vmem:[%s1765_s0 + $0x4] sm:$0xf]  ;;  %v949_v1 = vld [vmem:[%s1765_s0 + $0x1c] sm:$0xf0]  ;;  %v955_v2 = vld [vmem:[%s1765_s0 + $0x10] sm:$0xf] }
  0x19   :  { %v1253_v3 = vld [vmem:[%s1765_s0 + $0x20] sm:$0xf0]  ;;  %v944_v4 = vor.u32 %v1249_v60, %v941_v61  ;;  %v1254_v8 = vld [vmem:[%s1765_s0 + $0x2c] sm:$0xf]  ;;  %v961_v9 = vld [vmem:[%s1765_s0 + $0x3c] sm:$0xf0] }
  0x1a   :  { %1387 = vmatpush.bf16.msra.mxu1 %v1291_v5  ;;  %1388 = vmatpush.bf16.msra.mxu2 %v1291_v5  ;;  %v967_v10 = vld [vmem:[%s1765_s0 + $0x30] sm:$0xf]  ;;  %v1257_v11 = vld [vmem:[%s1765_s0 + $0x40] sm:$0xf0]  ;;  %v1255_v12 = vld [vmem:[%s1765_s0 + $0x34] sm:$0xf] }
  0x1b   :  { %1389 = vmatpush.bf16.msra.mxu3 %v1291_v5  ;;  %596 = vmatpush.bf16.msra.mxu0 %v1291_v5  ;;  %v948_v5 = vor.u32 %v1252_v63, %v947_v62  ;;  %v969_v13 = vld [vmem:[%s1765_s0 + $0x44] sm:$0xf0]  ;;  %v975_v14 = vld [vmem:[%s1765_s0 + $0x38] sm:$0xf]  ;;  %v1258_v15 = vld [vmem:[%s1765_s0 + $0x48] sm:$0xf0] }
  0x1c   :  { %v1267_v35 = vld [vmem:[%s1765_s0 + $0x90] sm:$0xf0]  ;;  %v1265_v36 = vld [vmem:[%s1765_s0 + $0x84] sm:$0xf]  ;;  %v1009_v37 = vld [vmem:[%s1765_s0 + $0x94] sm:$0xf0] }
  0x1d   :  { %v1015_v38 = vld [vmem:[%s1765_s0 + $0x88] sm:$0xf]  ;;  %v1268_v39 = vld [vmem:[%s1765_s0 + $0x98] sm:$0xf0]  ;;  %v1012_v42 = vor.u32 %v1265_v36, %v1009_v37  ;;  %v1275_v60 = vld [vmem:[%s1765_s0 + $0xd4] sm:$0xf] }
  0x1e   :  { %1390 = vmatpush.bf16.msra.mxu1 %v1290_v6  ;;  %1391 = vmatpush.bf16.msra.mxu2 %v1290_v6  ;;  %v1049_v61 = vld [vmem:[%s1765_s0 + $0xe4] sm:$0xf0]  ;;  %v1055_v62 = vld [vmem:[%s1765_s0 + $0xd8] sm:$0xf]  ;;  %v1278_v63 = vld [vmem:[%s1765_s0 + $0xe8] sm:$0xf0] }
  0x1f   :  { %1392 = vmatpush.bf16.msra.mxu3 %v1290_v6  ;;  %597 = vmatpush.bf16.msra.mxu0 %v1290_v6  ;;  %v952_v6 = vor.u32 %v1250_v0, %v949_v1 }
  0x22   :  { %1393 = vmatpush.bf16.msra.mxu1 %v1289_v7  ;;  %1394 = vmatpush.bf16.msra.mxu2 %v1289_v7 }
  0x23   :  { %1395 = vmatpush.bf16.msra.mxu3 %v1289_v7  ;;  %598 = vmatpush.bf16.msra.mxu0 %v1289_v7  ;;  %v956_v7 = vor.u32 %v1253_v3, %v955_v2  ;;  %v1052_v2 = vor.u32 %v1275_v60, %v1049_v61  ;;  %v1056_v3 = vor.u32 %v1278_v63, %v1055_v62 }
  0x25   :  { %609 = vmatmul.bf16.vlgmr.msra.gmra.mxu1 %v980_v18  ;;  %619 = vmatmul.bf16.vlgmr.msra.gmra.mxu2 %v1020_v19  ;;  %v972_v18 = vor.u32 %v1255_v12, %v969_v13  ;;  %v976_v19 = vor.u32 %v1258_v15, %v975_v14 }
  0x26   :  { %689 = vmatpush.bf16.msrb.mxu2 %v1312_v16  ;;  %640 = vmatpush.bf16.msrb.mxu1 %v1304_v17  ;;  %v964_v16 = vor.u32 %v1254_v8, %v961_v9  ;;  %v968_v17 = vor.u32 %v1257_v11, %v967_v10  ;;  %v1280_v8 = vld [vmem:[%s1765_s0 + $0xfc] sm:$0xf]  ;;  %v1069_v9 = vld [vmem:[%s1765_s0 + $0x10c] sm:$0xf0]  ;;  %v1075_v10 = vld [vmem:[%s1765_s0 + $0x100] sm:$0xf] }
  0x27   :  { %629 = vmatmul.bf16.vlgmr.msra.gmra.mxu3 %v1060_v20  ;;  %599 = vmatmul.bf16.vlgmr.msra.gmra.mxu0 %v940_v21  ;;  %v1259_v20 = vld [vmem:[%s1765_s0 + $0x54] sm:$0xf]  ;;  %v981_v21 = vld [vmem:[%s1765_s0 + $0x64] sm:$0xf0]  ;;  %v1072_v15 = vor.u32 %v1280_v8, %v1069_v9 }
  0x28   :  { %738 = vmatpush.bf16.msrb.mxu3 %v1320_v22  ;;  %791 = vmatpush.bf16.msrb.mxu0 %v1324_v23  ;;  %v987_v22 = vld [vmem:[%s1765_s0 + $0x58] sm:$0xf]  ;;  %v1262_v23 = vld [vmem:[%s1765_s0 + $0x68] sm:$0xf0]  ;;  %v1283_v11 = vld [vmem:[%s1765_s0 + $0x110] sm:$0xf0] }
  0x2a   :  { %690 = vmatpush.bf16.msrb.mxu2 %v1311_v24  ;;  %641 = vmatpush.bf16.msrb.mxu1 %v1303_v25  ;;  %v1260_v24 = vld [vmem:[%s1765_s0 + $0x5c] sm:$0xf]  ;;  %v989_v25 = vld [vmem:[%s1765_s0 + $0x6c] sm:$0xf0] }
  0x2c   :  { %739 = vmatpush.bf16.msrb.mxu3 %v1319_v26  ;;  %792 = vmatpush.bf16.msrb.mxu0 %v1323_v27  ;;  %v995_v26 = vld [vmem:[%s1765_s0 + $0x60] sm:$0xf]  ;;  %v1263_v27 = vld [vmem:[%s1765_s0 + $0x70] sm:$0xf0] }
  0x2e   :  { %691 = vmatpush.bf16.msrb.mxu2 %v1310_v28  ;;  %642 = vmatpush.bf16.msrb.mxu1 %v1302_v29  ;;  %v984_v28 = vor.u32 %v1259_v20, %v981_v21  ;;  %v988_v29 = vor.u32 %v1262_v23, %v987_v22  ;;  %v1284_v22 = vld [vmem:[%s1765_s0 + $0x11c] sm:$0xf]  ;;  %v1081_v23 = vld [vmem:[%s1765_s0 + $0x12c] sm:$0xf0] }
  0x30   :  { %740 = vmatpush.bf16.msrb.mxu3 %v1318_v30  ;;  %793 = vmatpush.bf16.msrb.mxu0 %v1322_v31  ;;  %v992_v30 = vor.u32 %v1260_v24, %v989_v25  ;;  %v996_v31 = vor.u32 %v1263_v27, %v995_v26  ;;  %v1087_v24 = vld [vmem:[%s1765_s0 + $0x120] sm:$0xf]  ;;  %v1287_v25 = vld [vmem:[%s1765_s0 + $0x130] sm:$0xf0]  ;;  %v1285_v26 = vld [vmem:[%s1765_s0 + $0x124] sm:$0xf] }
  0x31   :  { %v1089_v27 = vld [vmem:[%s1765_s0 + $0x134] sm:$0xf0] }
  0x32   :  { %692 = vmatpush.bf16.msrb.mxu2 %v1309_v32  ;;  %643 = vmatpush.bf16.msrb.mxu1 %v1301_v33  ;;  %v1264_v32 = vld [vmem:[%s1765_s0 + $0x7c] sm:$0xf]  ;;  %v1001_v33 = vld [vmem:[%s1765_s0 + $0x8c] sm:$0xf0] }
  0x33   :  { %v1004_v40 = vor.u32 %v1264_v32, %v1001_v33  ;;  %v1084_v32 = vor.u32 %v1284_v22, %v1081_v23  ;;  %v1088_v33 = vor.u32 %v1287_v25, %v1087_v24 }
  0x34   :  { %741 = vmatpush.bf16.msrb.mxu3 %v1317_v34  ;;  %794 = vmatpush.bf16.msrb.mxu0 %v1321_v43  ;;  %v1007_v34 = vld [vmem:[%s1765_s0 + $0x80] sm:$0xf]  ;;  %v1016_v43 = vor.u32 %v1268_v39, %v1015_v38 }
  0x35   :  { %614 = vmatmul.bf16.gmra.mxu1 %v1000_v46  ;;  %624 = vmatmul.bf16.gmra.mxu2 %v1040_v47  ;;  %v1008_v41 = vor.u32 %v1267_v35, %v1007_v34  ;;  %v1027_v46 = vld [vmem:[%s1765_s0 + $0xa8] sm:$0xf]  ;;  %v1272_v47 = vld [vmem:[%s1765_s0 + $0xb8] sm:$0xf0]  ;;  %v1092_v35 = vor.u32 %v1285_v26, %v1089_v27 }
  0x36   :  { %693 = vmatpush.bf16.msrb.mxu2 %v1308_v44  ;;  %644 = vmatpush.bf16.msrb.mxu1 %v1300_v45  ;;  %v1269_v44 = vld [vmem:[%s1765_s0 + $0xa4] sm:$0xf]  ;;  %v1021_v45 = vld [vmem:[%s1765_s0 + $0xb4] sm:$0xf0] }
  0x37   :  { %634 = vmatmul.bf16.gmra.mxu3 %v1080_v48  ;;  %604 = vmatmul.bf16.gmra.mxu0 %v960_v49  ;;  %v1270_v48 = vld [vmem:[%s1765_s0 + $0xac] sm:$0xf]  ;;  %v1029_v49 = vld [vmem:[%s1765_s0 + $0xbc] sm:$0xf0] }
  0x38   :  { %742 = vmatpush.bf16.msrb.mxu3 %v1316_v50  ;;  %v1035_v50 = vld [vmem:[%s1765_s0 + $0xb0] sm:$0xf] }
  0x3a   :  { %694 = vmatpush.bf16.msrb.mxu2 %v1307_v51  ;;  %645 = vmatpush.bf16.msrb.mxu1 %v1299_v52  ;;  %v1273_v51 = vld [vmem:[%s1765_s0 + $0xc0] sm:$0xf0]  ;;  %v1024_v52 = vor.u32 %v1269_v44, %v1021_v45 }
  0x3c   :  { %743 = vmatpush.bf16.msrb.mxu3 %v1315_v53  ;;  %v1028_v53 = vor.u32 %v1272_v47, %v1027_v46 }
  0x3e   :  { %695 = vmatpush.bf16.msrb.mxu2 %v1306_v54  ;;  %646 = vmatpush.bf16.msrb.mxu1 %v1298_v55  ;;  %v1032_v54 = vor.u32 %v1270_v48, %v1029_v49  ;;  %v1036_v55 = vor.u32 %v1273_v51, %v1035_v50 }
  0x40   :  { %744 = vmatpush.bf16.msrb.mxu3 %v1314_v56  ;;  %v1274_v56 = vld [vmem:[%s1765_s0 + $0xcc] sm:$0xf] }
  0x42   :  { %696 = vmatpush.bf16.msrb.mxu2 %v1305_v57  ;;  %647 = vmatpush.bf16.msrb.mxu1 %v1297_v58  ;;  %v1041_v57 = vld [vmem:[%s1765_s0 + $0xdc] sm:$0xf0]  ;;  %v1047_v58 = vld [vmem:[%s1765_s0 + $0xd0] sm:$0xf] }
  0x43   :  { %v1044_v0 = vor.u32 %v1274_v56, %v1041_v57 }
  0x44   :  { %745 = vmatpush.bf16.msrb.mxu3 %v1313_v59  ;;  %v1277_v59 = vld [vmem:[%s1765_s0 + $0xe0] sm:$0xf0] }
  0x45   :  { %648 = vmatmul.bf16.vlgmr.msrb.gmra.mxu1 %v944_v4  ;;  %697 = vmatmul.bf16.vlgmr.msrb.gmra.mxu2 %v948_v5  ;;  %v1048_v1 = vor.u32 %v1277_v59, %v1047_v58  ;;  %v1279_v4 = vld [vmem:[%s1765_s0 + $0xf4] sm:$0xf]  ;;  %v1061_v5 = vld [vmem:[%s1765_s0 + $0x104] sm:$0xf0] }
  0x46   :  { %v1064_v12 = vor.u32 %v1279_v4, %v1061_v5 }
  0x47   :  { %746 = vmatmul.bf16.vlgmr.msrb.gmra.mxu3 %v952_v6  ;;  %1241 = vmatmul.msk.bf16.vlgmr.msrb.gmra.mxu0 %vm566_vm0, %v956_v7  ;;  %v1067_v6 = vld [vmem:[%s1765_s0 + $0xf8] sm:$0xf]  ;;  %v1282_v7 = vld [vmem:[%s1765_s0 + $0x108] sm:$0xf0] }
  0x48   :  { %v1068_v13 = vor.u32 %v1282_v7, %v1067_v6 }
  0x55   :  { %653 = vmatmul.bf16.gmra.mxu1 %v964_v16  ;;  %702 = vmatmul.bf16.gmra.mxu2 %v968_v17  ;;  %v1076_v16 = vor.u32 %v1283_v11, %v1075_v10 }
  0x57   :  { %751 = vmatmul.bf16.gmra.mxu3 %v972_v18  ;;  %1242 = vmatmul.msk.bf16.gmra.mxu0 %vm566_vm0, %v976_v19 }
  0x65   :  { %658 = vmatmul.bf16.gmra.mxu1 %v984_v28  ;;  %707 = vmatmul.bf16.gmra.mxu2 %v988_v29  ;;  %v1095_v28 = vld [vmem:[%s1765_s0 + $0x128] sm:$0xf]  ;;  %v1288_v29 = vld [vmem:[%s1765_s0 + $0x138] sm:$0xf0] }
  0x66   :  { %v1096_v36 = vor.u32 %v1288_v29, %v1095_v28 }
  0x67   :  { %756 = vmatmul.bf16.gmra.mxu3 %v992_v30  ;;  %1243 = vmatmul.msk.bf16.gmra.mxu0 %vm566_vm0, %v996_v31 }
  0x75   :  { %663 = vmatmul.bf16.gmra.mxu1 %v1004_v40  ;;  %712 = vmatmul.bf16.gmra.mxu2 %v1008_v41 }
  0x77   :  { %761 = vmatmul.bf16.gmra.mxu3 %v1012_v42  ;;  %1244 = vmatmul.msk.bf16.gmra.mxu0 %vm566_vm0, %v1016_v43 }
  0x85   :  { %668 = vmatmul.bf16.gmra.mxu1 %v1024_v52  ;;  %717 = vmatmul.bf16.gmra.mxu2 %v1028_v53 }
  0x87   :  { %766 = vmatmul.bf16.gmra.mxu3 %v1032_v54  ;;  %1245 = vmatmul.msk.bf16.gmra.mxu0 %vm566_vm0, %v1036_v55 }
  0x95   :  { %673 = vmatmul.bf16.gmra.mxu1 %v1044_v0  ;;  %722 = vmatmul.bf16.gmra.mxu2 %v1048_v1 }
  0x97   :  { %771 = vmatmul.bf16.gmra.mxu3 %v1052_v2  ;;  %1246 = vmatmul.msk.bf16.gmra.mxu0 %vm566_vm0, %v1056_v3 }
  0xa2   :  { %v1673_v14 = vpop.f32.mrf.mxu1 }
  0xa4   :  { %v600_v17 = vpop.f32.mrf.mxu0 }
  0xa5   :  { %678 = vmatmul.bf16.gmra.mxu1 %v1064_v12  ;;  %727 = vmatmul.bf16.gmra.mxu2 %v1068_v13 }
  0xa7   :  { %776 = vmatmul.bf16.gmra.mxu3 %v1072_v15  ;;  %1247 = vmatmul.msk.bf16.gmra.mxu0 %vm566_vm0, %v1076_v16 }
  0xa8   :  { %v1676_v18 = vpop.f32.mrf.mxu2 }
  0xaa   :  { %v1678_v19 = vpop.f32.mrf.mxu3  ;;  %v1680_v20 = vpop.f32.mrf.mxu1 }
  0xac   :  { %v602_v21 = vpop.f32.mrf.mxu0 }
  0xb0   :  { %v1706_v30 = vpop.f32.mrf.mxu2 }
  0xb2   :  { %v1708_v31 = vpop.f32.mrf.mxu3  ;;  %v1710_v34 = vpop.f32.mrf.mxu1 }
  0xb4   :  { %v605_v37 = vpop.f32.mrf.mxu0 }
  0xb5   :  { %683 = vmatmul.bf16.gmra.mxu1 %v1084_v32  ;;  %732 = vmatmul.bf16.gmra.mxu2 %v1088_v33 }
  0xb7   :  { %781 = vmatmul.bf16.gmra.mxu3 %v1092_v35  ;;  %1248 = vmatmul.msk.bf16.gmra.mxu0 %vm566_vm0, %v1096_v36 }
  0xb8   :  { %v1713_v38 = vpop.f32.mrf.mxu2 }
  0xba   :  { %v1715_v39 = vpop.f32.mrf.mxu3  ;;  %v1717_v40 = vpop.f32.mrf.mxu1 }
  0xbc   :  { %v607_v41 = vpop.f32.mrf.mxu0 }
  0xc0   :  { %v1719_v42 = vpop.f32.mrf.mxu2 }
  0xc2   :  { %v1721_v43 = vpop.f32.mrf.mxu3  ;;  %v649_v44 = vpop.f32.mrf.mxu1 }
  0xc3   :  { %v650_v46 = vadd.f32 %v649_v44, %v600_v17 }
  0xc4   :  { %v796_v45 = vpop.f32.mrf.mxu0 }
  0xc8   :  { %v698_v47 = vpop.f32.mrf.mxu2 }
  0xc9   :  { %v699_v49 = vadd.f32 %v698_v47, %v650_v46 }
  0xca   :  { %v747_v48 = vpop.f32.mrf.mxu3  ;;  %v651_v50 = vpop.f32.mrf.mxu1 }
  0xcb   :  { %v748_v52 = vadd.f32 %v747_v48, %v699_v49  ;;  %v652_v53 = vadd.f32 %v651_v50, %v602_v21 }
  0xcc   :  { %v798_v51 = vpop.f32.mrf.mxu0 }
  0xcd   :  { %v797_v57 = vadd.f32 %v796_v45, %v748_v52 }
  0xcf   :  { %v890_v62 = vmul.f32 %v797_v57, %v797_v57 }
  0xd0   :  { %v700_v54 = vpop.f32.mrf.mxu2 }
  0xd1   :  { %v701_v55 = vadd.f32 %v700_v54, %v652_v53 }
  0xd2   :  { %v749_v56 = vpop.f32.mrf.mxu3  ;;  %v654_v58 = vpop.f32.mrf.mxu1 }
  0xd3   :  { %v750_v59 = vadd.f32 %v749_v56, %v701_v55  ;;  %v655_v2 = vadd.f32 %v654_v58, %v605_v37 }
  0xd4   :  { %v801_v60 = vpop.f32.mrf.mxu0 }
  0xd5   :  { %v799_v61 = vadd.f32 %v798_v51, %v750_v59 }
  0xd7   :  { %v1328_v63 = vpack.c.bf16 %v799_v61, %v797_v57  ;;  %v868_v0 = vadd.f32 %v799_v61, %v797_v57  ;;  %v891_v1 = vmul.f32 %v799_v61, %v799_v61 }
  0xd8   :  { %v703_v3 = vpop.f32.mrf.mxu2 }
  0xd9   :  { %1329 = vst [vmem:[%s1767_s2] sm:$0xff] %v1328_v63   ;;  %v906_v4 = vadd.f32 %v891_v1, %v890_v62  ;;  %v704_v5 = vadd.f32 %v703_v3, %v655_v2 }
  0xda   :  { %v752_v6 = vpop.f32.mrf.mxu3  ;;  %v656_v7 = vpop.f32.mrf.mxu1 }
  0xdb   :  { %v753_v8 = vadd.f32 %v752_v6, %v704_v5  ;;  %v657_v13 = vadd.f32 %v656_v7, %v607_v41 }
  0xdc   :  { %v803_v9 = vpop.f32.mrf.mxu0 }
  0xdd   :  { %v802_v10 = vadd.f32 %v801_v60, %v753_v8 }
  0xdf   :  { %v869_v11 = vadd.f32 %v868_v0, %v802_v10  ;;  %v892_v12 = vmul.f32 %v802_v10, %v802_v10 }
  0xe0   :  { %v705_v15 = vpop.f32.mrf.mxu2 }
  0xe1   :  { %v907_v16 = vadd.f32 %v906_v4, %v892_v12  ;;  %v706_v17 = vadd.f32 %v705_v15, %v657_v13 }
  0xe2   :  { %v754_v21 = vpop.f32.mrf.mxu3  ;;  %v659_v22 = vpop.f32.mrf.mxu1 }
  0xe3   :  { %v755_v23 = vadd.f32 %v754_v21, %v706_v17  ;;  %v660_v29 = vadd.f32 %v659_v22, %v1673_v14 }
  0xe4   :  { %v806_v24 = vpop.f32.mrf.mxu0 }
  0xe5   :  { %v804_v25 = vadd.f32 %v803_v9, %v755_v23 }
  0xe7   :  { %v1333_v26 = vpack.c.bf16 %v804_v25, %v802_v10  ;;  %v870_v27 = vadd.f32 %v869_v11, %v804_v25  ;;  %v893_v28 = vmul.f32 %v804_v25, %v804_v25 }
  0xe8   :  { %v708_v32 = vpop.f32.mrf.mxu2 }
  0xe9   :  { %1365 = vst [vmem:[%s1767_s2 + $0x8] sm:$0xff] %v1333_v26   ;;  %v908_v33 = vadd.f32 %v907_v16, %v893_v28  ;;  %v709_v35 = vadd.f32 %v708_v32, %v660_v29 }
  0xea   :  { %v757_v36 = vpop.f32.mrf.mxu3  ;;  %v661_v37 = vpop.f32.mrf.mxu1 }
  0xeb   :  { %v758_v41 = vadd.f32 %v757_v36, %v709_v35  ;;  %v662_v48 = vadd.f32 %v661_v37, %v1680_v20 }
  0xec   :  { %v808_v44 = vpop.f32.mrf.mxu0 }
  0xed   :  { %v807_v45 = vadd.f32 %v806_v24, %v758_v41 }
  0xef   :  { %v871_v46 = vadd.f32 %v870_v27, %v807_v45  ;;  %v894_v47 = vmul.f32 %v807_v45, %v807_v45 }
  0xf0   :  { %v710_v49 = vpop.f32.mrf.mxu2 }
  0xf1   :  { %v909_v50 = vadd.f32 %v908_v33, %v894_v47  ;;  %v711_v51 = vadd.f32 %v710_v49, %v662_v48 }
  0xf2   :  { %v759_v14 = vpop.f32.mrf.mxu3  ;;  %v664_v52 = vpop.f32.mrf.mxu1 }
  0xf3   :  { %v760_v53 = vadd.f32 %v759_v14, %v711_v51  ;;  %v665_v59 = vadd.f32 %v664_v52, %v1710_v34 }
  0xf4   :  { %v811_v54 = vpop.f32.mrf.mxu0 }
  0xf5   :  { %v809_v55 = vadd.f32 %v808_v44, %v760_v53 }
  0xf7   :  { %v1338_v56 = vpack.c.bf16 %v809_v55, %v807_v45  ;;  %v872_v57 = vadd.f32 %v871_v46, %v809_v55  ;;  %v895_v58 = vmul.f32 %v809_v55, %v809_v55 }
  0xf8   :  { %v713_v60 = vpop.f32.mrf.mxu2 }
  0xf9   :  { %1366 = vst [vmem:[%s1767_s2 + $0x10] sm:$0xff] %v1338_v56   ;;  %v910_v61 = vadd.f32 %v909_v50, %v895_v58  ;;  %v714_v20 = vadd.f32 %v713_v60, %v665_v59 }
  0xfa   :  { %v762_v62 = vpop.f32.mrf.mxu3  ;;  %v666_v63 = vpop.f32.mrf.mxu1 }
  0xfb   :  { %v763_v0 = vadd.f32 %v762_v62, %v714_v20  ;;  %v667_v5 = vadd.f32 %v666_v63, %v1717_v40 }
  0xfc   :  { %v813_v1 = vpop.f32.mrf.mxu0 }
  0xfd   :  { %v812_v2 = vadd.f32 %v811_v54, %v763_v0 }
  0xff   :  { %v873_v3 = vadd.f32 %v872_v57, %v812_v2  ;;  %v896_v4 = vmul.f32 %v812_v2, %v812_v2 }
 0x100   :  { %v715_v6 = vpop.f32.mrf.mxu2 }
 0x101   :  { %v911_v7 = vadd.f32 %v910_v61, %v896_v4  ;;  %v716_v8 = vadd.f32 %v715_v6, %v667_v5 }
 0x102   :  { %v764_v34 = vpop.f32.mrf.mxu3  ;;  %v669_v9 = vpop.f32.mrf.mxu1 }
 0x103   :  { %v765_v10 = vadd.f32 %v764_v34, %v716_v8  ;;  %v670_v40 = vadd.f32 %v669_v9, %v1676_v18 }
 0x104   :  { %v816_v11 = vpop.f32.mrf.mxu0 }
 0x105   :  { %v814_v12 = vadd.f32 %v813_v1, %v765_v10 }
 0x107   :  { %v1343_v13 = vpack.c.bf16 %v814_v12, %v812_v2  ;;  %v874_v15 = vadd.f32 %v873_v3, %v814_v12  ;;  %v897_v16 = vmul.f32 %v814_v12, %v814_v12 }
 0x108   :  { %v718_v17 = vpop.f32.mrf.mxu2 }
 0x109   :  { %1367 = vst [vmem:[%s1767_s2 + $0x18] sm:$0xff] %v1343_v13   ;;  %v912_v21 = vadd.f32 %v911_v7, %v897_v16  ;;  %v719_v25 = vadd.f32 %v718_v17, %v670_v40 }
 0x10a   :  { %v767_v22 = vpop.f32.mrf.mxu3  ;;  %v671_v23 = vpop.f32.mrf.mxu1 }
 0x10b   :  { %v672_v26 = vadd.f32 %v671_v23, %v1706_v30  ;;  %v768_v28 = vadd.f32 %v767_v22, %v719_v25 }
 0x10c   :  { %v818_v24 = vpop.f32.mrf.mxu0 }
 0x10d   :  { %v817_v37 = vadd.f32 %v816_v11, %v768_v28 }
 0x10f   :  { %v898_v7 = vmul.f32 %v817_v37, %v817_v37  ;;  %v875_v11 = vadd.f32 %v874_v15, %v817_v37 }
 0x110   :  { %v720_v27 = vpop.f32.mrf.mxu2 }
 0x111   :  { %v721_v29 = vadd.f32 %v720_v27, %v672_v26  ;;  %v913_v12 = vadd.f32 %v912_v21, %v898_v7 }
 0x112   :  { %v769_v32 = vpop.f32.mrf.mxu3  ;;  %v674_v33 = vpop.f32.mrf.mxu1 }
 0x113   :  { %v770_v35 = vadd.f32 %v769_v32, %v721_v29  ;;  %v675_v47 = vadd.f32 %v674_v33, %v1713_v38 }
 0x114   :  { %v821_v36 = vpop.f32.mrf.mxu0 }
 0x115   :  { %v819_v41 = vadd.f32 %v818_v24, %v770_v35 }
 0x117   :  { %v1348_v44 = vpack.c.bf16 %v819_v41, %v817_v37  ;;  %v899_v9 = vmul.f32 %v819_v41, %v819_v41  ;;  %v876_v17 = vadd.f32 %v875_v11, %v819_v41 }
 0x118   :  { %v723_v45 = vpop.f32.mrf.mxu2 }
 0x119   :  { %1368 = vst [vmem:[%s1767_s2 + $0x20] sm:$0xff] %v1348_v44   ;;  %v724_v48 = vadd.f32 %v723_v45, %v675_v47  ;;  %v914_v23 = vadd.f32 %v913_v12, %v899_v9 }
 0x11a   :  { %v772_v18 = vpop.f32.mrf.mxu3  ;;  %v676_v46 = vpop.f32.mrf.mxu1 }
 0x11b   :  { %v677_v49 = vadd.f32 %v676_v46, %v1719_v42  ;;  %v773_v51 = vadd.f32 %v772_v18, %v724_v48 }
 0x11c   :  { %v823_v30 = vpop.f32.mrf.mxu0 }
 0x11d   :  { %v822_v55 = vadd.f32 %v821_v36, %v773_v51 }
 0x11f   :  { %v900_v13 = vmul.f32 %v822_v55, %v822_v55  ;;  %v877_v24 = vadd.f32 %v876_v17, %v822_v55 }
 0x120   :  { %v725_v50 = vpop.f32.mrf.mxu2 }
 0x121   :  { %v726_v14 = vadd.f32 %v725_v50, %v677_v49  ;;  %v915_v26 = vadd.f32 %v914_v23, %v900_v13 }
 0x122   :  { %v774_v52 = vpop.f32.mrf.mxu3  ;;  %v679_v53 = vpop.f32.mrf.mxu1 }
 0x123   :  { %v775_v54 = vadd.f32 %v774_v52, %v726_v14  ;;  %v680_v61 = vadd.f32 %v679_v53, %v1678_v19 }
 0x124   :  { %v826_v57 = vpop.f32.mrf.mxu0 }
 0x125   :  { %v824_v56 = vadd.f32 %v823_v30, %v775_v54 }
 0x127   :  { %v1353_v58 = vpack.c.bf16 %v824_v56, %v822_v55  ;;  %v901_v25 = vmul.f32 %v824_v56, %v824_v56 }
 0x128   :  { %v728_v59 = vpop.f32.mrf.mxu2 }
 0x129   :  { %1369 = vst [vmem:[%s1767_s2 + $0x28] sm:$0xff] %v1353_v58   ;;  %v729_v42 = vadd.f32 %v728_v59, %v680_v61  ;;  %v916_v32 = vadd.f32 %v915_v26, %v901_v25 }
 0x12a   :  { %v777_v38 = vpop.f32.mrf.mxu3  ;;  %v681_v60 = vpop.f32.mrf.mxu1 }
 0x12b   :  { %v682_v20 = vadd.f32 %v681_v60, %v1708_v31  ;;  %v778_v0 = vadd.f32 %v777_v38, %v729_v42 }
 0x12c   :  { %v828_v62 = vpop.f32.mrf.mxu0 }
 0x12d   :  { %v827_v5 = vadd.f32 %v826_v57, %v778_v0 }
 0x12f   :  { %v902_v27 = vmul.f32 %v827_v5, %v827_v5 }
 0x130   :  { %v730_v63 = vpop.f32.mrf.mxu2 }
 0x131   :  { %v731_v1 = vadd.f32 %v730_v63, %v682_v20  ;;  %v917_v37 = vadd.f32 %v916_v32, %v902_v27 }
 0x132   :  { %v779_v2 = vpop.f32.mrf.mxu3  ;;  %v684_v3 = vpop.f32.mrf.mxu1 }
 0x133   :  { %v780_v4 = vadd.f32 %v779_v2, %v731_v1  ;;  %v685_v34 = vadd.f32 %v684_v3, %v1715_v39  ;;  %v878_v39 = vadd.f32 %v877_v24, %v824_v56 }
 0x134   :  { %v831_v16 = vpop.f32.mrf.mxu0 }
 0x135   :  { %v829_v6 = vadd.f32 %v828_v62, %v780_v4  ;;  %v879_v33 = vadd.f32 %v878_v39, %v827_v5 }
 0x137   :  { %v1358_v8 = vpack.c.bf16 %v829_v6, %v827_v5  ;;  %v903_v35 = vmul.f32 %v829_v6, %v829_v6  ;;  %v880_v44 = vadd.f32 %v879_v33, %v829_v6 }
 0x138   :  { %v733_v10 = vpop.f32.mrf.mxu2 }
 0x139   :  { %1370 = vst [vmem:[%s1767_s2 + $0x30] sm:$0xff] %v1358_v8   ;;  %v734_v19 = vadd.f32 %v733_v10, %v685_v34  ;;  %v918_v46 = vadd.f32 %v917_v37, %v903_v35 }
 0x13a   :  { %v782_v31 = vpop.f32.mrf.mxu3  ;;  %v686_v40 = vpop.f32.mrf.mxu1 }
 0x13b   :  { %v783_v22 = vadd.f32 %v782_v31, %v734_v19  ;;  %v687_v15 = vadd.f32 %v686_v40, %v1721_v43 }
 0x13c   :  { %v833_v18 = vpop.f32.mrf.mxu0 }
 0x13d   :  { %v832_v28 = vadd.f32 %v831_v16, %v783_v22 }
 0x13f   :  { %v904_v41 = vmul.f32 %v832_v28, %v832_v28  ;;  %v881_v47 = vadd.f32 %v880_v44, %v832_v28 }
 0x140   :  { %v735_v29 = vpop.f32.mrf.mxu2 }
 0x141   :  { %v736_v36 = vadd.f32 %v735_v29, %v687_v15  ;;  %v919_v48 = vadd.f32 %v918_v46, %v904_v41 }
 0x142   :  { %v784_v21 = vpop.f32.mrf.mxu3 }
 0x143   :  { %v785_v45 = vadd.f32 %v784_v21, %v736_v36 }
 0x145   :  { %v834_v30 = vadd.f32 %v833_v18, %v785_v45 }
 0x147   :  { %v1363_v49 = vpack.c.bf16 %v834_v30, %v832_v28  ;;  %v882_v50 = vadd.f32 %v881_v47, %v834_v30  ;;  %v905_v51 = vmul.f32 %v834_v30, %v834_v30 }
 0x149   :  { %1371 = vst [vmem:[%s1767_s2 + $0x38] sm:$0xff] %v1363_v49   ;;  %v883_v43 = vrot.slane %v882_v50, 4  ;;  %v920_v14 = vadd.f32 %v919_v48, %v905_v51 }
 0x14b   :  { %v884_v52 = vadd.f32 %v883_v43, %v882_v50  ;;  %v921_v53 = vrot.slane %v920_v14, 4 }
 0x14d   :  { %v885_v54 = vrot.slane %v884_v52, 2  ;;  %v922_v55 = vadd.f32 %v921_v53, %v920_v14 }
 0x14f   :  { %v886_v56 = vadd.f32 %v885_v54, %v884_v52  ;;  %v923_v57 = vrot.slane %v922_v55, 2 }
 0x151   :  { %v887_v58 = vrot.slane %v886_v56, 1  ;;  %v924_v59 = vadd.f32 %v923_v57, %v922_v55 }
 0x153   :  { %v888_v38 = vadd.f32 %v887_v58, %v886_v56  ;;  %v925_v60 = vrot.slane %v924_v59, 1 }
 0x155   :  { %889 = vst [vmem:[%s1768_s3] sm:$0x1] %v888_v38  ;;  %v926_v61 = vadd.f32 %v925_v60, %v924_v59 }
 0x157   :  { %927 = vst [vmem:[%s1768_s3 + $0x1] sm:$0x1] %v926_v61 }
 0x158   :  { %936 = vsyncpa [#allocation3], 1 }

// kernel: generator_forward.8
= control target key start
LH: loop header
LB: loop body
LE: loop exit
PB: predicated region body
PF: predicated region fallthrough
CT: control target
= control target key end

     0   :  { %9 = vsyncpa [#allocation3], 0  ;;  %s2567_s15 = smov [#allocation2]   ;;  %s2568_s17 = smov 64   ;;  %s3491_s0 = inlined_call_operand.vmem [shape: bf16[512,288], index: 0, kind: input, shape index: {}]   ;;  %s3492_s1 = inlined_call_operand.hbm [shape: bf16[288,128], index: 1, kind: input, shape index: {}]   ;;  %s3493_s2 = inlined_call_operand.vmem [shape: bf16[512,128], index: 2, kind: output, shape index: {0}]   ;;  %s3494_s3 = inlined_call_operand.vmem [shape: f32[1,2,128], index: 3, kind: output, shape index: {1}]  }
   0x1   :  { %s16_s14 = sshll.u32 %s3492_s1, 4  ;;  %s18_s16 = sshll.u32 %s2567_s15, 4  ;;  %s17_s14 = int_to_ptr.hbm [resolvable:$true] %s16_s14  ;;  %s19_s16 = int_to_ptr.vmem [resolvable:$true] %s18_s16 }
   0x2   :  { %s2569_s18 = smov 4  }
   0x3   :  { %24 = dma.hbm_to_vmem [thread:$0]  %s17_s14, 2304, %s19_s16, [#allocation3], %s2568_s17, %s2568_s17, %s2569_s18  }
   0x4   :  { %2565 = dma.done.wait [#allocation3], 2304  }
   0x5   :  { %2566 = vsyncadd [#allocation3], 4294964992  ;;  %v2318_v0 = vld [vmem:[#allocation2 + $0x38] sm:$0xff]  ;;  %v2593_v2 = vld [vmem:[#allocation2 + $0x88] sm:$0xff]  ;;  %vm782_vm0 = vcmask 261120  }
   0x6   :  { %v2326_v1 = vld [vmem:[#allocation2 + $0x78] sm:$0xff]  ;;  %879 = vmatpush.bf16.msra.mxu0 %v2318_v0  ;;  %2520 = vmatpush.bf16.msra.mxu3 %v2318_v0  ;;  %v2317_v3 = vld [vmem:[#allocation2 + $0x30] sm:$0xff]  ;;  %v2596_v5 = vld [vmem:[#allocation2 + $0x80] sm:$0xff] }
   0x7   :  { %v2325_v4 = vld [vmem:[#allocation2 + $0x70] sm:$0xff]  ;;  %1048 = vmatpush.bf16.msra.mxu1 %v2326_v1  ;;  %1223 = vmatpush.bf16.msra.mxu2 %v2593_v2  ;;  %v1737_v6 = vld [vmem:[%s3491_s0 + $0x8] sm:$0xf]  ;;  %v2315_v11 = vld [vmem:[#allocation2 + $0x20] sm:$0xff] }
   0x8   :  { %v2217_v7 = vld [vmem:[%s3491_s0 + $0x10] sm:$0xf0]  ;;  %v2316_v9 = vld [vmem:[#allocation2 + $0x28] sm:$0xff]  ;;  %v2323_v12 = vld [vmem:[#allocation2 + $0x60] sm:$0xff] }
   0x9   :  { %v1738_v8 = vor.u32 %v2217_v7, %v1737_v6  ;;  %v2324_v10 = vld [vmem:[#allocation2 + $0x68] sm:$0xff]  ;;  %v2314_v13 = vld [vmem:[#allocation2 + $0x18] sm:$0xff]  ;;  %v2313_v15 = vld [vmem:[#allocation2 + $0x10] sm:$0xff] }
   0xa   :  { %880 = vmatpush.bf16.msra.mxu0 %v2317_v3  ;;  %2521 = vmatpush.bf16.msra.mxu3 %v2317_v3  ;;  %v2322_v14 = vld [vmem:[#allocation2 + $0x58] sm:$0xff]  ;;  %v2321_v16 = vld [vmem:[#allocation2 + $0x50] sm:$0xff]  ;;  %v1749_v17 = vld [vmem:[%s3491_s0 + $0x20] sm:$0xf] }
   0xb   :  { %1049 = vmatpush.bf16.msra.mxu1 %v2325_v4  ;;  %1224 = vmatpush.bf16.msra.mxu2 %v2596_v5  ;;  %v2220_v18 = vld [vmem:[%s3491_s0 + $0x28] sm:$0xf0]  ;;  %v2311_v22 = vld [vmem:[#allocation2] sm:$0xff]  ;;  %v1731_v29 = vld [vmem:[%s3491_s0 + $0xc] sm:$0xf0] }
   0xc   :  { %v1750_v19 = vor.u32 %v2220_v18, %v1749_v17  ;;  %v2312_v20 = vld [vmem:[#allocation2 + $0x8] sm:$0xff]  ;;  %v2319_v23 = vld [vmem:[#allocation2 + $0x40] sm:$0xff]  ;;  %v1761_v33 = vld [vmem:[%s3491_s0 + $0x38] sm:$0xf] }
   0xd   :  { %v2320_v21 = vld [vmem:[#allocation2 + $0x48] sm:$0xff]  ;;  %v1729_v24 = vld [vmem:[%s3491_s0] sm:$0xf]  ;;  %v2215_v28 = vld [vmem:[%s3491_s0 + $0x4] sm:$0xf] }
   0xe   :  { %2183 = vmatmul.msk.bf16.vlgmr.msra.gmra.mxu2 %vm782_vm0, %v1738_v8  ;;  %881 = vmatpush.bf16.msra.mxu0 %v2316_v9  ;;  %v2216_v25 = vld [vmem:[%s3491_s0 + $0x8] sm:$0xf0]  ;;  %v2017_v26 = vld [vmem:[%s3491_s0 + $0x240] sm:$0xf]  ;;  %v1734_v32 = vor.u32 %v2215_v28, %v1731_v29  ;;  %v2223_v34 = vld [vmem:[%s3491_s0 + $0x40] sm:$0xf0] }
   0xf   :  { %2522 = vmatpush.bf16.msra.mxu3 %v2316_v9  ;;  %1050 = vmatpush.bf16.msra.mxu1 %v2324_v10  ;;  %v2288_v27 = vld [vmem:[%s3491_s0 + $0x248] sm:$0xf0]  ;;  %v1730_v30 = vor.u32 %v2216_v25, %v1729_v24  ;;  %v1762_v35 = vor.u32 %v2223_v34, %v1761_v33  ;;  %v1741_v36 = vld [vmem:[%s3491_s0 + $0x18] sm:$0xf]  ;;  %v2219_v37 = vld [vmem:[%s3491_s0 + $0x20] sm:$0xf0] }
  0x10   :  { %v2018_v31 = vor.u32 %v2288_v27, %v2017_v26  ;;  %v2029_v38 = vld [vmem:[%s3491_s0 + $0x258] sm:$0xf]  ;;  %v2291_v39 = vld [vmem:[%s3491_s0 + $0x260] sm:$0xf0]  ;;  %v2218_v40 = vld [vmem:[%s3491_s0 + $0x1c] sm:$0xf]  ;;  %v1742_v42 = vor.u32 %v2219_v37, %v1741_v36 }
  0x11   :  { %v1743_v41 = vld [vmem:[%s3491_s0 + $0x24] sm:$0xf0]  ;;  %v2030_v43 = vor.u32 %v2291_v39, %v2029_v38  ;;  %v1773_v45 = vld [vmem:[%s3491_s0 + $0x50] sm:$0xf]  ;;  %v2226_v46 = vld [vmem:[%s3491_s0 + $0x58] sm:$0xf0] }
  0x12   :  { %882 = vmatpush.bf16.msra.mxu0 %v2315_v11  ;;  %v1746_v44 = vor.u32 %v2218_v40, %v1743_v41  ;;  %v1774_v47 = vor.u32 %v2226_v46, %v1773_v45  ;;  %v1753_v48 = vld [vmem:[%s3491_s0 + $0x30] sm:$0xf]  ;;  %v2222_v49 = vld [vmem:[%s3491_s0 + $0x38] sm:$0xf0]  ;;  %v2221_v52 = vld [vmem:[%s3491_s0 + $0x34] sm:$0xf] }
  0x13   :  { %2523 = vmatpush.bf16.msra.mxu3 %v2315_v11  ;;  %1051 = vmatpush.bf16.msra.mxu1 %v2323_v12  ;;  %v2041_v50 = vld [vmem:[%s3491_s0 + $0x270] sm:$0xf]  ;;  %v2294_v51 = vld [vmem:[%s3491_s0 + $0x278] sm:$0xf0]  ;;  %v1755_v53 = vld [vmem:[%s3491_s0 + $0x3c] sm:$0xf0]  ;;  %v1754_v54 = vor.u32 %v2222_v49, %v1753_v48 }
  0x14   :  { %v2042_v55 = vor.u32 %v2294_v51, %v2041_v50  ;;  %v1758_v56 = vor.u32 %v2221_v52, %v1755_v53  ;;  %v1785_v57 = vld [vmem:[%s3491_s0 + $0x68] sm:$0xf]  ;;  %v2229_v58 = vld [vmem:[%s3491_s0 + $0x70] sm:$0xf0]  ;;  %v2224_v0 = vld [vmem:[%s3491_s0 + $0x4c] sm:$0xf] }
  0x15   :  { %v1786_v59 = vor.u32 %v2229_v58, %v1785_v57  ;;  %v1765_v60 = vld [vmem:[%s3491_s0 + $0x48] sm:$0xf]  ;;  %v2225_v61 = vld [vmem:[%s3491_s0 + $0x50] sm:$0xf0]  ;;  %v2232_v6 = vld [vmem:[%s3491_s0 + $0x88] sm:$0xf0] }
  0x16   :  { %883 = vmatpush.bf16.msra.mxu0 %v2314_v13  ;;  %v2053_v62 = vld [vmem:[%s3491_s0 + $0x288] sm:$0xf]  ;;  %v2297_v63 = vld [vmem:[%s3491_s0 + $0x290] sm:$0xf0]  ;;  %v1777_v8 = vld [vmem:[%s3491_s0 + $0x60] sm:$0xf] }
  0x17   :  { %2524 = vmatpush.bf16.msra.mxu3 %v2314_v13  ;;  %1052 = vmatpush.bf16.msra.mxu1 %v2322_v14  ;;  %v2054_v3 = vor.u32 %v2297_v63, %v2053_v62  ;;  %v2228_v9 = vld [vmem:[%s3491_s0 + $0x68] sm:$0xf0]  ;;  %v1779_v13 = vld [vmem:[%s3491_s0 + $0x6c] sm:$0xf0]  ;;  %v1809_v17 = vld [vmem:[%s3491_s0 + $0x98] sm:$0xf] }
  0x18   :  { %v2300_v11 = vld [vmem:[%s3491_s0 + $0x2a8] sm:$0xf0]  ;;  %v2235_v18 = vld [vmem:[%s3491_s0 + $0xa0] sm:$0xf0]  ;;  %v2230_v24 = vld [vmem:[%s3491_s0 + $0x7c] sm:$0xf] }
  0x19   :  { %v1791_v25 = vld [vmem:[%s3491_s0 + $0x84] sm:$0xf0]  ;;  %v1821_v29 = vld [vmem:[%s3491_s0 + $0xb0] sm:$0xf]  ;;  %v2234_v33 = vld [vmem:[%s3491_s0 + $0x98] sm:$0xf0] }
  0x1a   :  { %884 = vmatpush.bf16.msra.mxu0 %v2313_v15  ;;  %v1794_v28 = vor.u32 %v2230_v24, %v1791_v25  ;;  %v2089_v34 = vld [vmem:[%s3491_s0 + $0x2d0] sm:$0xf]  ;;  %v2233_v36 = vld [vmem:[%s3491_s0 + $0x94] sm:$0xf]  ;;  %v1803_v37 = vld [vmem:[%s3491_s0 + $0x9c] sm:$0xf0] }
  0x1b   :  { %2525 = vmatpush.bf16.msra.mxu3 %v2313_v15  ;;  %1053 = vmatpush.bf16.msra.mxu1 %v2321_v16  ;;  %v1806_v40 = vor.u32 %v2233_v36, %v1803_v37  ;;  %v1833_v41 = vld [vmem:[%s3491_s0 + $0xc8] sm:$0xf]  ;;  %v2237_v45 = vld [vmem:[%s3491_s0 + $0xb0] sm:$0xf0]  ;;  %v2236_v48 = vld [vmem:[%s3491_s0 + $0xac] sm:$0xf] }
  0x1c   :  { %v2101_v46 = vld [vmem:[%s3491_s0 + $0x2e8] sm:$0xf]  ;;  %v1815_v49 = vld [vmem:[%s3491_s0 + $0xb4] sm:$0xf0]  ;;  %v1825_v58 = vld [vmem:[%s3491_s0 + $0xc0] sm:$0xf] }
  0x1d   :  { %v1818_v53 = vor.u32 %v2236_v48, %v1815_v49  ;;  %v2287_v62 = vld [vmem:[%s3491_s0 + $0x244] sm:$0xf]  ;;  %v2019_v63 = vld [vmem:[%s3491_s0 + $0x24c] sm:$0xf0] }
  0x1e   :  { %2184 = vmatmul.msk.bf16.gmra.mxu2 %vm782_vm0, %v1750_v19  ;;  %885 = vmatpush.bf16.msra.mxu0 %v2312_v20  ;;  %v1810_v19 = vor.u32 %v2235_v18, %v1809_v17  ;;  %v1837_v17 = vld [vmem:[%s3491_s0 + $0xd8] sm:$0xf]  ;;  %v2243_v18 = vld [vmem:[%s3491_s0 + $0xe0] sm:$0xf0]  ;;  %v1869_v37 = vld [vmem:[%s3491_s0 + $0x110] sm:$0xf] }
  0x1f   :  { %2526 = vmatpush.bf16.msra.mxu3 %v2312_v20  ;;  %1054 = vmatpush.bf16.msra.mxu1 %v2320_v21  ;;  %v1789_v20 = vld [vmem:[%s3491_s0 + $0x78] sm:$0xf]  ;;  %v1849_v49 = vld [vmem:[%s3491_s0 + $0xf0] sm:$0xf] }
  0x22   :  { %886 = vmatpush.bf16.msra.mxu0 %v2311_v22 }
  0x23   :  { %2527 = vmatpush.bf16.msra.mxu3 %v2311_v22  ;;  %1055 = vmatpush.bf16.msra.mxu1 %v2319_v23  ;;  %v2077_v22 = vld [vmem:[%s3491_s0 + $0x2b8] sm:$0xf] }
  0x25   :  { %887 = vmatmul.bf16.vlgmr.msra.gmra.mxu0 %v1730_v30  ;;  %v2238_v30 = vld [vmem:[%s3491_s0 + $0xb8] sm:$0xf0] }
  0x26   :  { %1007 = vmatmul.bf16.vlgmr.msra.gmra.mxu3 %v2018_v31  ;;  %1056 = vmatmul.bf16.vlgmr.msra.gmra.mxu1 %v1734_v32  ;;  %v1822_v31 = vor.u32 %v2238_v30, %v1821_v29  ;;  %v1801_v32 = vld [vmem:[%s3491_s0 + $0x90] sm:$0xf]  ;;  %v1838_v29 = vor.u32 %v2243_v18, %v1837_v17  ;;  %v1861_v17 = vld [vmem:[%s3491_s0 + $0x108] sm:$0xf]  ;;  %v2249_v18 = vld [vmem:[%s3491_s0 + $0x110] sm:$0xf0] }
  0x27   :  { %2528 = vmatpush.bf16.msrb.mxu3 %v2326_v1  ;;  %v1767_v1 = vld [vmem:[%s3491_s0 + $0x54] sm:$0xf0]  ;;  %v1802_v38 = vor.u32 %v2234_v33, %v1801_v32 }
  0x2b   :  { %2529 = vmatpush.bf16.msrb.mxu3 %v2325_v4  ;;  %v1770_v4 = vor.u32 %v2224_v0, %v1767_v1 }
  0x2e   :  { %2185 = vmatmul.msk.bf16.gmra.mxu2 %vm782_vm0, %v1762_v35  ;;  %v2306_v35 = vld [vmem:[%s3491_s0 + $0x2d8] sm:$0xf0] }
  0x2f   :  { %2530 = vmatpush.bf16.msrb.mxu3 %v2324_v10  ;;  %v2065_v10 = vld [vmem:[%s3491_s0 + $0x2a0] sm:$0xf]  ;;  %v2090_v39 = vor.u32 %v2306_v35, %v2089_v34 }
  0x30   :  { %v2066_v15 = vor.u32 %v2300_v11, %v2065_v10 }
  0x33   :  { %2531 = vmatpush.bf16.msrb.mxu3 %v2323_v12  ;;  %v2227_v12 = vld [vmem:[%s3491_s0 + $0x64] sm:$0xf] }
  0x35   :  { %892 = vmatmul.bf16.gmra.mxu0 %v1742_v42  ;;  %v2241_v42 = vld [vmem:[%s3491_s0 + $0xd0] sm:$0xf0] }
  0x36   :  { %1012 = vmatmul.bf16.gmra.mxu3 %v2030_v43  ;;  %1061 = vmatmul.bf16.gmra.mxu1 %v1746_v44  ;;  %v1834_v43 = vor.u32 %v2241_v42, %v1833_v41  ;;  %v1813_v44 = vld [vmem:[%s3491_s0 + $0xa8] sm:$0xf] }
  0x37   :  { %2532 = vmatpush.bf16.msrb.mxu3 %v2322_v14  ;;  %v1778_v14 = vor.u32 %v2228_v9, %v1777_v8  ;;  %v1814_v51 = vor.u32 %v2237_v45, %v1813_v44 }
  0x3b   :  { %2533 = vmatpush.bf16.msrb.mxu3 %v2321_v16  ;;  %v1782_v16 = vor.u32 %v2227_v12, %v1779_v13 }
  0x3e   :  { %2186 = vmatmul.msk.bf16.gmra.mxu2 %vm782_vm0, %v1774_v47  ;;  %v2309_v47 = vld [vmem:[%s3491_s0 + $0x2f0] sm:$0xf0] }
  0x3f   :  { %2534 = vmatpush.bf16.msrb.mxu3 %v2320_v21  ;;  %v2231_v21 = vld [vmem:[%s3491_s0 + $0x80] sm:$0xf0]  ;;  %v2102_v52 = vor.u32 %v2309_v47, %v2101_v46 }
  0x40   :  { %v1790_v26 = vor.u32 %v2231_v21, %v1789_v20  ;;  %v1839_v20 = vld [vmem:[%s3491_s0 + $0xe4] sm:$0xf0]  ;;  %v2290_v21 = vld [vmem:[%s3491_s0 + $0x25c] sm:$0xf] }
  0x43   :  { %2535 = vmatpush.bf16.msrb.mxu3 %v2319_v23  ;;  %v2303_v23 = vld [vmem:[%s3491_s0 + $0x2c0] sm:$0xf0] }
  0x44   :  { %v2078_v27 = vor.u32 %v2303_v23, %v2077_v22  ;;  %v2031_v22 = vld [vmem:[%s3491_s0 + $0x264] sm:$0xf0] }
  0x45   :  { %897 = vmatmul.bf16.gmra.mxu0 %v1754_v54  ;;  %v1845_v54 = vld [vmem:[%s3491_s0 + $0xe0] sm:$0xf]  ;;  %v2034_v33 = vor.u32 %v2290_v21, %v2031_v22  ;;  %v2296_v21 = vld [vmem:[%s3491_s0 + $0x28c] sm:$0xf]  ;;  %v2055_v22 = vld [vmem:[%s3491_s0 + $0x294] sm:$0xf0] }
  0x46   :  { %1017 = vmatmul.bf16.gmra.mxu3 %v2042_v55  ;;  %1066 = vmatmul.bf16.gmra.mxu1 %v1758_v56  ;;  %v2244_v55 = vld [vmem:[%s3491_s0 + $0xe8] sm:$0xf0] }
  0x47   :  { %2536 = vmatpush.bf16.msra.mxu3 %v2593_v2  ;;  %v1766_v2 = vor.u32 %v2225_v61, %v1765_v60  ;;  %v1846_v57 = vor.u32 %v2244_v55, %v1845_v54  ;;  %v2239_v60 = vld [vmem:[%s3491_s0 + $0xc4] sm:$0xf]  ;;  %v1827_v61 = vld [vmem:[%s3491_s0 + $0xcc] sm:$0xf0]  ;;  %v2043_v54 = vld [vmem:[%s3491_s0 + $0x27c] sm:$0xf0] }
  0x4b   :  { %2537 = vmatpush.bf16.msra.mxu3 %v2596_v5  ;;  %v1797_v5 = vld [vmem:[%s3491_s0 + $0x80] sm:$0xf] }
  0x4c   :  { %v1798_v7 = vor.u32 %v2232_v6, %v1797_v5  ;;  %v1857_v6 = vld [vmem:[%s3491_s0 + $0xf8] sm:$0xf] }
  0x4e   :  { %2187 = vmatmul.msk.bf16.gmra.mxu2 %vm782_vm0, %v1786_v59  ;;  %v2240_v59 = vld [vmem:[%s3491_s0 + $0xc8] sm:$0xf0] }
  0x4f   :  { %v1826_v1 = vor.u32 %v2240_v59, %v1825_v58 }
  0x55   :  { %902 = vmatmul.bf16.gmra.mxu0 %v1766_v2 }
  0x56   :  { %1022 = vmatmul.bf16.gmra.mxu3 %v2054_v3  ;;  %1071 = vmatmul.bf16.gmra.mxu1 %v1770_v4  ;;  %v1830_v3 = vor.u32 %v2239_v60, %v1827_v61  ;;  %v2022_v4 = vor.u32 %v2287_v62, %v2019_v63 }
  0x5e   :  { %2188 = vmatmul.msk.bf16.gmra.mxu2 %vm782_vm0, %v1798_v7  ;;  %v2247_v7 = vld [vmem:[%s3491_s0 + $0x100] sm:$0xf0] }
  0x5f   :  { %v1858_v12 = vor.u32 %v2247_v7, %v1857_v6 }
  0x65   :  { %907 = vmatmul.bf16.gmra.mxu0 %v1778_v14 }
  0x66   :  { %1027 = vmatmul.bf16.gmra.mxu3 %v2066_v15  ;;  %1076 = vmatmul.bf16.gmra.mxu1 %v1782_v16 }
  0x6e   :  { %2189 = vmatmul.msk.bf16.gmra.mxu2 %vm782_vm0, %v1810_v19  ;;  %v2242_v19 = vld [vmem:[%s3491_s0 + $0xdc] sm:$0xf] }
  0x6f   :  { %v1842_v32 = vor.u32 %v2242_v19, %v1839_v20  ;;  %v2248_v19 = vld [vmem:[%s3491_s0 + $0x10c] sm:$0xf]  ;;  %v1863_v20 = vld [vmem:[%s3491_s0 + $0x114] sm:$0xf0] }
  0x75   :  { %912 = vmatmul.bf16.gmra.mxu0 %v1790_v26 }
  0x76   :  { %1032 = vmatmul.bf16.gmra.mxu3 %v2078_v27  ;;  %1081 = vmatmul.bf16.gmra.mxu1 %v1794_v28 }
  0x7e   :  { %2190 = vmatmul.msk.bf16.gmra.mxu2 %vm782_vm0, %v1822_v31 }
  0x85   :  { %917 = vmatmul.bf16.gmra.mxu0 %v1802_v38  ;;  %v2250_v38 = vld [vmem:[%s3491_s0 + $0x118] sm:$0xf0] }
  0x86   :  { %1037 = vmatmul.bf16.gmra.mxu3 %v2090_v39  ;;  %1086 = vmatmul.bf16.gmra.mxu1 %v1806_v40  ;;  %v1870_v45 = vor.u32 %v2250_v38, %v1869_v37  ;;  %v1893_v37 = vld [vmem:[%s3491_s0 + $0x140] sm:$0xf]  ;;  %v2256_v38 = vld [vmem:[%s3491_s0 + $0x148] sm:$0xf0] }
  0x8e   :  { %2191 = vmatmul.msk.bf16.gmra.mxu2 %vm782_vm0, %v1834_v43 }
  0x91   :  { %v1226_v50 = vpop.f32.mrf.mxu2 }
  0x95   :  { %922 = vmatmul.bf16.gmra.mxu0 %v1814_v51  ;;  %v2245_v51 = vld [vmem:[%s3491_s0 + $0xf4] sm:$0xf] }
  0x96   :  { %1042 = vmatmul.bf16.gmra.mxu3 %v2102_v52  ;;  %1091 = vmatmul.bf16.gmra.mxu1 %v1818_v53  ;;  %v1851_v52 = vld [vmem:[%s3491_s0 + $0xfc] sm:$0xf0]  ;;  %v2293_v53 = vld [vmem:[%s3491_s0 + $0x274] sm:$0xf] }
  0x97   :  { %v1854_v63 = vor.u32 %v2245_v51, %v1851_v52  ;;  %v2252_v51 = vld [vmem:[%s3491_s0 + $0x128] sm:$0xf0]  ;;  %v2251_v52 = vld [vmem:[%s3491_s0 + $0x124] sm:$0xf] }
  0x99   :  { %v1228_v56 = vpop.f32.mrf.mxu2 }
  0x9e   :  { %2192 = vmatmul.msk.bf16.gmra.mxu2 %vm782_vm0, %v1846_v57 }
  0xa1   :  { %v1231_v0 = vpop.f32.mrf.mxu2 }
  0xa2   :  { %v888_v2 = vpop.f32.mrf.mxu0 }
  0xa3   :  { %v1057_v5 = vpop.f32.mrf.mxu1 }
  0xa4   :  { %v1058_v8 = vadd.f32 %v1057_v5, %v888_v2  ;;  %v2253_v5 = vld [vmem:[%s3491_s0 + $0x130] sm:$0xf0] }
  0xa5   :  { %927 = vmatmul.bf16.gmra.mxu0 %v1826_v1 }
  0xa6   :  { %1096 = vmatmul.bf16.gmra.mxu1 %v1830_v3  ;;  %1176 = vmatmul.bf16.vlgmr.msrb.gmra.mxu3 %v2022_v4  ;;  %v1227_v14 = vadd.f32 %v1226_v50, %v1058_v8  ;;  %v2246_v50 = vld [vmem:[%s3491_s0 + $0xf8] sm:$0xf0]  ;;  %v1881_v4 = vld [vmem:[%s3491_s0 + $0x128] sm:$0xf] }
  0xa7   :  { %v1850_v60 = vor.u32 %v2246_v50, %v1849_v49  ;;  %v1873_v50 = vld [vmem:[%s3491_s0 + $0x120] sm:$0xf] }
  0xa8   :  { %v1584_v23 = vmul.f32 %v1227_v14, %v1227_v14 }
  0xa9   :  { %v2839_v9 = vpop.f32.mrf.mxu3  ;;  %v1233_v10 = vpop.f32.mrf.mxu2 }
  0xaa   :  { %v890_v11 = vpop.f32.mrf.mxu0 }
  0xab   :  { %v1059_v13 = vpop.f32.mrf.mxu1 }
  0xac   :  { %v1060_v15 = vadd.f32 %v1059_v13, %v890_v11  ;;  %v1882_v13 = vor.u32 %v2253_v5, %v1881_v4 }
  0xae   :  { %v1229_v16 = vadd.f32 %v1228_v56, %v1060_v15  ;;  %2193 = vmatmul.msk.bf16.gmra.mxu2 %vm782_vm0, %v1858_v12 }
  0xb0   :  { %v2332_v24 = vpack.c.bf16 %v1229_v16, %v1227_v14  ;;  %v1514_v25 = vadd.f32 %v1229_v16, %v1227_v14  ;;  %v1585_v26 = vmul.f32 %v1229_v16, %v1229_v16 }
  0xb1   :  { %v2860_v27 = vpop.f32.mrf.mxu3  ;;  %v1236_v28 = vpop.f32.mrf.mxu2 }
  0xb2   :  { %2333 = vst [vmem:[%s3493_s2] sm:$0xff] %v2332_v24   ;;  %v1648_v30 = vadd.f32 %v1585_v26, %v1584_v23  ;;  %v893_v31 = vpop.f32.mrf.mxu0 }
  0xb3   :  { %v1062_v34 = vpop.f32.mrf.mxu1 }
  0xb4   :  { %v1063_v35 = vadd.f32 %v1062_v34, %v893_v31 }
  0xb5   :  { %932 = vmatmul.bf16.gmra.mxu0 %v1838_v29  ;;  %v1862_v29 = vor.u32 %v2249_v18, %v1861_v17 }
  0xb6   :  { %v1232_v36 = vadd.f32 %v1231_v0, %v1063_v35  ;;  %1101 = vmatmul.bf16.gmra.mxu1 %v1842_v32  ;;  %1181 = vmatmul.bf16.gmra.mxu3 %v2034_v33  ;;  %v2046_v0 = vor.u32 %v2293_v53, %v2043_v54  ;;  %v1866_v32 = vor.u32 %v2248_v19, %v1863_v20  ;;  %v1875_v53 = vld [vmem:[%s3491_s0 + $0x12c] sm:$0xf0]  ;;  %v2299_v54 = vld [vmem:[%s3491_s0 + $0x2a4] sm:$0xf]  ;;  %v1885_v20 = vld [vmem:[%s3491_s0 + $0x138] sm:$0xf] }
  0xb7   :  { %v2058_v33 = vor.u32 %v2296_v21, %v2055_v22  ;;  %v2255_v21 = vld [vmem:[%s3491_s0 + $0x140] sm:$0xf0]  ;;  %v2254_v22 = vld [vmem:[%s3491_s0 + $0x13c] sm:$0xf] }
  0xb8   :  { %v1515_v39 = vadd.f32 %v1514_v25, %v1232_v36  ;;  %v1586_v40 = vmul.f32 %v1232_v36, %v1232_v36 }
  0xb9   :  { %v2871_v41 = vpop.f32.mrf.mxu3  ;;  %v1238_v42 = vpop.f32.mrf.mxu2 }
  0xba   :  { %v1649_v43 = vadd.f32 %v1648_v30, %v1586_v40  ;;  %v895_v44 = vpop.f32.mrf.mxu0 }
  0xbb   :  { %v1064_v46 = vpop.f32.mrf.mxu1 }
  0xbc   :  { %v1065_v47 = vadd.f32 %v1064_v46, %v895_v44  ;;  %v1894_v46 = vor.u32 %v2256_v38, %v1893_v37 }
  0xbe   :  { %v1234_v48 = vadd.f32 %v1233_v10, %v1065_v47  ;;  %2194 = vmatmul.msk.bf16.gmra.mxu2 %vm782_vm0, %v1870_v45 }
  0xc0   :  { %v2337_v55 = vpack.c.bf16 %v1234_v48, %v1232_v36  ;;  %v1516_v56 = vadd.f32 %v1515_v39, %v1234_v48  ;;  %v1587_v57 = vmul.f32 %v1234_v48, %v1234_v48 }
  0xc1   :  { %v2892_v58 = vpop.f32.mrf.mxu3  ;;  %v1241_v59 = vpop.f32.mrf.mxu2 }
  0xc2   :  { %2489 = vst [vmem:[%s3493_s2 + $0x8] sm:$0xff] %v2337_v55   ;;  %v1650_v61 = vadd.f32 %v1649_v43, %v1587_v57  ;;  %v898_v62 = vpop.f32.mrf.mxu0  ;;  %v2067_v55 = vld [vmem:[%s3491_s0 + $0x2ac] sm:$0xf0] }
  0xc3   :  { %v1067_v1 = vpop.f32.mrf.mxu1 }
  0xc4   :  { %v1068_v2 = vadd.f32 %v1067_v1, %v898_v62  ;;  %v1874_v62 = vor.u32 %v2252_v51, %v1873_v50  ;;  %v1878_v1 = vor.u32 %v2251_v52, %v1875_v53 }
  0xc5   :  { %937 = vmatmul.bf16.gmra.mxu0 %v1850_v60 }
  0xc6   :  { %v1237_v3 = vadd.f32 %v1236_v28, %v1068_v2  ;;  %1106 = vmatmul.bf16.gmra.mxu1 %v1854_v63  ;;  %1186 = vmatmul.bf16.gmra.mxu3 %v2046_v0  ;;  %v2070_v2 = vor.u32 %v2299_v54, %v2067_v55  ;;  %v1897_v55 = vld [vmem:[%s3491_s0 + $0x150] sm:$0xf] }
  0xc8   :  { %v1517_v6 = vadd.f32 %v1516_v56, %v1237_v3  ;;  %v1588_v7 = vmul.f32 %v1237_v3, %v1237_v3 }
  0xc9   :  { %v2903_v8 = vpop.f32.mrf.mxu3  ;;  %v1243_v10 = vpop.f32.mrf.mxu2 }
  0xca   :  { %v1651_v11 = vadd.f32 %v1650_v61, %v1588_v7  ;;  %v900_v12 = vpop.f32.mrf.mxu0  ;;  %v2259_v7 = vld [vmem:[%s3491_s0 + $0x160] sm:$0xf0] }
  0xcb   :  { %v1069_v14 = vpop.f32.mrf.mxu1 }
  0xcc   :  { %v1070_v15 = vadd.f32 %v1069_v14, %v900_v12 }
  0xce   :  { %v1239_v16 = vadd.f32 %v1238_v42, %v1070_v15  ;;  %2195 = vmatmul.msk.bf16.gmra.mxu2 %vm782_vm0, %v1882_v13 }
  0xd0   :  { %v2342_v23 = vpack.c.bf16 %v1239_v16, %v1237_v3  ;;  %v1518_v24 = vadd.f32 %v1517_v6, %v1239_v16  ;;  %v1589_v25 = vmul.f32 %v1239_v16, %v1239_v16  ;;  %v1905_v6 = vld [vmem:[%s3491_s0 + $0x158] sm:$0xf] }
  0xd1   :  { %v2924_v26 = vpop.f32.mrf.mxu3  ;;  %v1246_v28 = vpop.f32.mrf.mxu2  ;;  %v1906_v16 = vor.u32 %v2259_v7, %v1905_v6 }
  0xd2   :  { %2490 = vst [vmem:[%s3493_s2 + $0x10] sm:$0xff] %v2342_v23   ;;  %v1652_v30 = vadd.f32 %v1651_v11, %v1589_v25  ;;  %v903_v31 = vpop.f32.mrf.mxu0  ;;  %v1887_v23 = vld [vmem:[%s3491_s0 + $0x144] sm:$0xf0] }
  0xd3   :  { %v1072_v34 = vpop.f32.mrf.mxu1  ;;  %v2079_v25 = vld [vmem:[%s3491_s0 + $0x2c4] sm:$0xf0] }
  0xd4   :  { %v1073_v35 = vadd.f32 %v1072_v34, %v903_v31 }
  0xd5   :  { %942 = vmatmul.bf16.gmra.mxu0 %v1862_v29 }
  0xd6   :  { %v1242_v36 = vadd.f32 %v1241_v59, %v1073_v35  ;;  %1111 = vmatmul.bf16.gmra.mxu1 %v1866_v32  ;;  %1191 = vmatmul.bf16.gmra.mxu3 %v2058_v33  ;;  %v1886_v33 = vor.u32 %v2255_v21, %v1885_v20 }
  0xd8   :  { %v1519_v39 = vadd.f32 %v1518_v24, %v1242_v36  ;;  %v1590_v40 = vmul.f32 %v1242_v36, %v1242_v36  ;;  %v2302_v24 = vld [vmem:[%s3491_s0 + $0x2bc] sm:$0xf] }
  0xd9   :  { %v2935_v42 = vpop.f32.mrf.mxu3  ;;  %v1248_v43 = vpop.f32.mrf.mxu2  ;;  %v2082_v37 = vor.u32 %v2302_v24, %v2079_v25 }
  0xda   :  { %v1653_v44 = vadd.f32 %v1652_v30, %v1590_v40  ;;  %v905_v45 = vpop.f32.mrf.mxu0 }
  0xdb   :  { %v1074_v47 = vpop.f32.mrf.mxu1 }
  0xdc   :  { %v1075_v48 = vadd.f32 %v1074_v47, %v905_v45 }
  0xde   :  { %v1244_v49 = vadd.f32 %v1243_v10, %v1075_v48  ;;  %2196 = vmatmul.msk.bf16.gmra.mxu2 %vm782_vm0, %v1894_v46 }
  0xe0   :  { %v2347_v56 = vpack.c.bf16 %v1244_v49, %v1242_v36  ;;  %v1520_v57 = vadd.f32 %v1519_v39, %v1244_v49  ;;  %v1591_v59 = vmul.f32 %v1244_v49, %v1244_v49  ;;  %v1890_v36 = vor.u32 %v2254_v22, %v1887_v23 }
  0xe1   :  { %v2956_v60 = vpop.f32.mrf.mxu3  ;;  %v1251_v61 = vpop.f32.mrf.mxu2 }
  0xe2   :  { %2491 = vst [vmem:[%s3493_s2 + $0x18] sm:$0xff] %v2347_v56   ;;  %v1654_v63 = vadd.f32 %v1653_v44, %v1591_v59  ;;  %v908_v0 = vpop.f32.mrf.mxu0  ;;  %v2262_v44 = vld [vmem:[%s3491_s0 + $0x178] sm:$0xf0]  ;;  %v1899_v59 = vld [vmem:[%s3491_s0 + $0x15c] sm:$0xf0] }
  0xe3   :  { %v1077_v3 = vpop.f32.mrf.mxu1  ;;  %v2258_v56 = vld [vmem:[%s3491_s0 + $0x158] sm:$0xf0] }
  0xe4   :  { %v1078_v4 = vadd.f32 %v1077_v3, %v908_v0 }
  0xe5   :  { %947 = vmatmul.bf16.gmra.mxu0 %v1874_v62  ;;  %v2091_v62 = vld [vmem:[%s3491_s0 + $0x2dc] sm:$0xf0] }
  0xe6   :  { %v1247_v5 = vadd.f32 %v1246_v28, %v1078_v4  ;;  %1116 = vmatmul.bf16.gmra.mxu1 %v1878_v1  ;;  %1196 = vmatmul.bf16.gmra.mxu3 %v2070_v2  ;;  %v1898_v4 = vor.u32 %v2258_v56, %v1897_v55 }
  0xe8   :  { %v1521_v10 = vadd.f32 %v1520_v57, %v1247_v5  ;;  %v1592_v11 = vmul.f32 %v1247_v5, %v1247_v5  ;;  %v2257_v57 = vld [vmem:[%s3491_s0 + $0x154] sm:$0xf] }
  0xe9   :  { %v2967_v12 = vpop.f32.mrf.mxu3  ;;  %v1253_v13 = vpop.f32.mrf.mxu2  ;;  %v1902_v7 = vor.u32 %v2257_v57, %v1899_v59 }
  0xea   :  { %v1655_v14 = vadd.f32 %v1654_v63, %v1592_v11  ;;  %v910_v15 = vpop.f32.mrf.mxu0 }
  0xeb   :  { %v1079_v17 = vpop.f32.mrf.mxu1 }
  0xec   :  { %v1080_v18 = vadd.f32 %v1079_v17, %v910_v15  ;;  %v1929_v15 = vld [vmem:[%s3491_s0 + $0x188] sm:$0xf] }
  0xee   :  { %v1249_v19 = vadd.f32 %v1248_v43, %v1080_v18  ;;  %2197 = vmatmul.msk.bf16.gmra.mxu2 %vm782_vm0, %v1906_v16  ;;  %v1917_v43 = vld [vmem:[%s3491_s0 + $0x170] sm:$0xf]  ;;  %v2265_v16 = vld [vmem:[%s3491_s0 + $0x190] sm:$0xf0] }
  0xef   :  { %v1918_v51 = vor.u32 %v2262_v44, %v1917_v43  ;;  %v1930_v23 = vor.u32 %v2265_v16, %v1929_v15 }
  0xf0   :  { %v2352_v28 = vpack.c.bf16 %v1249_v19, %v1247_v5  ;;  %v1522_v29 = vadd.f32 %v1521_v10, %v1249_v19  ;;  %v1593_v30 = vmul.f32 %v1249_v19, %v1249_v19 }
  0xf1   :  { %v2988_v31 = vpop.f32.mrf.mxu3  ;;  %v1256_v32 = vpop.f32.mrf.mxu2 }
  0xf2   :  { %2492 = vst [vmem:[%s3493_s2 + $0x20] sm:$0xff] %v2352_v28   ;;  %v1656_v34 = vadd.f32 %v1655_v14, %v1593_v30  ;;  %v913_v35 = vpop.f32.mrf.mxu0  ;;  %v2261_v30 = vld [vmem:[%s3491_s0 + $0x170] sm:$0xf0] }
  0xf3   :  { %v1082_v38 = vpop.f32.mrf.mxu1 }
  0xf4   :  { %v1083_v39 = vadd.f32 %v1082_v38, %v913_v35  ;;  %v2103_v35 = vld [vmem:[%s3491_s0 + $0x2f4] sm:$0xf0] }
  0xf5   :  { %952 = vmatmul.bf16.gmra.mxu0 %v1886_v33  ;;  %v1911_v33 = vld [vmem:[%s3491_s0 + $0x174] sm:$0xf0] }
  0xf6   :  { %v1252_v40 = vadd.f32 %v1251_v61, %v1083_v39  ;;  %1121 = vmatmul.bf16.gmra.mxu1 %v1890_v36  ;;  %1201 = vmatmul.bf16.gmra.mxu3 %v2082_v37  ;;  %v2305_v61 = vld [vmem:[%s3491_s0 + $0x2d4] sm:$0xf] }
  0xf7   :  { %v2094_v10 = vor.u32 %v2305_v61, %v2091_v62 }
  0xf8   :  { %v1523_v45 = vadd.f32 %v1522_v29, %v1252_v40  ;;  %v1594_v46 = vmul.f32 %v1252_v40, %v1252_v40  ;;  %v1909_v29 = vld [vmem:[%s3491_s0 + $0x168] sm:$0xf] }
  0xf9   :  { %v2999_v47 = vpop.f32.mrf.mxu3  ;;  %v1258_v48 = vpop.f32.mrf.mxu2  ;;  %v1910_v43 = vor.u32 %v2261_v30, %v1909_v29  ;;  %v2271_v29 = vld [vmem:[%s3491_s0 + $0x1c0] sm:$0xf0] }
  0xfa   :  { %v1657_v49 = vadd.f32 %v1656_v34, %v1594_v46  ;;  %v915_v50 = vpop.f32.mrf.mxu0  ;;  %v2308_v34 = vld [vmem:[%s3491_s0 + $0x2ec] sm:$0xf] }
  0xfb   :  { %v1084_v52 = vpop.f32.mrf.mxu1 }
  0xfc   :  { %v1085_v53 = vadd.f32 %v1084_v52, %v915_v50  ;;  %v1941_v52 = vld [vmem:[%s3491_s0 + $0x1a0] sm:$0xf] }
  0xfe   :  { %v1254_v54 = vadd.f32 %v1253_v13, %v1085_v53  ;;  %2198 = vmatmul.msk.bf16.gmra.mxu2 %vm782_vm0, %v1918_v51  ;;  %v2268_v53 = vld [vmem:[%s3491_s0 + $0x1a8] sm:$0xf0] }
  0xff   :  { %v1942_v62 = vor.u32 %v2268_v53, %v1941_v52 }
 0x100   :  { %v2357_v63 = vpack.c.bf16 %v1254_v54, %v1252_v40  ;;  %v1524_v0 = vadd.f32 %v1523_v45, %v1254_v54  ;;  %v1595_v1 = vmul.f32 %v1254_v54, %v1254_v54 }
 0x101   :  { %v3020_v2 = vpop.f32.mrf.mxu3  ;;  %v1261_v3 = vpop.f32.mrf.mxu2 }
 0x102   :  { %2493 = vst [vmem:[%s3493_s2 + $0x28] sm:$0xff] %v2357_v63   ;;  %v1658_v5 = vadd.f32 %v1657_v49, %v1595_v1  ;;  %v918_v6 = vpop.f32.mrf.mxu0 }
 0x103   :  { %v1087_v11 = vpop.f32.mrf.mxu1 }
 0x104   :  { %v1088_v13 = vadd.f32 %v1087_v11, %v918_v6  ;;  %v1923_v6 = vld [vmem:[%s3491_s0 + $0x18c] sm:$0xf0] }
 0x105   :  { %957 = vmatmul.bf16.gmra.mxu0 %v1898_v4  ;;  %v2264_v4 = vld [vmem:[%s3491_s0 + $0x188] sm:$0xf0] }
 0x106   :  { %v1257_v14 = vadd.f32 %v1256_v32, %v1088_v13  ;;  %1126 = vmatmul.bf16.gmra.mxu1 %v1902_v7  ;;  %1206 = vmatmul.bf16.gmra.mxu3 %v2094_v10  ;;  %v2260_v32 = vld [vmem:[%s3491_s0 + $0x16c] sm:$0xf]  ;;  %v2049_v7 = vld [vmem:[%s3491_s0 + $0x278] sm:$0xf]  ;;  %v2295_v10 = vld [vmem:[%s3491_s0 + $0x280] sm:$0xf0] }
 0x107   :  { %v1914_v46 = vor.u32 %v2260_v32, %v1911_v33 }
 0x108   :  { %v1525_v17 = vadd.f32 %v1524_v0, %v1257_v14  ;;  %v1596_v18 = vmul.f32 %v1257_v14, %v1257_v14 }
 0x109   :  { %v3031_v19 = vpop.f32.mrf.mxu3  ;;  %v1263_v20 = vpop.f32.mrf.mxu2 }
 0x10a   :  { %v1659_v21 = vadd.f32 %v1658_v5, %v1596_v18  ;;  %v920_v22 = vpop.f32.mrf.mxu0  ;;  %v2263_v5 = vld [vmem:[%s3491_s0 + $0x184] sm:$0xf] }
 0x10b   :  { %v1089_v24 = vpop.f32.mrf.mxu1 }
 0x10c   :  { %v1090_v25 = vadd.f32 %v1089_v24, %v920_v22  ;;  %v2050_v22 = vor.u32 %v2295_v10, %v2049_v7 }
 0x10e   :  { %v1259_v28 = vadd.f32 %v1258_v48, %v1090_v25  ;;  %2199 = vmatmul.msk.bf16.gmra.mxu2 %vm782_vm0, %v1930_v23  ;;  %v2106_v48 = vor.u32 %v2308_v34, %v2103_v35 }
 0x110   :  { %v2362_v36 = vpack.c.bf16 %v1259_v28, %v1257_v14  ;;  %v1526_v37 = vadd.f32 %v1525_v17, %v1259_v28  ;;  %v1597_v38 = vmul.f32 %v1259_v28, %v1259_v28  ;;  %v1953_v28 = vld [vmem:[%s3491_s0 + $0x1b8] sm:$0xf] }
 0x111   :  { %v3052_v39 = vpop.f32.mrf.mxu3  ;;  %v1266_v40 = vpop.f32.mrf.mxu2 }
 0x112   :  { %2494 = vst [vmem:[%s3493_s2 + $0x30] sm:$0xff] %v2362_v36   ;;  %v1660_v44 = vadd.f32 %v1659_v21, %v1597_v38  ;;  %v923_v45 = vpop.f32.mrf.mxu0  ;;  %v1926_v21 = vor.u32 %v2263_v5, %v1923_v6  ;;  %v2274_v5 = vld [vmem:[%s3491_s0 + $0x1d8] sm:$0xf0] }
 0x113   :  { %v1092_v49 = vpop.f32.mrf.mxu1 }
 0x114   :  { %v1093_v50 = vadd.f32 %v1092_v49, %v923_v45  ;;  %v2267_v45 = vld [vmem:[%s3491_s0 + $0x1a0] sm:$0xf0]  ;;  %v2061_v49 = vld [vmem:[%s3491_s0 + $0x290] sm:$0xf] }
 0x115   :  { %962 = vmatmul.bf16.gmra.mxu0 %v1910_v43 }
 0x116   :  { %v1262_v51 = vadd.f32 %v1261_v3, %v1093_v50  ;;  %1131 = vmatmul.bf16.gmra.mxu1 %v1914_v46  ;;  %1211 = vmatmul.bf16.gmra.mxu3 %v2106_v48  ;;  %v1921_v3 = vld [vmem:[%s3491_s0 + $0x180] sm:$0xf]  ;;  %v2266_v46 = vld [vmem:[%s3491_s0 + $0x19c] sm:$0xf]  ;;  %v1935_v48 = vld [vmem:[%s3491_s0 + $0x1a4] sm:$0xf0] }
 0x117   :  { %v1922_v17 = vor.u32 %v2264_v4, %v1921_v3  ;;  %v2298_v50 = vld [vmem:[%s3491_s0 + $0x298] sm:$0xf0]  ;;  %v1965_v4 = vld [vmem:[%s3491_s0 + $0x1d0] sm:$0xf] }
 0x118   :  { %v1527_v54 = vadd.f32 %v1526_v37, %v1262_v51  ;;  %v1598_v55 = vmul.f32 %v1262_v51, %v1262_v51  ;;  %v1954_v37 = vor.u32 %v2271_v29, %v1953_v28  ;;  %v2301_v28 = vld [vmem:[%s3491_s0 + $0x2b0] sm:$0xf0] }
 0x119   :  { %v3063_v56 = vpop.f32.mrf.mxu3  ;;  %v1268_v57 = vpop.f32.mrf.mxu2 }
 0x11a   :  { %v1661_v59 = vadd.f32 %v1660_v44, %v1598_v55  ;;  %v925_v61 = vpop.f32.mrf.mxu0  ;;  %v1933_v44 = vld [vmem:[%s3491_s0 + $0x198] sm:$0xf] }
 0x11b   :  { %v1094_v63 = vpop.f32.mrf.mxu1 }
 0x11c   :  { %v1095_v0 = vadd.f32 %v1094_v63, %v925_v61  ;;  %v2062_v63 = vor.u32 %v2298_v50, %v2061_v49  ;;  %v2277_v49 = vld [vmem:[%s3491_s0 + $0x1f0] sm:$0xf0] }
 0x11e   :  { %v1264_v1 = vadd.f32 %v1263_v20, %v1095_v0  ;;  %2200 = vmatmul.msk.bf16.gmra.mxu2 %vm782_vm0, %v1942_v62  ;;  %v1938_v62 = vor.u32 %v2266_v46, %v1935_v48  ;;  %v1977_v48 = vld [vmem:[%s3491_s0 + $0x1e8] sm:$0xf] }
 0x120   :  { %v2367_v11 = vpack.c.bf16 %v1264_v1, %v1262_v51  ;;  %v1528_v13 = vadd.f32 %v1527_v54, %v1264_v1  ;;  %v1599_v14 = vmul.f32 %v1264_v1, %v1264_v1 }
 0x121   :  { %v3084_v15 = vpop.f32.mrf.mxu3  ;;  %v1271_v16 = vpop.f32.mrf.mxu2 }
 0x122   :  { %2495 = vst [vmem:[%s3493_s2 + $0x38] sm:$0xff] %v2367_v11   ;;  %v1662_v18 = vadd.f32 %v1661_v59, %v1599_v14  ;;  %v928_v20 = vpop.f32.mrf.mxu0 }
 0x123   :  { %v1097_v23 = vpop.f32.mrf.mxu1 }
 0x124   :  { %v1098_v24 = vadd.f32 %v1097_v23, %v928_v20  ;;  %v2269_v23 = vld [vmem:[%s3491_s0 + $0x1b4] sm:$0xf] }
 0x125   :  { %967 = vmatmul.bf16.gmra.mxu0 %v1922_v17  ;;  %v1966_v17 = vor.u32 %v2274_v5, %v1965_v4  ;;  %v1959_v4 = vld [vmem:[%s3491_s0 + $0x1d4] sm:$0xf0]  ;;  %v2085_v5 = vld [vmem:[%s3491_s0 + $0x2c0] sm:$0xf] }
 0x126   :  { %v1267_v25 = vadd.f32 %v1266_v40, %v1098_v24  ;;  %1136 = vmatmul.bf16.gmra.mxu1 %v1926_v21  ;;  %2209 = vmatmul.msk.bf16.vlgmr.msra.gmra.mxu3 %vm782_vm0, %v2050_v22  ;;  %v1945_v21 = vld [vmem:[%s3491_s0 + $0x1b0] sm:$0xf]  ;;  %v2270_v22 = vld [vmem:[%s3491_s0 + $0x1b8] sm:$0xf0]  ;;  %v1947_v24 = vld [vmem:[%s3491_s0 + $0x1bc] sm:$0xf0] }
 0x128   :  { %v1529_v30 = vadd.f32 %v1528_v13, %v1267_v25  ;;  %v1600_v32 = vmul.f32 %v1267_v25, %v1267_v25 }
 0x129   :  { %v3096_v33 = vpop.f32.mrf.mxu3  ;;  %v1273_v34 = vpop.f32.mrf.mxu2 }
 0x12a   :  { %v1663_v35 = vadd.f32 %v1662_v18, %v1600_v32  ;;  %v930_v36 = vpop.f32.mrf.mxu0 }
 0x12b   :  { %v1099_v38 = vpop.f32.mrf.mxu1 }
 0x12c   :  { %v1100_v40 = vadd.f32 %v1099_v38, %v930_v36  ;;  %v1946_v36 = vor.u32 %v2270_v22, %v1945_v21 }
 0x12e   :  { %v1269_v43 = vadd.f32 %v1268_v57, %v1100_v40  ;;  %2201 = vmatmul.msk.bf16.gmra.mxu2 %vm782_vm0, %v1954_v37  ;;  %v1934_v57 = vor.u32 %v2267_v45, %v1933_v44  ;;  %v1950_v40 = vor.u32 %v2269_v23, %v1947_v24 }
 0x130   :  { %v2372_v51 = vpack.c.bf16 %v1269_v43, %v1267_v25  ;;  %v1530_v52 = vadd.f32 %v1529_v30, %v1269_v43  ;;  %v1601_v53 = vmul.f32 %v1269_v43, %v1269_v43  ;;  %v2073_v25 = vld [vmem:[%s3491_s0 + $0x2a8] sm:$0xf] }
 0x131   :  { %v3117_v54 = vpop.f32.mrf.mxu3  ;;  %v1276_v55 = vpop.f32.mrf.mxu2  ;;  %v2074_v43 = vor.u32 %v2301_v28, %v2073_v25  ;;  %v1989_v28 = vld [vmem:[%s3491_s0 + $0x200] sm:$0xf] }
 0x132   :  { %2496 = vst [vmem:[%s3493_s2 + $0x40] sm:$0xff] %v2372_v51   ;;  %v1664_v59 = vadd.f32 %v1663_v35, %v1601_v53  ;;  %v933_v61 = vpop.f32.mrf.mxu0 }
 0x133   :  { %v1102_v0 = vpop.f32.mrf.mxu1 }
 0x134   :  { %v1103_v1 = vadd.f32 %v1102_v0, %v933_v61  ;;  %v1978_v61 = vor.u32 %v2277_v49, %v1977_v48  ;;  %v1957_v0 = vld [vmem:[%s3491_s0 + $0x1c8] sm:$0xf]  ;;  %v2276_v48 = vld [vmem:[%s3491_s0 + $0x1e8] sm:$0xf0]  ;;  %v2275_v49 = vld [vmem:[%s3491_s0 + $0x1e4] sm:$0xf] }
 0x135   :  { %972 = vmatmul.bf16.gmra.mxu0 %v1934_v57 }
 0x136   :  { %v1272_v3 = vadd.f32 %v1271_v16, %v1103_v1  ;;  %1141 = vmatmul.bf16.gmra.mxu1 %v1938_v62  ;;  %2210 = vmatmul.msk.bf16.gmra.mxu3 %vm782_vm0, %v2062_v63  ;;  %v2273_v1 = vld [vmem:[%s3491_s0 + $0x1d0] sm:$0xf0] }
 0x138   :  { %v1531_v6 = vadd.f32 %v1530_v52, %v1272_v3  ;;  %v1602_v7 = vmul.f32 %v1272_v3, %v1272_v3 }
 0x139   :  { %v3129_v10 = vpop.f32.mrf.mxu3  ;;  %v1278_v11 = vpop.f32.mrf.mxu2 }
 0x13a   :  { %v1665_v13 = vadd.f32 %v1664_v59, %v1602_v7  ;;  %v935_v14 = vpop.f32.mrf.mxu0 }
 0x13b   :  { %v1104_v16 = vpop.f32.mrf.mxu1 }
 0x13c   :  { %v1105_v18 = vadd.f32 %v1104_v16, %v935_v14  ;;  %v1958_v16 = vor.u32 %v2273_v1, %v1957_v0 }
 0x13e   :  { %v1274_v20 = vadd.f32 %v1273_v34, %v1105_v18  ;;  %2202 = vmatmul.msk.bf16.gmra.mxu2 %vm782_vm0, %v1966_v17 }
 0x140   :  { %v2377_v29 = vpack.c.bf16 %v1274_v20, %v1272_v3  ;;  %v1532_v30 = vadd.f32 %v1531_v6, %v1274_v20  ;;  %v1603_v32 = vmul.f32 %v1274_v20, %v1274_v20  ;;  %v2272_v3 = vld [vmem:[%s3491_s0 + $0x1cc] sm:$0xf] }
 0x141   :  { %v3150_v34 = vpop.f32.mrf.mxu3  ;;  %v1281_v35 = vpop.f32.mrf.mxu2  ;;  %v2304_v6 = vld [vmem:[%s3491_s0 + $0x2c8] sm:$0xf0]  ;;  %v1962_v21 = vor.u32 %v2272_v3, %v1959_v4 }
 0x142   :  { %2497 = vst [vmem:[%s3493_s2 + $0x48] sm:$0xff] %v2377_v29   ;;  %v1666_v37 = vadd.f32 %v1665_v13, %v1603_v32  ;;  %v938_v38 = vpop.f32.mrf.mxu0  ;;  %v2086_v22 = vor.u32 %v2304_v6, %v2085_v5  ;;  %v2280_v29 = vld [vmem:[%s3491_s0 + $0x208] sm:$0xf0] }
 0x143   :  { %v1107_v44 = vpop.f32.mrf.mxu1 }
 0x144   :  { %v1108_v45 = vadd.f32 %v1107_v44, %v938_v38 }
 0x145   :  { %977 = vmatmul.bf16.gmra.mxu0 %v1946_v36 }
 0x146   :  { %v1277_v46 = vadd.f32 %v1276_v55, %v1108_v45  ;;  %1146 = vmatmul.bf16.gmra.mxu1 %v1950_v40  ;;  %2211 = vmatmul.msk.bf16.gmra.mxu3 %vm782_vm0, %v2074_v43  ;;  %v1990_v43 = vor.u32 %v2280_v29, %v1989_v28  ;;  %v1981_v29 = vld [vmem:[%s3491_s0 + $0x1f8] sm:$0xf] }
 0x148   :  { %v1533_v50 = vadd.f32 %v1532_v30, %v1277_v46  ;;  %v1604_v51 = vmul.f32 %v1277_v46, %v1277_v46 }
 0x149   :  { %v3162_v52 = vpop.f32.mrf.mxu3  ;;  %v1283_v53 = vpop.f32.mrf.mxu2 }
 0x14a   :  { %v1667_v57 = vadd.f32 %v1666_v37, %v1604_v51  ;;  %v940_v59 = vpop.f32.mrf.mxu0  ;;  %v2097_v51 = vld [vmem:[%s3491_s0 + $0x2d8] sm:$0xf] }
 0x14b   :  { %v1109_v55 = vpop.f32.mrf.mxu1 }
 0x14c   :  { %v1110_v62 = vadd.f32 %v1109_v55, %v940_v59 }
 0x14e   :  { %v1279_v63 = vadd.f32 %v1278_v11, %v1110_v62  ;;  %2203 = vmatmul.msk.bf16.gmra.mxu2 %vm782_vm0, %v1978_v61 }
 0x150   :  { %v2382_v7 = vpack.c.bf16 %v1279_v63, %v1277_v46  ;;  %v1534_v11 = vadd.f32 %v1533_v50, %v1279_v63  ;;  %v1605_v13 = vmul.f32 %v1279_v63, %v1279_v63  ;;  %v1969_v46 = vld [vmem:[%s3491_s0 + $0x1e0] sm:$0xf]  ;;  %v1971_v50 = vld [vmem:[%s3491_s0 + $0x1ec] sm:$0xf0] }
 0x151   :  { %v3183_v14 = vpop.f32.mrf.mxu3  ;;  %v1286_v17 = vpop.f32.mrf.mxu2  ;;  %v1970_v63 = vor.u32 %v2276_v48, %v1969_v46  ;;  %v1974_v3 = vor.u32 %v2275_v49, %v1971_v50 }
 0x152   :  { %2498 = vst [vmem:[%s3493_s2 + $0x50] sm:$0xff] %v2382_v7   ;;  %v1668_v18 = vadd.f32 %v1667_v57, %v1605_v13  ;;  %v943_v20 = vpop.f32.mrf.mxu0  ;;  %v2283_v13 = vld [vmem:[%s3491_s0 + $0x220] sm:$0xf0] }
 0x153   :  { %v1112_v23 = vpop.f32.mrf.mxu1 }
 0x154   :  { %v1113_v24 = vadd.f32 %v1112_v23, %v943_v20 }
 0x155   :  { %982 = vmatmul.bf16.gmra.mxu0 %v1958_v16 }
 0x156   :  { %v1282_v25 = vadd.f32 %v1281_v35, %v1113_v24  ;;  %1151 = vmatmul.bf16.gmra.mxu1 %v1962_v21  ;;  %2212 = vmatmul.msk.bf16.gmra.mxu3 %vm782_vm0, %v2086_v22 }
 0x158   :  { %v1535_v30 = vadd.f32 %v1534_v11, %v1282_v25  ;;  %v1606_v32 = vmul.f32 %v1282_v25, %v1282_v25  ;;  %v2001_v11 = vld [vmem:[%s3491_s0 + $0x218] sm:$0xf] }
 0x159   :  { %v3195_v36 = vpop.f32.mrf.mxu3  ;;  %v1288_v37 = vpop.f32.mrf.mxu2  ;;  %v2002_v24 = vor.u32 %v2283_v13, %v2001_v11 }
 0x15a   :  { %v1669_v38 = vadd.f32 %v1668_v18, %v1606_v32  ;;  %v945_v40 = vpop.f32.mrf.mxu0  ;;  %v2278_v32 = vld [vmem:[%s3491_s0 + $0x1fc] sm:$0xf] }
 0x15b   :  { %v1114_v35 = vpop.f32.mrf.mxu1 }
 0x15c   :  { %v1115_v44 = vadd.f32 %v1114_v35, %v945_v40  ;;  %v2310_v40 = vld [vmem:[%s3491_s0 + $0x2f8] sm:$0xf0] }
 0x15e   :  { %v1284_v45 = vadd.f32 %v1283_v53, %v1115_v44  ;;  %2204 = vmatmul.msk.bf16.gmra.mxu2 %vm782_vm0, %v1990_v43  ;;  %v2307_v53 = vld [vmem:[%s3491_s0 + $0x2e0] sm:$0xf0] }
 0x15f   :  { %v2098_v4 = vor.u32 %v2307_v53, %v2097_v51 }
 0x160   :  { %v2387_v57 = vpack.c.bf16 %v1284_v45, %v1282_v25  ;;  %v1536_v59 = vadd.f32 %v1535_v30, %v1284_v45  ;;  %v1607_v61 = vmul.f32 %v1284_v45, %v1284_v45  ;;  %v2279_v30 = vld [vmem:[%s3491_s0 + $0x200] sm:$0xf0] }
 0x161   :  { %v3216_v55 = vpop.f32.mrf.mxu3  ;;  %v1291_v62 = vpop.f32.mrf.mxu2  ;;  %v1982_v48 = vor.u32 %v2279_v30, %v1981_v29 }
 0x162   :  { %2499 = vst [vmem:[%s3493_s2 + $0x58] sm:$0xff] %v2387_v57   ;;  %v1670_v0 = vadd.f32 %v1669_v38, %v1607_v61  ;;  %v948_v1 = vpop.f32.mrf.mxu0  ;;  %v1983_v38 = vld [vmem:[%s3491_s0 + $0x204] sm:$0xf0] }
 0x163   :  { %v1117_v5 = vpop.f32.mrf.mxu1  ;;  %v1986_v51 = vor.u32 %v2278_v32, %v1983_v38 }
 0x164   :  { %v1118_v6 = vadd.f32 %v1117_v5, %v948_v1 }
 0x165   :  { %987 = vmatmul.bf16.gmra.mxu0 %v1970_v63  ;;  %v2013_v63 = vld [vmem:[%s3491_s0 + $0x230] sm:$0xf] }
 0x166   :  { %v1287_v7 = vadd.f32 %v1286_v17, %v1118_v6  ;;  %1156 = vmatmul.bf16.gmra.mxu1 %v1974_v3  ;;  %2213 = vmatmul.msk.bf16.gmra.mxu3 %vm782_vm0, %v2098_v4 }
 0x168   :  { %v1537_v16 = vadd.f32 %v1536_v59, %v1287_v7  ;;  %v1608_v18 = vmul.f32 %v1287_v7, %v1287_v7 }
 0x169   :  { %v3228_v20 = vpop.f32.mrf.mxu3  ;;  %v1293_v21 = vpop.f32.mrf.mxu2 }
 0x16a   :  { %v1671_v22 = vadd.f32 %v1670_v0, %v1608_v18  ;;  %v950_v23 = vpop.f32.mrf.mxu0  ;;  %v2286_v0 = vld [vmem:[%s3491_s0 + $0x238] sm:$0xf0]  ;;  %v1993_v18 = vld [vmem:[%s3491_s0 + $0x210] sm:$0xf] }
 0x16b   :  { %v1119_v17 = vpop.f32.mrf.mxu1  ;;  %v2014_v11 = vor.u32 %v2286_v0, %v2013_v63 }
 0x16c   :  { %v1120_v25 = vadd.f32 %v1119_v17, %v950_v23  ;;  %v2281_v23 = vld [vmem:[%s3491_s0 + $0x214] sm:$0xf] }
 0x16e   :  { %v1289_v28 = vadd.f32 %v1288_v37, %v1120_v25  ;;  %2205 = vmatmul.msk.bf16.gmra.mxu2 %vm782_vm0, %v2002_v24  ;;  %v2109_v37 = vld [vmem:[%s3491_s0 + $0x2f0] sm:$0xf]  ;;  %v1995_v24 = vld [vmem:[%s3491_s0 + $0x21c] sm:$0xf0] }
 0x16f   :  { %v2110_v53 = vor.u32 %v2310_v40, %v2109_v37  ;;  %v1998_v37 = vor.u32 %v2281_v23, %v1995_v24 }
 0x170   :  { %v2392_v43 = vpack.c.bf16 %v1289_v28, %v1287_v7  ;;  %v1538_v35 = vadd.f32 %v1537_v16, %v1289_v28  ;;  %v1609_v44 = vmul.f32 %v1289_v28, %v1289_v28 }
 0x171   :  { %v3249_v45 = vpop.f32.mrf.mxu3  ;;  %v1296_v46 = vpop.f32.mrf.mxu2 }
 0x172   :  { %2500 = vst [vmem:[%s3493_s2 + $0x60] sm:$0xff] %v2392_v43   ;;  %v1672_v49 = vadd.f32 %v1671_v22, %v1609_v44  ;;  %v953_v50 = vpop.f32.mrf.mxu0  ;;  %v2282_v22 = vld [vmem:[%s3491_s0 + $0x218] sm:$0xf0]  ;;  %v2025_v44 = vld [vmem:[%s3491_s0 + $0x248] sm:$0xf] }
 0x173   :  { %v1122_v57 = vpop.f32.mrf.mxu1  ;;  %v1994_v30 = vor.u32 %v2282_v22, %v1993_v18 }
 0x174   :  { %v1123_v59 = vadd.f32 %v1122_v57, %v953_v50 }
 0x175   :  { %992 = vmatmul.bf16.gmra.mxu0 %v1982_v48  ;;  %v2289_v48 = vld [vmem:[%s3491_s0 + $0x250] sm:$0xf0] }
 0x176   :  { %v1292_v61 = vadd.f32 %v1291_v62, %v1123_v59  ;;  %1161 = vmatmul.bf16.gmra.mxu1 %v1986_v51  ;;  %2214 = vmatmul.msk.bf16.gmra.mxu3 %vm782_vm0, %v2110_v53 }
 0x178   :  { %v1539_v1 = vadd.f32 %v1538_v35, %v1292_v61  ;;  %v1610_v3 = vmul.f32 %v1292_v61, %v1292_v61 }
 0x179   :  { %v3261_v4 = vpop.f32.mrf.mxu3  ;;  %v1298_v5 = vpop.f32.mrf.mxu2 }
 0x17a   :  { %v1673_v6 = vadd.f32 %v1672_v49, %v1610_v3  ;;  %v955_v7 = vpop.f32.mrf.mxu0  ;;  %v2285_v3 = vld [vmem:[%s3491_s0 + $0x230] sm:$0xf0] }
 0x17b   :  { %v1124_v62 = vpop.f32.mrf.mxu1 }
 0x17c   :  { %v1125_v13 = vadd.f32 %v1124_v62, %v955_v7  ;;  %v2007_v7 = vld [vmem:[%s3491_s0 + $0x234] sm:$0xf0] }
 0x17e   :  { %v1294_v16 = vadd.f32 %v1293_v21, %v1125_v13  ;;  %2206 = vmatmul.msk.bf16.gmra.mxu2 %vm782_vm0, %v2014_v11 }
 0x180   :  { %v2397_v17 = vpack.c.bf16 %v1294_v16, %v1292_v61  ;;  %v1540_v21 = vadd.f32 %v1539_v1, %v1294_v16  ;;  %v1611_v25 = vmul.f32 %v1294_v16, %v1294_v16  ;;  %v2026_v61 = vor.u32 %v2289_v48, %v2025_v44  ;;  %v2005_v1 = vld [vmem:[%s3491_s0 + $0x228] sm:$0xf] }
 0x181   :  { %v3276_v28 = vpop.f32.mrf.mxu3  ;;  %v1301_v29 = vpop.f32.mrf.mxu2  ;;  %v2006_v18 = vor.u32 %v2285_v3, %v2005_v1 }
 0x182   :  { %2501 = vst [vmem:[%s3493_s2 + $0x68] sm:$0xff] %v2397_v17   ;;  %v1674_v32 = vadd.f32 %v1673_v6, %v1611_v25  ;;  %v958_v38 = vpop.f32.mrf.mxu0  ;;  %v2284_v6 = vld [vmem:[%s3491_s0 + $0x22c] sm:$0xf] }
 0x183   :  { %v1127_v40 = vpop.f32.mrf.mxu1  ;;  %v2010_v24 = vor.u32 %v2284_v6, %v2007_v7 }
 0x184   :  { %v1128_v43 = vadd.f32 %v1127_v40, %v958_v38 }
 0x185   :  { %997 = vmatmul.bf16.gmra.mxu0 %v1994_v30  ;;  %v2037_v30 = vld [vmem:[%s3491_s0 + $0x260] sm:$0xf] }
 0x186   :  { %v1297_v35 = vadd.f32 %v1296_v46, %v1128_v43  ;;  %1166 = vmatmul.bf16.gmra.mxu1 %v1998_v37 }
 0x188   :  { %v1541_v49 = vadd.f32 %v1540_v21, %v1297_v35  ;;  %v1612_v50 = vmul.f32 %v1297_v35, %v1297_v35 }
 0x189   :  { %v3287_v51 = vpop.f32.mrf.mxu3  ;;  %v1303_v53 = vpop.f32.mrf.mxu2 }
 0x18a   :  { %v1675_v57 = vadd.f32 %v1674_v32, %v1612_v50  ;;  %v960_v59 = vpop.f32.mrf.mxu0  ;;  %v2292_v32 = vld [vmem:[%s3491_s0 + $0x268] sm:$0xf0] }
 0x18b   :  { %v1129_v63 = vpop.f32.mrf.mxu1  ;;  %v2038_v48 = vor.u32 %v2292_v32, %v2037_v30 }
 0x18c   :  { %v1130_v0 = vadd.f32 %v1129_v63, %v960_v59 }
 0x18e   :  { %v1299_v46 = vadd.f32 %v1298_v5, %v1130_v0  ;;  %2207 = vmatmul.msk.bf16.gmra.mxu2 %vm782_vm0, %v2026_v61 }
 0x190   :  { %v2402_v11 = vpack.c.bf16 %v1299_v46, %v1297_v35  ;;  %v1542_v5 = vadd.f32 %v1541_v49, %v1299_v46  ;;  %v1613_v62 = vmul.f32 %v1299_v46, %v1299_v46 }
 0x191   :  { %v3302_v13 = vpop.f32.mrf.mxu3  ;;  %v1306_v16 = vpop.f32.mrf.mxu2 }
 0x192   :  { %2502 = vst [vmem:[%s3493_s2 + $0x70] sm:$0xff] %v2402_v11   ;;  %v1676_v22 = vadd.f32 %v1675_v57, %v1613_v62  ;;  %v963_v23 = vpop.f32.mrf.mxu0 }
 0x193   :  { %v1132_v17 = vpop.f32.mrf.mxu1 }
 0x194   :  { %v1133_v21 = vadd.f32 %v1132_v17, %v963_v23 }
 0x195   :  { %1002 = vmatmul.bf16.gmra.mxu0 %v2006_v18 }
 0x196   :  { %v1302_v25 = vadd.f32 %v1301_v29, %v1133_v21  ;;  %1171 = vmatmul.bf16.gmra.mxu1 %v2010_v24  ;;  %v1188_v21 = vadd.f32 %v3162_v52, %v2903_v8 }
 0x198   :  { %v1543_v38 = vadd.f32 %v1542_v5, %v1302_v25  ;;  %v1614_v37 = vmul.f32 %v1302_v25, %v1302_v25 }
 0x199   :  { %v3313_v40 = vpop.f32.mrf.mxu3  ;;  %v1308_v43 = vpop.f32.mrf.mxu2 }
 0x19a   :  { %v1677_v35 = vadd.f32 %v1676_v22, %v1614_v37  ;;  %v965_v44 = vpop.f32.mrf.mxu0 }
 0x19b   :  { %v1134_v49 = vpop.f32.mrf.mxu1 }
 0x19c   :  { %v1135_v50 = vadd.f32 %v1134_v49, %v965_v44 }
 0x19e   :  { %v1304_v29 = vadd.f32 %v1303_v53, %v1135_v50  ;;  %2208 = vmatmul.msk.bf16.gmra.mxu2 %vm782_vm0, %v2038_v48 }
 0x1a0   :  { %v2407_v57 = vpack.c.bf16 %v1304_v29, %v1302_v25  ;;  %v1544_v59 = vadd.f32 %v1543_v38, %v1304_v29  ;;  %v1615_v61 = vmul.f32 %v1304_v29, %v1304_v29  ;;  %v1190_v25 = vadd.f32 %v3183_v14, %v2924_v26 }
 0x1a1   :  { %v3316_v63 = vpop.f32.mrf.mxu3  ;;  %v1311_v0 = vpop.f32.mrf.mxu2 }
 0x1a2   :  { %2503 = vst [vmem:[%s3493_s2 + $0x78] sm:$0xff] %v2407_v57   ;;  %v1678_v46 = vadd.f32 %v1677_v35, %v1615_v61  ;;  %v968_v1 = vpop.f32.mrf.mxu0 }
 0x1a3   :  { %v1137_v3 = vpop.f32.mrf.mxu1 }
 0x1a4   :  { %v1138_v6 = vadd.f32 %v1137_v3, %v968_v1 }
 0x1a6   :  { %v1307_v7 = vadd.f32 %v1306_v16, %v1138_v6  ;;  %v1193_v6 = vadd.f32 %v3195_v36, %v2935_v42 }
 0x1a8   :  { %v1545_v11 = vadd.f32 %v1544_v59, %v1307_v7  ;;  %v1616_v5 = vmul.f32 %v1307_v7, %v1307_v7 }
 0x1a9   :  { %v1313_v53 = vpop.f32.mrf.mxu2  ;;  %v1356_v62 = vpop.f32.mrf.mxu3 }
 0x1aa   :  { %v1679_v18 = vadd.f32 %v1678_v46, %v1616_v5  ;;  %v970_v22 = vpop.f32.mrf.mxu0  ;;  %v3325_v35 = vadd.f32 %v1356_v62, %v1188_v21 }
 0x1ab   :  { %v1139_v23 = vpop.f32.mrf.mxu1 }
 0x1ac   :  { %v1140_v24 = vadd.f32 %v1139_v23, %v970_v22 }
 0x1ae   :  { %v1309_v17 = vadd.f32 %v1308_v43, %v1140_v24 }
 0x1b0   :  { %v2412_v30 = vpack.c.bf16 %v1309_v17, %v1307_v7  ;;  %v1546_v32 = vadd.f32 %v1545_v11, %v1309_v17  ;;  %v1617_v38 = vmul.f32 %v1309_v17, %v1309_v17  ;;  %v1195_v7 = vadd.f32 %v3216_v55, %v2956_v60 }
 0x1b1   :  { %v1316_v37 = vpop.f32.mrf.mxu2  ;;  %v1358_v16 = vpop.f32.mrf.mxu3 }
 0x1b2   :  { %2504 = vst [vmem:[%s3493_s2 + $0x80] sm:$0xff] %v2412_v30   ;;  %v1680_v44 = vadd.f32 %v1679_v18, %v1617_v38  ;;  %v3330_v48 = vadd.f32 %v1358_v16, %v1190_v25  ;;  %v973_v43 = vpop.f32.mrf.mxu0 }
 0x1b3   :  { %v1142_v49 = vpop.f32.mrf.mxu1 }
 0x1b4   :  { %v2462_v8 = vpack.c.bf16 %v3330_v48, %v3325_v35  ;;  %v1143_v26 = vadd.f32 %v1142_v49, %v973_v43  ;;  %v1198_v43 = vadd.f32 %v3228_v20, %v2967_v12  ;;  %v1200_v49 = vadd.f32 %v3249_v45, %v2988_v31 }
 0x1b6   :  { %2514 = vst [vmem:[%s3493_s2 + $0xd0] sm:$0xff] %v2462_v8   ;;  %v1312_v52 = vadd.f32 %v1311_v0, %v1143_v26 }
 0x1b8   :  { %v1547_v14 = vadd.f32 %v1546_v32, %v1312_v52  ;;  %v1618_v50 = vmul.f32 %v1312_v52, %v1312_v52 }
 0x1b9   :  { %v1318_v29 = vpop.f32.mrf.mxu2  ;;  %v1361_v57 = vpop.f32.mrf.mxu3 }
 0x1ba   :  { %v1681_v59 = vadd.f32 %v1680_v44, %v1618_v50  ;;  %v975_v61 = vpop.f32.mrf.mxu0  ;;  %v3341_v22 = vadd.f32 %v1361_v57, %v1193_v6 }
 0x1bb   :  { %v1144_v46 = vpop.f32.mrf.mxu1 }
 0x1bc   :  { %v1145_v1 = vadd.f32 %v1144_v46, %v975_v61 }
 0x1be   :  { %v1314_v3 = vadd.f32 %v1313_v53, %v1145_v1 }
 0x1c0   :  { %v2417_v11 = vpack.c.bf16 %v1314_v3, %v1312_v52  ;;  %v1548_v5 = vadd.f32 %v1547_v14, %v1314_v3  ;;  %v1619_v62 = vmul.f32 %v1314_v3, %v1314_v3 }
 0x1c1   :  { %v1321_v18 = vpop.f32.mrf.mxu2  ;;  %v1363_v0 = vpop.f32.mrf.mxu3 }
 0x1c2   :  { %2505 = vst [vmem:[%s3493_s2 + $0x88] sm:$0xff] %v2417_v11   ;;  %v1682_v23 = vadd.f32 %v1681_v59, %v1619_v62  ;;  %v3346_v24 = vadd.f32 %v1363_v0, %v1195_v7  ;;  %v978_v53 = vpop.f32.mrf.mxu0  ;;  %v1205_v62 = vadd.f32 %v3276_v28, %v3020_v2 }
 0x1c3   :  { %v1147_v17 = vpop.f32.mrf.mxu1 }
 0x1c4   :  { %v2467_v42 = vpack.c.bf16 %v3346_v24, %v3341_v22  ;;  %v1148_v60 = vadd.f32 %v1147_v17, %v978_v53 }
 0x1c6   :  { %2515 = vst [vmem:[%s3493_s2 + $0xd8] sm:$0xff] %v2467_v42   ;;  %v1317_v36 = vadd.f32 %v1316_v37, %v1148_v60 }
 0x1c8   :  { %v1620_v32 = vmul.f32 %v1317_v36, %v1317_v36  ;;  %v1549_v16 = vadd.f32 %v1548_v5, %v1317_v36  ;;  %v1203_v5 = vadd.f32 %v3261_v4, %v2999_v47 }
 0x1c9   :  { %v1323_v55 = vpop.f32.mrf.mxu2  ;;  %v1366_v21 = vpop.f32.mrf.mxu3 }
 0x1ca   :  { %v980_v25 = vpop.f32.mrf.mxu0  ;;  %v1683_v8 = vadd.f32 %v1682_v23, %v1620_v32  ;;  %v3359_v57 = vadd.f32 %v1366_v21, %v1198_v43  ;;  %v1208_v32 = vadd.f32 %v3287_v51, %v3031_v19 }
 0x1cb   :  { %v1149_v30 = vpop.f32.mrf.mxu1 }
 0x1cc   :  { %v1150_v38 = vadd.f32 %v1149_v30, %v980_v25 }
 0x1ce   :  { %v1319_v44 = vadd.f32 %v1318_v29, %v1150_v38  ;;  %v1210_v38 = vadd.f32 %v3302_v13, %v3052_v39 }
 0x1d0   :  { %v2422_v26 = vpack.c.bf16 %v1319_v44, %v1317_v36  ;;  %v3357_v52 = vadd.f32 %v1549_v16, %v1319_v44  ;;  %v1621_v14 = vmul.f32 %v1319_v44, %v1319_v44 }
 0x1d1   :  { %v1326_v37 = vpop.f32.mrf.mxu2  ;;  %v1368_v50 = vpop.f32.mrf.mxu3 }
 0x1d2   :  { %2506 = vst [vmem:[%s3493_s2 + $0x90] sm:$0xff] %v2422_v26   ;;  %v3364_v29 = vadd.f32 %v1683_v8, %v1621_v14  ;;  %v3366_v59 = vadd.f32 %v1368_v50, %v1200_v49  ;;  %v983_v12 = vpop.f32.mrf.mxu0 }
 0x1d3   :  { %v1152_v20 = vpop.f32.mrf.mxu1 }
 0x1d4   :  { %v2472_v31 = vpack.c.bf16 %v3366_v59, %v3359_v57  ;;  %v1153_v46 = vadd.f32 %v1152_v20, %v983_v12 }
 0x1d6   :  { %2516 = vst [vmem:[%s3493_s2 + $0xe0] sm:$0xff] %v2472_v31   ;;  %v1322_v7 = vadd.f32 %v1321_v18, %v1153_v46 }
 0x1d9   :  { %v1328_v45 = vpop.f32.mrf.mxu2  ;;  %v1371_v61 = vpop.f32.mrf.mxu3 }
 0x1da   :  { %v985_v1 = vpop.f32.mrf.mxu0  ;;  %v3380_v17 = vadd.f32 %v1371_v61, %v1203_v5  ;;  %v1215_v61 = vadd.f32 %v3316_v63, %v3084_v15  ;;  %v1622_v63 = vmul.f32 %v1322_v7, %v1322_v7 }
 0x1db   :  { %v1154_v3 = vpop.f32.mrf.mxu1 }
 0x1dc   :  { %v1155_v6 = vadd.f32 %v1154_v3, %v985_v1 }
 0x1de   :  { %v3373_v11 = vadd.f32 %v1323_v55, %v1155_v6 }
 0x1e0   :  { %v2427_v0 = vpack.c.bf16 %v3373_v11, %v1322_v7 }
 0x1e1   :  { %v1331_v23 = vpop.f32.mrf.mxu2  ;;  %v1373_v53 = vpop.f32.mrf.mxu3 }
 0x1e2   :  { %2507 = vst [vmem:[%s3493_s2 + $0x98] sm:$0xff] %v2427_v0   ;;  %v3385_v42 = vadd.f32 %v1373_v53, %v1205_v62  ;;  %v988_v18 = vpop.f32.mrf.mxu0 }
 0x1e3   :  { %v1157_v60 = vpop.f32.mrf.mxu1 }
 0x1e4   :  { %v2477_v47 = vpack.c.bf16 %v3385_v42, %v3380_v17  ;;  %v1158_v28 = vadd.f32 %v1157_v60, %v988_v18  ;;  %v1623_v60 = vmul.f32 %v3373_v11, %v3373_v11 }
 0x1e6   :  { %2517 = vst [vmem:[%s3493_s2 + $0xe8] sm:$0xff] %v2477_v47   ;;  %v1327_v25 = vadd.f32 %v1326_v37, %v1158_v28  ;;  %v1551_v47 = vadd.f32 %v3357_v52, %v1322_v7  ;;  %v1685_v28 = vadd.f32 %v3364_v29, %v1622_v63 }
 0x1e9   :  { %v1333_v2 = vpop.f32.mrf.mxu2  ;;  %v1376_v4 = vpop.f32.mrf.mxu3 }
 0x1ea   :  { %v990_v36 = vpop.f32.mrf.mxu0  ;;  %v3396_v49 = vadd.f32 %v1376_v4, %v1208_v32  ;;  %v1686_v32 = vadd.f32 %v1685_v28, %v1623_v60 }
 0x1eb   :  { %v1159_v55 = vpop.f32.mrf.mxu1 }
 0x1ec   :  { %v1160_v21 = vadd.f32 %v1159_v55, %v990_v36  ;;  %v1624_v36 = vmul.f32 %v1327_v25, %v1327_v25  ;;  %v1552_v55 = vadd.f32 %v1551_v47, %v3373_v11 }
 0x1ee   :  { %v1329_v30 = vadd.f32 %v1328_v45, %v1160_v21  ;;  %v1213_v45 = vadd.f32 %v3313_v40, %v3063_v56 }
 0x1f0   :  { %v2432_v16 = vpack.c.bf16 %v1329_v30, %v1327_v25 }
 0x1f1   :  { %v1336_v44 = vpop.f32.mrf.mxu2  ;;  %v1378_v43 = vpop.f32.mrf.mxu3 }
 0x1f2   :  { %2508 = vst [vmem:[%s3493_s2 + $0xa0] sm:$0xff] %v2432_v16   ;;  %v3401_v8 = vadd.f32 %v1378_v43, %v1210_v38  ;;  %v993_v26 = vpop.f32.mrf.mxu0  ;;  %v1625_v38 = vmul.f32 %v1329_v30, %v1329_v30  ;;  %v1553_v43 = vadd.f32 %v1552_v55, %v1327_v25  ;;  %v1180_v25 = vadd.f32 %v3117_v54, %v2860_v27 }
 0x1f3   :  { %v1162_v14 = vpop.f32.mrf.mxu1 }
 0x1f4   :  { %v2482_v37 = vpack.c.bf16 %v3401_v8, %v3396_v49  ;;  %v1163_v51 = vadd.f32 %v1162_v14, %v993_v26  ;;  %v1687_v14 = vadd.f32 %v1686_v32, %v1624_v36  ;;  %v1554_v7 = vadd.f32 %v1553_v43, %v1329_v30 }
 0x1f6   :  { %2518 = vst [vmem:[%s3493_s2 + $0xf0] sm:$0xff] %v2482_v37   ;;  %v1332_v20 = vadd.f32 %v1331_v23, %v1163_v51 }
 0x1f8   :  { %v1626_v37 = vmul.f32 %v1332_v20, %v1332_v20 }
 0x1f9   :  { %v1338_v19 = vpop.f32.mrf.mxu2  ;;  %v1381_v39 = vpop.f32.mrf.mxu3 }
 0x1fa   :  { %v995_v13 = vpop.f32.mrf.mxu0  ;;  %v3412_v6 = vadd.f32 %v1381_v39, %v1213_v45  ;;  %v1555_v39 = vadd.f32 %v1554_v7, %v1332_v20  ;;  %v1636_v7 = vmul.f32 %v3325_v35, %v3325_v35 }
 0x1fb   :  { %v1164_v50 = vpop.f32.mrf.mxu1 }
 0x1fc   :  { %v1165_v12 = vadd.f32 %v1164_v50, %v995_v13  ;;  %v1178_v13 = vadd.f32 %v3096_v33, %v2839_v9  ;;  %v1183_v33 = vadd.f32 %v3129_v10, %v2871_v41  ;;  %v1185_v41 = vadd.f32 %v3150_v34, %v2892_v58 }
 0x1fe   :  { %v1334_v31 = vadd.f32 %v1333_v2, %v1165_v12 }
 0x200   :  { %v2437_v46 = vpack.c.bf16 %v1334_v31, %v1332_v20  ;;  %v1627_v29 = vmul.f32 %v1334_v31, %v1334_v31  ;;  %v1556_v50 = vadd.f32 %v1555_v39, %v1334_v31  ;;  %v1638_v39 = vmul.f32 %v3341_v22, %v3341_v22 }
 0x201   :  { %v1341_v1 = vpop.f32.mrf.mxu2  ;;  %v1383_v3 = vpop.f32.mrf.mxu3 }
 0x202   :  { %2509 = vst [vmem:[%s3493_s2 + $0xa8] sm:$0xff] %v2437_v46   ;;  %v3417_v5 = vadd.f32 %v1383_v3, %v1215_v61  ;;  %v998_v62 = vpop.f32.mrf.mxu0 }
 0x203   :  { %v1167_v0 = vpop.f32.mrf.mxu1 }
 0x204   :  { %v2487_v23 = vpack.c.bf16 %v3417_v5, %v3412_v6  ;;  %v1168_v15 = vadd.f32 %v1167_v0, %v998_v62 }
 0x206   :  { %2519 = vst [vmem:[%s3493_s2 + $0xf8] sm:$0xff] %v2487_v23   ;;  %v1337_v2 = vadd.f32 %v1336_v44, %v1168_v15 }
 0x208   :  { %v1628_v11 = vmul.f32 %v1337_v2, %v1337_v2  ;;  %v1557_v46 = vadd.f32 %v1556_v50, %v1337_v2 }
 0x209   :  { %v1343_v56 = vpop.f32.mrf.mxu2 }
 0x20a   :  { %v1000_v40 = vpop.f32.mrf.mxu0 }
 0x20b   :  { %v1169_v53 = vpop.f32.mrf.mxu1 }
 0x20c   :  { %v1170_v18 = vadd.f32 %v1169_v53, %v1000_v40 }
 0x20e   :  { %v1339_v4 = vadd.f32 %v1338_v19, %v1170_v18  ;;  %v1688_v19 = vadd.f32 %v1687_v14, %v1625_v38 }
 0x210   :  { %v2442_v21 = vpack.c.bf16 %v1339_v4, %v1337_v2  ;;  %v1689_v51 = vadd.f32 %v1688_v19, %v1626_v37  ;;  %v1629_v3 = vmul.f32 %v1339_v4, %v1339_v4  ;;  %v1558_v20 = vadd.f32 %v1557_v46, %v1339_v4 }
 0x211   :  { %v1346_v16 = vpop.f32.mrf.mxu2 }
 0x212   :  { %2510 = vst [vmem:[%s3493_s2 + $0xb0] sm:$0xff] %v2442_v21   ;;  %v1003_v26 = vpop.f32.mrf.mxu0  ;;  %v1690_v45 = vadd.f32 %v1689_v51, %v1627_v29  ;;  %v1347_v62 = vadd.f32 %v1346_v16, %v1178_v13  ;;  %v1637_v29 = vmul.f32 %v3330_v48, %v3330_v48  ;;  %v1639_v13 = vmul.f32 %v3346_v24, %v3346_v24 }
 0x213   :  { %v1172_v52 = vpop.f32.mrf.mxu1 }
 0x214   :  { %v1173_v44 = vadd.f32 %v1172_v52, %v1003_v26  ;;  %v1691_v23 = vadd.f32 %v1690_v45, %v1628_v11  ;;  %v1632_v2 = vmul.f32 %v1347_v62, %v1347_v62 }
 0x216   :  { %v1342_v12 = vadd.f32 %v1341_v1, %v1173_v44  ;;  %v1692_v18 = vadd.f32 %v1691_v23, %v1629_v3 }
 0x218   :  { %v1630_v40 = vmul.f32 %v1342_v12, %v1342_v12  ;;  %v1559_v9 = vadd.f32 %v1558_v20, %v1342_v12 }
 0x219   :  { %v1348_v61 = vpop.f32.mrf.mxu2 }
 0x21a   :  { %v1349_v30 = vadd.f32 %v1348_v61, %v1180_v25  ;;  %v1005_v0 = vpop.f32.mrf.mxu0  ;;  %v1693_v54 = vadd.f32 %v1692_v18, %v1630_v40 }
 0x21b   :  { %v1174_v15 = vpop.f32.mrf.mxu1 }
 0x21c   :  { %v2452_v63 = vpack.c.bf16 %v1349_v30, %v1347_v62  ;;  %v1175_v53 = vadd.f32 %v1174_v15, %v1005_v0  ;;  %v1633_v55 = vmul.f32 %v1349_v30, %v1349_v30 }
 0x21e   :  { %2512 = vst [vmem:[%s3493_s2 + $0xc0] sm:$0xff] %v2452_v63   ;;  %v1344_v27 = vadd.f32 %v1343_v56, %v1175_v53 }
 0x220   :  { %v2447_v31 = vpack.c.bf16 %v1344_v27, %v1342_v12  ;;  %v1560_v1 = vadd.f32 %v1559_v9, %v1344_v27  ;;  %v1631_v60 = vmul.f32 %v1344_v27, %v1344_v27 }
 0x221   :  { %v1351_v47 = vpop.f32.mrf.mxu2 }
 0x222   :  { %2511 = vst [vmem:[%s3493_s2 + $0xb8] sm:$0xff] %v2447_v31   ;;  %v1694_v4 = vadd.f32 %v1693_v54, %v1631_v60  ;;  %v1352_v28 = vadd.f32 %v1351_v47, %v1183_v33  ;;  %v1561_v36 = vadd.f32 %v1560_v1, %v1347_v62 }
 0x224   :  { %v1562_v21 = vadd.f32 %v1561_v36, %v1349_v30  ;;  %v1695_v32 = vadd.f32 %v1694_v4, %v1632_v2  ;;  %v1634_v38 = vmul.f32 %v1352_v28, %v1352_v28 }
 0x226   :  { %v1563_v56 = vadd.f32 %v1562_v21, %v1352_v28  ;;  %v1696_v16 = vadd.f32 %v1695_v32, %v1633_v55 }
 0x228   :  { %v1697_v10 = vadd.f32 %v1696_v16, %v1634_v38 }
 0x229   :  { %v1353_v43 = vpop.f32.mrf.mxu2 }
 0x22a   :  { %v1354_v26 = vadd.f32 %v1353_v43, %v1185_v41 }
 0x22c   :  { %v2457_v14 = vpack.c.bf16 %v1354_v26, %v1352_v28  ;;  %v1564_v37 = vadd.f32 %v1563_v56, %v1354_v26  ;;  %v1635_v52 = vmul.f32 %v1354_v26, %v1354_v26 }
 0x22e   :  { %2513 = vst [vmem:[%s3493_s2 + $0xc8] sm:$0xff] %v2457_v14   ;;  %v1565_v44 = vadd.f32 %v1564_v37, %v3325_v35  ;;  %v1698_v19 = vadd.f32 %v1697_v10, %v1635_v52  ;;  %v1640_v35 = vmul.f32 %v3359_v57, %v3359_v57 }
 0x230   :  { %v1566_v58 = vadd.f32 %v1565_v44, %v3330_v48  ;;  %v1699_v34 = vadd.f32 %v1698_v19, %v1636_v7  ;;  %v1641_v48 = vmul.f32 %v3366_v59, %v3366_v59 }
 0x232   :  { %v1567_v51 = vadd.f32 %v1566_v58, %v3341_v22  ;;  %v1700_v11 = vadd.f32 %v1699_v34, %v1637_v29  ;;  %v1642_v22 = vmul.f32 %v3380_v17, %v3380_v17 }
 0x234   :  { %v1568_v25 = vadd.f32 %v1567_v51, %v3346_v24  ;;  %v1701_v50 = vadd.f32 %v1700_v11, %v1638_v39  ;;  %v1643_v24 = vmul.f32 %v3385_v42, %v3385_v42 }
 0x236   :  { %v1569_v12 = vadd.f32 %v1568_v25, %v3359_v57  ;;  %v1702_v45 = vadd.f32 %v1701_v50, %v1639_v13  ;;  %v1644_v57 = vmul.f32 %v3396_v49, %v3396_v49 }
 0x238   :  { %v1570_v61 = vadd.f32 %v1569_v12, %v3366_v59  ;;  %v1703_v46 = vadd.f32 %v1702_v45, %v1640_v35  ;;  %v1645_v59 = vmul.f32 %v3401_v8, %v3401_v8 }
 0x23a   :  { %v1571_v3 = vadd.f32 %v1570_v61, %v3380_v17  ;;  %v1704_v62 = vadd.f32 %v1703_v46, %v1641_v48  ;;  %v1646_v17 = vmul.f32 %v3412_v6, %v3412_v6 }
 0x23c   :  { %v1572_v30 = vadd.f32 %v1571_v3, %v3385_v42  ;;  %v1705_v0 = vadd.f32 %v1704_v62, %v1642_v22  ;;  %v1647_v42 = vmul.f32 %v3417_v5, %v3417_v5 }
 0x23e   :  { %v1573_v23 = vadd.f32 %v1572_v30, %v3396_v49  ;;  %v1706_v15 = vadd.f32 %v1705_v0, %v1643_v24 }
 0x240   :  { %v1574_v20 = vadd.f32 %v1573_v23, %v3401_v8  ;;  %v1707_v40 = vadd.f32 %v1706_v15, %v1644_v57 }
 0x242   :  { %v1575_v63 = vadd.f32 %v1574_v20, %v3412_v6  ;;  %v1708_v53 = vadd.f32 %v1707_v40, %v1645_v59 }
 0x244   :  { %v1576_v18 = vadd.f32 %v1575_v63, %v3417_v5  ;;  %v1709_v9 = vadd.f32 %v1708_v53, %v1646_v17 }
 0x246   :  { %v1577_v49 = vrot.slane %v1576_v18, 4  ;;  %v1710_v27 = vadd.f32 %v1709_v9, %v1647_v42 }
 0x248   :  { %v1578_v33 = vadd.f32 %v1577_v49, %v1576_v18  ;;  %v1711_v54 = vrot.slane %v1710_v27, 4 }
 0x24a   :  { %v1579_v31 = vrot.slane %v1578_v33, 2  ;;  %v1712_v1 = vadd.f32 %v1711_v54, %v1710_v27 }
 0x24c   :  { %v1580_v8 = vadd.f32 %v1579_v31, %v1578_v33  ;;  %v1713_v60 = vrot.slane %v1712_v1, 2 }
 0x24e   :  { %v1581_v47 = vrot.slane %v1580_v8, 1  ;;  %v1714_v2 = vadd.f32 %v1713_v60, %v1712_v1 }
 0x250   :  { %v1582_v4 = vadd.f32 %v1581_v47, %v1580_v8  ;;  %v1715_v28 = vrot.slane %v1714_v2, 1 }
 0x252   :  { %1583 = vst [vmem:[%s3494_s3] sm:$0x1] %v1582_v4  ;;  %v1716_v6 = vadd.f32 %v1715_v28, %v1714_v2 }
 0x254   :  { %1717 = vst [vmem:[%s3494_s3 + $0x1] sm:$0x1] %v1716_v6 }
 0x255   :  { %1726 = vsyncpa [#allocation3], 1 }

// kernel: generator_forward.9
= control target key start
LH: loop header
LB: loop body
LE: loop exit
PB: predicated region body
PF: predicated region fallthrough
CT: control target
= control target key end

     0   :  { %vm1499_vm0 = vcmask 130048   ;;  %s9093_s1 = inlined_call_operand.vmem [shape: bf16[144,128], index: 1, kind: input, shape index: {}]   ;;  %s9094_s0 = inlined_call_operand.vmem [shape: bf16[2048,144], index: 0, kind: input, shape index: {}]   ;;  %s9095_s2 = inlined_call_operand.vmem [shape: f32[1,128], index: 2, kind: input, shape index: {}]   ;;  %s9096_s3 = inlined_call_operand.vmem [shape: f32[2048,128], index: 3, kind: output, shape index: {}]  }
   0x1   :  { %v5149_v0 = vld [vmem:[%s9093_s1 + $0x38] sm:$0xff]  ;;  %v5150_v1 = vld [vmem:[%s9093_s1 + $0x40] sm:$0xff]  ;;  %v3702_v3 = vld [vmem:[%s9094_s0 + $0x8] sm:$0xf0] }
   0x2   :  { %v4886_v2 = vld [vmem:[%s9094_s0 + $0x4] sm:$0xf]  ;;  %1884 = vmatpush.bf16.msra.mxu0 %v5149_v0  ;;  %5151 = vmatpush.bf16.msra.mxu2 %v5149_v0  ;;  %v5148_v5 = vld [vmem:[%s9093_s1 + $0x30] sm:$0xff]  ;;  %v5147_v6 = vld [vmem:[%s9093_s1 + $0x28] sm:$0xff] }
   0x3   :  { %v3705_v4 = vor.u32 %v4886_v2, %v3702_v3  ;;  %2540 = vmatpush.bf16.msra.mxu1 %v5150_v1  ;;  %5159 = vmatpush.bf16.msra.mxu3 %v5150_v1  ;;  %v5016_v7 = vld [vmem:[%s9094_s0 + $0x414] sm:$0xf]  ;;  %v4222_v8 = vld [vmem:[%s9094_s0 + $0x418] sm:$0xf0]  ;;  %v5146_v10 = vld [vmem:[%s9093_s1 + $0x20] sm:$0xff] }
   0x4   :  { %v4225_v9 = vor.u32 %v5016_v7, %v4222_v8  ;;  %v5145_v11 = vld [vmem:[%s9093_s1 + $0x18] sm:$0xff]  ;;  %v4888_v12 = vld [vmem:[%s9094_s0 + $0x14] sm:$0xf]  ;;  %v5143_v16 = vld [vmem:[%s9093_s1 + $0x8] sm:$0xff] }
   0x5   :  { %v3710_v13 = vld [vmem:[%s9094_s0 + $0x18] sm:$0xf0]  ;;  %v5144_v15 = vld [vmem:[%s9093_s1 + $0x10] sm:$0xff]  ;;  %v5018_v17 = vld [vmem:[%s9094_s0 + $0x424] sm:$0xf] }
   0x6   :  { %4758 = vmatmul.msk.bf16.vlgmr.msra.gmra.mxu1 %vm1499_vm0, %v3705_v4  ;;  %1885 = vmatpush.bf16.msra.mxu0 %v5148_v5  ;;  %v3713_v14 = vor.u32 %v4888_v12, %v3710_v13  ;;  %v4230_v18 = vld [vmem:[%s9094_s0 + $0x428] sm:$0xf0]  ;;  %v5142_v20 = vld [vmem:[%s9093_s1] sm:$0xff]  ;;  %v4887_v22 = vld [vmem:[%s9094_s0 + $0x4] sm:$0xf0] }
   0x7   :  { %5152 = vmatpush.bf16.msra.mxu2 %v5148_v5  ;;  %4823 = vmatmul.msk.bf16.vlgmr.msra.gmra.mxu3 %vm1499_vm0, %v4225_v9  ;;  %v4233_v19 = vor.u32 %v5018_v17, %v4230_v18  ;;  %v3700_v21 = vld [vmem:[%s9094_s0] sm:$0xf]  ;;  %v5015_v24 = vld [vmem:[%s9094_s0 + $0x404] sm:$0xf0]  ;;  %v4890_v27 = vld [vmem:[%s9094_s0 + $0x24] sm:$0xf] }
   0x8   :  { %v4212_v23 = vld [vmem:[%s9094_s0 + $0x400] sm:$0xf]  ;;  %v3701_v25 = vor.u32 %v4887_v22, %v3700_v21  ;;  %v3718_v28 = vld [vmem:[%s9094_s0 + $0x28] sm:$0xf0]  ;;  %v5020_v30 = vld [vmem:[%s9094_s0 + $0x434] sm:$0xf] }
   0x9   :  { %v4213_v26 = vor.u32 %v5015_v24, %v4212_v23  ;;  %v3721_v29 = vor.u32 %v4890_v27, %v3718_v28  ;;  %v4238_v31 = vld [vmem:[%s9094_s0 + $0x438] sm:$0xf0]  ;;  %v3708_v33 = vld [vmem:[%s9094_s0 + $0x10] sm:$0xf]  ;;  %v4889_v34 = vld [vmem:[%s9094_s0 + $0x14] sm:$0xf0] }
   0xa   :  { %1886 = vmatpush.bf16.msra.mxu0 %v5147_v6  ;;  %v4241_v32 = vor.u32 %v5020_v30, %v4238_v31  ;;  %v4220_v35 = vld [vmem:[%s9094_s0 + $0x410] sm:$0xf]  ;;  %v5017_v36 = vld [vmem:[%s9094_s0 + $0x414] sm:$0xf0]  ;;  %v3709_v37 = vor.u32 %v4889_v34, %v3708_v33  ;;  %v4892_v39 = vld [vmem:[%s9094_s0 + $0x34] sm:$0xf] }
   0xb   :  { %5153 = vmatpush.bf16.msra.mxu2 %v5147_v6  ;;  %v4221_v38 = vor.u32 %v5017_v36, %v4220_v35  ;;  %v3726_v40 = vld [vmem:[%s9094_s0 + $0x38] sm:$0xf0]  ;;  %v5022_v42 = vld [vmem:[%s9094_s0 + $0x444] sm:$0xf]  ;;  %v4246_v43 = vld [vmem:[%s9094_s0 + $0x448] sm:$0xf0] }
   0xc   :  { %v3729_v41 = vor.u32 %v4892_v39, %v3726_v40  ;;  %v4249_v44 = vor.u32 %v5022_v42, %v4246_v43  ;;  %v3716_v45 = vld [vmem:[%s9094_s0 + $0x20] sm:$0xf]  ;;  %v4891_v46 = vld [vmem:[%s9094_s0 + $0x24] sm:$0xf0]  ;;  %v4894_v51 = vld [vmem:[%s9094_s0 + $0x44] sm:$0xf] }
   0xd   :  { %v4228_v47 = vld [vmem:[%s9094_s0 + $0x420] sm:$0xf]  ;;  %v5019_v48 = vld [vmem:[%s9094_s0 + $0x424] sm:$0xf0]  ;;  %v3717_v49 = vor.u32 %v4891_v46, %v3716_v45  ;;  %v3734_v52 = vld [vmem:[%s9094_s0 + $0x48] sm:$0xf0] }
   0xe   :  { %1887 = vmatpush.bf16.msra.mxu0 %v5146_v10  ;;  %v4229_v50 = vor.u32 %v5019_v48, %v4228_v47  ;;  %v3737_v53 = vor.u32 %v4894_v51, %v3734_v52  ;;  %v5024_v54 = vld [vmem:[%s9094_s0 + $0x454] sm:$0xf]  ;;  %v4254_v55 = vld [vmem:[%s9094_s0 + $0x458] sm:$0xf0]  ;;  %v3724_v57 = vld [vmem:[%s9094_s0 + $0x30] sm:$0xf] }
   0xf   :  { %5154 = vmatpush.bf16.msra.mxu2 %v5146_v10  ;;  %v4257_v56 = vor.u32 %v5024_v54, %v4254_v55  ;;  %v4893_v58 = vld [vmem:[%s9094_s0 + $0x34] sm:$0xf0]  ;;  %v4236_v59 = vld [vmem:[%s9094_s0 + $0x430] sm:$0xf]  ;;  %v4896_v63 = vld [vmem:[%s9094_s0 + $0x54] sm:$0xf] }
  0x10   :  { %v5021_v60 = vld [vmem:[%s9094_s0 + $0x434] sm:$0xf0]  ;;  %v3725_v61 = vor.u32 %v4893_v58, %v3724_v57  ;;  %v3742_v0 = vld [vmem:[%s9094_s0 + $0x58] sm:$0xf0]  ;;  %v5026_v2 = vld [vmem:[%s9094_s0 + $0x464] sm:$0xf] }
  0x11   :  { %v4237_v62 = vor.u32 %v5021_v60, %v4236_v59  ;;  %v3745_v1 = vor.u32 %v4896_v63, %v3742_v0  ;;  %v4262_v3 = vld [vmem:[%s9094_s0 + $0x468] sm:$0xf0]  ;;  %v3732_v5 = vld [vmem:[%s9094_s0 + $0x40] sm:$0xf]  ;;  %v4895_v6 = vld [vmem:[%s9094_s0 + $0x44] sm:$0xf0] }
  0x12   :  { %1888 = vmatpush.bf16.msra.mxu0 %v5145_v11  ;;  %v4265_v4 = vor.u32 %v5026_v2, %v4262_v3  ;;  %v4244_v7 = vld [vmem:[%s9094_s0 + $0x440] sm:$0xf]  ;;  %v5023_v8 = vld [vmem:[%s9094_s0 + $0x444] sm:$0xf0]  ;;  %v3733_v9 = vor.u32 %v4895_v6, %v3732_v5  ;;  %v3750_v12 = vld [vmem:[%s9094_s0 + $0x68] sm:$0xf0] }
  0x13   :  { %5155 = vmatpush.bf16.msra.mxu2 %v5145_v11  ;;  %v4245_v10 = vor.u32 %v5023_v8, %v4244_v7  ;;  %v4898_v11 = vld [vmem:[%s9094_s0 + $0x64] sm:$0xf]  ;;  %v4897_v17 = vld [vmem:[%s9094_s0 + $0x54] sm:$0xf0]  ;;  %v4900_v23 = vld [vmem:[%s9094_s0 + $0x74] sm:$0xf] }
  0x14   :  { %v3753_v13 = vor.u32 %v4898_v11, %v3750_v12  ;;  %v3758_v24 = vld [vmem:[%s9094_s0 + $0x78] sm:$0xf0]  ;;  %v4278_v27 = vld [vmem:[%s9094_s0 + $0x488] sm:$0xf0]  ;;  %v3748_v28 = vld [vmem:[%s9094_s0 + $0x60] sm:$0xf] }
  0x15   :  { %v4260_v31 = vld [vmem:[%s9094_s0 + $0x460] sm:$0xf]  ;;  %v4902_v35 = vld [vmem:[%s9094_s0 + $0x84] sm:$0xf]  ;;  %v3766_v36 = vld [vmem:[%s9094_s0 + $0x88] sm:$0xf0] }
  0x16   :  { %4759 = vmatmul.msk.bf16.gmra.mxu1 %vm1499_vm0, %v3713_v14  ;;  %1889 = vmatpush.bf16.msra.mxu0 %v5144_v15  ;;  %v5028_v14 = vld [vmem:[%s9094_s0 + $0x474] sm:$0xf]  ;;  %v4286_v40 = vld [vmem:[%s9094_s0 + $0x498] sm:$0xf0]  ;;  %v4901_v42 = vld [vmem:[%s9094_s0 + $0x74] sm:$0xf0] }
  0x17   :  { %5156 = vmatpush.bf16.msra.mxu2 %v5144_v15  ;;  %4824 = vmatmul.msk.bf16.gmra.mxu3 %vm1499_vm0, %v4233_v19  ;;  %v4270_v15 = vld [vmem:[%s9094_s0 + $0x478] sm:$0xf0]  ;;  %v4252_v19 = vld [vmem:[%s9094_s0 + $0x450] sm:$0xf]  ;;  %v5032_v39 = vld [vmem:[%s9094_s0 + $0x494] sm:$0xf] }
  0x18   :  { %v4273_v18 = vor.u32 %v5028_v14, %v4270_v15  ;;  %v4289_v43 = vor.u32 %v5032_v39, %v4286_v40  ;;  %v4268_v45 = vld [vmem:[%s9094_s0 + $0x470] sm:$0xf]  ;;  %v5029_v46 = vld [vmem:[%s9094_s0 + $0x474] sm:$0xf0]  ;;  %v5034_v55 = vld [vmem:[%s9094_s0 + $0x4a4] sm:$0xf] }
  0x19   :  { %v4269_v48 = vor.u32 %v5029_v46, %v4268_v45  ;;  %v3764_v57 = vld [vmem:[%s9094_s0 + $0x80] sm:$0xf]  ;;  %v4903_v58 = vld [vmem:[%s9094_s0 + $0x84] sm:$0xf0]  ;;  %v3782_v5 = vld [vmem:[%s9094_s0 + $0xa8] sm:$0xf0] }
  0x1a   :  { %1890 = vmatpush.bf16.msra.mxu0 %v5143_v16  ;;  %v5031_v63 = vld [vmem:[%s9094_s0 + $0x484] sm:$0xf0]  ;;  %v3765_v0 = vor.u32 %v4903_v58, %v3764_v57  ;;  %v4310_v45 = vld [vmem:[%s9094_s0 + $0x4c8] sm:$0xf0]  ;;  %v3780_v46 = vld [vmem:[%s9094_s0 + $0xa0] sm:$0xf] }
  0x1b   :  { %5157 = vmatpush.bf16.msra.mxu2 %v5143_v16  ;;  %v3740_v16 = vld [vmem:[%s9094_s0 + $0x50] sm:$0xf] }
  0x1c   :  { %v3741_v21 = vor.u32 %v4897_v17, %v3740_v16  ;;  %v5036_v16 = vld [vmem:[%s9094_s0 + $0x4b4] sm:$0xf]  ;;  %v4302_v17 = vld [vmem:[%s9094_s0 + $0x4b8] sm:$0xf0] }
  0x1e   :  { %1891 = vmatpush.bf16.msra.mxu0 %v5142_v20 }
  0x1f   :  { %5158 = vmatpush.bf16.msra.mxu2 %v5142_v20  ;;  %v5025_v20 = vld [vmem:[%s9094_s0 + $0x454] sm:$0xf0] }
  0x20   :  { %v4253_v22 = vor.u32 %v5025_v20, %v4252_v19  ;;  %v4905_v19 = vld [vmem:[%s9094_s0 + $0x94] sm:$0xf0]  ;;  %v4305_v20 = vor.u32 %v5036_v16, %v4302_v17  ;;  %v5040_v16 = vld [vmem:[%s9094_s0 + $0x4d4] sm:$0xf]  ;;  %v4318_v17 = vld [vmem:[%s9094_s0 + $0x4d8] sm:$0xf0] }
  0x21   :  { %1892 = vmatmul.bf16.vlgmr.msra.gmra.mxu0 %v3701_v25  ;;  %v3761_v25 = vor.u32 %v4900_v23, %v3758_v24  ;;  %v5033_v23 = vld [vmem:[%s9094_s0 + $0x494] sm:$0xf0] }
  0x22   :  { %2212 = vmatmul.bf16.vlgmr.msra.gmra.mxu2 %v4213_v26  ;;  %v5030_v26 = vld [vmem:[%s9094_s0 + $0x484] sm:$0xf] }
  0x23   :  { %v4281_v30 = vor.u32 %v5030_v26, %v4278_v27 }
  0x26   :  { %4760 = vmatmul.msk.bf16.gmra.mxu1 %vm1499_vm0, %v3721_v29  ;;  %v4899_v29 = vld [vmem:[%s9094_s0 + $0x64] sm:$0xf0] }
  0x27   :  { %4825 = vmatmul.msk.bf16.gmra.mxu3 %vm1499_vm0, %v4241_v32  ;;  %v5027_v32 = vld [vmem:[%s9094_s0 + $0x464] sm:$0xf0]  ;;  %v3749_v33 = vor.u32 %v4899_v29, %v3748_v28  ;;  %v4908_v29 = vld [vmem:[%s9094_s0 + $0xb4] sm:$0xf] }
  0x28   :  { %v4261_v34 = vor.u32 %v5027_v32, %v4260_v31 }
  0x31   :  { %1897 = vmatmul.bf16.gmra.mxu0 %v3709_v37  ;;  %v3769_v37 = vor.u32 %v4902_v35, %v3766_v36 }
  0x32   :  { %2217 = vmatmul.bf16.gmra.mxu2 %v4221_v38 }
  0x36   :  { %4761 = vmatmul.msk.bf16.gmra.mxu1 %vm1499_vm0, %v3729_v41  ;;  %v3756_v41 = vld [vmem:[%s9094_s0 + $0x70] sm:$0xf] }
  0x37   :  { %4826 = vmatmul.msk.bf16.gmra.mxu3 %vm1499_vm0, %v4249_v44  ;;  %v3757_v47 = vor.u32 %v4901_v42, %v3756_v41 }
  0x41   :  { %1902 = vmatmul.bf16.gmra.mxu0 %v3717_v49  ;;  %v4904_v49 = vld [vmem:[%s9094_s0 + $0x94] sm:$0xf] }
  0x42   :  { %2222 = vmatmul.bf16.gmra.mxu2 %v4229_v50  ;;  %v3774_v50 = vld [vmem:[%s9094_s0 + $0x98] sm:$0xf0] }
  0x43   :  { %v3777_v52 = vor.u32 %v4904_v49, %v3774_v50  ;;  %v4292_v50 = vld [vmem:[%s9094_s0 + $0x4a0] sm:$0xf] }
  0x46   :  { %4762 = vmatmul.msk.bf16.gmra.mxu1 %vm1499_vm0, %v3737_v53 }
  0x47   :  { %4827 = vmatmul.msk.bf16.gmra.mxu3 %vm1499_vm0, %v4257_v56  ;;  %v4294_v56 = vld [vmem:[%s9094_s0 + $0x4a8] sm:$0xf0] }
  0x48   :  { %v4297_v59 = vor.u32 %v5034_v55, %v4294_v56 }
  0x51   :  { %1907 = vmatmul.bf16.gmra.mxu0 %v3725_v61  ;;  %v5973_v61 = vld [vmem:[%s9095_s2] ss:$0 sm:$0xff] }
  0x52   :  { %2227 = vmatmul.bf16.gmra.mxu2 %v4237_v62  ;;  %v4276_v62 = vld [vmem:[%s9094_s0 + $0x480] sm:$0xf] }
  0x53   :  { %v4277_v2 = vor.u32 %v5031_v63, %v4276_v62 }
  0x56   :  { %4763 = vmatmul.msk.bf16.gmra.mxu1 %vm1499_vm0, %v3745_v1 }
  0x57   :  { %4828 = vmatmul.msk.bf16.gmra.mxu3 %vm1499_vm0, %v4265_v4  ;;  %v4906_v4 = vld [vmem:[%s9094_s0 + $0xa4] sm:$0xf] }
  0x58   :  { %v3785_v8 = vor.u32 %v4906_v4, %v3782_v5 }
  0x61   :  { %1912 = vmatmul.bf16.gmra.mxu0 %v3733_v9 }
  0x62   :  { %2232 = vmatmul.bf16.gmra.mxu2 %v4245_v10 }
  0x66   :  { %4764 = vmatmul.msk.bf16.gmra.mxu1 %vm1499_vm0, %v3753_v13 }
  0x67   :  { %4829 = vmatmul.msk.bf16.gmra.mxu3 %vm1499_vm0, %v4273_v18  ;;  %v3772_v18 = vld [vmem:[%s9094_s0 + $0x90] sm:$0xf] }
  0x71   :  { %1917 = vmatmul.bf16.gmra.mxu0 %v3741_v21 }
  0x72   :  { %2237 = vmatmul.bf16.gmra.mxu2 %v4253_v22  ;;  %v4284_v22 = vld [vmem:[%s9094_s0 + $0x490] sm:$0xf] }
  0x73   :  { %v4285_v27 = vor.u32 %v5033_v23, %v4284_v22  ;;  %v5037_v22 = vld [vmem:[%s9094_s0 + $0x4b4] sm:$0xf0] }
  0x76   :  { %4765 = vmatmul.msk.bf16.gmra.mxu1 %vm1499_vm0, %v3761_v25  ;;  %v3773_v25 = vor.u32 %v4905_v19, %v3772_v18  ;;  %v4909_v18 = vld [vmem:[%s9094_s0 + $0xb4] sm:$0xf0]  ;;  %v4321_v19 = vor.u32 %v5040_v16, %v4318_v17 }
  0x77   :  { %4830 = vmatmul.msk.bf16.gmra.mxu3 %vm1499_vm0, %v4281_v30  ;;  %v3790_v30 = vld [vmem:[%s9094_s0 + $0xb8] sm:$0xf0] }
  0x81   :  { %1922 = vmatmul.bf16.gmra.mxu0 %v3749_v33 }
  0x82   :  { %2242 = vmatmul.bf16.gmra.mxu2 %v4261_v34  ;;  %v3793_v34 = vor.u32 %v4908_v29, %v3790_v30  ;;  %v4912_v30 = vld [vmem:[%s9094_s0 + $0xd4] sm:$0xf] }
  0x83   :  { %v2542_v38 = vpop.f32.mrf.mxu1 }
  0x86   :  { %4766 = vmatmul.msk.bf16.gmra.mxu1 %vm1499_vm0, %v3769_v37 }
  0x87   :  { %4831 = vmatmul.msk.bf16.gmra.mxu3 %vm1499_vm0, %v4289_v43 }
  0x8a   :  { %v5953_v51 = vpop.f32.mrf.mxu3 }
  0x8b   :  { %v2544_v44 = vpop.f32.mrf.mxu1 }
  0x91   :  { %1927 = vmatmul.bf16.gmra.mxu0 %v3757_v47  ;;  %v4907_v47 = vld [vmem:[%s9094_s0 + $0xa4] sm:$0xf0] }
  0x92   :  { %2247 = vmatmul.bf16.gmra.mxu2 %v4269_v48  ;;  %v5956_v54 = vpop.f32.mrf.mxu3 }
  0x93   :  { %v2547_v53 = vpop.f32.mrf.mxu1 }
  0x96   :  { %4767 = vmatmul.msk.bf16.gmra.mxu1 %vm1499_vm0, %v3777_v52 }
  0x97   :  { %4832 = vmatmul.msk.bf16.gmra.mxu3 %vm1499_vm0, %v4297_v59  ;;  %v4910_v59 = vld [vmem:[%s9094_s0 + $0xc4] sm:$0xf] }
  0x9a   :  { %v5989_v6 = vpop.f32.mrf.mxu3 }
  0x9b   :  { %v2549_v60 = vpop.f32.mrf.mxu1 }
  0x9e   :  { %v1893_v1 = vpop.f32.mrf.mxu0 }
  0x9f   :  { %v1894_v3 = vadd.f32 %v5973_v61, %v1893_v1 }
  0xa1   :  { %v2543_v7 = vadd.f32 %v2542_v38, %v1894_v3  ;;  %1932 = vmatmul.bf16.gmra.mxu0 %v3765_v0 }
  0xa2   :  { %2252 = vmatmul.bf16.gmra.mxu2 %v4277_v2  ;;  %v5997_v13 = vpop.f32.mrf.mxu3 }
  0xa3   :  { %5161 = vtanh.f32 %v2543_v7  ;;  %v5991_v9 = vpop.f32.mrf.mxu1 }
  0xa5   :  { %v5993_v10 = vpop.f32.mrf.mxu2 }
  0xa6   :  { %4768 = vmatmul.msk.bf16.gmra.mxu1 %vm1499_vm0, %v3785_v8  ;;  %v1895_v11 = vpop.f32.mrf.mxu0 }
  0xa7   :  { %v1896_v12 = vadd.f32 %v5973_v61, %v1895_v11  ;;  %4833 = vmatmul.msk.bf16.gmra.mxu3 %vm1499_vm0, %v4305_v20 }
  0xa9   :  { %v5162_v14 = vpop.eup %5161  ;;  %v2545_v15 = vadd.f32 %v2544_v44, %v1896_v12  ;;  %v5038_v44 = vld [vmem:[%s9094_s0 + $0x4c4] sm:$0xf] }
  0xaa   :  { %3438 = vst [vmem:[%s9096_s3] sm:$0xff] %v5162_v14  ;;  %v6032_v31 = vpop.f32.mrf.mxu3  ;;  %v4313_v48 = vor.u32 %v5038_v44, %v4310_v45 }
  0xab   :  { %5163 = vtanh.f32 %v2545_v15  ;;  %v6014_v21 = vpop.f32.mrf.mxu1 }
  0xad   :  { %v6023_v24 = vpop.f32.mrf.mxu2 }
  0xae   :  { %v1898_v26 = vpop.f32.mrf.mxu0 }
  0xaf   :  { %v1899_v28 = vadd.f32 %v5973_v61, %v1898_v26 }
  0xb1   :  { %v5164_v32 = vpop.eup %5163  ;;  %v2548_v33 = vadd.f32 %v2547_v53, %v1899_v28  ;;  %1937 = vmatmul.bf16.gmra.mxu0 %v3773_v25  ;;  %v3781_v53 = vor.u32 %v4907_v47, %v3780_v46 }
  0xb2   :  { %3439 = vst [vmem:[%s9096_s3 + $0x8] sm:$0xff] %v5164_v32  ;;  %2257 = vmatmul.bf16.gmra.mxu2 %v4285_v27  ;;  %v6042_v40 = vpop.f32.mrf.mxu3  ;;  %v3806_v32 = vld [vmem:[%s9094_s0 + $0xd8] sm:$0xf0] }
  0xb3   :  { %5165 = vtanh.f32 %v2548_v33  ;;  %v6037_v35 = vpop.f32.mrf.mxu1 }
  0xb5   :  { %v2218_v36 = vpop.f32.mrf.mxu2 }
  0xb6   :  { %v2219_v37 = vadd.f32 %v5973_v61, %v2218_v36  ;;  %4769 = vmatmul.msk.bf16.gmra.mxu1 %vm1499_vm0, %v3793_v34  ;;  %v1900_v38 = vpop.f32.mrf.mxu0 }
  0xb7   :  { %v1901_v39 = vadd.f32 %v5973_v61, %v1900_v38  ;;  %4834 = vmatmul.msk.bf16.gmra.mxu3 %vm1499_vm0, %v4313_v48 }
  0xb8   :  { %v2868_v41 = vadd.f32 %v5953_v51, %v2219_v37  ;;  %v5035_v51 = vld [vmem:[%s9094_s0 + $0x4a4] sm:$0xf0] }
  0xb9   :  { %v5166_v42 = vpop.eup %5165  ;;  %v2550_v43 = vadd.f32 %v2549_v60, %v1901_v39  ;;  %v4293_v57 = vor.u32 %v5035_v51, %v4292_v50  ;;  %v3798_v60 = vld [vmem:[%s9094_s0 + $0xc8] sm:$0xf0]  ;;  %v3809_v39 = vor.u32 %v4912_v30, %v3806_v32  ;;  %v5042_v50 = vld [vmem:[%s9094_s0 + $0x4e4] sm:$0xf] }
  0xba   :  { %3440 = vst [vmem:[%s9096_s3 + $0x10] sm:$0xff] %v5166_v42  ;;  %5167 = vtanh.f32 %v2868_v41  ;;  %v6077_v62 = vpop.f32.mrf.mxu3  ;;  %v3801_v3 = vor.u32 %v4910_v59, %v3798_v60  ;;  %v4326_v51 = vld [vmem:[%s9094_s0 + $0x4e8] sm:$0xf0] }
  0xbb   :  { %5169 = vtanh.f32 %v2550_v43  ;;  %v6060_v49 = vpop.f32.mrf.mxu1 }
  0xbd   :  { %v2220_v52 = vpop.f32.mrf.mxu2 }
  0xbe   :  { %v2221_v55 = vadd.f32 %v5973_v61, %v2220_v52  ;;  %v1903_v56 = vpop.f32.mrf.mxu0  ;;  %v4329_v52 = vor.u32 %v5042_v50, %v4326_v51 }
  0xbf   :  { %v1904_v58 = vadd.f32 %v5973_v61, %v1903_v56  ;;  %v5039_v56 = vld [vmem:[%s9094_s0 + $0x4c4] sm:$0xf0] }
  0xc0   :  { %v5168_v63 = vpop.eup %5167  ;;  %v2870_v0 = vadd.f32 %v5956_v54, %v2221_v55  ;;  %v4308_v55 = vld [vmem:[%s9094_s0 + $0x4c0] sm:$0xf] }
  0xc1   :  { %v5170_v1 = vpop.eup %5169  ;;  %3568 = vst [vmem:[%s9096_s3 + $0x410] sm:$0xff] %v5168_v63  ;;  %v2553_v2 = vadd.f32 %v5991_v9, %v1904_v58  ;;  %1942 = vmatmul.bf16.gmra.mxu0 %v3781_v53  ;;  %v4309_v63 = vor.u32 %v5039_v56, %v4308_v55  ;;  %v5046_v55 = vld [vmem:[%s9094_s0 + $0x504] sm:$0xf]  ;;  %v4342_v56 = vld [vmem:[%s9094_s0 + $0x508] sm:$0xf0] }
  0xc2   :  { %3441 = vst [vmem:[%s9096_s3 + $0x18] sm:$0xff] %v5170_v1  ;;  %5171 = vtanh.f32 %v2870_v0  ;;  %2262 = vmatmul.bf16.gmra.mxu2 %v4293_v57  ;;  %v6092_v9 = vpop.f32.mrf.mxu3  ;;  %v4914_v1 = vld [vmem:[%s9094_s0 + $0xe4] sm:$0xf] }
  0xc3   :  { %5173 = vtanh.f32 %v2553_v2  ;;  %v6087_v4 = vpop.f32.mrf.mxu1  ;;  %v3814_v2 = vld [vmem:[%s9094_s0 + $0xe8] sm:$0xf0] }
  0xc5   :  { %v2223_v5 = vpop.f32.mrf.mxu2 }
  0xc6   :  { %v2224_v54 = vadd.f32 %v5973_v61, %v2223_v5  ;;  %4770 = vmatmul.msk.bf16.gmra.mxu1 %vm1499_vm0, %v3801_v3  ;;  %v1905_v7 = vpop.f32.mrf.mxu0 }
  0xc7   :  { %v1906_v8 = vadd.f32 %v5973_v61, %v1905_v7  ;;  %4835 = vmatmul.msk.bf16.gmra.mxu3 %vm1499_vm0, %v4321_v19 }
  0xc8   :  { %v5172_v11 = vpop.eup %5171  ;;  %v2873_v12 = vadd.f32 %v5989_v6, %v2224_v54  ;;  %v3788_v6 = vld [vmem:[%s9094_s0 + $0xb0] sm:$0xf] }
  0xc9   :  { %v5174_v14 = vpop.eup %5173  ;;  %3569 = vst [vmem:[%s9096_s3 + $0x418] sm:$0xff] %v5172_v11  ;;  %v2555_v15 = vadd.f32 %v6014_v21, %v1906_v8  ;;  %v4300_v21 = vld [vmem:[%s9094_s0 + $0x4b0] sm:$0xf]  ;;  %v3789_v25 = vor.u32 %v4909_v18, %v3788_v6  ;;  %v3817_v11 = vor.u32 %v4914_v1, %v3814_v2 }
  0xca   :  { %3442 = vst [vmem:[%s9096_s3 + $0x20] sm:$0xff] %v5174_v14  ;;  %5175 = vtanh.f32 %v2873_v12  ;;  %v4301_v28 = vor.u32 %v5037_v22, %v4300_v21  ;;  %v6131_v33 = vpop.f32.mrf.mxu3  ;;  %v5044_v21 = vld [vmem:[%s9094_s0 + $0x4f4] sm:$0xf]  ;;  %v4334_v22 = vld [vmem:[%s9094_s0 + $0x4f8] sm:$0xf0] }
  0xcb   :  { %5177 = vtanh.f32 %v2555_v15  ;;  %v6114_v20 = vpop.f32.mrf.mxu1 }
  0xcd   :  { %v2225_v23 = vpop.f32.mrf.mxu2 }
  0xce   :  { %v2226_v26 = vadd.f32 %v5973_v61, %v2225_v23  ;;  %v1908_v27 = vpop.f32.mrf.mxu0  ;;  %v4337_v23 = vor.u32 %v5044_v21, %v4334_v22 }
  0xcf   :  { %v1909_v29 = vadd.f32 %v5973_v61, %v1908_v27  ;;  %v5041_v27 = vld [vmem:[%s9094_s0 + $0x4d4] sm:$0xf0] }
  0xd0   :  { %v5176_v34 = vpop.eup %5175  ;;  %v2875_v36 = vadd.f32 %v5997_v13, %v2226_v26  ;;  %v4316_v26 = vld [vmem:[%s9094_s0 + $0x4d0] sm:$0xf] }
  0xd1   :  { %v5178_v37 = vpop.eup %5177  ;;  %3570 = vst [vmem:[%s9096_s3 + $0x420] sm:$0xff] %v5176_v34  ;;  %v2558_v38 = vadd.f32 %v6037_v35, %v1909_v29  ;;  %1947 = vmatmul.bf16.gmra.mxu0 %v3789_v25  ;;  %v4317_v34 = vor.u32 %v5041_v27, %v4316_v26  ;;  %v5048_v26 = vld [vmem:[%s9094_s0 + $0x514] sm:$0xf]  ;;  %v4350_v27 = vld [vmem:[%s9094_s0 + $0x518] sm:$0xf0] }
  0xd2   :  { %3443 = vst [vmem:[%s9096_s3 + $0x28] sm:$0xff] %v5178_v37  ;;  %5179 = vtanh.f32 %v2875_v36  ;;  %2267 = vmatmul.bf16.gmra.mxu2 %v4301_v28  ;;  %v6146_v35 = vpop.f32.mrf.mxu3  ;;  %v4916_v37 = vld [vmem:[%s9094_s0 + $0xf4] sm:$0xf] }
  0xd3   :  { %5181 = vtanh.f32 %v2558_v38  ;;  %v6141_v41 = vpop.f32.mrf.mxu1  ;;  %v3822_v38 = vld [vmem:[%s9094_s0 + $0xf8] sm:$0xf0] }
  0xd5   :  { %v2228_v42 = vpop.f32.mrf.mxu2 }
  0xd6   :  { %v2229_v13 = vadd.f32 %v5973_v61, %v2228_v42  ;;  %4771 = vmatmul.msk.bf16.gmra.mxu1 %vm1499_vm0, %v3809_v39  ;;  %v1910_v43 = vpop.f32.mrf.mxu0 }
  0xd7   :  { %v1911_v44 = vadd.f32 %v5973_v61, %v1910_v43  ;;  %4836 = vmatmul.msk.bf16.gmra.mxu3 %vm1499_vm0, %v4329_v52 }
  0xd8   :  { %v5180_v45 = vpop.eup %5179  ;;  %v2878_v46 = vadd.f32 %v6032_v31, %v2229_v13  ;;  %v3796_v31 = vld [vmem:[%s9094_s0 + $0xc0] sm:$0xf] }
  0xd9   :  { %v5182_v47 = vpop.eup %5181  ;;  %3571 = vst [vmem:[%s9096_s3 + $0x428] sm:$0xff] %v5180_v45  ;;  %v2560_v48 = vadd.f32 %v6060_v49, %v1911_v44  ;;  %v4911_v49 = vld [vmem:[%s9094_s0 + $0xc4] sm:$0xf0]  ;;  %v3825_v45 = vor.u32 %v4916_v37, %v3822_v38 }
  0xda   :  { %3444 = vst [vmem:[%s9096_s3 + $0x30] sm:$0xff] %v5182_v47  ;;  %5183 = vtanh.f32 %v2878_v46  ;;  %v3797_v58 = vor.u32 %v4911_v49, %v3796_v31  ;;  %v6185_v3 = vpop.f32.mrf.mxu3 }
  0xdb   :  { %5185 = vtanh.f32 %v2560_v48  ;;  %v6168_v53 = vpop.f32.mrf.mxu1 }
  0xdd   :  { %v2230_v57 = vpop.f32.mrf.mxu2 }
  0xde   :  { %v2231_v59 = vadd.f32 %v5973_v61, %v2230_v57  ;;  %v1913_v60 = vpop.f32.mrf.mxu0  ;;  %v4345_v57 = vor.u32 %v5046_v55, %v4342_v56 }
  0xdf   :  { %v1914_v0 = vadd.f32 %v5973_v61, %v1913_v60  ;;  %v5043_v60 = vld [vmem:[%s9094_s0 + $0x4e4] sm:$0xf0] }
  0xe0   :  { %v5184_v5 = vpop.eup %5183  ;;  %v2880_v54 = vadd.f32 %v6042_v40, %v2231_v59  ;;  %v4324_v59 = vld [vmem:[%s9094_s0 + $0x4e0] sm:$0xf] }
  0xe1   :  { %v5186_v7 = vpop.eup %5185  ;;  %3572 = vst [vmem:[%s9096_s3 + $0x430] sm:$0xff] %v5184_v5  ;;  %v2563_v8 = vadd.f32 %v6087_v4, %v1914_v0  ;;  %1952 = vmatmul.bf16.gmra.mxu0 %v3797_v58  ;;  %v4325_v5 = vor.u32 %v5043_v60, %v4324_v59  ;;  %v5050_v59 = vld [vmem:[%s9094_s0 + $0x524] sm:$0xf]  ;;  %v4358_v60 = vld [vmem:[%s9094_s0 + $0x528] sm:$0xf0] }
  0xe2   :  { %3445 = vst [vmem:[%s9096_s3 + $0x38] sm:$0xff] %v5186_v7  ;;  %5187 = vtanh.f32 %v2880_v54  ;;  %2272 = vmatmul.bf16.gmra.mxu2 %v4309_v63  ;;  %v6200_v4 = vpop.f32.mrf.mxu3  ;;  %v4918_v7 = vld [vmem:[%s9094_s0 + $0x104] sm:$0xf] }
  0xe3   :  { %5189 = vtanh.f32 %v2563_v8  ;;  %v6195_v12 = vpop.f32.mrf.mxu1  ;;  %v3830_v8 = vld [vmem:[%s9094_s0 + $0x108] sm:$0xf0] }
  0xe5   :  { %v2233_v14 = vpop.f32.mrf.mxu2 }
  0xe6   :  { %v2234_v40 = vadd.f32 %v5973_v61, %v2233_v14  ;;  %4772 = vmatmul.msk.bf16.gmra.mxu1 %vm1499_vm0, %v3817_v11  ;;  %v1915_v15 = vpop.f32.mrf.mxu0 }
  0xe7   :  { %v1916_v16 = vadd.f32 %v5973_v61, %v1915_v15  ;;  %4837 = vmatmul.msk.bf16.gmra.mxu3 %vm1499_vm0, %v4337_v23 }
  0xe8   :  { %v5188_v17 = vpop.eup %5187  ;;  %v2883_v6 = vadd.f32 %v6077_v62, %v2234_v40  ;;  %v3804_v62 = vld [vmem:[%s9094_s0 + $0xd0] sm:$0xf] }
  0xe9   :  { %v5190_v18 = vpop.eup %5189  ;;  %3573 = vst [vmem:[%s9096_s3 + $0x438] sm:$0xff] %v5188_v17  ;;  %v2565_v19 = vadd.f32 %v6114_v20, %v1916_v16  ;;  %v4913_v20 = vld [vmem:[%s9094_s0 + $0xd4] sm:$0xf0]  ;;  %v3833_v17 = vor.u32 %v4918_v7, %v3830_v8 }
  0xea   :  { %3446 = vst [vmem:[%s9096_s3 + $0x40] sm:$0xff] %v5190_v18  ;;  %5191 = vtanh.f32 %v2883_v6  ;;  %v3805_v29 = vor.u32 %v4913_v20, %v3804_v62  ;;  %v6239_v39 = vpop.f32.mrf.mxu3 }
  0xeb   :  { %5193 = vtanh.f32 %v2565_v19  ;;  %v6222_v25 = vpop.f32.mrf.mxu1 }
  0xed   :  { %v2235_v28 = vpop.f32.mrf.mxu2 }
  0xee   :  { %v2236_v30 = vadd.f32 %v5973_v61, %v2235_v28  ;;  %v1918_v32 = vpop.f32.mrf.mxu0  ;;  %v4353_v28 = vor.u32 %v5048_v26, %v4350_v27 }
  0xef   :  { %v1919_v36 = vadd.f32 %v5973_v61, %v1918_v32  ;;  %v5045_v32 = vld [vmem:[%s9094_s0 + $0x4f4] sm:$0xf0] }
  0xf0   :  { %v5192_v42 = vpop.eup %5191  ;;  %v2885_v13 = vadd.f32 %v6092_v9, %v2236_v30  ;;  %v4332_v30 = vld [vmem:[%s9094_s0 + $0x4f0] sm:$0xf] }
  0xf1   :  { %v5194_v43 = vpop.eup %5193  ;;  %3574 = vst [vmem:[%s9096_s3 + $0x440] sm:$0xff] %v5192_v42  ;;  %v2568_v44 = vadd.f32 %v6141_v41, %v1919_v36  ;;  %1957 = vmatmul.bf16.gmra.mxu0 %v3805_v29  ;;  %v4333_v42 = vor.u32 %v5045_v32, %v4332_v30  ;;  %v5052_v30 = vld [vmem:[%s9094_s0 + $0x534] sm:$0xf]  ;;  %v4366_v32 = vld [vmem:[%s9094_s0 + $0x538] sm:$0xf0] }
  0xf2   :  { %3447 = vst [vmem:[%s9096_s3 + $0x48] sm:$0xff] %v5194_v43  ;;  %5195 = vtanh.f32 %v2885_v13  ;;  %2277 = vmatmul.bf16.gmra.mxu2 %v4317_v34  ;;  %v6254_v41 = vpop.f32.mrf.mxu3  ;;  %v4920_v43 = vld [vmem:[%s9094_s0 + $0x114] sm:$0xf] }
  0xf3   :  { %5197 = vtanh.f32 %v2568_v44  ;;  %v6249_v46 = vpop.f32.mrf.mxu1  ;;  %v3838_v44 = vld [vmem:[%s9094_s0 + $0x118] sm:$0xf0] }
  0xf5   :  { %v2238_v47 = vpop.f32.mrf.mxu2 }
  0xf6   :  { %v2239_v9 = vadd.f32 %v5973_v61, %v2238_v47  ;;  %4773 = vmatmul.msk.bf16.gmra.mxu1 %vm1499_vm0, %v3825_v45  ;;  %v1920_v48 = vpop.f32.mrf.mxu0 }
  0xf7   :  { %v1921_v50 = vadd.f32 %v5973_v61, %v1920_v48  ;;  %4838 = vmatmul.msk.bf16.gmra.mxu3 %vm1499_vm0, %v4345_v57 }
  0xf8   :  { %v5196_v51 = vpop.eup %5195  ;;  %v2888_v31 = vadd.f32 %v6131_v33, %v2239_v9  ;;  %v3812_v33 = vld [vmem:[%s9094_s0 + $0xe0] sm:$0xf] }
  0xf9   :  { %v5198_v49 = vpop.eup %5197  ;;  %3575 = vst [vmem:[%s9096_s3 + $0x448] sm:$0xff] %v5196_v51  ;;  %v2570_v52 = vadd.f32 %v6168_v53, %v1921_v50  ;;  %v4915_v53 = vld [vmem:[%s9094_s0 + $0xe4] sm:$0xf0]  ;;  %v3841_v51 = vor.u32 %v4920_v43, %v3838_v44 }
  0xfa   :  { %3448 = vst [vmem:[%s9096_s3 + $0x50] sm:$0xff] %v5198_v49  ;;  %5199 = vtanh.f32 %v2888_v31  ;;  %v3813_v0 = vor.u32 %v4915_v53, %v3812_v33  ;;  %v6293_v11 = vpop.f32.mrf.mxu3 }
  0xfb   :  { %5201 = vtanh.f32 %v2570_v52  ;;  %v6276_v58 = vpop.f32.mrf.mxu1 }
  0xfd   :  { %v2240_v63 = vpop.f32.mrf.mxu2 }
  0xfe   :  { %v2241_v1 = vadd.f32 %v5973_v61, %v2240_v63  ;;  %v1923_v2 = vpop.f32.mrf.mxu0  ;;  %v4361_v63 = vor.u32 %v5050_v59, %v4358_v60 }
  0xff   :  { %v1924_v54 = vadd.f32 %v5973_v61, %v1923_v2  ;;  %v5047_v2 = vld [vmem:[%s9094_s0 + $0x504] sm:$0xf0] }
 0x100   :  { %v5200_v14 = vpop.eup %5199  ;;  %v2890_v40 = vadd.f32 %v6146_v35, %v2241_v1  ;;  %v4340_v1 = vld [vmem:[%s9094_s0 + $0x500] sm:$0xf] }
 0x101   :  { %v5202_v15 = vpop.eup %5201  ;;  %3576 = vst [vmem:[%s9096_s3 + $0x450] sm:$0xff] %v5200_v14  ;;  %v2573_v16 = vadd.f32 %v6195_v12, %v1924_v54  ;;  %1962 = vmatmul.bf16.gmra.mxu0 %v3813_v0  ;;  %v4341_v14 = vor.u32 %v5047_v2, %v4340_v1  ;;  %v5054_v1 = vld [vmem:[%s9094_s0 + $0x544] sm:$0xf]  ;;  %v4374_v2 = vld [vmem:[%s9094_s0 + $0x548] sm:$0xf0] }
 0x102   :  { %3449 = vst [vmem:[%s9096_s3 + $0x58] sm:$0xff] %v5202_v15  ;;  %5203 = vtanh.f32 %v2890_v40  ;;  %2282 = vmatmul.bf16.gmra.mxu2 %v4325_v5  ;;  %v6308_v12 = vpop.f32.mrf.mxu3  ;;  %v4922_v15 = vld [vmem:[%s9094_s0 + $0x124] sm:$0xf] }
 0x103   :  { %5205 = vtanh.f32 %v2573_v16  ;;  %v6303_v6 = vpop.f32.mrf.mxu1  ;;  %v3846_v16 = vld [vmem:[%s9094_s0 + $0x128] sm:$0xf0] }
 0x105   :  { %v2243_v18 = vpop.f32.mrf.mxu2 }
 0x106   :  { %v2244_v35 = vadd.f32 %v5973_v61, %v2243_v18  ;;  %4774 = vmatmul.msk.bf16.gmra.mxu1 %vm1499_vm0, %v3833_v17  ;;  %v1925_v19 = vpop.f32.mrf.mxu0 }
 0x107   :  { %v1926_v21 = vadd.f32 %v5973_v61, %v1925_v19  ;;  %4839 = vmatmul.msk.bf16.gmra.mxu3 %vm1499_vm0, %v4353_v28 }
 0x108   :  { %v5204_v22 = vpop.eup %5203  ;;  %v2893_v62 = vadd.f32 %v6185_v3, %v2244_v35  ;;  %v3820_v3 = vld [vmem:[%s9094_s0 + $0xf0] sm:$0xf] }
 0x109   :  { %v5206_v20 = vpop.eup %5205  ;;  %3577 = vst [vmem:[%s9096_s3 + $0x458] sm:$0xff] %v5204_v22  ;;  %v2575_v23 = vadd.f32 %v6222_v25, %v1926_v21  ;;  %v4917_v25 = vld [vmem:[%s9094_s0 + $0xf4] sm:$0xf0]  ;;  %v3849_v22 = vor.u32 %v4922_v15, %v3846_v16 }
 0x10a   :  { %3450 = vst [vmem:[%s9096_s3 + $0x60] sm:$0xff] %v5206_v20  ;;  %5207 = vtanh.f32 %v2893_v62  ;;  %v3821_v36 = vor.u32 %v4917_v25, %v3820_v3  ;;  %v6347_v45 = vpop.f32.mrf.mxu3 }
 0x10b   :  { %5209 = vtanh.f32 %v2575_v23  ;;  %v6330_v29 = vpop.f32.mrf.mxu1 }
 0x10d   :  { %v2245_v34 = vpop.f32.mrf.mxu2 }
 0x10e   :  { %v2246_v37 = vadd.f32 %v5973_v61, %v2245_v34  ;;  %v1928_v38 = vpop.f32.mrf.mxu0  ;;  %v4369_v34 = vor.u32 %v5052_v30, %v4366_v32 }
 0x10f   :  { %v1929_v13 = vadd.f32 %v5973_v61, %v1928_v38  ;;  %v5049_v38 = vld [vmem:[%s9094_s0 + $0x514] sm:$0xf0] }
 0x110   :  { %v5208_v47 = vpop.eup %5207  ;;  %v2895_v9 = vadd.f32 %v6200_v4, %v2246_v37  ;;  %v4348_v37 = vld [vmem:[%s9094_s0 + $0x510] sm:$0xf] }
 0x111   :  { %v5210_v48 = vpop.eup %5209  ;;  %3578 = vst [vmem:[%s9096_s3 + $0x460] sm:$0xff] %v5208_v47  ;;  %v2578_v50 = vadd.f32 %v6249_v46, %v1929_v13  ;;  %1967 = vmatmul.bf16.gmra.mxu0 %v3821_v36  ;;  %v4349_v47 = vor.u32 %v5049_v38, %v4348_v37  ;;  %v5056_v37 = vld [vmem:[%s9094_s0 + $0x554] sm:$0xf]  ;;  %v4382_v38 = vld [vmem:[%s9094_s0 + $0x558] sm:$0xf0] }
 0x112   :  { %3451 = vst [vmem:[%s9096_s3 + $0x68] sm:$0xff] %v5210_v48  ;;  %5211 = vtanh.f32 %v2895_v9  ;;  %2287 = vmatmul.bf16.gmra.mxu2 %v4333_v42  ;;  %v6362_v46 = vpop.f32.mrf.mxu3  ;;  %v4924_v48 = vld [vmem:[%s9094_s0 + $0x134] sm:$0xf] }
 0x113   :  { %5213 = vtanh.f32 %v2578_v50  ;;  %v6357_v31 = vpop.f32.mrf.mxu1  ;;  %v3854_v50 = vld [vmem:[%s9094_s0 + $0x138] sm:$0xf0] }
 0x115   :  { %v2248_v49 = vpop.f32.mrf.mxu2 }
 0x116   :  { %v2249_v4 = vadd.f32 %v5973_v61, %v2248_v49  ;;  %4775 = vmatmul.msk.bf16.gmra.mxu1 %vm1499_vm0, %v3841_v51  ;;  %v1930_v52 = vpop.f32.mrf.mxu0 }
 0x117   :  { %v1931_v55 = vadd.f32 %v5973_v61, %v1930_v52  ;;  %4840 = vmatmul.msk.bf16.gmra.mxu3 %vm1499_vm0, %v4361_v63 }
 0x118   :  { %v5212_v56 = vpop.eup %5211  ;;  %v2898_v33 = vadd.f32 %v6239_v39, %v2249_v4  ;;  %v3828_v39 = vld [vmem:[%s9094_s0 + $0x100] sm:$0xf] }
 0x119   :  { %v5214_v53 = vpop.eup %5213  ;;  %3579 = vst [vmem:[%s9096_s3 + $0x468] sm:$0xff] %v5212_v56  ;;  %v2580_v57 = vadd.f32 %v6276_v58, %v1931_v55  ;;  %v4919_v58 = vld [vmem:[%s9094_s0 + $0x104] sm:$0xf0]  ;;  %v3857_v56 = vor.u32 %v4924_v48, %v3854_v50 }
 0x11a   :  { %3452 = vst [vmem:[%s9096_s3 + $0x70] sm:$0xff] %v5214_v53  ;;  %5215 = vtanh.f32 %v2898_v33  ;;  %v3829_v54 = vor.u32 %v4919_v58, %v3828_v39  ;;  %v6401_v17 = vpop.f32.mrf.mxu3 }
 0x11b   :  { %5217 = vtanh.f32 %v2580_v57  ;;  %v6384_v0 = vpop.f32.mrf.mxu1 }
 0x11d   :  { %v2250_v5 = vpop.f32.mrf.mxu2 }
 0x11e   :  { %v2251_v7 = vadd.f32 %v5973_v61, %v2250_v5  ;;  %v1933_v8 = vpop.f32.mrf.mxu0  ;;  %v4377_v5 = vor.u32 %v5054_v1, %v4374_v2 }
 0x11f   :  { %v1934_v40 = vadd.f32 %v5973_v61, %v1933_v8  ;;  %v5051_v8 = vld [vmem:[%s9094_s0 + $0x524] sm:$0xf0] }
 0x120   :  { %v5216_v18 = vpop.eup %5215  ;;  %v2900_v35 = vadd.f32 %v6254_v41, %v2251_v7  ;;  %v4356_v7 = vld [vmem:[%s9094_s0 + $0x520] sm:$0xf] }
 0x121   :  { %v5218_v19 = vpop.eup %5217  ;;  %3580 = vst [vmem:[%s9096_s3 + $0x470] sm:$0xff] %v5216_v18  ;;  %v2583_v21 = vadd.f32 %v6303_v6, %v1934_v40  ;;  %1972 = vmatmul.bf16.gmra.mxu0 %v3829_v54  ;;  %v4357_v18 = vor.u32 %v5051_v8, %v4356_v7  ;;  %v5058_v7 = vld [vmem:[%s9094_s0 + $0x564] sm:$0xf] }
 0x122   :  { %3453 = vst [vmem:[%s9096_s3 + $0x78] sm:$0xff] %v5218_v19  ;;  %5219 = vtanh.f32 %v2900_v35  ;;  %2292 = vmatmul.bf16.gmra.mxu2 %v4341_v14  ;;  %v6416_v6 = vpop.f32.mrf.mxu3  ;;  %v4926_v19 = vld [vmem:[%s9094_s0 + $0x144] sm:$0xf] }
 0x123   :  { %5221 = vtanh.f32 %v2583_v21  ;;  %v6411_v62 = vpop.f32.mrf.mxu1  ;;  %v3862_v21 = vld [vmem:[%s9094_s0 + $0x148] sm:$0xf0] }
 0x125   :  { %v2253_v20 = vpop.f32.mrf.mxu2 }
 0x126   :  { %v2254_v41 = vadd.f32 %v5973_v61, %v2253_v20  ;;  %4776 = vmatmul.msk.bf16.gmra.mxu1 %vm1499_vm0, %v3849_v22  ;;  %v1935_v23 = vpop.f32.mrf.mxu0 }
 0x127   :  { %v1936_v26 = vadd.f32 %v5973_v61, %v1935_v23  ;;  %4841 = vmatmul.msk.bf16.gmra.mxu3 %vm1499_vm0, %v4369_v34 }
 0x128   :  { %v5220_v27 = vpop.eup %5219  ;;  %v2903_v3 = vadd.f32 %v6293_v11, %v2254_v41  ;;  %v3836_v11 = vld [vmem:[%s9094_s0 + $0x110] sm:$0xf] }
 0x129   :  { %v5222_v25 = vpop.eup %5221  ;;  %3581 = vst [vmem:[%s9096_s3 + $0x478] sm:$0xff] %v5220_v27  ;;  %v2585_v28 = vadd.f32 %v6330_v29, %v1936_v26  ;;  %v4921_v29 = vld [vmem:[%s9094_s0 + $0x114] sm:$0xf0]  ;;  %v3865_v27 = vor.u32 %v4926_v19, %v3862_v21 }
 0x12a   :  { %3454 = vst [vmem:[%s9096_s3 + $0x80] sm:$0xff] %v5222_v25  ;;  %5223 = vtanh.f32 %v2903_v3  ;;  %v3837_v13 = vor.u32 %v4921_v29, %v3836_v11  ;;  %v6455_v51 = vpop.f32.mrf.mxu3 }
 0x12b   :  { %5225 = vtanh.f32 %v2585_v28  ;;  %v6438_v36 = vpop.f32.mrf.mxu1 }
 0x12d   :  { %v2255_v42 = vpop.f32.mrf.mxu2 }
 0x12e   :  { %v2256_v43 = vadd.f32 %v5973_v61, %v2255_v42  ;;  %v1938_v44 = vpop.f32.mrf.mxu0  ;;  %v4385_v42 = vor.u32 %v5056_v37, %v4382_v38 }
 0x12f   :  { %v1939_v9 = vadd.f32 %v5973_v61, %v1938_v44  ;;  %v5053_v44 = vld [vmem:[%s9094_s0 + $0x534] sm:$0xf0] }
 0x130   :  { %v5224_v49 = vpop.eup %5223  ;;  %v2905_v4 = vadd.f32 %v6308_v12, %v2256_v43  ;;  %v4364_v43 = vld [vmem:[%s9094_s0 + $0x530] sm:$0xf] }
 0x131   :  { %v5226_v52 = vpop.eup %5225  ;;  %3582 = vst [vmem:[%s9096_s3 + $0x480] sm:$0xff] %v5224_v49  ;;  %v2588_v55 = vadd.f32 %v6357_v31, %v1939_v9  ;;  %1977 = vmatmul.bf16.gmra.mxu0 %v3837_v13  ;;  %v4365_v49 = vor.u32 %v5053_v44, %v4364_v43  ;;  %v5060_v43 = vld [vmem:[%s9094_s0 + $0x574] sm:$0xf]  ;;  %v4398_v44 = vld [vmem:[%s9094_s0 + $0x578] sm:$0xf0] }
 0x132   :  { %3455 = vst [vmem:[%s9096_s3 + $0x88] sm:$0xff] %v5226_v52  ;;  %5227 = vtanh.f32 %v2905_v4  ;;  %2297 = vmatmul.bf16.gmra.mxu2 %v4349_v47  ;;  %v6470_v31 = vpop.f32.mrf.mxu3  ;;  %v4928_v52 = vld [vmem:[%s9094_s0 + $0x154] sm:$0xf] }
 0x133   :  { %5229 = vtanh.f32 %v2588_v55  ;;  %v6465_v33 = vpop.f32.mrf.mxu1  ;;  %v3870_v55 = vld [vmem:[%s9094_s0 + $0x158] sm:$0xf0] }
 0x135   :  { %v2258_v53 = vpop.f32.mrf.mxu2 }
 0x136   :  { %v2259_v12 = vadd.f32 %v5973_v61, %v2258_v53  ;;  %4777 = vmatmul.msk.bf16.gmra.mxu1 %vm1499_vm0, %v3857_v56  ;;  %v1940_v57 = vpop.f32.mrf.mxu0 }
 0x137   :  { %v1941_v59 = vadd.f32 %v5973_v61, %v1940_v57  ;;  %4842 = vmatmul.msk.bf16.gmra.mxu3 %vm1499_vm0, %v4377_v5 }
 0x138   :  { %v5228_v60 = vpop.eup %5227  ;;  %v2908_v39 = vadd.f32 %v6347_v45, %v2259_v12  ;;  %v3844_v45 = vld [vmem:[%s9094_s0 + $0x120] sm:$0xf] }
 0x139   :  { %v5230_v58 = vpop.eup %5229  ;;  %3583 = vst [vmem:[%s9096_s3 + $0x488] sm:$0xff] %v5228_v60  ;;  %v2590_v63 = vadd.f32 %v6384_v0, %v1941_v59  ;;  %v4923_v0 = vld [vmem:[%s9094_s0 + $0x124] sm:$0xf0]  ;;  %v3873_v60 = vor.u32 %v4928_v52, %v3870_v55 }
 0x13a   :  { %3456 = vst [vmem:[%s9096_s3 + $0x90] sm:$0xff] %v5230_v58  ;;  %5231 = vtanh.f32 %v2908_v39  ;;  %v3845_v40 = vor.u32 %v4923_v0, %v3844_v45  ;;  %v6509_v22 = vpop.f32.mrf.mxu3 }
 0x13b   :  { %5233 = vtanh.f32 %v2590_v63  ;;  %v6492_v54 = vpop.f32.mrf.mxu1 }
 0x13d   :  { %v2260_v14 = vpop.f32.mrf.mxu2 }
 0x13e   :  { %v2261_v15 = vadd.f32 %v5973_v61, %v2260_v14  ;;  %v1943_v16 = vpop.f32.mrf.mxu0 }
 0x13f   :  { %v1944_v35 = vadd.f32 %v5973_v61, %v1943_v16 }
 0x140   :  { %v5232_v20 = vpop.eup %5231  ;;  %v2910_v41 = vadd.f32 %v6362_v46, %v2261_v15  ;;  %v5055_v15 = vld [vmem:[%s9094_s0 + $0x544] sm:$0xf0] }
 0x141   :  { %v5234_v23 = vpop.eup %5233  ;;  %3584 = vst [vmem:[%s9096_s3 + $0x490] sm:$0xff] %v5232_v20  ;;  %v2593_v26 = vadd.f32 %v6411_v62, %v1944_v35  ;;  %1982 = vmatmul.bf16.gmra.mxu0 %v3845_v40  ;;  %v4372_v40 = vld [vmem:[%s9094_s0 + $0x540] sm:$0xf] }
 0x142   :  { %3457 = vst [vmem:[%s9096_s3 + $0x98] sm:$0xff] %v5234_v23  ;;  %5235 = vtanh.f32 %v2910_v41  ;;  %2302 = vmatmul.bf16.gmra.mxu2 %v4357_v18  ;;  %v6524_v62 = vpop.f32.mrf.mxu3  ;;  %v6612_v35 = vld [vmem:[%s9095_s2] ss:$0 sm:$0xff]  ;;  %v4373_v20 = vor.u32 %v5055_v15, %v4372_v40  ;;  %v4930_v23 = vld [vmem:[%s9094_s0 + $0x164] sm:$0xf] }
 0x143   :  { %5237 = vtanh.f32 %v2593_v26  ;;  %v6519_v3 = vpop.f32.mrf.mxu1  ;;  %v3878_v26 = vld [vmem:[%s9094_s0 + $0x168] sm:$0xf0]  ;;  %v5062_v40 = vld [vmem:[%s9094_s0 + $0x584] sm:$0xf] }
 0x144   :  { %v4406_v15 = vld [vmem:[%s9094_s0 + $0x588] sm:$0xf0] }
 0x145   :  { %v2263_v25 = vpop.f32.mrf.mxu2 }
 0x146   :  { %v2264_v46 = vadd.f32 %v5973_v61, %v2263_v25  ;;  %4778 = vmatmul.msk.bf16.gmra.mxu1 %vm1499_vm0, %v3865_v27  ;;  %v1945_v28 = vpop.f32.mrf.mxu0 }
 0x147   :  { %v1946_v30 = vadd.f32 %v5973_v61, %v1945_v28  ;;  %4843 = vmatmul.msk.bf16.gmra.mxu3 %vm1499_vm0, %v4385_v42 }
 0x148   :  { %v5236_v32 = vpop.eup %5235  ;;  %v2913_v11 = vadd.f32 %v6401_v17, %v2264_v46  ;;  %v3852_v17 = vld [vmem:[%s9094_s0 + $0x130] sm:$0xf] }
 0x149   :  { %v5238_v29 = vpop.eup %5237  ;;  %3585 = vst [vmem:[%s9096_s3 + $0x498] sm:$0xff] %v5236_v32  ;;  %v2595_v34 = vadd.f32 %v6438_v36, %v1946_v30  ;;  %v4925_v36 = vld [vmem:[%s9094_s0 + $0x134] sm:$0xf0]  ;;  %v3881_v32 = vor.u32 %v4930_v23, %v3878_v26 }
 0x14a   :  { %3458 = vst [vmem:[%s9096_s3 + $0xa0] sm:$0xff] %v5238_v29  ;;  %5239 = vtanh.f32 %v2913_v11  ;;  %v3853_v9 = vor.u32 %v4925_v36, %v3852_v17  ;;  %v6563_v56 = vpop.f32.mrf.mxu3 }
 0x14b   :  { %5241 = vtanh.f32 %v2595_v34  ;;  %v6546_v13 = vpop.f32.mrf.mxu1 }
 0x14d   :  { %v2265_v47 = vpop.f32.mrf.mxu2 }
 0x14e   :  { %v2266_v48 = vadd.f32 %v5973_v61, %v2265_v47  ;;  %v1948_v50 = vpop.f32.mrf.mxu0  ;;  %v4401_v47 = vor.u32 %v5060_v43, %v4398_v44 }
 0x14f   :  { %v1949_v4 = vadd.f32 %v5973_v61, %v1948_v50  ;;  %v5057_v50 = vld [vmem:[%s9094_s0 + $0x554] sm:$0xf0] }
 0x150   :  { %v5240_v53 = vpop.eup %5239  ;;  %v2915_v12 = vadd.f32 %v6416_v6, %v2266_v48  ;;  %v4380_v48 = vld [vmem:[%s9094_s0 + $0x550] sm:$0xf] }
 0x151   :  { %v5242_v57 = vpop.eup %5241  ;;  %3586 = vst [vmem:[%s9096_s3 + $0x4a0] sm:$0xff] %v5240_v53  ;;  %v2598_v59 = vadd.f32 %v6465_v33, %v1949_v4  ;;  %1987 = vmatmul.bf16.gmra.mxu0 %v3853_v9  ;;  %v4381_v53 = vor.u32 %v5057_v50, %v4380_v48  ;;  %v5064_v48 = vld [vmem:[%s9094_s0 + $0x594] sm:$0xf]  ;;  %v4414_v50 = vld [vmem:[%s9094_s0 + $0x598] sm:$0xf0] }
 0x152   :  { %3459 = vst [vmem:[%s9096_s3 + $0xa8] sm:$0xff] %v5242_v57  ;;  %5243 = vtanh.f32 %v2915_v12  ;;  %2307 = vmatmul.bf16.gmra.mxu2 %v4365_v49  ;;  %v6578_v33 = vpop.f32.mrf.mxu3  ;;  %v4932_v57 = vld [vmem:[%s9094_s0 + $0x174] sm:$0xf] }
 0x153   :  { %5245 = vtanh.f32 %v2598_v59  ;;  %v6573_v39 = vpop.f32.mrf.mxu1  ;;  %v3886_v59 = vld [vmem:[%s9094_s0 + $0x178] sm:$0xf0] }
 0x155   :  { %v2268_v58 = vpop.f32.mrf.mxu2 }
 0x156   :  { %v2269_v6 = vadd.f32 %v5973_v61, %v2268_v58  ;;  %4779 = vmatmul.msk.bf16.gmra.mxu1 %vm1499_vm0, %v3873_v60  ;;  %v1950_v63 = vpop.f32.mrf.mxu0 }
 0x157   :  { %v1951_v1 = vadd.f32 %v5973_v61, %v1950_v63  ;;  %v4390_v61 = vld [vmem:[%s9094_s0 + $0x568] sm:$0xf0] }
 0x158   :  { %v5244_v2 = vpop.eup %5243  ;;  %v2918_v45 = vadd.f32 %v6455_v51, %v2269_v6  ;;  %v3860_v51 = vld [vmem:[%s9094_s0 + $0x140] sm:$0xf]  ;;  %v4393_v8 = vor.u32 %v5058_v7, %v4390_v61 }
 0x159   :  { %v5246_v0 = vpop.eup %5245  ;;  %3587 = vst [vmem:[%s9096_s3 + $0x4a8] sm:$0xff] %v5244_v2  ;;  %v2600_v5 = vadd.f32 %v6492_v54, %v1951_v1  ;;  %v4927_v54 = vld [vmem:[%s9094_s0 + $0x144] sm:$0xf0]  ;;  %v3889_v2 = vor.u32 %v4932_v57, %v3886_v59 }
 0x15a   :  { %3460 = vst [vmem:[%s9096_s3 + $0xb0] sm:$0xff] %v5246_v0  ;;  %5247 = vtanh.f32 %v2918_v45  ;;  %4844 = vmatmul.msk.bf16.gmra.mxu3 %vm1499_vm0, %v4393_v8  ;;  %v3861_v18 = vor.u32 %v4927_v54, %v3860_v51  ;;  %v6622_v27 = vpop.f32.mrf.mxu3 }
 0x15b   :  { %5249 = vtanh.f32 %v2600_v5  ;;  %v6600_v14 = vpop.f32.mrf.mxu1 }
 0x15d   :  { %v2270_v16 = vpop.f32.mrf.mxu2 }
 0x15e   :  { %v2271_v19 = vadd.f32 %v6612_v35, %v2270_v16  ;;  %v1953_v21 = vpop.f32.mrf.mxu0  ;;  %v4409_v16 = vor.u32 %v5062_v40, %v4406_v15 }
 0x15f   :  { %v1954_v41 = vadd.f32 %v6612_v35, %v1953_v21  ;;  %v5059_v21 = vld [vmem:[%s9094_s0 + $0x564] sm:$0xf0] }
 0x160   :  { %v5248_v25 = vpop.eup %5247  ;;  %v2920_v46 = vadd.f32 %v6470_v31, %v2271_v19  ;;  %v4388_v19 = vld [vmem:[%s9094_s0 + $0x560] sm:$0xf] }
 0x161   :  { %v5250_v28 = vpop.eup %5249  ;;  %3588 = vst [vmem:[%s9096_s3 + $0x4b0] sm:$0xff] %v5248_v25  ;;  %v2603_v30 = vadd.f32 %v6519_v3, %v1954_v41  ;;  %1992 = vmatmul.bf16.gmra.mxu0 %v3861_v18  ;;  %v4389_v25 = vor.u32 %v5059_v21, %v4388_v19  ;;  %v5066_v19 = vld [vmem:[%s9094_s0 + $0x5a4] sm:$0xf]  ;;  %v4422_v21 = vld [vmem:[%s9094_s0 + $0x5a8] sm:$0xf0] }
 0x162   :  { %3461 = vst [vmem:[%s9096_s3 + $0xb8] sm:$0xff] %v5250_v28  ;;  %5251 = vtanh.f32 %v2920_v46  ;;  %2312 = vmatmul.bf16.gmra.mxu2 %v4373_v20  ;;  %v6637_v3 = vpop.f32.mrf.mxu3  ;;  %v4934_v28 = vld [vmem:[%s9094_s0 + $0x184] sm:$0xf] }
 0x163   :  { %5253 = vtanh.f32 %v2603_v30  ;;  %v6632_v11 = vpop.f32.mrf.mxu1  ;;  %v3894_v30 = vld [vmem:[%s9094_s0 + $0x188] sm:$0xf0] }
 0x165   :  { %v2273_v29 = vpop.f32.mrf.mxu2 }
 0x166   :  { %v2274_v31 = vadd.f32 %v6612_v35, %v2273_v29  ;;  %4780 = vmatmul.msk.bf16.gmra.mxu1 %vm1499_vm0, %v3881_v32  ;;  %v1955_v34 = vpop.f32.mrf.mxu0 }
 0x167   :  { %v1956_v37 = vadd.f32 %v6612_v35, %v1955_v34 }
 0x168   :  { %v5252_v38 = vpop.eup %5251  ;;  %v2923_v17 = vadd.f32 %v6509_v22, %v2274_v31  ;;  %v3868_v22 = vld [vmem:[%s9094_s0 + $0x150] sm:$0xf] }
 0x169   :  { %v5254_v36 = vpop.eup %5253  ;;  %3589 = vst [vmem:[%s9096_s3 + $0x4b8] sm:$0xff] %v5252_v38  ;;  %v2605_v42 = vadd.f32 %v6546_v13, %v1956_v37  ;;  %v4929_v13 = vld [vmem:[%s9094_s0 + $0x154] sm:$0xf0]  ;;  %v3897_v38 = vor.u32 %v4934_v28, %v3894_v30 }
 0x16a   :  { %3462 = vst [vmem:[%s9096_s3 + $0xc0] sm:$0xff] %v5254_v36  ;;  %5255 = vtanh.f32 %v2923_v17  ;;  %4845 = vmatmul.msk.bf16.gmra.mxu3 %vm1499_vm0, %v4401_v47  ;;  %v3869_v4 = vor.u32 %v4929_v13, %v3868_v22  ;;  %v6676_v60 = vpop.f32.mrf.mxu3 }
 0x16b   :  { %5257 = vtanh.f32 %v2605_v42  ;;  %v6659_v9 = vpop.f32.mrf.mxu1 }
 0x16d   :  { %v2275_v49 = vpop.f32.mrf.mxu2 }
 0x16e   :  { %v2276_v52 = vadd.f32 %v6612_v35, %v2275_v49  ;;  %v1958_v55 = vpop.f32.mrf.mxu0  ;;  %v4417_v49 = vor.u32 %v5064_v48, %v4414_v50 }
 0x16f   :  { %v1959_v12 = vadd.f32 %v6612_v35, %v1958_v55  ;;  %v5061_v55 = vld [vmem:[%s9094_s0 + $0x574] sm:$0xf0] }
 0x170   :  { %v5256_v58 = vpop.eup %5255  ;;  %v2925_v6 = vadd.f32 %v6524_v62, %v2276_v52  ;;  %v4396_v52 = vld [vmem:[%s9094_s0 + $0x570] sm:$0xf] }
 0x171   :  { %v5258_v63 = vpop.eup %5257  ;;  %3590 = vst [vmem:[%s9096_s3 + $0x4c0] sm:$0xff] %v5256_v58  ;;  %v2608_v1 = vadd.f32 %v6573_v39, %v1959_v12  ;;  %1997 = vmatmul.bf16.gmra.mxu0 %v3869_v4  ;;  %v4397_v58 = vor.u32 %v5061_v55, %v4396_v52  ;;  %v5068_v52 = vld [vmem:[%s9094_s0 + $0x5b4] sm:$0xf]  ;;  %v4430_v55 = vld [vmem:[%s9094_s0 + $0x5b8] sm:$0xf0] }
 0x172   :  { %3463 = vst [vmem:[%s9096_s3 + $0xc8] sm:$0xff] %v5258_v63  ;;  %5259 = vtanh.f32 %v2925_v6  ;;  %2317 = vmatmul.bf16.gmra.mxu2 %v4381_v53  ;;  %v6691_v39 = vpop.f32.mrf.mxu3  ;;  %v4936_v63 = vld [vmem:[%s9094_s0 + $0x194] sm:$0xf] }
 0x173   :  { %5261 = vtanh.f32 %v2608_v1  ;;  %v6686_v45 = vpop.f32.mrf.mxu1  ;;  %v3902_v1 = vld [vmem:[%s9094_s0 + $0x198] sm:$0xf0] }
 0x175   :  { %v2278_v0 = vpop.f32.mrf.mxu2 }
 0x176   :  { %v2279_v62 = vadd.f32 %v6612_v35, %v2278_v0  ;;  %4781 = vmatmul.msk.bf16.gmra.mxu1 %vm1499_vm0, %v3889_v2  ;;  %v1960_v5 = vpop.f32.mrf.mxu0 }
 0x177   :  { %v1961_v7 = vadd.f32 %v6612_v35, %v1960_v5 }
 0x178   :  { %v5260_v61 = vpop.eup %5259  ;;  %v2928_v51 = vadd.f32 %v6563_v56, %v2279_v62  ;;  %v3876_v56 = vld [vmem:[%s9094_s0 + $0x160] sm:$0xf] }
 0x179   :  { %v5262_v54 = vpop.eup %5261  ;;  %3591 = vst [vmem:[%s9096_s3 + $0x4c8] sm:$0xff] %v5260_v61  ;;  %v2610_v8 = vadd.f32 %v6600_v14, %v1961_v7  ;;  %v4931_v14 = vld [vmem:[%s9094_s0 + $0x164] sm:$0xf0]  ;;  %v3905_v61 = vor.u32 %v4936_v63, %v3902_v1 }
 0x17a   :  { %3464 = vst [vmem:[%s9096_s3 + $0xd0] sm:$0xff] %v5262_v54  ;;  %5263 = vtanh.f32 %v2928_v51  ;;  %4846 = vmatmul.msk.bf16.gmra.mxu3 %vm1499_vm0, %v4409_v16  ;;  %v3877_v41 = vor.u32 %v4931_v14, %v3876_v56  ;;  %v6730_v32 = vpop.f32.mrf.mxu3 }
 0x17b   :  { %5265 = vtanh.f32 %v2610_v8  ;;  %v6713_v18 = vpop.f32.mrf.mxu1 }
 0x17d   :  { %v2280_v20 = vpop.f32.mrf.mxu2 }
 0x17e   :  { %v2281_v23 = vadd.f32 %v6612_v35, %v2280_v20  ;;  %v1963_v26 = vpop.f32.mrf.mxu0  ;;  %v4425_v20 = vor.u32 %v5066_v19, %v4422_v21 }
 0x17f   :  { %v1964_v46 = vadd.f32 %v6612_v35, %v1963_v26  ;;  %v5063_v26 = vld [vmem:[%s9094_s0 + $0x584] sm:$0xf0] }
 0x180   :  { %v5264_v29 = vpop.eup %5263  ;;  %v2930_v31 = vadd.f32 %v6578_v33, %v2281_v23  ;;  %v4404_v23 = vld [vmem:[%s9094_s0 + $0x580] sm:$0xf] }
 0x181   :  { %v5266_v34 = vpop.eup %5265  ;;  %3592 = vst [vmem:[%s9096_s3 + $0x4d0] sm:$0xff] %v5264_v29  ;;  %v2613_v37 = vadd.f32 %v6632_v11, %v1964_v46  ;;  %2002 = vmatmul.bf16.gmra.mxu0 %v3877_v41  ;;  %v4405_v29 = vor.u32 %v5063_v26, %v4404_v23  ;;  %v5070_v23 = vld [vmem:[%s9094_s0 + $0x5c4] sm:$0xf]  ;;  %v4438_v26 = vld [vmem:[%s9094_s0 + $0x5c8] sm:$0xf0] }
 0x182   :  { %3465 = vst [vmem:[%s9096_s3 + $0xd8] sm:$0xff] %v5266_v34  ;;  %5267 = vtanh.f32 %v2930_v31  ;;  %2322 = vmatmul.bf16.gmra.mxu2 %v4389_v25  ;;  %v6745_v11 = vpop.f32.mrf.mxu3  ;;  %v4938_v34 = vld [vmem:[%s9094_s0 + $0x1a4] sm:$0xf] }
 0x183   :  { %5269 = vtanh.f32 %v2613_v37  ;;  %v6740_v17 = vpop.f32.mrf.mxu1  ;;  %v3910_v37 = vld [vmem:[%s9094_s0 + $0x1a8] sm:$0xf0] }
 0x185   :  { %v2283_v36 = vpop.f32.mrf.mxu2 }
 0x186   :  { %v2284_v33 = vadd.f32 %v6612_v35, %v2283_v36  ;;  %4782 = vmatmul.msk.bf16.gmra.mxu1 %vm1499_vm0, %v3897_v38  ;;  %v1965_v42 = vpop.f32.mrf.mxu0 }
 0x187   :  { %v1966_v43 = vadd.f32 %v6612_v35, %v1965_v42 }
 0x188   :  { %v5268_v44 = vpop.eup %5267  ;;  %v2933_v22 = vadd.f32 %v6622_v27, %v2284_v33  ;;  %v3884_v27 = vld [vmem:[%s9094_s0 + $0x170] sm:$0xf] }
 0x189   :  { %v5270_v13 = vpop.eup %5269  ;;  %3593 = vst [vmem:[%s9096_s3 + $0x4d8] sm:$0xff] %v5268_v44  ;;  %v2615_v47 = vadd.f32 %v6659_v9, %v1966_v43  ;;  %v4933_v9 = vld [vmem:[%s9094_s0 + $0x174] sm:$0xf0]  ;;  %v3913_v44 = vor.u32 %v4938_v34, %v3910_v37 }
 0x18a   :  { %3466 = vst [vmem:[%s9096_s3 + $0xe0] sm:$0xff] %v5270_v13  ;;  %5271 = vtanh.f32 %v2933_v22  ;;  %4847 = vmatmul.msk.bf16.gmra.mxu3 %vm1499_vm0, %v4417_v49  ;;  %v3885_v12 = vor.u32 %v4933_v9, %v3884_v27  ;;  %v6784_v2 = vpop.f32.mrf.mxu3 }
 0x18b   :  { %5273 = vtanh.f32 %v2615_v47  ;;  %v6767_v4 = vpop.f32.mrf.mxu1 }
 0x18d   :  { %v2285_v53 = vpop.f32.mrf.mxu2 }
 0x18e   :  { %v2286_v57 = vadd.f32 %v6612_v35, %v2285_v53  ;;  %v1968_v59 = vpop.f32.mrf.mxu0  ;;  %v4433_v53 = vor.u32 %v5068_v52, %v4430_v55 }
 0x18f   :  { %v1969_v6 = vadd.f32 %v6612_v35, %v1968_v59  ;;  %v5065_v59 = vld [vmem:[%s9094_s0 + $0x594] sm:$0xf0] }
 0x190   :  { %v5272_v0 = vpop.eup %5271  ;;  %v2935_v62 = vadd.f32 %v6637_v3, %v2286_v57  ;;  %v4412_v57 = vld [vmem:[%s9094_s0 + $0x590] sm:$0xf] }
 0x191   :  { %v5274_v5 = vpop.eup %5273  ;;  %3594 = vst [vmem:[%s9096_s3 + $0x4e0] sm:$0xff] %v5272_v0  ;;  %v2618_v7 = vadd.f32 %v6686_v45, %v1969_v6  ;;  %2007 = vmatmul.bf16.gmra.mxu0 %v3885_v12  ;;  %v4413_v0 = vor.u32 %v5065_v59, %v4412_v57  ;;  %v5072_v57 = vld [vmem:[%s9094_s0 + $0x5d4] sm:$0xf]  ;;  %v4446_v59 = vld [vmem:[%s9094_s0 + $0x5d8] sm:$0xf0] }
 0x192   :  { %3467 = vst [vmem:[%s9096_s3 + $0xe8] sm:$0xff] %v5274_v5  ;;  %5275 = vtanh.f32 %v2935_v62  ;;  %2327 = vmatmul.bf16.gmra.mxu2 %v4397_v58  ;;  %v6799_v45 = vpop.f32.mrf.mxu3  ;;  %v4940_v5 = vld [vmem:[%s9094_s0 + $0x1b4] sm:$0xf] }
 0x193   :  { %5277 = vtanh.f32 %v2618_v7  ;;  %v6794_v51 = vpop.f32.mrf.mxu1  ;;  %v3918_v7 = vld [vmem:[%s9094_s0 + $0x1b8] sm:$0xf0] }
 0x195   :  { %v2288_v54 = vpop.f32.mrf.mxu2 }
 0x196   :  { %v2289_v3 = vadd.f32 %v6612_v35, %v2288_v54  ;;  %4783 = vmatmul.msk.bf16.gmra.mxu1 %vm1499_vm0, %v3905_v61  ;;  %v1970_v8 = vpop.f32.mrf.mxu0 }
 0x197   :  { %v1971_v40 = vadd.f32 %v6612_v35, %v1970_v8 }
 0x198   :  { %v5276_v15 = vpop.eup %5275  ;;  %v2938_v56 = vadd.f32 %v6676_v60, %v2289_v3  ;;  %v3892_v60 = vld [vmem:[%s9094_s0 + $0x180] sm:$0xf] }
 0x199   :  { %v5278_v14 = vpop.eup %5277  ;;  %3595 = vst [vmem:[%s9096_s3 + $0x4e8] sm:$0xff] %v5276_v15  ;;  %v2620_v16 = vadd.f32 %v6713_v18, %v1971_v40  ;;  %v4935_v18 = vld [vmem:[%s9094_s0 + $0x184] sm:$0xf0]  ;;  %v3921_v15 = vor.u32 %v4940_v5, %v3918_v7 }
 0x19a   :  { %3468 = vst [vmem:[%s9096_s3 + $0xf0] sm:$0xff] %v5278_v14  ;;  %5279 = vtanh.f32 %v2938_v56  ;;  %4848 = vmatmul.msk.bf16.gmra.mxu3 %vm1499_vm0, %v4425_v20  ;;  %v3893_v46 = vor.u32 %v4935_v18, %v3892_v60  ;;  %v6838_v38 = vpop.f32.mrf.mxu3 }
 0x19b   :  { %5281 = vtanh.f32 %v2620_v16  ;;  %v6821_v41 = vpop.f32.mrf.mxu1 }
 0x19d   :  { %v2290_v25 = vpop.f32.mrf.mxu2 }
 0x19e   :  { %v2291_v28 = vadd.f32 %v6612_v35, %v2290_v25  ;;  %v1973_v30 = vpop.f32.mrf.mxu0  ;;  %v4441_v25 = vor.u32 %v5070_v23, %v4438_v26 }
 0x19f   :  { %v1974_v31 = vadd.f32 %v6612_v35, %v1973_v30  ;;  %v5067_v30 = vld [vmem:[%s9094_s0 + $0x5a4] sm:$0xf0] }
 0x1a0   :  { %v5280_v36 = vpop.eup %5279  ;;  %v2940_v33 = vadd.f32 %v6691_v39, %v2291_v28  ;;  %v4420_v28 = vld [vmem:[%s9094_s0 + $0x5a0] sm:$0xf] }
 0x1a1   :  { %v5282_v42 = vpop.eup %5281  ;;  %3596 = vst [vmem:[%s9096_s3 + $0x4f0] sm:$0xff] %v5280_v36  ;;  %v2623_v43 = vadd.f32 %v6740_v17, %v1974_v31  ;;  %2012 = vmatmul.bf16.gmra.mxu0 %v3893_v46  ;;  %v4421_v36 = vor.u32 %v5067_v30, %v4420_v28  ;;  %v5074_v28 = vld [vmem:[%s9094_s0 + $0x5e4] sm:$0xf]  ;;  %v4454_v30 = vld [vmem:[%s9094_s0 + $0x5e8] sm:$0xf0] }
 0x1a2   :  { %3469 = vst [vmem:[%s9096_s3 + $0xf8] sm:$0xff] %v5282_v42  ;;  %5283 = vtanh.f32 %v2940_v33  ;;  %2332 = vmatmul.bf16.gmra.mxu2 %v4405_v29  ;;  %v6853_v17 = vpop.f32.mrf.mxu3  ;;  %v4942_v42 = vld [vmem:[%s9094_s0 + $0x1c4] sm:$0xf] }
 0x1a3   :  { %5285 = vtanh.f32 %v2623_v43  ;;  %v6848_v22 = vpop.f32.mrf.mxu1  ;;  %v3926_v43 = vld [vmem:[%s9094_s0 + $0x1c8] sm:$0xf0] }
 0x1a5   :  { %v2293_v13 = vpop.f32.mrf.mxu2 }
 0x1a6   :  { %v2294_v39 = vadd.f32 %v6612_v35, %v2293_v13  ;;  %4784 = vmatmul.msk.bf16.gmra.mxu1 %vm1499_vm0, %v3913_v44  ;;  %v1975_v47 = vpop.f32.mrf.mxu0 }
 0x1a7   :  { %v1976_v48 = vadd.f32 %v6612_v35, %v1975_v47 }
 0x1a8   :  { %v5284_v50 = vpop.eup %5283  ;;  %v2943_v27 = vadd.f32 %v6730_v32, %v2294_v39  ;;  %v3900_v32 = vld [vmem:[%s9094_s0 + $0x190] sm:$0xf] }
 0x1a9   :  { %v5286_v9 = vpop.eup %5285  ;;  %3597 = vst [vmem:[%s9096_s3 + $0x4f8] sm:$0xff] %v5284_v50  ;;  %v2625_v49 = vadd.f32 %v6767_v4, %v1976_v48  ;;  %v4937_v4 = vld [vmem:[%s9094_s0 + $0x194] sm:$0xf0]  ;;  %v3929_v50 = vor.u32 %v4942_v42, %v3926_v43 }
 0x1aa   :  { %3470 = vst [vmem:[%s9096_s3 + $0x100] sm:$0xff] %v5286_v9  ;;  %5287 = vtanh.f32 %v2943_v27  ;;  %4849 = vmatmul.msk.bf16.gmra.mxu3 %vm1499_vm0, %v4433_v53  ;;  %v3901_v6 = vor.u32 %v4937_v4, %v3900_v32  ;;  %v6892_v61 = vpop.f32.mrf.mxu3 }
 0x1ab   :  { %5289 = vtanh.f32 %v2625_v49  ;;  %v6875_v12 = vpop.f32.mrf.mxu1 }
 0x1ad   :  { %v2295_v58 = vpop.f32.mrf.mxu2 }
 0x1ae   :  { %v2296_v63 = vadd.f32 %v6612_v35, %v2295_v58  ;;  %v1978_v1 = vpop.f32.mrf.mxu0  ;;  %v4449_v58 = vor.u32 %v5072_v57, %v4446_v59 }
 0x1af   :  { %v1979_v62 = vadd.f32 %v6612_v35, %v1978_v1  ;;  %v5069_v1 = vld [vmem:[%s9094_s0 + $0x5b4] sm:$0xf0] }
 0x1b0   :  { %v5288_v54 = vpop.eup %5287  ;;  %v2945_v3 = vadd.f32 %v6745_v11, %v2296_v63  ;;  %v4428_v63 = vld [vmem:[%s9094_s0 + $0x5b0] sm:$0xf] }
 0x1b1   :  { %v5290_v8 = vpop.eup %5289  ;;  %3598 = vst [vmem:[%s9096_s3 + $0x500] sm:$0xff] %v5288_v54  ;;  %v2628_v40 = vadd.f32 %v6794_v51, %v1979_v62  ;;  %2017 = vmatmul.bf16.gmra.mxu0 %v3901_v6  ;;  %v4429_v54 = vor.u32 %v5069_v1, %v4428_v63  ;;  %v5076_v63 = vld [vmem:[%s9094_s0 + $0x5f4] sm:$0xf]  ;;  %v4462_v1 = vld [vmem:[%s9094_s0 + $0x5f8] sm:$0xf0] }
 0x1b2   :  { %3471 = vst [vmem:[%s9096_s3 + $0x108] sm:$0xff] %v5290_v8  ;;  %5291 = vtanh.f32 %v2945_v3  ;;  %2337 = vmatmul.bf16.gmra.mxu2 %v4413_v0  ;;  %v6907_v51 = vpop.f32.mrf.mxu3  ;;  %v4944_v8 = vld [vmem:[%s9094_s0 + $0x1d4] sm:$0xf] }
 0x1b3   :  { %5293 = vtanh.f32 %v2628_v40  ;;  %v6902_v56 = vpop.f32.mrf.mxu1  ;;  %v3934_v40 = vld [vmem:[%s9094_s0 + $0x1d8] sm:$0xf0] }
 0x1b5   :  { %v2298_v14 = vpop.f32.mrf.mxu2 }
 0x1b6   :  { %v2299_v11 = vadd.f32 %v6612_v35, %v2298_v14  ;;  %4785 = vmatmul.msk.bf16.gmra.mxu1 %vm1499_vm0, %v3921_v15  ;;  %v1980_v16 = vpop.f32.mrf.mxu0 }
 0x1b7   :  { %v1981_v19 = vadd.f32 %v6612_v35, %v1980_v16 }
 0x1b8   :  { %v5292_v21 = vpop.eup %5291  ;;  %v2948_v60 = vadd.f32 %v6784_v2, %v2299_v11  ;;  %v3908_v2 = vld [vmem:[%s9094_s0 + $0x1a0] sm:$0xf] }
 0x1b9   :  { %v5294_v18 = vpop.eup %5293  ;;  %3599 = vst [vmem:[%s9096_s3 + $0x508] sm:$0xff] %v5292_v21  ;;  %v2630_v20 = vadd.f32 %v6821_v41, %v1981_v19  ;;  %v4939_v41 = vld [vmem:[%s9094_s0 + $0x1a4] sm:$0xf0]  ;;  %v3937_v21 = vor.u32 %v4944_v8, %v3934_v40 }
 0x1ba   :  { %3472 = vst [vmem:[%s9096_s3 + $0x110] sm:$0xff] %v5294_v18  ;;  %5295 = vtanh.f32 %v2948_v60  ;;  %4850 = vmatmul.msk.bf16.gmra.mxu3 %vm1499_vm0, %v4441_v25  ;;  %v3909_v31 = vor.u32 %v4939_v41, %v3908_v2  ;;  %v6946_v44 = vpop.f32.mrf.mxu3 }
 0x1bb   :  { %5297 = vtanh.f32 %v2630_v20  ;;  %v6929_v46 = vpop.f32.mrf.mxu1 }
 0x1bd   :  { %v2300_v29 = vpop.f32.mrf.mxu2 }
 0x1be   :  { %v2301_v34 = vadd.f32 %v6612_v35, %v2300_v29  ;;  %v1983_v37 = vpop.f32.mrf.mxu0  ;;  %v4457_v29 = vor.u32 %v5074_v28, %v4454_v30 }
 0x1bf   :  { %v1984_v33 = vadd.f32 %v6612_v35, %v1983_v37  ;;  %v5071_v37 = vld [vmem:[%s9094_s0 + $0x5c4] sm:$0xf0] }
 0x1c0   :  { %v5296_v13 = vpop.eup %5295  ;;  %v2950_v39 = vadd.f32 %v6799_v45, %v2301_v34  ;;  %v4436_v34 = vld [vmem:[%s9094_s0 + $0x5c0] sm:$0xf] }
 0x1c1   :  { %v5298_v47 = vpop.eup %5297  ;;  %3600 = vst [vmem:[%s9096_s3 + $0x510] sm:$0xff] %v5296_v13  ;;  %v2633_v48 = vadd.f32 %v6848_v22, %v1984_v33  ;;  %2022 = vmatmul.bf16.gmra.mxu0 %v3909_v31  ;;  %v4437_v13 = vor.u32 %v5071_v37, %v4436_v34  ;;  %v5078_v34 = vld [vmem:[%s9094_s0 + $0x604] sm:$0xf]  ;;  %v4470_v37 = vld [vmem:[%s9094_s0 + $0x608] sm:$0xf0] }
 0x1c2   :  { %3473 = vst [vmem:[%s9096_s3 + $0x118] sm:$0xff] %v5298_v47  ;;  %5299 = vtanh.f32 %v2950_v39  ;;  %2342 = vmatmul.bf16.gmra.mxu2 %v4421_v36  ;;  %v6961_v22 = vpop.f32.mrf.mxu3  ;;  %v4946_v47 = vld [vmem:[%s9094_s0 + $0x1e4] sm:$0xf] }
 0x1c3   :  { %5301 = vtanh.f32 %v2633_v48  ;;  %v6956_v27 = vpop.f32.mrf.mxu1  ;;  %v3942_v48 = vld [vmem:[%s9094_s0 + $0x1e8] sm:$0xf0] }
 0x1c5   :  { %v2303_v9 = vpop.f32.mrf.mxu2 }
 0x1c6   :  { %v2304_v45 = vadd.f32 %v6612_v35, %v2303_v9  ;;  %4786 = vmatmul.msk.bf16.gmra.mxu1 %vm1499_vm0, %v3929_v50  ;;  %v1985_v49 = vpop.f32.mrf.mxu0 }
 0x1c7   :  { %v1986_v52 = vadd.f32 %v6612_v35, %v1985_v49 }
 0x1c8   :  { %v5300_v55 = vpop.eup %5299  ;;  %v2953_v32 = vadd.f32 %v6838_v38, %v2304_v45  ;;  %v3916_v38 = vld [vmem:[%s9094_s0 + $0x1b0] sm:$0xf] }
 0x1c9   :  { %v5302_v4 = vpop.eup %5301  ;;  %3601 = vst [vmem:[%s9096_s3 + $0x518] sm:$0xff] %v5300_v55  ;;  %v2635_v53 = vadd.f32 %v6875_v12, %v1986_v52  ;;  %v4941_v12 = vld [vmem:[%s9094_s0 + $0x1b4] sm:$0xf0]  ;;  %v3945_v55 = vor.u32 %v4946_v47, %v3942_v48 }
 0x1ca   :  { %3474 = vst [vmem:[%s9096_s3 + $0x120] sm:$0xff] %v5302_v4  ;;  %5303 = vtanh.f32 %v2953_v32  ;;  %4851 = vmatmul.msk.bf16.gmra.mxu3 %vm1499_vm0, %v4449_v58  ;;  %v3917_v62 = vor.u32 %v4941_v12, %v3916_v38  ;;  %v7000_v15 = vpop.f32.mrf.mxu3 }
 0x1cb   :  { %5305 = vtanh.f32 %v2635_v53  ;;  %v6983_v6 = vpop.f32.mrf.mxu1 }
 0x1cd   :  { %v2305_v0 = vpop.f32.mrf.mxu2 }
 0x1ce   :  { %v2306_v5 = vadd.f32 %v6612_v35, %v2305_v0  ;;  %v1988_v7 = vpop.f32.mrf.mxu0  ;;  %v4465_v0 = vor.u32 %v5076_v63, %v4462_v1 }
 0x1cf   :  { %v1989_v3 = vadd.f32 %v6612_v35, %v1988_v7  ;;  %v5073_v7 = vld [vmem:[%s9094_s0 + $0x5d4] sm:$0xf0] }
 0x1d0   :  { %v5304_v14 = vpop.eup %5303  ;;  %v2955_v11 = vadd.f32 %v6853_v17, %v2306_v5  ;;  %v4444_v5 = vld [vmem:[%s9094_s0 + $0x5d0] sm:$0xf] }
 0x1d1   :  { %v5306_v16 = vpop.eup %5305  ;;  %3602 = vst [vmem:[%s9096_s3 + $0x520] sm:$0xff] %v5304_v14  ;;  %v2638_v19 = vadd.f32 %v6902_v56, %v1989_v3  ;;  %2027 = vmatmul.bf16.gmra.mxu0 %v3917_v62  ;;  %v4445_v14 = vor.u32 %v5073_v7, %v4444_v5  ;;  %v5080_v5 = vld [vmem:[%s9094_s0 + $0x614] sm:$0xf]  ;;  %v4478_v7 = vld [vmem:[%s9094_s0 + $0x618] sm:$0xf0] }
 0x1d2   :  { %3475 = vst [vmem:[%s9096_s3 + $0x128] sm:$0xff] %v5306_v16  ;;  %5307 = vtanh.f32 %v2955_v11  ;;  %2347 = vmatmul.bf16.gmra.mxu2 %v4429_v54  ;;  %v7015_v56 = vpop.f32.mrf.mxu3  ;;  %v4948_v16 = vld [vmem:[%s9094_s0 + $0x1f4] sm:$0xf] }
 0x1d3   :  { %5309 = vtanh.f32 %v2638_v19  ;;  %v7010_v60 = vpop.f32.mrf.mxu1  ;;  %v3950_v19 = vld [vmem:[%s9094_s0 + $0x1f8] sm:$0xf0] }
 0x1d5   :  { %v2308_v18 = vpop.f32.mrf.mxu2 }
 0x1d6   :  { %v2309_v17 = vadd.f32 %v6612_v35, %v2308_v18  ;;  %4787 = vmatmul.msk.bf16.gmra.mxu1 %vm1499_vm0, %v3937_v21  ;;  %v1990_v20 = vpop.f32.mrf.mxu0 }
 0x1d7   :  { %v1991_v23 = vadd.f32 %v6612_v35, %v1990_v20 }
 0x1d8   :  { %v5308_v26 = vpop.eup %5307  ;;  %v2958_v2 = vadd.f32 %v6892_v61, %v2309_v17  ;;  %v3924_v61 = vld [vmem:[%s9094_s0 + $0x1c0] sm:$0xf] }
 0x1d9   :  { %v5310_v41 = vpop.eup %5309  ;;  %3603 = vst [vmem:[%s9096_s3 + $0x528] sm:$0xff] %v5308_v26  ;;  %v2640_v25 = vadd.f32 %v6929_v46, %v1991_v23  ;;  %v4943_v46 = vld [vmem:[%s9094_s0 + $0x1c4] sm:$0xf0]  ;;  %v3953_v26 = vor.u32 %v4948_v16, %v3950_v19 }
 0x1da   :  { %3476 = vst [vmem:[%s9096_s3 + $0x130] sm:$0xff] %v5310_v41  ;;  %5311 = vtanh.f32 %v2958_v2  ;;  %4852 = vmatmul.msk.bf16.gmra.mxu3 %vm1499_vm0, %v4457_v29  ;;  %v3925_v33 = vor.u32 %v4943_v46, %v3924_v61 }
 0x1db   :  { %5313 = vtanh.f32 %v2640_v25  ;;  %v7037_v31 = vpop.f32.mrf.mxu1 }
 0x1dd   :  { %v2310_v36 = vpop.f32.mrf.mxu2  ;;  %v7054_v50 = vpop.f32.mrf.mxu3 }
 0x1de   :  { %v2311_v42 = vadd.f32 %v6612_v35, %v2310_v36  ;;  %v1993_v43 = vpop.f32.mrf.mxu0  ;;  %v4473_v36 = vor.u32 %v5078_v34, %v4470_v37 }
 0x1df   :  { %v1994_v39 = vadd.f32 %v6612_v35, %v1993_v43  ;;  %v5075_v43 = vld [vmem:[%s9094_s0 + $0x5e4] sm:$0xf0] }
 0x1e0   :  { %v5312_v9 = vpop.eup %5311  ;;  %v2960_v45 = vadd.f32 %v6907_v51, %v2311_v42  ;;  %v4452_v42 = vld [vmem:[%s9094_s0 + $0x5e0] sm:$0xf] }
 0x1e1   :  { %v5314_v49 = vpop.eup %5313  ;;  %3604 = vst [vmem:[%s9096_s3 + $0x530] sm:$0xff] %v5312_v9  ;;  %v2643_v52 = vadd.f32 %v6956_v27, %v1994_v39  ;;  %2032 = vmatmul.bf16.gmra.mxu0 %v3925_v33  ;;  %v4453_v9 = vor.u32 %v5075_v43, %v4452_v42  ;;  %v5082_v42 = vld [vmem:[%s9094_s0 + $0x624] sm:$0xf] }
 0x1e2   :  { %3477 = vst [vmem:[%s9096_s3 + $0x138] sm:$0xff] %v5314_v49  ;;  %5315 = vtanh.f32 %v2960_v45  ;;  %2352 = vmatmul.bf16.gmra.mxu2 %v4437_v13  ;;  %v4950_v49 = vld [vmem:[%s9094_s0 + $0x204] sm:$0xf] }
 0x1e3   :  { %5317 = vtanh.f32 %v2643_v52  ;;  %v7064_v32 = vpop.f32.mrf.mxu1  ;;  %v3958_v52 = vld [vmem:[%s9094_s0 + $0x208] sm:$0xf0] }
 0x1e5   :  { %v2313_v4 = vpop.f32.mrf.mxu2  ;;  %v7069_v27 = vpop.f32.mrf.mxu3 }
 0x1e6   :  { %v2314_v51 = vadd.f32 %v6612_v35, %v2313_v4  ;;  %4788 = vmatmul.msk.bf16.gmra.mxu1 %vm1499_vm0, %v3945_v55  ;;  %v1995_v53 = vpop.f32.mrf.mxu0 }
 0x1e7   :  { %v1996_v57 = vadd.f32 %v6612_v35, %v1995_v53 }
 0x1e8   :  { %v5316_v59 = vpop.eup %5315  ;;  %v2963_v38 = vadd.f32 %v6946_v44, %v2314_v51  ;;  %v3932_v44 = vld [vmem:[%s9094_s0 + $0x1d0] sm:$0xf] }
 0x1e9   :  { %v5318_v12 = vpop.eup %5317  ;;  %3605 = vst [vmem:[%s9096_s3 + $0x538] sm:$0xff] %v5316_v59  ;;  %v2645_v58 = vadd.f32 %v6983_v6, %v1996_v57  ;;  %v4945_v6 = vld [vmem:[%s9094_s0 + $0x1d4] sm:$0xf0]  ;;  %v3961_v59 = vor.u32 %v4950_v49, %v3958_v52 }
 0x1ea   :  { %3478 = vst [vmem:[%s9096_s3 + $0x140] sm:$0xff] %v5318_v12  ;;  %5319 = vtanh.f32 %v2963_v38  ;;  %4853 = vmatmul.msk.bf16.gmra.mxu3 %vm1499_vm0, %v4465_v0  ;;  %v3933_v3 = vor.u32 %v4945_v6, %v3932_v44 }
 0x1eb   :  { %5321 = vtanh.f32 %v2645_v58  ;;  %v7091_v62 = vpop.f32.mrf.mxu1 }
 0x1ed   :  { %v2315_v54 = vpop.f32.mrf.mxu2  ;;  %v7108_v21 = vpop.f32.mrf.mxu3 }
 0x1ee   :  { %v2316_v8 = vadd.f32 %v6612_v35, %v2315_v54  ;;  %v1998_v40 = vpop.f32.mrf.mxu0  ;;  %v4481_v54 = vor.u32 %v5080_v5, %v4478_v7 }
 0x1ef   :  { %v1999_v11 = vadd.f32 %v6612_v35, %v1998_v40  ;;  %v5077_v40 = vld [vmem:[%s9094_s0 + $0x5f4] sm:$0xf0] }
 0x1f0   :  { %v5320_v18 = vpop.eup %5319  ;;  %v2965_v17 = vadd.f32 %v6961_v22, %v2316_v8  ;;  %v4460_v8 = vld [vmem:[%s9094_s0 + $0x5f0] sm:$0xf] }
 0x1f1   :  { %v5322_v20 = vpop.eup %5321  ;;  %3606 = vst [vmem:[%s9096_s3 + $0x540] sm:$0xff] %v5320_v18  ;;  %v2648_v23 = vadd.f32 %v7010_v60, %v1999_v11  ;;  %2037 = vmatmul.bf16.gmra.mxu0 %v3933_v3  ;;  %v4461_v18 = vor.u32 %v5077_v40, %v4460_v8  ;;  %v5084_v8 = vld [vmem:[%s9094_s0 + $0x634] sm:$0xf]  ;;  %v4494_v40 = vld [vmem:[%s9094_s0 + $0x638] sm:$0xf0] }
 0x1f2   :  { %3479 = vst [vmem:[%s9096_s3 + $0x148] sm:$0xff] %v5322_v20  ;;  %5323 = vtanh.f32 %v2965_v17  ;;  %2357 = vmatmul.bf16.gmra.mxu2 %v4445_v14  ;;  %v4952_v20 = vld [vmem:[%s9094_s0 + $0x214] sm:$0xf] }
 0x1f3   :  { %5325 = vtanh.f32 %v2648_v23  ;;  %v7118_v2 = vpop.f32.mrf.mxu1  ;;  %v3966_v23 = vld [vmem:[%s9094_s0 + $0x218] sm:$0xf0] }
 0x1f5   :  { %v2318_v41 = vpop.f32.mrf.mxu2  ;;  %v7123_v60 = vpop.f32.mrf.mxu3 }
 0x1f6   :  { %v2319_v22 = vadd.f32 %v6612_v35, %v2318_v41  ;;  %4789 = vmatmul.msk.bf16.gmra.mxu1 %vm1499_vm0, %v3953_v26  ;;  %v2000_v25 = vpop.f32.mrf.mxu0 }
 0x1f7   :  { %v2001_v28 = vadd.f32 %v6612_v35, %v2000_v25 }
 0x1f8   :  { %v5324_v30 = vpop.eup %5323  ;;  %v2968_v61 = vadd.f32 %v7000_v15, %v2319_v22  ;;  %v3940_v15 = vld [vmem:[%s9094_s0 + $0x1e0] sm:$0xf] }
 0x1f9   :  { %v5326_v46 = vpop.eup %5325  ;;  %3607 = vst [vmem:[%s9096_s3 + $0x548] sm:$0xff] %v5324_v30  ;;  %v2650_v29 = vadd.f32 %v7037_v31, %v2001_v28  ;;  %v4947_v31 = vld [vmem:[%s9094_s0 + $0x1e4] sm:$0xf0]  ;;  %v3969_v30 = vor.u32 %v4952_v20, %v3966_v23 }
 0x1fa   :  { %3480 = vst [vmem:[%s9096_s3 + $0x150] sm:$0xff] %v5326_v46  ;;  %5327 = vtanh.f32 %v2968_v61  ;;  %4854 = vmatmul.msk.bf16.gmra.mxu3 %vm1499_vm0, %v4473_v36  ;;  %v3941_v39 = vor.u32 %v4947_v31, %v3940_v15 }
 0x1fb   :  { %5329 = vtanh.f32 %v2650_v29  ;;  %v7145_v33 = vpop.f32.mrf.mxu1 }
 0x1fd   :  { %v2320_v13 = vpop.f32.mrf.mxu2  ;;  %v7162_v55 = vpop.f32.mrf.mxu3 }
 0x1fe   :  { %v2321_v47 = vadd.f32 %v6612_v35, %v2320_v13  ;;  %v2003_v48 = vpop.f32.mrf.mxu0 }
 0x1ff   :  { %v2004_v45 = vadd.f32 %v6612_v35, %v2003_v48 }
 0x200   :  { %v5328_v4 = vpop.eup %5327  ;;  %v2970_v51 = vadd.f32 %v7015_v56, %v2321_v47  ;;  %v5079_v47 = vld [vmem:[%s9094_s0 + $0x604] sm:$0xf0] }
 0x201   :  { %v5330_v53 = vpop.eup %5329  ;;  %3608 = vst [vmem:[%s9096_s3 + $0x550] sm:$0xff] %v5328_v4  ;;  %v2653_v57 = vadd.f32 %v7064_v32, %v2004_v45  ;;  %2042 = vmatmul.bf16.gmra.mxu0 %v3941_v39  ;;  %v4468_v39 = vld [vmem:[%s9094_s0 + $0x600] sm:$0xf] }
 0x202   :  { %3481 = vst [vmem:[%s9096_s3 + $0x158] sm:$0xff] %v5330_v53  ;;  %5331 = vtanh.f32 %v2970_v51  ;;  %2362 = vmatmul.bf16.gmra.mxu2 %v4453_v9  ;;  %v7265_v45 = vld [vmem:[%s9095_s2] ss:$0 sm:$0xff]  ;;  %v4469_v4 = vor.u32 %v5079_v47, %v4468_v39  ;;  %v4954_v53 = vld [vmem:[%s9094_s0 + $0x224] sm:$0xf] }
 0x203   :  { %5333 = vtanh.f32 %v2653_v57  ;;  %v7172_v38 = vpop.f32.mrf.mxu1  ;;  %v3974_v57 = vld [vmem:[%s9094_s0 + $0x228] sm:$0xf0]  ;;  %v5086_v39 = vld [vmem:[%s9094_s0 + $0x644] sm:$0xf] }
 0x204   :  { %v4502_v47 = vld [vmem:[%s9094_s0 + $0x648] sm:$0xf0] }
 0x205   :  { %v2323_v12 = vpop.f32.mrf.mxu2  ;;  %v7177_v32 = vpop.f32.mrf.mxu3 }
 0x206   :  { %v2324_v56 = vadd.f32 %v6612_v35, %v2323_v12  ;;  %4790 = vmatmul.msk.bf16.gmra.mxu1 %vm1499_vm0, %v3961_v59  ;;  %v2005_v58 = vpop.f32.mrf.mxu0 }
 0x207   :  { %v2006_v63 = vadd.f32 %v6612_v35, %v2005_v58 }
 0x208   :  { %v5332_v1 = vpop.eup %5331  ;;  %v2973_v44 = vadd.f32 %v7054_v50, %v2324_v56  ;;  %v3948_v50 = vld [vmem:[%s9094_s0 + $0x1f0] sm:$0xf] }
 0x209   :  { %v5334_v6 = vpop.eup %5333  ;;  %3609 = vst [vmem:[%s9096_s3 + $0x558] sm:$0xff] %v5332_v1  ;;  %v2655_v0 = vadd.f32 %v7091_v62, %v2006_v63  ;;  %v4949_v62 = vld [vmem:[%s9094_s0 + $0x1f4] sm:$0xf0]  ;;  %v3977_v1 = vor.u32 %v4954_v53, %v3974_v57 }
 0x20a   :  { %3482 = vst [vmem:[%s9096_s3 + $0x160] sm:$0xff] %v5334_v6  ;;  %5335 = vtanh.f32 %v2973_v44  ;;  %4855 = vmatmul.msk.bf16.gmra.mxu3 %vm1499_vm0, %v4481_v54  ;;  %v3949_v11 = vor.u32 %v4949_v62, %v3948_v50 }
 0x20b   :  { %5337 = vtanh.f32 %v2655_v0  ;;  %v7199_v3 = vpop.f32.mrf.mxu1 }
 0x20d   :  { %v2325_v14 = vpop.f32.mrf.mxu2  ;;  %v7216_v26 = vpop.f32.mrf.mxu3 }
 0x20e   :  { %v2326_v16 = vadd.f32 %v6612_v35, %v2325_v14  ;;  %v2008_v19 = vpop.f32.mrf.mxu0  ;;  %v4497_v14 = vor.u32 %v5084_v8, %v4494_v40 }
 0x20f   :  { %v2009_v17 = vadd.f32 %v6612_v35, %v2008_v19  ;;  %v5081_v19 = vld [vmem:[%s9094_s0 + $0x614] sm:$0xf0] }
 0x210   :  { %v5336_v41 = vpop.eup %5335  ;;  %v2975_v22 = vadd.f32 %v7069_v27, %v2326_v16  ;;  %v4476_v16 = vld [vmem:[%s9094_s0 + $0x610] sm:$0xf] }
 0x211   :  { %v5338_v25 = vpop.eup %5337  ;;  %3610 = vst [vmem:[%s9096_s3 + $0x560] sm:$0xff] %v5336_v41  ;;  %v2658_v28 = vadd.f32 %v7118_v2, %v2009_v17  ;;  %2047 = vmatmul.bf16.gmra.mxu0 %v3949_v11  ;;  %v4477_v41 = vor.u32 %v5081_v19, %v4476_v16  ;;  %v5088_v16 = vld [vmem:[%s9094_s0 + $0x654] sm:$0xf]  ;;  %v4510_v19 = vld [vmem:[%s9094_s0 + $0x658] sm:$0xf0] }
 0x212   :  { %3483 = vst [vmem:[%s9096_s3 + $0x168] sm:$0xff] %v5338_v25  ;;  %5339 = vtanh.f32 %v2975_v22  ;;  %2367 = vmatmul.bf16.gmra.mxu2 %v4461_v18  ;;  %v4956_v25 = vld [vmem:[%s9094_s0 + $0x234] sm:$0xf] }
 0x213   :  { %5341 = vtanh.f32 %v2658_v28  ;;  %v7226_v61 = vpop.f32.mrf.mxu1  ;;  %v3982_v28 = vld [vmem:[%s9094_s0 + $0x238] sm:$0xf0] }
 0x215   :  { %v2328_v46 = vpop.f32.mrf.mxu2  ;;  %v7231_v2 = vpop.f32.mrf.mxu3 }
 0x216   :  { %v2329_v27 = vadd.f32 %v6612_v35, %v2328_v46  ;;  %4791 = vmatmul.msk.bf16.gmra.mxu1 %vm1499_vm0, %v3969_v30  ;;  %v2010_v29 = vpop.f32.mrf.mxu0 }
 0x217   :  { %v2011_v34 = vadd.f32 %v6612_v35, %v2010_v29  ;;  %v4486_v35 = vld [vmem:[%s9094_s0 + $0x628] sm:$0xf0] }
 0x218   :  { %v5340_v37 = vpop.eup %5339  ;;  %v2978_v15 = vadd.f32 %v7108_v21, %v2329_v27  ;;  %v3956_v21 = vld [vmem:[%s9094_s0 + $0x200] sm:$0xf]  ;;  %v4489_v43 = vor.u32 %v5082_v42, %v4486_v35 }
 0x219   :  { %v5342_v31 = vpop.eup %5341  ;;  %3611 = vst [vmem:[%s9096_s3 + $0x568] sm:$0xff] %v5340_v37  ;;  %v2660_v36 = vadd.f32 %v7145_v33, %v2011_v34  ;;  %v4951_v33 = vld [vmem:[%s9094_s0 + $0x204] sm:$0xf0]  ;;  %v3985_v37 = vor.u32 %v4956_v25, %v3982_v28 }
 0x21a   :  { %3484 = vst [vmem:[%s9096_s3 + $0x170] sm:$0xff] %v5342_v31  ;;  %5343 = vtanh.f32 %v2978_v15  ;;  %4856 = vmatmul.msk.bf16.gmra.mxu3 %vm1499_vm0, %v4489_v43  ;;  %v3957_v9 = vor.u32 %v4951_v33, %v3956_v21 }
 0x21b   :  { %5345 = vtanh.f32 %v2660_v36  ;;  %v7253_v13 = vpop.f32.mrf.mxu1 }
 0x21d   :  { %v2330_v48 = vpop.f32.mrf.mxu2  ;;  %v7275_v59 = vpop.f32.mrf.mxu3 }
 0x21e   :  { %v2331_v49 = vadd.f32 %v7265_v45, %v2330_v48  ;;  %v2013_v52 = vpop.f32.mrf.mxu0  ;;  %v4505_v48 = vor.u32 %v5086_v39, %v4502_v47 }
 0x21f   :  { %v2014_v51 = vadd.f32 %v7265_v45, %v2013_v52  ;;  %v5083_v52 = vld [vmem:[%s9094_s0 + $0x624] sm:$0xf0] }
 0x220   :  { %v5344_v12 = vpop.eup %5343  ;;  %v2980_v56 = vadd.f32 %v7123_v60, %v2331_v49  ;;  %v4484_v49 = vld [vmem:[%s9094_s0 + $0x620] sm:$0xf] }
 0x221   :  { %v5346_v58 = vpop.eup %5345  ;;  %3612 = vst [vmem:[%s9096_s3 + $0x570] sm:$0xff] %v5344_v12  ;;  %v2663_v63 = vadd.f32 %v7172_v38, %v2014_v51  ;;  %2052 = vmatmul.bf16.gmra.mxu0 %v3957_v9  ;;  %v4485_v12 = vor.u32 %v5083_v52, %v4484_v49  ;;  %v5090_v49 = vld [vmem:[%s9094_s0 + $0x664] sm:$0xf]  ;;  %v4518_v52 = vld [vmem:[%s9094_s0 + $0x668] sm:$0xf0] }
 0x222   :  { %3485 = vst [vmem:[%s9096_s3 + $0x178] sm:$0xff] %v5346_v58  ;;  %5347 = vtanh.f32 %v2980_v56  ;;  %2372 = vmatmul.bf16.gmra.mxu2 %v4469_v4  ;;  %v4958_v58 = vld [vmem:[%s9094_s0 + $0x244] sm:$0xf] }
 0x223   :  { %5349 = vtanh.f32 %v2663_v63  ;;  %v7285_v44 = vpop.f32.mrf.mxu1  ;;  %v3990_v63 = vld [vmem:[%s9094_s0 + $0x248] sm:$0xf0] }
 0x225   :  { %v2333_v6 = vpop.f32.mrf.mxu2  ;;  %v7290_v38 = vpop.f32.mrf.mxu3 }
 0x226   :  { %v2334_v60 = vadd.f32 %v7265_v45, %v2333_v6  ;;  %4792 = vmatmul.msk.bf16.gmra.mxu1 %vm1499_vm0, %v3977_v1  ;;  %v2015_v0 = vpop.f32.mrf.mxu0 }
 0x227   :  { %v2016_v5 = vadd.f32 %v7265_v45, %v2015_v0 }
 0x228   :  { %v5348_v7 = vpop.eup %5347  ;;  %v2983_v50 = vadd.f32 %v7162_v55, %v2334_v60  ;;  %v3964_v55 = vld [vmem:[%s9094_s0 + $0x210] sm:$0xf] }
 0x229   :  { %v5350_v62 = vpop.eup %5349  ;;  %3613 = vst [vmem:[%s9096_s3 + $0x578] sm:$0xff] %v5348_v7  ;;  %v2665_v54 = vadd.f32 %v7199_v3, %v2016_v5  ;;  %v4953_v3 = vld [vmem:[%s9094_s0 + $0x214] sm:$0xf0]  ;;  %v3993_v7 = vor.u32 %v4958_v58, %v3990_v63 }
 0x22a   :  { %3486 = vst [vmem:[%s9096_s3 + $0x180] sm:$0xff] %v5350_v62  ;;  %5351 = vtanh.f32 %v2983_v50  ;;  %4857 = vmatmul.msk.bf16.gmra.mxu3 %vm1499_vm0, %v4497_v14  ;;  %v3965_v17 = vor.u32 %v4953_v3, %v3964_v55 }
 0x22b   :  { %5353 = vtanh.f32 %v2665_v54  ;;  %v7312_v11 = vpop.f32.mrf.mxu1 }
 0x22d   :  { %v2335_v18 = vpop.f32.mrf.mxu2  ;;  %v7329_v30 = vpop.f32.mrf.mxu3 }
 0x22e   :  { %v2336_v20 = vadd.f32 %v7265_v45, %v2335_v18  ;;  %v2018_v23 = vpop.f32.mrf.mxu0  ;;  %v4513_v18 = vor.u32 %v5088_v16, %v4510_v19 }
 0x22f   :  { %v2019_v22 = vadd.f32 %v7265_v45, %v2018_v23  ;;  %v5085_v23 = vld [vmem:[%s9094_s0 + $0x634] sm:$0xf0] }
 0x230   :  { %v5352_v46 = vpop.eup %5351  ;;  %v2985_v27 = vadd.f32 %v7177_v32, %v2336_v20  ;;  %v4492_v20 = vld [vmem:[%s9094_s0 + $0x630] sm:$0xf] }
 0x231   :  { %v5354_v29 = vpop.eup %5353  ;;  %3614 = vst [vmem:[%s9096_s3 + $0x580] sm:$0xff] %v5352_v46  ;;  %v2668_v34 = vadd.f32 %v7226_v61, %v2019_v22  ;;  %2057 = vmatmul.bf16.gmra.mxu0 %v3965_v17  ;;  %v4493_v46 = vor.u32 %v5085_v23, %v4492_v20  ;;  %v5092_v20 = vld [vmem:[%s9094_s0 + $0x674] sm:$0xf]  ;;  %v4526_v23 = vld [vmem:[%s9094_s0 + $0x678] sm:$0xf0] }
 0x232   :  { %3487 = vst [vmem:[%s9096_s3 + $0x188] sm:$0xff] %v5354_v29  ;;  %5355 = vtanh.f32 %v2985_v27  ;;  %2377 = vmatmul.bf16.gmra.mxu2 %v4477_v41  ;;  %v4960_v29 = vld [vmem:[%s9094_s0 + $0x254] sm:$0xf] }
 0x233   :  { %5357 = vtanh.f32 %v2668_v34  ;;  %v7339_v15 = vpop.f32.mrf.mxu1  ;;  %v3998_v34 = vld [vmem:[%s9094_s0 + $0x258] sm:$0xf0] }
 0x235   :  { %v2338_v31 = vpop.f32.mrf.mxu2  ;;  %v7344_v61 = vpop.f32.mrf.mxu3 }
 0x236   :  { %v2339_v32 = vadd.f32 %v7265_v45, %v2338_v31  ;;  %4793 = vmatmul.msk.bf16.gmra.mxu1 %vm1499_vm0, %v3985_v37  ;;  %v2020_v36 = vpop.f32.mrf.mxu0 }
 0x237   :  { %v2021_v42 = vadd.f32 %v7265_v45, %v2020_v36 }
 0x238   :  { %v5356_v35 = vpop.eup %5355  ;;  %v2988_v21 = vadd.f32 %v7216_v26, %v2339_v32  ;;  %v3972_v26 = vld [vmem:[%s9094_s0 + $0x220] sm:$0xf] }
 0x239   :  { %v5358_v33 = vpop.eup %5357  ;;  %3615 = vst [vmem:[%s9096_s3 + $0x588] sm:$0xff] %v5356_v35  ;;  %v2670_v43 = vadd.f32 %v7253_v13, %v2021_v42  ;;  %v4955_v13 = vld [vmem:[%s9094_s0 + $0x224] sm:$0xf0]  ;;  %v4001_v35 = vor.u32 %v4960_v29, %v3998_v34 }
 0x23a   :  { %3488 = vst [vmem:[%s9096_s3 + $0x190] sm:$0xff] %v5358_v33  ;;  %5359 = vtanh.f32 %v2988_v21  ;;  %4858 = vmatmul.msk.bf16.gmra.mxu3 %vm1499_vm0, %v4505_v48  ;;  %v3973_v51 = vor.u32 %v4955_v13, %v3972_v26 }
 0x23b   :  { %5361 = vtanh.f32 %v2670_v43  ;;  %v7366_v9 = vpop.f32.mrf.mxu1 }
 0x23d   :  { %v2340_v4 = vpop.f32.mrf.mxu2  ;;  %v7383_v1 = vpop.f32.mrf.mxu3 }
 0x23e   :  { %v2341_v53 = vadd.f32 %v7265_v45, %v2340_v4  ;;  %v2023_v57 = vpop.f32.mrf.mxu0  ;;  %v4521_v4 = vor.u32 %v5090_v49, %v4518_v52 }
 0x23f   :  { %v2024_v56 = vadd.f32 %v7265_v45, %v2023_v57  ;;  %v5087_v57 = vld [vmem:[%s9094_s0 + $0x644] sm:$0xf0] }
 0x240   :  { %v5360_v6 = vpop.eup %5359  ;;  %v2990_v60 = vadd.f32 %v7231_v2, %v2341_v53  ;;  %v4500_v53 = vld [vmem:[%s9094_s0 + $0x640] sm:$0xf] }
 0x241   :  { %v5362_v0 = vpop.eup %5361  ;;  %3616 = vst [vmem:[%s9096_s3 + $0x590] sm:$0xff] %v5360_v6  ;;  %v2673_v5 = vadd.f32 %v7285_v44, %v2024_v56  ;;  %2062 = vmatmul.bf16.gmra.mxu0 %v3973_v51  ;;  %v4501_v6 = vor.u32 %v5087_v57, %v4500_v53  ;;  %v5094_v53 = vld [vmem:[%s9094_s0 + $0x684] sm:$0xf]  ;;  %v4534_v57 = vld [vmem:[%s9094_s0 + $0x688] sm:$0xf0] }
 0x242   :  { %3489 = vst [vmem:[%s9096_s3 + $0x198] sm:$0xff] %v5362_v0  ;;  %5363 = vtanh.f32 %v2990_v60  ;;  %2382 = vmatmul.bf16.gmra.mxu2 %v4485_v12  ;;  %v4962_v0 = vld [vmem:[%s9094_s0 + $0x264] sm:$0xf] }
 0x243   :  { %5365 = vtanh.f32 %v2673_v5  ;;  %v7393_v50 = vpop.f32.mrf.mxu1  ;;  %v4006_v5 = vld [vmem:[%s9094_s0 + $0x268] sm:$0xf0] }
 0x245   :  { %v2343_v62 = vpop.f32.mrf.mxu2  ;;  %v7398_v44 = vpop.f32.mrf.mxu3 }
 0x246   :  { %v2344_v2 = vadd.f32 %v7265_v45, %v2343_v62  ;;  %4794 = vmatmul.msk.bf16.gmra.mxu1 %vm1499_vm0, %v3993_v7  ;;  %v2025_v54 = vpop.f32.mrf.mxu0 }
 0x247   :  { %v2026_v8 = vadd.f32 %v7265_v45, %v2025_v54 }
 0x248   :  { %v5364_v40 = vpop.eup %5363  ;;  %v2993_v55 = vadd.f32 %v7275_v59, %v2344_v2  ;;  %v3980_v59 = vld [vmem:[%s9094_s0 + $0x230] sm:$0xf] }
 0x249   :  { %v5366_v3 = vpop.eup %5365  ;;  %3617 = vst [vmem:[%s9096_s3 + $0x598] sm:$0xff] %v5364_v40  ;;  %v2675_v14 = vadd.f32 %v7312_v11, %v2026_v8  ;;  %v4957_v11 = vld [vmem:[%s9094_s0 + $0x234] sm:$0xf0]  ;;  %v4009_v40 = vor.u32 %v4962_v0, %v4006_v5 }
 0x24a   :  { %3490 = vst [vmem:[%s9096_s3 + $0x1a0] sm:$0xff] %v5366_v3  ;;  %5367 = vtanh.f32 %v2993_v55  ;;  %4859 = vmatmul.msk.bf16.gmra.mxu3 %vm1499_vm0, %v4513_v18  ;;  %v3981_v22 = vor.u32 %v4957_v11, %v3980_v59 }
 0x24b   :  { %5369 = vtanh.f32 %v2675_v14  ;;  %v7420_v17 = vpop.f32.mrf.mxu1 }
 0x24d   :  { %v2345_v41 = vpop.f32.mrf.mxu2  ;;  %v7437_v37 = vpop.f32.mrf.mxu3 }
 0x24e   :  { %v2346_v25 = vadd.f32 %v7265_v45, %v2345_v41  ;;  %v2028_v28 = vpop.f32.mrf.mxu0  ;;  %v4529_v41 = vor.u32 %v5092_v20, %v4526_v23 }
 0x24f   :  { %v2029_v27 = vadd.f32 %v7265_v45, %v2028_v28  ;;  %v5089_v28 = vld [vmem:[%s9094_s0 + $0x654] sm:$0xf0] }
 0x250   :  { %v5368_v31 = vpop.eup %5367  ;;  %v2995_v32 = vadd.f32 %v7290_v38, %v2346_v25  ;;  %v4508_v25 = vld [vmem:[%s9094_s0 + $0x650] sm:$0xf] }
 0x251   :  { %v5370_v36 = vpop.eup %5369  ;;  %3618 = vst [vmem:[%s9096_s3 + $0x5a0] sm:$0xff] %v5368_v31  ;;  %v2678_v42 = vadd.f32 %v7339_v15, %v2029_v27  ;;  %2067 = vmatmul.bf16.gmra.mxu0 %v3981_v22  ;;  %v4509_v31 = vor.u32 %v5089_v28, %v4508_v25  ;;  %v5096_v25 = vld [vmem:[%s9094_s0 + $0x694] sm:$0xf]  ;;  %v4542_v28 = vld [vmem:[%s9094_s0 + $0x698] sm:$0xf0] }
 0x252   :  { %3491 = vst [vmem:[%s9096_s3 + $0x1a8] sm:$0xff] %v5370_v36  ;;  %5371 = vtanh.f32 %v2995_v32  ;;  %2387 = vmatmul.bf16.gmra.mxu2 %v4493_v46  ;;  %v4964_v36 = vld [vmem:[%s9094_s0 + $0x274] sm:$0xf] }
 0x253   :  { %5373 = vtanh.f32 %v2678_v42  ;;  %v7447_v21 = vpop.f32.mrf.mxu1  ;;  %v4014_v42 = vld [vmem:[%s9094_s0 + $0x278] sm:$0xf0] }
 0x255   :  { %v2348_v33 = vpop.f32.mrf.mxu2  ;;  %v7452_v15 = vpop.f32.mrf.mxu3 }
 0x256   :  { %v2349_v38 = vadd.f32 %v7265_v45, %v2348_v33  ;;  %4795 = vmatmul.msk.bf16.gmra.mxu1 %vm1499_vm0, %v4001_v35  ;;  %v2030_v43 = vpop.f32.mrf.mxu0 }
 0x257   :  { %v2031_v39 = vadd.f32 %v7265_v45, %v2030_v43 }
 0x258   :  { %v5372_v47 = vpop.eup %5371  ;;  %v2998_v26 = vadd.f32 %v7329_v30, %v2349_v38  ;;  %v3988_v30 = vld [vmem:[%s9094_s0 + $0x240] sm:$0xf] }
 0x259   :  { %v5374_v13 = vpop.eup %5373  ;;  %3619 = vst [vmem:[%s9096_s3 + $0x5a8] sm:$0xff] %v5372_v47  ;;  %v2680_v48 = vadd.f32 %v7366_v9, %v2031_v39  ;;  %v4959_v9 = vld [vmem:[%s9094_s0 + $0x244] sm:$0xf0]  ;;  %v4017_v47 = vor.u32 %v4964_v36, %v4014_v42 }
 0x25a   :  { %3492 = vst [vmem:[%s9096_s3 + $0x1b0] sm:$0xff] %v5374_v13  ;;  %5375 = vtanh.f32 %v2998_v26  ;;  %4860 = vmatmul.msk.bf16.gmra.mxu3 %vm1499_vm0, %v4521_v4  ;;  %v3989_v56 = vor.u32 %v4959_v9, %v3988_v30 }
 0x25b   :  { %5377 = vtanh.f32 %v2680_v48  ;;  %v7474_v51 = vpop.f32.mrf.mxu1 }
 0x25d   :  { %v2350_v12 = vpop.f32.mrf.mxu2  ;;  %v7491_v7 = vpop.f32.mrf.mxu3 }
 0x25e   :  { %v2351_v58 = vadd.f32 %v7265_v45, %v2350_v12  ;;  %v2033_v63 = vpop.f32.mrf.mxu0  ;;  %v4537_v12 = vor.u32 %v5094_v53, %v4534_v57 }
 0x25f   :  { %v2034_v60 = vadd.f32 %v7265_v45, %v2033_v63  ;;  %v5091_v63 = vld [vmem:[%s9094_s0 + $0x664] sm:$0xf0] }
 0x260   :  { %v5376_v62 = vpop.eup %5375  ;;  %v3000_v2 = vadd.f32 %v7344_v61, %v2351_v58  ;;  %v4516_v58 = vld [vmem:[%s9094_s0 + $0x660] sm:$0xf] }
 0x261   :  { %v5378_v54 = vpop.eup %5377  ;;  %3620 = vst [vmem:[%s9096_s3 + $0x5b0] sm:$0xff] %v5376_v62  ;;  %v2683_v8 = vadd.f32 %v7393_v50, %v2034_v60  ;;  %2072 = vmatmul.bf16.gmra.mxu0 %v3989_v56  ;;  %v4517_v62 = vor.u32 %v5091_v63, %v4516_v58  ;;  %v5098_v58 = vld [vmem:[%s9094_s0 + $0x6a4] sm:$0xf]  ;;  %v4550_v63 = vld [vmem:[%s9094_s0 + $0x6a8] sm:$0xf0] }
 0x262   :  { %3493 = vst [vmem:[%s9096_s3 + $0x1b8] sm:$0xff] %v5378_v54  ;;  %5379 = vtanh.f32 %v3000_v2  ;;  %2392 = vmatmul.bf16.gmra.mxu2 %v4501_v6  ;;  %v4966_v54 = vld [vmem:[%s9094_s0 + $0x284] sm:$0xf] }
 0x263   :  { %5381 = vtanh.f32 %v2683_v8  ;;  %v7501_v55 = vpop.f32.mrf.mxu1  ;;  %v4022_v8 = vld [vmem:[%s9094_s0 + $0x288] sm:$0xf0] }
 0x265   :  { %v2353_v3 = vpop.f32.mrf.mxu2  ;;  %v7506_v50 = vpop.f32.mrf.mxu3 }
 0x266   :  { %v2354_v61 = vadd.f32 %v7265_v45, %v2353_v3  ;;  %4796 = vmatmul.msk.bf16.gmra.mxu1 %vm1499_vm0, %v4009_v40  ;;  %v2035_v14 = vpop.f32.mrf.mxu0 }
 0x267   :  { %v2036_v16 = vadd.f32 %v7265_v45, %v2035_v14 }
 0x268   :  { %v5380_v19 = vpop.eup %5379  ;;  %v3003_v59 = vadd.f32 %v7383_v1, %v2354_v61  ;;  %v3996_v1 = vld [vmem:[%s9094_s0 + $0x250] sm:$0xf] }
 0x269   :  { %v5382_v11 = vpop.eup %5381  ;;  %3621 = vst [vmem:[%s9096_s3 + $0x5b8] sm:$0xff] %v5380_v19  ;;  %v2685_v18 = vadd.f32 %v7420_v17, %v2036_v16  ;;  %v4961_v17 = vld [vmem:[%s9094_s0 + $0x254] sm:$0xf0]  ;;  %v4025_v19 = vor.u32 %v4966_v54, %v4022_v8 }
 0x26a   :  { %3494 = vst [vmem:[%s9096_s3 + $0x1c0] sm:$0xff] %v5382_v11  ;;  %5383 = vtanh.f32 %v3003_v59  ;;  %4861 = vmatmul.msk.bf16.gmra.mxu3 %vm1499_vm0, %v4529_v41  ;;  %v3997_v27 = vor.u32 %v4961_v17, %v3996_v1 }
 0x26b   :  { %5385 = vtanh.f32 %v2685_v18  ;;  %v7528_v22 = vpop.f32.mrf.mxu1 }
 0x26d   :  { %v2355_v46 = vpop.f32.mrf.mxu2  ;;  %v7545_v35 = vpop.f32.mrf.mxu3 }
 0x26e   :  { %v2356_v29 = vadd.f32 %v7265_v45, %v2355_v46  ;;  %v2038_v34 = vpop.f32.mrf.mxu0  ;;  %v4545_v46 = vor.u32 %v5096_v25, %v4542_v28 }
 0x26f   :  { %v2039_v32 = vadd.f32 %v7265_v45, %v2038_v34  ;;  %v5093_v34 = vld [vmem:[%s9094_s0 + $0x674] sm:$0xf0] }
 0x270   :  { %v5384_v33 = vpop.eup %5383  ;;  %v3005_v38 = vadd.f32 %v7398_v44, %v2356_v29  ;;  %v4524_v29 = vld [vmem:[%s9094_s0 + $0x670] sm:$0xf] }
 0x271   :  { %v5386_v43 = vpop.eup %5385  ;;  %3622 = vst [vmem:[%s9096_s3 + $0x5c0] sm:$0xff] %v5384_v33  ;;  %v2688_v39 = vadd.f32 %v7447_v21, %v2039_v32  ;;  %2077 = vmatmul.bf16.gmra.mxu0 %v3997_v27  ;;  %v4525_v33 = vor.u32 %v5093_v34, %v4524_v29  ;;  %v5100_v29 = vld [vmem:[%s9094_s0 + $0x6b4] sm:$0xf]  ;;  %v4558_v34 = vld [vmem:[%s9094_s0 + $0x6b8] sm:$0xf0] }
 0x272   :  { %3495 = vst [vmem:[%s9096_s3 + $0x1c8] sm:$0xff] %v5386_v43  ;;  %5387 = vtanh.f32 %v3005_v38  ;;  %2397 = vmatmul.bf16.gmra.mxu2 %v4509_v31  ;;  %v4968_v43 = vld [vmem:[%s9094_s0 + $0x294] sm:$0xf] }
 0x273   :  { %5389 = vtanh.f32 %v2688_v39  ;;  %v7555_v26 = vpop.f32.mrf.mxu1  ;;  %v4030_v39 = vld [vmem:[%s9094_s0 + $0x298] sm:$0xf0] }
 0x275   :  { %v2358_v13 = vpop.f32.mrf.mxu2  ;;  %v7560_v21 = vpop.f32.mrf.mxu3 }
 0x276   :  { %v2359_v44 = vadd.f32 %v7265_v45, %v2358_v13  ;;  %4797 = vmatmul.msk.bf16.gmra.mxu1 %vm1499_vm0, %v4017_v47  ;;  %v2040_v48 = vpop.f32.mrf.mxu0 }
 0x277   :  { %v2041_v49 = vadd.f32 %v7265_v45, %v2040_v48 }
 0x278   :  { %v5388_v52 = vpop.eup %5387  ;;  %v3008_v30 = vadd.f32 %v7437_v37, %v2359_v44  ;;  %v4004_v37 = vld [vmem:[%s9094_s0 + $0x260] sm:$0xf] }
 0x279   :  { %v5390_v9 = vpop.eup %5389  ;;  %3623 = vst [vmem:[%s9096_s3 + $0x5c8] sm:$0xff] %v5388_v52  ;;  %v2690_v4 = vadd.f32 %v7474_v51, %v2041_v49  ;;  %v4963_v51 = vld [vmem:[%s9094_s0 + $0x264] sm:$0xf0]  ;;  %v4033_v52 = vor.u32 %v4968_v43, %v4030_v39 }
 0x27a   :  { %3496 = vst [vmem:[%s9096_s3 + $0x1d0] sm:$0xff] %v5390_v9  ;;  %5391 = vtanh.f32 %v3008_v30  ;;  %4862 = vmatmul.msk.bf16.gmra.mxu3 %vm1499_vm0, %v4537_v12  ;;  %v4005_v60 = vor.u32 %v4963_v51, %v4004_v37 }
 0x27b   :  { %5393 = vtanh.f32 %v2690_v4  ;;  %v7582_v56 = vpop.f32.mrf.mxu1 }
 0x27d   :  { %v2360_v6 = vpop.f32.mrf.mxu2  ;;  %v7599_v40 = vpop.f32.mrf.mxu3 }
 0x27e   :  { %v2361_v0 = vadd.f32 %v7265_v45, %v2360_v6  ;;  %v2043_v5 = vpop.f32.mrf.mxu0  ;;  %v4553_v6 = vor.u32 %v5098_v58, %v4550_v63 }
 0x27f   :  { %v2044_v2 = vadd.f32 %v7265_v45, %v2043_v5  ;;  %v5095_v5 = vld [vmem:[%s9094_s0 + $0x684] sm:$0xf0] }
 0x280   :  { %v5392_v3 = vpop.eup %5391  ;;  %v3010_v61 = vadd.f32 %v7452_v15, %v2361_v0  ;;  %v4532_v0 = vld [vmem:[%s9094_s0 + $0x680] sm:$0xf] }
 0x281   :  { %v5394_v14 = vpop.eup %5393  ;;  %3624 = vst [vmem:[%s9096_s3 + $0x5d0] sm:$0xff] %v5392_v3  ;;  %v2693_v16 = vadd.f32 %v7501_v55, %v2044_v2  ;;  %2082 = vmatmul.bf16.gmra.mxu0 %v4005_v60  ;;  %v4533_v3 = vor.u32 %v5095_v5, %v4532_v0  ;;  %v5102_v0 = vld [vmem:[%s9094_s0 + $0x6c4] sm:$0xf]  ;;  %v4566_v5 = vld [vmem:[%s9094_s0 + $0x6c8] sm:$0xf0] }
 0x282   :  { %3497 = vst [vmem:[%s9096_s3 + $0x1d8] sm:$0xff] %v5394_v14  ;;  %5395 = vtanh.f32 %v3010_v61  ;;  %2402 = vmatmul.bf16.gmra.mxu2 %v4517_v62  ;;  %v4970_v14 = vld [vmem:[%s9094_s0 + $0x2a4] sm:$0xf] }
 0x283   :  { %5397 = vtanh.f32 %v2693_v16  ;;  %v7609_v59 = vpop.f32.mrf.mxu1  ;;  %v4038_v16 = vld [vmem:[%s9094_s0 + $0x2a8] sm:$0xf0] }
 0x285   :  { %v2363_v11 = vpop.f32.mrf.mxu2  ;;  %v7614_v55 = vpop.f32.mrf.mxu3 }
 0x286   :  { %v2364_v15 = vadd.f32 %v7265_v45, %v2363_v11  ;;  %4798 = vmatmul.msk.bf16.gmra.mxu1 %vm1499_vm0, %v4025_v19  ;;  %v2045_v18 = vpop.f32.mrf.mxu0 }
 0x287   :  { %v2046_v20 = vadd.f32 %v7265_v45, %v2045_v18 }
 0x288   :  { %v5396_v23 = vpop.eup %5395  ;;  %v3013_v1 = vadd.f32 %v7491_v7, %v2364_v15  ;;  %v4012_v7 = vld [vmem:[%s9094_s0 + $0x270] sm:$0xf] }
 0x289   :  { %v5398_v17 = vpop.eup %5397  ;;  %3625 = vst [vmem:[%s9096_s3 + $0x5d8] sm:$0xff] %v5396_v23  ;;  %v2695_v41 = vadd.f32 %v7528_v22, %v2046_v20  ;;  %v4965_v22 = vld [vmem:[%s9094_s0 + $0x274] sm:$0xf0]  ;;  %v4041_v23 = vor.u32 %v4970_v14, %v4038_v16 }
 0x28a   :  { %3498 = vst [vmem:[%s9096_s3 + $0x1e0] sm:$0xff] %v5398_v17  ;;  %5399 = vtanh.f32 %v3013_v1  ;;  %4863 = vmatmul.msk.bf16.gmra.mxu3 %vm1499_vm0, %v4545_v46  ;;  %v4013_v32 = vor.u32 %v4965_v22, %v4012_v7 }
 0x28b   :  { %5401 = vtanh.f32 %v2695_v41  ;;  %v7636_v27 = vpop.f32.mrf.mxu1 }
 0x28d   :  { %v2365_v31 = vpop.f32.mrf.mxu2  ;;  %v7653_v47 = vpop.f32.mrf.mxu3 }
 0x28e   :  { %v2366_v36 = vadd.f32 %v7265_v45, %v2365_v31  ;;  %v2048_v42 = vpop.f32.mrf.mxu0  ;;  %v4561_v31 = vor.u32 %v5100_v29, %v4558_v34 }
 0x28f   :  { %v2049_v38 = vadd.f32 %v7265_v45, %v2048_v42  ;;  %v5097_v42 = vld [vmem:[%s9094_s0 + $0x694] sm:$0xf0] }
 0x290   :  { %v5400_v13 = vpop.eup %5399  ;;  %v3015_v44 = vadd.f32 %v7506_v50, %v2366_v36  ;;  %v4540_v36 = vld [vmem:[%s9094_s0 + $0x690] sm:$0xf] }
 0x291   :  { %v5402_v48 = vpop.eup %5401  ;;  %3626 = vst [vmem:[%s9096_s3 + $0x5e0] sm:$0xff] %v5400_v13  ;;  %v2698_v49 = vadd.f32 %v7555_v26, %v2049_v38  ;;  %2087 = vmatmul.bf16.gmra.mxu0 %v4013_v32  ;;  %v4541_v13 = vor.u32 %v5097_v42, %v4540_v36  ;;  %v5104_v36 = vld [vmem:[%s9094_s0 + $0x6d4] sm:$0xf]  ;;  %v4574_v42 = vld [vmem:[%s9094_s0 + $0x6d8] sm:$0xf0] }
 0x292   :  { %3499 = vst [vmem:[%s9096_s3 + $0x1e8] sm:$0xff] %v5402_v48  ;;  %5403 = vtanh.f32 %v3015_v44  ;;  %2407 = vmatmul.bf16.gmra.mxu2 %v4525_v33  ;;  %v4972_v48 = vld [vmem:[%s9094_s0 + $0x2b4] sm:$0xf] }
 0x293   :  { %5405 = vtanh.f32 %v2698_v49  ;;  %v7663_v30 = vpop.f32.mrf.mxu1  ;;  %v4046_v49 = vld [vmem:[%s9094_s0 + $0x2b8] sm:$0xf0] }
 0x295   :  { %v2368_v9 = vpop.f32.mrf.mxu2  ;;  %v7668_v26 = vpop.f32.mrf.mxu3 }
 0x296   :  { %v2369_v50 = vadd.f32 %v7265_v45, %v2368_v9  ;;  %4799 = vmatmul.msk.bf16.gmra.mxu1 %vm1499_vm0, %v4033_v52  ;;  %v2050_v4 = vpop.f32.mrf.mxu0 }
 0x297   :  { %v2051_v53 = vadd.f32 %v7265_v45, %v2050_v4 }
 0x298   :  { %v5404_v57 = vpop.eup %5403  ;;  %v3018_v37 = vadd.f32 %v7545_v35, %v2369_v50  ;;  %v4020_v35 = vld [vmem:[%s9094_s0 + $0x280] sm:$0xf] }
 0x299   :  { %v5406_v51 = vpop.eup %5405  ;;  %3627 = vst [vmem:[%s9096_s3 + $0x5e8] sm:$0xff] %v5404_v57  ;;  %v2700_v12 = vadd.f32 %v7582_v56, %v2051_v53  ;;  %v4967_v56 = vld [vmem:[%s9094_s0 + $0x284] sm:$0xf0]  ;;  %v4049_v57 = vor.u32 %v4972_v48, %v4046_v49 }
 0x29a   :  { %3500 = vst [vmem:[%s9096_s3 + $0x1f0] sm:$0xff] %v5406_v51  ;;  %5407 = vtanh.f32 %v3018_v37  ;;  %4864 = vmatmul.msk.bf16.gmra.mxu3 %vm1499_vm0, %v4553_v6  ;;  %v4021_v2 = vor.u32 %v4967_v56, %v4020_v35 }
 0x29b   :  { %5409 = vtanh.f32 %v2700_v12  ;;  %v7690_v60 = vpop.f32.mrf.mxu1 }
 0x29d   :  { %v2370_v62 = vpop.f32.mrf.mxu2  ;;  %v7707_v19 = vpop.f32.mrf.mxu3 }
 0x29e   :  { %v2371_v54 = vadd.f32 %v7265_v45, %v2370_v62  ;;  %v2053_v8 = vpop.f32.mrf.mxu0  ;;  %v4569_v62 = vor.u32 %v5102_v0, %v4566_v5 }
 0x29f   :  { %v2054_v61 = vadd.f32 %v7265_v45, %v2053_v8  ;;  %v5099_v8 = vld [vmem:[%s9094_s0 + $0x6a4] sm:$0xf0] }
 0x2a0   :  { %v5408_v11 = vpop.eup %5407  ;;  %v3020_v15 = vadd.f32 %v7560_v21, %v2371_v54  ;;  %v4548_v54 = vld [vmem:[%s9094_s0 + $0x6a0] sm:$0xf] }
 0x2a1   :  { %v5410_v18 = vpop.eup %5409  ;;  %3628 = vst [vmem:[%s9096_s3 + $0x5f0] sm:$0xff] %v5408_v11  ;;  %v2703_v20 = vadd.f32 %v7609_v59, %v2054_v61  ;;  %2092 = vmatmul.bf16.gmra.mxu0 %v4021_v2  ;;  %v4549_v11 = vor.u32 %v5099_v8, %v4548_v54  ;;  %v5106_v54 = vld [vmem:[%s9094_s0 + $0x6e4] sm:$0xf] }
 0x2a2   :  { %3501 = vst [vmem:[%s9096_s3 + $0x1f8] sm:$0xff] %v5410_v18  ;;  %5411 = vtanh.f32 %v3020_v15  ;;  %2412 = vmatmul.bf16.gmra.mxu2 %v4533_v3  ;;  %v4974_v18 = vld [vmem:[%s9094_s0 + $0x2c4] sm:$0xf] }
 0x2a3   :  { %5413 = vtanh.f32 %v2703_v20  ;;  %v7717_v1 = vpop.f32.mrf.mxu1  ;;  %v4054_v20 = vld [vmem:[%s9094_s0 + $0x2c8] sm:$0xf0] }
 0x2a5   :  { %v2373_v17 = vpop.f32.mrf.mxu2  ;;  %v7722_v59 = vpop.f32.mrf.mxu3 }
 0x2a6   :  { %v2374_v21 = vadd.f32 %v7265_v45, %v2373_v17  ;;  %4800 = vmatmul.msk.bf16.gmra.mxu1 %vm1499_vm0, %v4041_v23  ;;  %v2055_v41 = vpop.f32.mrf.mxu0 }
 0x2a7   :  { %v2056_v25 = vadd.f32 %v7265_v45, %v2055_v41 }
 0x2a8   :  { %v5412_v28 = vpop.eup %5411  ;;  %v3023_v7 = vadd.f32 %v7599_v40, %v2374_v21  ;;  %v4028_v40 = vld [vmem:[%s9094_s0 + $0x290] sm:$0xf] }
 0x2a9   :  { %v5414_v22 = vpop.eup %5413  ;;  %3629 = vst [vmem:[%s9096_s3 + $0x5f8] sm:$0xff] %v5412_v28  ;;  %v2705_v46 = vadd.f32 %v7636_v27, %v2056_v25  ;;  %v4969_v27 = vld [vmem:[%s9094_s0 + $0x294] sm:$0xf0]  ;;  %v4057_v28 = vor.u32 %v4974_v18, %v4054_v20 }
 0x2aa   :  { %3502 = vst [vmem:[%s9096_s3 + $0x200] sm:$0xff] %v5414_v22  ;;  %5415 = vtanh.f32 %v3023_v7  ;;  %4865 = vmatmul.msk.bf16.gmra.mxu3 %vm1499_vm0, %v4561_v31  ;;  %v4029_v38 = vor.u32 %v4969_v27, %v4028_v40 }
 0x2ab   :  { %5417 = vtanh.f32 %v2705_v46  ;;  %v7744_v32 = vpop.f32.mrf.mxu1 }
 0x2ad   :  { %v2375_v33 = vpop.f32.mrf.mxu2  ;;  %v7761_v52 = vpop.f32.mrf.mxu3 }
 0x2ae   :  { %v2376_v43 = vadd.f32 %v7265_v45, %v2375_v33  ;;  %v2058_v39 = vpop.f32.mrf.mxu0  ;;  %v4577_v33 = vor.u32 %v5104_v36, %v4574_v42 }
 0x2af   :  { %v2059_v44 = vadd.f32 %v7265_v45, %v2058_v39  ;;  %v5101_v39 = vld [vmem:[%s9094_s0 + $0x6b4] sm:$0xf0] }
 0x2b0   :  { %v5416_v9 = vpop.eup %5415  ;;  %v3025_v50 = vadd.f32 %v7614_v55, %v2376_v43  ;;  %v4556_v43 = vld [vmem:[%s9094_s0 + $0x6b0] sm:$0xf] }
 0x2b1   :  { %v5418_v4 = vpop.eup %5417  ;;  %3630 = vst [vmem:[%s9096_s3 + $0x600] sm:$0xff] %v5416_v9  ;;  %v2708_v53 = vadd.f32 %v7663_v30, %v2059_v44  ;;  %2097 = vmatmul.bf16.gmra.mxu0 %v4029_v38  ;;  %v4557_v9 = vor.u32 %v5101_v39, %v4556_v43  ;;  %v5108_v43 = vld [vmem:[%s9094_s0 + $0x6f4] sm:$0xf]  ;;  %v4590_v39 = vld [vmem:[%s9094_s0 + $0x6f8] sm:$0xf0] }
 0x2b2   :  { %3503 = vst [vmem:[%s9096_s3 + $0x208] sm:$0xff] %v5418_v4  ;;  %5419 = vtanh.f32 %v3025_v50  ;;  %2417 = vmatmul.bf16.gmra.mxu2 %v4541_v13  ;;  %v4976_v4 = vld [vmem:[%s9094_s0 + $0x2d4] sm:$0xf] }
 0x2b3   :  { %5421 = vtanh.f32 %v2708_v53  ;;  %v7771_v37 = vpop.f32.mrf.mxu1  ;;  %v4062_v53 = vld [vmem:[%s9094_s0 + $0x2d8] sm:$0xf0] }
 0x2b5   :  { %v2378_v51 = vpop.f32.mrf.mxu2  ;;  %v7776_v30 = vpop.f32.mrf.mxu3 }
 0x2b6   :  { %v2379_v55 = vadd.f32 %v7265_v45, %v2378_v51  ;;  %4801 = vmatmul.msk.bf16.gmra.mxu1 %vm1499_vm0, %v4049_v57  ;;  %v2060_v12 = vpop.f32.mrf.mxu0 }
 0x2b7   :  { %v2061_v58 = vadd.f32 %v7265_v45, %v2060_v12 }
 0x2b8   :  { %v5420_v63 = vpop.eup %5419  ;;  %v3028_v35 = vadd.f32 %v7653_v47, %v2379_v55  ;;  %v4036_v47 = vld [vmem:[%s9094_s0 + $0x2a0] sm:$0xf] }
 0x2b9   :  { %v5422_v56 = vpop.eup %5421  ;;  %3631 = vst [vmem:[%s9096_s3 + $0x608] sm:$0xff] %v5420_v63  ;;  %v2710_v6 = vadd.f32 %v7690_v60, %v2061_v58  ;;  %v4971_v60 = vld [vmem:[%s9094_s0 + $0x2a4] sm:$0xf0]  ;;  %v4065_v63 = vor.u32 %v4976_v4, %v4062_v53 }
 0x2ba   :  { %3504 = vst [vmem:[%s9096_s3 + $0x210] sm:$0xff] %v5422_v56  ;;  %5423 = vtanh.f32 %v3028_v35  ;;  %4866 = vmatmul.msk.bf16.gmra.mxu3 %vm1499_vm0, %v4569_v62  ;;  %v4037_v61 = vor.u32 %v4971_v60, %v4036_v47 }
 0x2bb   :  { %5425 = vtanh.f32 %v2710_v6  ;;  %v7798_v2 = vpop.f32.mrf.mxu1 }
 0x2bd   :  { %v2380_v3 = vpop.f32.mrf.mxu2  ;;  %v7815_v23 = vpop.f32.mrf.mxu3 }
 0x2be   :  { %v2381_v14 = vadd.f32 %v7265_v45, %v2380_v3  ;;  %v2063_v16 = vpop.f32.mrf.mxu0 }
 0x2bf   :  { %v2064_v15 = vadd.f32 %v7265_v45, %v2063_v16 }
 0x2c0   :  { %v5424_v17 = vpop.eup %5423  ;;  %v3030_v21 = vadd.f32 %v7668_v26, %v2381_v14  ;;  %v5103_v14 = vld [vmem:[%s9094_s0 + $0x6c4] sm:$0xf0] }
 0x2c1   :  { %v5426_v41 = vpop.eup %5425  ;;  %3632 = vst [vmem:[%s9096_s3 + $0x610] sm:$0xff] %v5424_v17  ;;  %v2713_v25 = vadd.f32 %v7717_v1, %v2064_v15  ;;  %2102 = vmatmul.bf16.gmra.mxu0 %v4037_v61  ;;  %v4564_v61 = vld [vmem:[%s9094_s0 + $0x6c0] sm:$0xf] }
 0x2c2   :  { %3505 = vst [vmem:[%s9096_s3 + $0x218] sm:$0xff] %v5426_v41  ;;  %5427 = vtanh.f32 %v3030_v21  ;;  %2422 = vmatmul.bf16.gmra.mxu2 %v4549_v11  ;;  %v7918_v15 = vld [vmem:[%s9095_s2] ss:$0 sm:$0xff]  ;;  %v4565_v17 = vor.u32 %v5103_v14, %v4564_v61  ;;  %v4978_v41 = vld [vmem:[%s9094_s0 + $0x2e4] sm:$0xf] }
 0x2c3   :  { %5429 = vtanh.f32 %v2713_v25  ;;  %v7825_v7 = vpop.f32.mrf.mxu1  ;;  %v4070_v25 = vld [vmem:[%s9094_s0 + $0x2e8] sm:$0xf0]  ;;  %v5110_v61 = vld [vmem:[%s9094_s0 + $0x704] sm:$0xf] }
 0x2c4   :  { %v4598_v14 = vld [vmem:[%s9094_s0 + $0x708] sm:$0xf0] }
 0x2c5   :  { %v2383_v22 = vpop.f32.mrf.mxu2  ;;  %v7830_v1 = vpop.f32.mrf.mxu3 }
 0x2c6   :  { %v2384_v26 = vadd.f32 %v7265_v45, %v2383_v22  ;;  %4802 = vmatmul.msk.bf16.gmra.mxu1 %vm1499_vm0, %v4057_v28  ;;  %v2065_v46 = vpop.f32.mrf.mxu0 }
 0x2c7   :  { %v2066_v29 = vadd.f32 %v7265_v45, %v2065_v46 }
 0x2c8   :  { %v5428_v34 = vpop.eup %5427  ;;  %v3033_v40 = vadd.f32 %v7707_v19, %v2384_v26  ;;  %v4044_v19 = vld [vmem:[%s9094_s0 + $0x2b0] sm:$0xf] }
 0x2c9   :  { %v5430_v27 = vpop.eup %5429  ;;  %3633 = vst [vmem:[%s9096_s3 + $0x618] sm:$0xff] %v5428_v34  ;;  %v2715_v31 = vadd.f32 %v7744_v32, %v2066_v29  ;;  %v4973_v32 = vld [vmem:[%s9094_s0 + $0x2b4] sm:$0xf0]  ;;  %v4073_v34 = vor.u32 %v4978_v41, %v4070_v25 }
 0x2ca   :  { %3506 = vst [vmem:[%s9096_s3 + $0x220] sm:$0xff] %v5430_v27  ;;  %5431 = vtanh.f32 %v3033_v40  ;;  %4867 = vmatmul.msk.bf16.gmra.mxu3 %vm1499_vm0, %v4577_v33  ;;  %v4045_v44 = vor.u32 %v4973_v32, %v4044_v19 }
 0x2cb   :  { %5433 = vtanh.f32 %v2715_v31  ;;  %v7852_v38 = vpop.f32.mrf.mxu1 }
 0x2cd   :  { %v2385_v13 = vpop.f32.mrf.mxu2  ;;  %v7869_v57 = vpop.f32.mrf.mxu3 }
 0x2ce   :  { %v2386_v48 = vadd.f32 %v7265_v45, %v2385_v13  ;;  %v2068_v49 = vpop.f32.mrf.mxu0  ;;  %v4593_v13 = vor.u32 %v5108_v43, %v4590_v39 }
 0x2cf   :  { %v2069_v50 = vadd.f32 %v7265_v45, %v2068_v49  ;;  %v5105_v49 = vld [vmem:[%s9094_s0 + $0x6d4] sm:$0xf0] }
 0x2d0   :  { %v5432_v51 = vpop.eup %5431  ;;  %v3035_v55 = vadd.f32 %v7722_v59, %v2386_v48  ;;  %v4572_v48 = vld [vmem:[%s9094_s0 + $0x6d0] sm:$0xf] }
 0x2d1   :  { %v5434_v12 = vpop.eup %5433  ;;  %3634 = vst [vmem:[%s9096_s3 + $0x620] sm:$0xff] %v5432_v51  ;;  %v2718_v58 = vadd.f32 %v7771_v37, %v2069_v50  ;;  %2107 = vmatmul.bf16.gmra.mxu0 %v4045_v44  ;;  %v4573_v51 = vor.u32 %v5105_v49, %v4572_v48  ;;  %v5112_v48 = vld [vmem:[%s9094_s0 + $0x714] sm:$0xf]  ;;  %v4606_v49 = vld [vmem:[%s9094_s0 + $0x718] sm:$0xf0] }
 0x2d2   :  { %3507 = vst [vmem:[%s9096_s3 + $0x228] sm:$0xff] %v5434_v12  ;;  %5435 = vtanh.f32 %v3035_v55  ;;  %2427 = vmatmul.bf16.gmra.mxu2 %v4557_v9  ;;  %v4980_v12 = vld [vmem:[%s9094_s0 + $0x2f4] sm:$0xf] }
 0x2d3   :  { %5437 = vtanh.f32 %v2718_v58  ;;  %v7879_v35 = vpop.f32.mrf.mxu1  ;;  %v4078_v58 = vld [vmem:[%s9094_s0 + $0x2f8] sm:$0xf0] }
 0x2d5   :  { %v2388_v56 = vpop.f32.mrf.mxu2  ;;  %v7884_v37 = vpop.f32.mrf.mxu3 }
 0x2d6   :  { %v2389_v59 = vadd.f32 %v7265_v45, %v2388_v56  ;;  %4803 = vmatmul.msk.bf16.gmra.mxu1 %vm1499_vm0, %v4065_v63  ;;  %v2070_v6 = vpop.f32.mrf.mxu0 }
 0x2d7   :  { %v2071_v0 = vadd.f32 %v7265_v45, %v2070_v6  ;;  %v4582_v45 = vld [vmem:[%s9094_s0 + $0x6e8] sm:$0xf0] }
 0x2d8   :  { %v5436_v5 = vpop.eup %5435  ;;  %v3038_v47 = vadd.f32 %v7761_v52, %v2389_v59  ;;  %v4052_v52 = vld [vmem:[%s9094_s0 + $0x2c0] sm:$0xf]  ;;  %v4585_v8 = vor.u32 %v5106_v54, %v4582_v45 }
 0x2d9   :  { %v5438_v60 = vpop.eup %5437  ;;  %3635 = vst [vmem:[%s9096_s3 + $0x628] sm:$0xff] %v5436_v5  ;;  %v2720_v62 = vadd.f32 %v7798_v2, %v2071_v0  ;;  %v4975_v2 = vld [vmem:[%s9094_s0 + $0x2c4] sm:$0xf0]  ;;  %v4081_v5 = vor.u32 %v4980_v12, %v4078_v58 }
 0x2da   :  { %3508 = vst [vmem:[%s9096_s3 + $0x230] sm:$0xff] %v5438_v60  ;;  %5439 = vtanh.f32 %v3038_v47  ;;  %4868 = vmatmul.msk.bf16.gmra.mxu3 %vm1499_vm0, %v4585_v8  ;;  %v4053_v11 = vor.u32 %v4975_v2, %v4052_v52 }
 0x2db   :  { %5441 = vtanh.f32 %v2720_v62  ;;  %v7906_v3 = vpop.f32.mrf.mxu1 }
 0x2dd   :  { %v2390_v16 = vpop.f32.mrf.mxu2  ;;  %v7928_v28 = vpop.f32.mrf.mxu3 }
 0x2de   :  { %v2391_v18 = vadd.f32 %v7918_v15, %v2390_v16  ;;  %v2073_v20 = vpop.f32.mrf.mxu0  ;;  %v4601_v16 = vor.u32 %v5110_v61, %v4598_v14 }
 0x2df   :  { %v2074_v21 = vadd.f32 %v7918_v15, %v2073_v20  ;;  %v5107_v20 = vld [vmem:[%s9094_s0 + $0x6e4] sm:$0xf0] }
 0x2e0   :  { %v5440_v22 = vpop.eup %5439  ;;  %v3040_v26 = vadd.f32 %v7776_v30, %v2391_v18  ;;  %v4580_v18 = vld [vmem:[%s9094_s0 + $0x6e0] sm:$0xf] }
 0x2e1   :  { %v5442_v46 = vpop.eup %5441  ;;  %3636 = vst [vmem:[%s9096_s3 + $0x630] sm:$0xff] %v5440_v22  ;;  %v2723_v29 = vadd.f32 %v7825_v7, %v2074_v21  ;;  %2112 = vmatmul.bf16.gmra.mxu0 %v4053_v11  ;;  %v4581_v22 = vor.u32 %v5107_v20, %v4580_v18  ;;  %v5114_v18 = vld [vmem:[%s9094_s0 + $0x724] sm:$0xf]  ;;  %v4614_v20 = vld [vmem:[%s9094_s0 + $0x728] sm:$0xf0] }
 0x2e2   :  { %3509 = vst [vmem:[%s9096_s3 + $0x238] sm:$0xff] %v5442_v46  ;;  %5443 = vtanh.f32 %v3040_v26  ;;  %2432 = vmatmul.bf16.gmra.mxu2 %v4565_v17  ;;  %v4982_v46 = vld [vmem:[%s9094_s0 + $0x304] sm:$0xf] }
 0x2e3   :  { %5445 = vtanh.f32 %v2723_v29  ;;  %v7938_v40 = vpop.f32.mrf.mxu1  ;;  %v4086_v29 = vld [vmem:[%s9094_s0 + $0x308] sm:$0xf0] }
 0x2e5   :  { %v2393_v27 = vpop.f32.mrf.mxu2  ;;  %v7943_v7 = vpop.f32.mrf.mxu3 }
 0x2e6   :  { %v2394_v30 = vadd.f32 %v7918_v15, %v2393_v27  ;;  %4804 = vmatmul.msk.bf16.gmra.mxu1 %vm1499_vm0, %v4073_v34  ;;  %v2075_v31 = vpop.f32.mrf.mxu0 }
 0x2e7   :  { %v2076_v36 = vadd.f32 %v7918_v15, %v2075_v31 }
 0x2e8   :  { %v5444_v42 = vpop.eup %5443  ;;  %v3043_v19 = vadd.f32 %v7815_v23, %v2394_v30  ;;  %v4060_v23 = vld [vmem:[%s9094_s0 + $0x2d0] sm:$0xf] }
 0x2e9   :  { %v5446_v32 = vpop.eup %5445  ;;  %3637 = vst [vmem:[%s9096_s3 + $0x638] sm:$0xff] %v5444_v42  ;;  %v2725_v33 = vadd.f32 %v7852_v38, %v2076_v36  ;;  %v4977_v38 = vld [vmem:[%s9094_s0 + $0x2d4] sm:$0xf0]  ;;  %v4089_v42 = vor.u32 %v4982_v46, %v4086_v29 }
 0x2ea   :  { %3510 = vst [vmem:[%s9096_s3 + $0x240] sm:$0xff] %v5446_v32  ;;  %5447 = vtanh.f32 %v3043_v19  ;;  %4869 = vmatmul.msk.bf16.gmra.mxu3 %vm1499_vm0, %v4593_v13  ;;  %v4061_v50 = vor.u32 %v4977_v38, %v4060_v23 }
 0x2eb   :  { %5449 = vtanh.f32 %v2725_v33  ;;  %v7965_v44 = vpop.f32.mrf.mxu1 }
 0x2ed   :  { %v2395_v9 = vpop.f32.mrf.mxu2  ;;  %v7982_v63 = vpop.f32.mrf.mxu3 }
 0x2ee   :  { %v2396_v4 = vadd.f32 %v7918_v15, %v2395_v9  ;;  %v2078_v53 = vpop.f32.mrf.mxu0  ;;  %v4609_v9 = vor.u32 %v5112_v48, %v4606_v49 }
 0x2ef   :  { %v2079_v55 = vadd.f32 %v7918_v15, %v2078_v53  ;;  %v5109_v53 = vld [vmem:[%s9094_s0 + $0x6f4] sm:$0xf0] }
 0x2f0   :  { %v5448_v56 = vpop.eup %5447  ;;  %v3045_v59 = vadd.f32 %v7830_v1, %v2396_v4  ;;  %v4588_v4 = vld [vmem:[%s9094_s0 + $0x6f0] sm:$0xf] }
 0x2f1   :  { %v5450_v6 = vpop.eup %5449  ;;  %3638 = vst [vmem:[%s9096_s3 + $0x640] sm:$0xff] %v5448_v56  ;;  %v2728_v0 = vadd.f32 %v7879_v35, %v2079_v55  ;;  %2117 = vmatmul.bf16.gmra.mxu0 %v4061_v50  ;;  %v4589_v56 = vor.u32 %v5109_v53, %v4588_v4  ;;  %v5116_v4 = vld [vmem:[%s9094_s0 + $0x734] sm:$0xf]  ;;  %v4622_v53 = vld [vmem:[%s9094_s0 + $0x738] sm:$0xf0] }
 0x2f2   :  { %3511 = vst [vmem:[%s9096_s3 + $0x248] sm:$0xff] %v5450_v6  ;;  %5451 = vtanh.f32 %v3045_v59  ;;  %2437 = vmatmul.bf16.gmra.mxu2 %v4573_v51  ;;  %v4984_v6 = vld [vmem:[%s9094_s0 + $0x314] sm:$0xf] }
 0x2f3   :  { %5453 = vtanh.f32 %v2728_v0  ;;  %v7992_v47 = vpop.f32.mrf.mxu1  ;;  %v4094_v0 = vld [vmem:[%s9094_s0 + $0x318] sm:$0xf0] }
 0x2f5   :  { %v2398_v60 = vpop.f32.mrf.mxu2  ;;  %v7997_v35 = vpop.f32.mrf.mxu3 }
 0x2f6   :  { %v2399_v1 = vadd.f32 %v7918_v15, %v2398_v60  ;;  %4805 = vmatmul.msk.bf16.gmra.mxu1 %vm1499_vm0, %v4081_v5  ;;  %v2080_v62 = vpop.f32.mrf.mxu0 }
 0x2f7   :  { %v2081_v54 = vadd.f32 %v7918_v15, %v2080_v62 }
 0x2f8   :  { %v5452_v45 = vpop.eup %5451  ;;  %v3048_v52 = vadd.f32 %v7869_v57, %v2399_v1  ;;  %v4068_v57 = vld [vmem:[%s9094_s0 + $0x2e0] sm:$0xf] }
 0x2f9   :  { %v5454_v2 = vpop.eup %5453  ;;  %3639 = vst [vmem:[%s9096_s3 + $0x648] sm:$0xff] %v5452_v45  ;;  %v2730_v8 = vadd.f32 %v7906_v3, %v2081_v54  ;;  %v4979_v3 = vld [vmem:[%s9094_s0 + $0x2e4] sm:$0xf0]  ;;  %v4097_v45 = vor.u32 %v4984_v6, %v4094_v0 }
 0x2fa   :  { %3512 = vst [vmem:[%s9096_s3 + $0x250] sm:$0xff] %v5454_v2  ;;  %5455 = vtanh.f32 %v3048_v52  ;;  %4870 = vmatmul.msk.bf16.gmra.mxu3 %vm1499_vm0, %v4601_v16  ;;  %v4069_v21 = vor.u32 %v4979_v3, %v4068_v57 }
 0x2fb   :  { %5457 = vtanh.f32 %v2730_v8  ;;  %v8019_v11 = vpop.f32.mrf.mxu1 }
 0x2fd   :  { %v2400_v17 = vpop.f32.mrf.mxu2  ;;  %v8036_v34 = vpop.f32.mrf.mxu3 }
 0x2fe   :  { %v2401_v41 = vadd.f32 %v7918_v15, %v2400_v17  ;;  %v2083_v25 = vpop.f32.mrf.mxu0  ;;  %v4617_v17 = vor.u32 %v5114_v18, %v4614_v20 }
 0x2ff   :  { %v2084_v26 = vadd.f32 %v7918_v15, %v2083_v25  ;;  %v5111_v25 = vld [vmem:[%s9094_s0 + $0x704] sm:$0xf0] }
 0x300   :  { %v5456_v27 = vpop.eup %5455  ;;  %v3050_v30 = vadd.f32 %v7884_v37, %v2401_v41  ;;  %v4596_v41 = vld [vmem:[%s9094_s0 + $0x700] sm:$0xf] }
 0x301   :  { %v5458_v31 = vpop.eup %5457  ;;  %3640 = vst [vmem:[%s9096_s3 + $0x650] sm:$0xff] %v5456_v27  ;;  %v2733_v36 = vadd.f32 %v7938_v40, %v2084_v26  ;;  %2122 = vmatmul.bf16.gmra.mxu0 %v4069_v21  ;;  %v4597_v27 = vor.u32 %v5111_v25, %v4596_v41  ;;  %v5118_v41 = vld [vmem:[%s9094_s0 + $0x744] sm:$0xf]  ;;  %v4630_v25 = vld [vmem:[%s9094_s0 + $0x748] sm:$0xf0] }
 0x302   :  { %3513 = vst [vmem:[%s9096_s3 + $0x258] sm:$0xff] %v5458_v31  ;;  %5459 = vtanh.f32 %v3050_v30  ;;  %2442 = vmatmul.bf16.gmra.mxu2 %v4581_v22  ;;  %v4986_v31 = vld [vmem:[%s9094_s0 + $0x324] sm:$0xf] }
 0x303   :  { %5461 = vtanh.f32 %v2733_v36  ;;  %v8046_v19 = vpop.f32.mrf.mxu1  ;;  %v4102_v36 = vld [vmem:[%s9094_s0 + $0x328] sm:$0xf0] }
 0x305   :  { %v2403_v32 = vpop.f32.mrf.mxu2  ;;  %v8051_v40 = vpop.f32.mrf.mxu3 }
 0x306   :  { %v2404_v37 = vadd.f32 %v7918_v15, %v2403_v32  ;;  %4806 = vmatmul.msk.bf16.gmra.mxu1 %vm1499_vm0, %v4089_v42  ;;  %v2085_v33 = vpop.f32.mrf.mxu0 }
 0x307   :  { %v2086_v43 = vadd.f32 %v7918_v15, %v2085_v33 }
 0x308   :  { %v5460_v39 = vpop.eup %5459  ;;  %v3053_v23 = vadd.f32 %v7928_v28, %v2404_v37  ;;  %v4076_v28 = vld [vmem:[%s9094_s0 + $0x2f0] sm:$0xf] }
 0x309   :  { %v5462_v38 = vpop.eup %5461  ;;  %3641 = vst [vmem:[%s9096_s3 + $0x658] sm:$0xff] %v5460_v39  ;;  %v2735_v13 = vadd.f32 %v7965_v44, %v2086_v43  ;;  %v4981_v44 = vld [vmem:[%s9094_s0 + $0x2f4] sm:$0xf0]  ;;  %v4105_v39 = vor.u32 %v4986_v31, %v4102_v36 }
 0x30a   :  { %3514 = vst [vmem:[%s9096_s3 + $0x260] sm:$0xff] %v5462_v38  ;;  %5463 = vtanh.f32 %v3053_v23  ;;  %4871 = vmatmul.msk.bf16.gmra.mxu3 %vm1499_vm0, %v4609_v9  ;;  %v4077_v55 = vor.u32 %v4981_v44, %v4076_v28 }
 0x30b   :  { %5465 = vtanh.f32 %v2735_v13  ;;  %v8073_v50 = vpop.f32.mrf.mxu1 }
 0x30d   :  { %v2405_v51 = vpop.f32.mrf.mxu2  ;;  %v8090_v5 = vpop.f32.mrf.mxu3 }
 0x30e   :  { %v2406_v12 = vadd.f32 %v7918_v15, %v2405_v51  ;;  %v2088_v58 = vpop.f32.mrf.mxu0  ;;  %v4625_v51 = vor.u32 %v5116_v4, %v4622_v53 }
 0x30f   :  { %v2089_v59 = vadd.f32 %v7918_v15, %v2088_v58  ;;  %v5113_v58 = vld [vmem:[%s9094_s0 + $0x714] sm:$0xf0] }
 0x310   :  { %v5464_v60 = vpop.eup %5463  ;;  %v3055_v1 = vadd.f32 %v7943_v7, %v2406_v12  ;;  %v4604_v12 = vld [vmem:[%s9094_s0 + $0x710] sm:$0xf] }
 0x311   :  { %v5466_v62 = vpop.eup %5465  ;;  %3642 = vst [vmem:[%s9096_s3 + $0x660] sm:$0xff] %v5464_v60  ;;  %v2738_v54 = vadd.f32 %v7992_v47, %v2089_v59  ;;  %2127 = vmatmul.bf16.gmra.mxu0 %v4077_v55  ;;  %v4605_v60 = vor.u32 %v5113_v58, %v4604_v12  ;;  %v5120_v12 = vld [vmem:[%s9094_s0 + $0x754] sm:$0xf]  ;;  %v4638_v58 = vld [vmem:[%s9094_s0 + $0x758] sm:$0xf0] }
 0x312   :  { %3515 = vst [vmem:[%s9096_s3 + $0x268] sm:$0xff] %v5466_v62  ;;  %5467 = vtanh.f32 %v3055_v1  ;;  %2447 = vmatmul.bf16.gmra.mxu2 %v4589_v56  ;;  %v4988_v62 = vld [vmem:[%s9094_s0 + $0x334] sm:$0xf] }
 0x313   :  { %5469 = vtanh.f32 %v2738_v54  ;;  %v8100_v52 = vpop.f32.mrf.mxu1  ;;  %v4110_v54 = vld [vmem:[%s9094_s0 + $0x338] sm:$0xf0] }
 0x315   :  { %v2408_v2 = vpop.f32.mrf.mxu2  ;;  %v8105_v47 = vpop.f32.mrf.mxu3 }
 0x316   :  { %v2409_v7 = vadd.f32 %v7918_v15, %v2408_v2  ;;  %4807 = vmatmul.msk.bf16.gmra.mxu1 %vm1499_vm0, %v4097_v45  ;;  %v2090_v8 = vpop.f32.mrf.mxu0 }
 0x317   :  { %v2091_v61 = vadd.f32 %v7918_v15, %v2090_v8 }
 0x318   :  { %v5468_v14 = vpop.eup %5467  ;;  %v3058_v57 = vadd.f32 %v7982_v63, %v2409_v7  ;;  %v4084_v63 = vld [vmem:[%s9094_s0 + $0x300] sm:$0xf] }
 0x319   :  { %v5470_v3 = vpop.eup %5469  ;;  %3643 = vst [vmem:[%s9096_s3 + $0x668] sm:$0xff] %v5468_v14  ;;  %v2740_v16 = vadd.f32 %v8019_v11, %v2091_v61  ;;  %v4983_v11 = vld [vmem:[%s9094_s0 + $0x304] sm:$0xf0]  ;;  %v4113_v14 = vor.u32 %v4988_v62, %v4110_v54 }
 0x31a   :  { %3516 = vst [vmem:[%s9096_s3 + $0x270] sm:$0xff] %v5470_v3  ;;  %5471 = vtanh.f32 %v3058_v57  ;;  %4872 = vmatmul.msk.bf16.gmra.mxu3 %vm1499_vm0, %v4617_v17  ;;  %v4085_v26 = vor.u32 %v4983_v11, %v4084_v63 }
 0x31b   :  { %5473 = vtanh.f32 %v2740_v16  ;;  %v8127_v21 = vpop.f32.mrf.mxu1 }
 0x31d   :  { %v2410_v22 = vpop.f32.mrf.mxu2  ;;  %v8144_v42 = vpop.f32.mrf.mxu3 }
 0x31e   :  { %v2411_v46 = vadd.f32 %v7918_v15, %v2410_v22  ;;  %v2093_v29 = vpop.f32.mrf.mxu0  ;;  %v4633_v22 = vor.u32 %v5118_v41, %v4630_v25 }
 0x31f   :  { %v2094_v30 = vadd.f32 %v7918_v15, %v2093_v29  ;;  %v5115_v29 = vld [vmem:[%s9094_s0 + $0x724] sm:$0xf0] }
 0x320   :  { %v5472_v32 = vpop.eup %5471  ;;  %v3060_v37 = vadd.f32 %v7997_v35, %v2411_v46  ;;  %v4612_v46 = vld [vmem:[%s9094_s0 + $0x720] sm:$0xf] }
 0x321   :  { %v5474_v33 = vpop.eup %5473  ;;  %3644 = vst [vmem:[%s9096_s3 + $0x670] sm:$0xff] %v5472_v32  ;;  %v2743_v43 = vadd.f32 %v8046_v19, %v2094_v30  ;;  %2132 = vmatmul.bf16.gmra.mxu0 %v4085_v26  ;;  %v4613_v32 = vor.u32 %v5115_v29, %v4612_v46  ;;  %v5122_v46 = vld [vmem:[%s9094_s0 + $0x764] sm:$0xf]  ;;  %v4646_v29 = vld [vmem:[%s9094_s0 + $0x768] sm:$0xf0] }
 0x322   :  { %3517 = vst [vmem:[%s9096_s3 + $0x278] sm:$0xff] %v5474_v33  ;;  %5475 = vtanh.f32 %v3060_v37  ;;  %2452 = vmatmul.bf16.gmra.mxu2 %v4597_v27  ;;  %v4990_v33 = vld [vmem:[%s9094_s0 + $0x344] sm:$0xf] }
 0x323   :  { %5477 = vtanh.f32 %v2743_v43  ;;  %v8154_v23 = vpop.f32.mrf.mxu1  ;;  %v4118_v43 = vld [vmem:[%s9094_s0 + $0x348] sm:$0xf0] }
 0x325   :  { %v2413_v38 = vpop.f32.mrf.mxu2  ;;  %v8159_v19 = vpop.f32.mrf.mxu3 }
 0x326   :  { %v2414_v35 = vadd.f32 %v7918_v15, %v2413_v38  ;;  %4808 = vmatmul.msk.bf16.gmra.mxu1 %vm1499_vm0, %v4105_v39  ;;  %v2095_v13 = vpop.f32.mrf.mxu0 }
 0x327   :  { %v2096_v48 = vadd.f32 %v7918_v15, %v2095_v13 }
 0x328   :  { %v5476_v49 = vpop.eup %5475  ;;  %v3063_v28 = vadd.f32 %v8036_v34, %v2414_v35  ;;  %v4092_v34 = vld [vmem:[%s9094_s0 + $0x310] sm:$0xf] }
 0x329   :  { %v5478_v44 = vpop.eup %5477  ;;  %3645 = vst [vmem:[%s9096_s3 + $0x678] sm:$0xff] %v5476_v49  ;;  %v2745_v9 = vadd.f32 %v8073_v50, %v2096_v48  ;;  %v4985_v50 = vld [vmem:[%s9094_s0 + $0x314] sm:$0xf0]  ;;  %v4121_v49 = vor.u32 %v4990_v33, %v4118_v43 }
 0x32a   :  { %3518 = vst [vmem:[%s9096_s3 + $0x280] sm:$0xff] %v5478_v44  ;;  %5479 = vtanh.f32 %v3063_v28  ;;  %4873 = vmatmul.msk.bf16.gmra.mxu3 %vm1499_vm0, %v4625_v51  ;;  %v4093_v59 = vor.u32 %v4985_v50, %v4092_v34 }
 0x32b   :  { %5481 = vtanh.f32 %v2745_v9  ;;  %v8181_v55 = vpop.f32.mrf.mxu1 }
 0x32d   :  { %v2415_v56 = vpop.f32.mrf.mxu2  ;;  %v8198_v45 = vpop.f32.mrf.mxu3 }
 0x32e   :  { %v2416_v6 = vadd.f32 %v7918_v15, %v2415_v56  ;;  %v2098_v0 = vpop.f32.mrf.mxu0  ;;  %v4641_v56 = vor.u32 %v5120_v12, %v4638_v58 }
 0x32f   :  { %v2099_v1 = vadd.f32 %v7918_v15, %v2098_v0  ;;  %v5117_v0 = vld [vmem:[%s9094_s0 + $0x734] sm:$0xf0] }
 0x330   :  { %v5480_v2 = vpop.eup %5479  ;;  %v3065_v7 = vadd.f32 %v8051_v40, %v2416_v6  ;;  %v4620_v6 = vld [vmem:[%s9094_s0 + $0x730] sm:$0xf] }
 0x331   :  { %v5482_v8 = vpop.eup %5481  ;;  %3646 = vst [vmem:[%s9096_s3 + $0x680] sm:$0xff] %v5480_v2  ;;  %v2748_v61 = vadd.f32 %v8100_v52, %v2099_v1  ;;  %2137 = vmatmul.bf16.gmra.mxu0 %v4093_v59  ;;  %v4621_v2 = vor.u32 %v5117_v0, %v4620_v6  ;;  %v5124_v6 = vld [vmem:[%s9094_s0 + $0x774] sm:$0xf]  ;;  %v4654_v0 = vld [vmem:[%s9094_s0 + $0x778] sm:$0xf0] }
 0x332   :  { %3519 = vst [vmem:[%s9096_s3 + $0x288] sm:$0xff] %v5482_v8  ;;  %5483 = vtanh.f32 %v3065_v7  ;;  %2457 = vmatmul.bf16.gmra.mxu2 %v4605_v60  ;;  %v4992_v8 = vld [vmem:[%s9094_s0 + $0x354] sm:$0xf] }
 0x333   :  { %5485 = vtanh.f32 %v2748_v61  ;;  %v8208_v57 = vpop.f32.mrf.mxu1  ;;  %v4126_v61 = vld [vmem:[%s9094_s0 + $0x358] sm:$0xf0] }
 0x335   :  { %v2418_v3 = vpop.f32.mrf.mxu2  ;;  %v8213_v52 = vpop.f32.mrf.mxu3 }
 0x336   :  { %v2419_v40 = vadd.f32 %v7918_v15, %v2418_v3  ;;  %4809 = vmatmul.msk.bf16.gmra.mxu1 %vm1499_vm0, %v4113_v14  ;;  %v2100_v16 = vpop.f32.mrf.mxu0 }
 0x337   :  { %v2101_v18 = vadd.f32 %v7918_v15, %v2100_v16 }
 0x338   :  { %v5484_v20 = vpop.eup %5483  ;;  %v3068_v63 = vadd.f32 %v8090_v5, %v2419_v40  ;;  %v4100_v5 = vld [vmem:[%s9094_s0 + $0x320] sm:$0xf] }
 0x339   :  { %v5486_v11 = vpop.eup %5485  ;;  %3647 = vst [vmem:[%s9096_s3 + $0x688] sm:$0xff] %v5484_v20  ;;  %v2750_v17 = vadd.f32 %v8127_v21, %v2101_v18  ;;  %v4987_v21 = vld [vmem:[%s9094_s0 + $0x324] sm:$0xf0]  ;;  %v4129_v20 = vor.u32 %v4992_v8, %v4126_v61 }
 0x33a   :  { %3520 = vst [vmem:[%s9096_s3 + $0x290] sm:$0xff] %v5486_v11  ;;  %5487 = vtanh.f32 %v3068_v63  ;;  %4874 = vmatmul.msk.bf16.gmra.mxu3 %vm1499_vm0, %v4633_v22  ;;  %v4101_v30 = vor.u32 %v4987_v21, %v4100_v5 }
 0x33b   :  { %5489 = vtanh.f32 %v2750_v17  ;;  %v8235_v26 = vpop.f32.mrf.mxu1 }
 0x33d   :  { %v2420_v27 = vpop.f32.mrf.mxu2  ;;  %v8252_v39 = vpop.f32.mrf.mxu3 }
 0x33e   :  { %v2421_v31 = vadd.f32 %v7918_v15, %v2420_v27  ;;  %v2103_v36 = vpop.f32.mrf.mxu0  ;;  %v4649_v27 = vor.u32 %v5122_v46, %v4646_v29 }
 0x33f   :  { %v2104_v37 = vadd.f32 %v7918_v15, %v2103_v36  ;;  %v5119_v36 = vld [vmem:[%s9094_s0 + $0x744] sm:$0xf0] }
 0x340   :  { %v5488_v38 = vpop.eup %5487  ;;  %v3070_v35 = vadd.f32 %v8105_v47, %v2421_v31  ;;  %v4628_v31 = vld [vmem:[%s9094_s0 + $0x740] sm:$0xf] }
 0x341   :  { %v5490_v13 = vpop.eup %5489  ;;  %3648 = vst [vmem:[%s9096_s3 + $0x690] sm:$0xff] %v5488_v38  ;;  %v2753_v48 = vadd.f32 %v8154_v23, %v2104_v37  ;;  %2142 = vmatmul.bf16.gmra.mxu0 %v4101_v30  ;;  %v4629_v38 = vor.u32 %v5119_v36, %v4628_v31  ;;  %v5126_v31 = vld [vmem:[%s9094_s0 + $0x784] sm:$0xf]  ;;  %v4662_v36 = vld [vmem:[%s9094_s0 + $0x788] sm:$0xf0] }
 0x342   :  { %3521 = vst [vmem:[%s9096_s3 + $0x298] sm:$0xff] %v5490_v13  ;;  %5491 = vtanh.f32 %v3070_v35  ;;  %2462 = vmatmul.bf16.gmra.mxu2 %v4613_v32  ;;  %v4994_v13 = vld [vmem:[%s9094_s0 + $0x364] sm:$0xf] }
 0x343   :  { %5493 = vtanh.f32 %v2753_v48  ;;  %v8262_v28 = vpop.f32.mrf.mxu1  ;;  %v4134_v48 = vld [vmem:[%s9094_s0 + $0x368] sm:$0xf0] }
 0x345   :  { %v2423_v44 = vpop.f32.mrf.mxu2  ;;  %v8267_v23 = vpop.f32.mrf.mxu3 }
 0x346   :  { %v2424_v47 = vadd.f32 %v7918_v15, %v2423_v44  ;;  %4810 = vmatmul.msk.bf16.gmra.mxu1 %vm1499_vm0, %v4121_v49  ;;  %v2105_v9 = vpop.f32.mrf.mxu0 }
 0x347   :  { %v2106_v4 = vadd.f32 %v7918_v15, %v2105_v9 }
 0x348   :  { %v5492_v53 = vpop.eup %5491  ;;  %v3073_v34 = vadd.f32 %v8144_v42, %v2424_v47  ;;  %v4108_v42 = vld [vmem:[%s9094_s0 + $0x330] sm:$0xf] }
 0x349   :  { %v5494_v50 = vpop.eup %5493  ;;  %3649 = vst [vmem:[%s9096_s3 + $0x698] sm:$0xff] %v5492_v53  ;;  %v2755_v51 = vadd.f32 %v8181_v55, %v2106_v4  ;;  %v4989_v55 = vld [vmem:[%s9094_s0 + $0x334] sm:$0xf0]  ;;  %v4137_v53 = vor.u32 %v4994_v13, %v4134_v48 }
 0x34a   :  { %3522 = vst [vmem:[%s9096_s3 + $0x2a0] sm:$0xff] %v5494_v50  ;;  %5495 = vtanh.f32 %v3073_v34  ;;  %4875 = vmatmul.msk.bf16.gmra.mxu3 %vm1499_vm0, %v4641_v56  ;;  %v4109_v1 = vor.u32 %v4989_v55, %v4108_v42 }
 0x34b   :  { %5497 = vtanh.f32 %v2755_v51  ;;  %v8289_v59 = vpop.f32.mrf.mxu1 }
 0x34d   :  { %v2425_v60 = vpop.f32.mrf.mxu2  ;;  %v8306_v14 = vpop.f32.mrf.mxu3 }
 0x34e   :  { %v2426_v62 = vadd.f32 %v7918_v15, %v2425_v60  ;;  %v2108_v54 = vpop.f32.mrf.mxu0  ;;  %v4657_v60 = vor.u32 %v5124_v6, %v4654_v0 }
 0x34f   :  { %v2109_v7 = vadd.f32 %v7918_v15, %v2108_v54  ;;  %v5121_v54 = vld [vmem:[%s9094_s0 + $0x754] sm:$0xf0] }
 0x350   :  { %v5496_v3 = vpop.eup %5495  ;;  %v3075_v40 = vadd.f32 %v8159_v19, %v2426_v62  ;;  %v4636_v62 = vld [vmem:[%s9094_s0 + $0x750] sm:$0xf] }
 0x351   :  { %v5498_v16 = vpop.eup %5497  ;;  %3650 = vst [vmem:[%s9096_s3 + $0x6a0] sm:$0xff] %v5496_v3  ;;  %v2758_v18 = vadd.f32 %v8208_v57, %v2109_v7  ;;  %2147 = vmatmul.bf16.gmra.mxu0 %v4109_v1  ;;  %v4637_v3 = vor.u32 %v5121_v54, %v4636_v62  ;;  %v5128_v62 = vld [vmem:[%s9094_s0 + $0x794] sm:$0xf]  ;;  %v4670_v54 = vld [vmem:[%s9094_s0 + $0x798] sm:$0xf0] }
 0x352   :  { %3523 = vst [vmem:[%s9096_s3 + $0x2a8] sm:$0xff] %v5498_v16  ;;  %5499 = vtanh.f32 %v3075_v40  ;;  %2467 = vmatmul.bf16.gmra.mxu2 %v4621_v2  ;;  %v4996_v16 = vld [vmem:[%s9094_s0 + $0x374] sm:$0xf] }
 0x353   :  { %5501 = vtanh.f32 %v2758_v18  ;;  %v8316_v63 = vpop.f32.mrf.mxu1  ;;  %v4142_v18 = vld [vmem:[%s9094_s0 + $0x378] sm:$0xf0] }
 0x355   :  { %v2428_v11 = vpop.f32.mrf.mxu2  ;;  %v8321_v57 = vpop.f32.mrf.mxu3 }
 0x356   :  { %v2429_v19 = vadd.f32 %v7918_v15, %v2428_v11  ;;  %4811 = vmatmul.msk.bf16.gmra.mxu1 %vm1499_vm0, %v4129_v20  ;;  %v2110_v17 = vpop.f32.mrf.mxu0 }
 0x357   :  { %v2111_v41 = vadd.f32 %v7918_v15, %v2110_v17 }
 0x358   :  { %v5500_v25 = vpop.eup %5499  ;;  %v3078_v5 = vadd.f32 %v8198_v45, %v2429_v19  ;;  %v4116_v45 = vld [vmem:[%s9094_s0 + $0x340] sm:$0xf] }
 0x359   :  { %v5502_v21 = vpop.eup %5501  ;;  %3651 = vst [vmem:[%s9096_s3 + $0x6a8] sm:$0xff] %v5500_v25  ;;  %v2760_v22 = vadd.f32 %v8235_v26, %v2111_v41  ;;  %v4991_v26 = vld [vmem:[%s9094_s0 + $0x344] sm:$0xf0]  ;;  %v4145_v25 = vor.u32 %v4996_v16, %v4142_v18 }
 0x35a   :  { %3524 = vst [vmem:[%s9096_s3 + $0x2b0] sm:$0xff] %v5502_v21  ;;  %5503 = vtanh.f32 %v3078_v5  ;;  %4876 = vmatmul.msk.bf16.gmra.mxu3 %vm1499_vm0, %v4649_v27  ;;  %v4117_v37 = vor.u32 %v4991_v26, %v4116_v45 }
 0x35b   :  { %5505 = vtanh.f32 %v2760_v22  ;;  %v8343_v30 = vpop.f32.mrf.mxu1 }
 0x35d   :  { %v2430_v32 = vpop.f32.mrf.mxu2  ;;  %v8360_v49 = vpop.f32.mrf.mxu3 }
 0x35e   :  { %v2431_v33 = vadd.f32 %v7918_v15, %v2430_v32  ;;  %v2113_v43 = vpop.f32.mrf.mxu0  ;;  %v4665_v32 = vor.u32 %v5126_v31, %v4662_v36 }
 0x35f   :  { %v2114_v35 = vadd.f32 %v7918_v15, %v2113_v43  ;;  %v5123_v43 = vld [vmem:[%s9094_s0 + $0x764] sm:$0xf0] }
 0x360   :  { %v5504_v44 = vpop.eup %5503  ;;  %v3080_v47 = vadd.f32 %v8213_v52, %v2431_v33  ;;  %v4644_v33 = vld [vmem:[%s9094_s0 + $0x760] sm:$0xf] }
 0x361   :  { %v5506_v9 = vpop.eup %5505  ;;  %3652 = vst [vmem:[%s9096_s3 + $0x6b0] sm:$0xff] %v5504_v44  ;;  %v2763_v4 = vadd.f32 %v8262_v28, %v2114_v35  ;;  %2152 = vmatmul.bf16.gmra.mxu0 %v4117_v37  ;;  %v4645_v44 = vor.u32 %v5123_v43, %v4644_v33  ;;  %v5130_v33 = vld [vmem:[%s9094_s0 + $0x7a4] sm:$0xf] }
 0x362   :  { %3525 = vst [vmem:[%s9096_s3 + $0x2b8] sm:$0xff] %v5506_v9  ;;  %5507 = vtanh.f32 %v3080_v47  ;;  %2472 = vmatmul.bf16.gmra.mxu2 %v4629_v38  ;;  %v4998_v9 = vld [vmem:[%s9094_s0 + $0x384] sm:$0xf] }
 0x363   :  { %5509 = vtanh.f32 %v2763_v4  ;;  %v8370_v34 = vpop.f32.mrf.mxu1  ;;  %v4150_v4 = vld [vmem:[%s9094_s0 + $0x388] sm:$0xf0] }
 0x365   :  { %v2433_v50 = vpop.f32.mrf.mxu2  ;;  %v8375_v28 = vpop.f32.mrf.mxu3 }
 0x366   :  { %v2434_v52 = vadd.f32 %v7918_v15, %v2433_v50  ;;  %4812 = vmatmul.msk.bf16.gmra.mxu1 %vm1499_vm0, %v4137_v53  ;;  %v2115_v51 = vpop.f32.mrf.mxu0 }
 0x367   :  { %v2116_v12 = vadd.f32 %v7918_v15, %v2115_v51 }
 0x368   :  { %v5508_v58 = vpop.eup %5507  ;;  %v3083_v42 = vadd.f32 %v8252_v39, %v2434_v52  ;;  %v4124_v39 = vld [vmem:[%s9094_s0 + $0x350] sm:$0xf] }
 0x369   :  { %v5510_v55 = vpop.eup %5509  ;;  %3653 = vst [vmem:[%s9096_s3 + $0x6b8] sm:$0xff] %v5508_v58  ;;  %v2765_v56 = vadd.f32 %v8289_v59, %v2116_v12  ;;  %v4993_v59 = vld [vmem:[%s9094_s0 + $0x354] sm:$0xf0]  ;;  %v4153_v58 = vor.u32 %v4998_v9, %v4150_v4 }
 0x36a   :  { %3526 = vst [vmem:[%s9096_s3 + $0x2c0] sm:$0xff] %v5510_v55  ;;  %5511 = vtanh.f32 %v3083_v42  ;;  %4877 = vmatmul.msk.bf16.gmra.mxu3 %vm1499_vm0, %v4657_v60  ;;  %v4125_v7 = vor.u32 %v4993_v59, %v4124_v39 }
 0x36b   :  { %5513 = vtanh.f32 %v2765_v56  ;;  %v8397_v1 = vpop.f32.mrf.mxu1 }
 0x36d   :  { %v2435_v2 = vpop.f32.mrf.mxu2  ;;  %v8414_v20 = vpop.f32.mrf.mxu3 }
 0x36e   :  { %v2436_v8 = vadd.f32 %v7918_v15, %v2435_v2  ;;  %v2118_v61 = vpop.f32.mrf.mxu0  ;;  %v4673_v2 = vor.u32 %v5128_v62, %v4670_v54 }
 0x36f   :  { %v2119_v40 = vadd.f32 %v7918_v15, %v2118_v61  ;;  %v5125_v61 = vld [vmem:[%s9094_s0 + $0x774] sm:$0xf0] }
 0x370   :  { %v5512_v11 = vpop.eup %5511  ;;  %v3085_v19 = vadd.f32 %v8267_v23, %v2436_v8  ;;  %v4652_v8 = vld [vmem:[%s9094_s0 + $0x770] sm:$0xf] }
 0x371   :  { %v5514_v17 = vpop.eup %5513  ;;  %3654 = vst [vmem:[%s9096_s3 + $0x6c0] sm:$0xff] %v5512_v11  ;;  %v2768_v41 = vadd.f32 %v8316_v63, %v2119_v40  ;;  %2157 = vmatmul.bf16.gmra.mxu0 %v4125_v7  ;;  %v4653_v11 = vor.u32 %v5125_v61, %v4652_v8  ;;  %v5132_v8 = vld [vmem:[%s9094_s0 + $0x7b4] sm:$0xf]  ;;  %v4686_v61 = vld [vmem:[%s9094_s0 + $0x7b8] sm:$0xf0] }
 0x372   :  { %3527 = vst [vmem:[%s9096_s3 + $0x2c8] sm:$0xff] %v5514_v17  ;;  %5515 = vtanh.f32 %v3085_v19  ;;  %2477 = vmatmul.bf16.gmra.mxu2 %v4637_v3  ;;  %v5000_v17 = vld [vmem:[%s9094_s0 + $0x394] sm:$0xf] }
 0x373   :  { %5517 = vtanh.f32 %v2768_v41  ;;  %v8424_v5 = vpop.f32.mrf.mxu1  ;;  %v4158_v41 = vld [vmem:[%s9094_s0 + $0x398] sm:$0xf0] }
 0x375   :  { %v2438_v21 = vpop.f32.mrf.mxu2  ;;  %v8429_v63 = vpop.f32.mrf.mxu3 }
 0x376   :  { %v2439_v23 = vadd.f32 %v7918_v15, %v2438_v21  ;;  %4813 = vmatmul.msk.bf16.gmra.mxu1 %vm1499_vm0, %v4145_v25  ;;  %v2120_v22 = vpop.f32.mrf.mxu0 }
 0x377   :  { %v2121_v46 = vadd.f32 %v7918_v15, %v2120_v22 }
 0x378   :  { %v5516_v29 = vpop.eup %5515  ;;  %v3088_v45 = vadd.f32 %v8306_v14, %v2439_v23  ;;  %v4132_v14 = vld [vmem:[%s9094_s0 + $0x360] sm:$0xf] }
 0x379   :  { %v5518_v26 = vpop.eup %5517  ;;  %3655 = vst [vmem:[%s9096_s3 + $0x6c8] sm:$0xff] %v5516_v29  ;;  %v2770_v27 = vadd.f32 %v8343_v30, %v2121_v46  ;;  %v4995_v30 = vld [vmem:[%s9094_s0 + $0x364] sm:$0xf0]  ;;  %v4161_v29 = vor.u32 %v5000_v17, %v4158_v41 }
 0x37a   :  { %3528 = vst [vmem:[%s9096_s3 + $0x2d0] sm:$0xff] %v5518_v26  ;;  %5519 = vtanh.f32 %v3088_v45  ;;  %4878 = vmatmul.msk.bf16.gmra.mxu3 %vm1499_vm0, %v4665_v32  ;;  %v4133_v35 = vor.u32 %v4995_v30, %v4132_v14 }
 0x37b   :  { %5521 = vtanh.f32 %v2770_v27  ;;  %v8451_v37 = vpop.f32.mrf.mxu1 }
 0x37d   :  { %v2440_v38 = vpop.f32.mrf.mxu2  ;;  %v8468_v53 = vpop.f32.mrf.mxu3 }
 0x37e   :  { %v2441_v13 = vadd.f32 %v7918_v15, %v2440_v38  ;;  %v2123_v48 = vpop.f32.mrf.mxu0 }
 0x37f   :  { %v2124_v47 = vadd.f32 %v7918_v15, %v2123_v48 }
 0x380   :  { %v5520_v50 = vpop.eup %5519  ;;  %v3090_v52 = vadd.f32 %v8321_v57, %v2441_v13  ;;  %v5127_v13 = vld [vmem:[%s9094_s0 + $0x784] sm:$0xf0] }
 0x381   :  { %v5522_v51 = vpop.eup %5521  ;;  %3656 = vst [vmem:[%s9096_s3 + $0x6d0] sm:$0xff] %v5520_v50  ;;  %v2773_v12 = vadd.f32 %v8370_v34, %v2124_v47  ;;  %2162 = vmatmul.bf16.gmra.mxu0 %v4133_v35  ;;  %v4660_v35 = vld [vmem:[%s9094_s0 + $0x780] sm:$0xf] }
 0x382   :  { %3529 = vst [vmem:[%s9096_s3 + $0x2d8] sm:$0xff] %v5522_v51  ;;  %5523 = vtanh.f32 %v3090_v52  ;;  %2482 = vmatmul.bf16.gmra.mxu2 %v4645_v44  ;;  %v8571_v47 = vld [vmem:[%s9095_s2] ss:$0 sm:$0xff]  ;;  %v4661_v50 = vor.u32 %v5127_v13, %v4660_v35  ;;  %v5002_v51 = vld [vmem:[%s9094_s0 + $0x3a4] sm:$0xf] }
 0x383   :  { %5525 = vtanh.f32 %v2773_v12  ;;  %v8478_v42 = vpop.f32.mrf.mxu1  ;;  %v4166_v12 = vld [vmem:[%s9094_s0 + $0x3a8] sm:$0xf0]  ;;  %v5134_v35 = vld [vmem:[%s9094_s0 + $0x7c4] sm:$0xf] }
 0x384   :  { %v4694_v13 = vld [vmem:[%s9094_s0 + $0x7c8] sm:$0xf0] }
 0x385   :  { %v2443_v55 = vpop.f32.mrf.mxu2  ;;  %v8483_v34 = vpop.f32.mrf.mxu3 }
 0x386   :  { %v2444_v57 = vadd.f32 %v7918_v15, %v2443_v55  ;;  %4814 = vmatmul.msk.bf16.gmra.mxu1 %vm1499_vm0, %v4153_v58  ;;  %v2125_v56 = vpop.f32.mrf.mxu0 }
 0x387   :  { %v2126_v6 = vadd.f32 %v7918_v15, %v2125_v56 }
 0x388   :  { %v5524_v0 = vpop.eup %5523  ;;  %v3093_v39 = vadd.f32 %v8360_v49, %v2444_v57  ;;  %v4140_v49 = vld [vmem:[%s9094_s0 + $0x370] sm:$0xf] }
 0x389   :  { %v5526_v59 = vpop.eup %5525  ;;  %3657 = vst [vmem:[%s9096_s3 + $0x6d8] sm:$0xff] %v5524_v0  ;;  %v2775_v60 = vadd.f32 %v8397_v1, %v2126_v6  ;;  %v4997_v1 = vld [vmem:[%s9094_s0 + $0x374] sm:$0xf0]  ;;  %v4169_v0 = vor.u32 %v5002_v51, %v4166_v12 }
 0x38a   :  { %3530 = vst [vmem:[%s9096_s3 + $0x2e0] sm:$0xff] %v5526_v59  ;;  %5527 = vtanh.f32 %v3093_v39  ;;  %4879 = vmatmul.msk.bf16.gmra.mxu3 %vm1499_vm0, %v4673_v2  ;;  %v4141_v40 = vor.u32 %v4997_v1, %v4140_v49 }
 0x38b   :  { %5529 = vtanh.f32 %v2775_v60  ;;  %v8505_v7 = vpop.f32.mrf.mxu1 }
 0x38d   :  { %v2445_v3 = vpop.f32.mrf.mxu2  ;;  %v8522_v25 = vpop.f32.mrf.mxu3 }
 0x38e   :  { %v2446_v16 = vadd.f32 %v7918_v15, %v2445_v3  ;;  %v2128_v18 = vpop.f32.mrf.mxu0  ;;  %v4689_v3 = vor.u32 %v5132_v8, %v4686_v61 }
 0x38f   :  { %v2129_v19 = vadd.f32 %v7918_v15, %v2128_v18  ;;  %v5129_v18 = vld [vmem:[%s9094_s0 + $0x794] sm:$0xf0] }
 0x390   :  { %v5528_v21 = vpop.eup %5527  ;;  %v3095_v23 = vadd.f32 %v8375_v28, %v2446_v16  ;;  %v4668_v16 = vld [vmem:[%s9094_s0 + $0x790] sm:$0xf] }
 0x391   :  { %v5530_v22 = vpop.eup %5529  ;;  %3658 = vst [vmem:[%s9096_s3 + $0x6e0] sm:$0xff] %v5528_v21  ;;  %v2778_v46 = vadd.f32 %v8424_v5, %v2129_v19  ;;  %2167 = vmatmul.bf16.gmra.mxu0 %v4141_v40  ;;  %v4669_v21 = vor.u32 %v5129_v18, %v4668_v16  ;;  %v5136_v16 = vld [vmem:[%s9094_s0 + $0x7d4] sm:$0xf]  ;;  %v4702_v18 = vld [vmem:[%s9094_s0 + $0x7d8] sm:$0xf0] }
 0x392   :  { %3531 = vst [vmem:[%s9096_s3 + $0x2e8] sm:$0xff] %v5530_v22  ;;  %5531 = vtanh.f32 %v3095_v23  ;;  %2487 = vmatmul.bf16.gmra.mxu2 %v4653_v11  ;;  %v5004_v22 = vld [vmem:[%s9094_s0 + $0x3b4] sm:$0xf] }
 0x393   :  { %5533 = vtanh.f32 %v2778_v46  ;;  %v8532_v45 = vpop.f32.mrf.mxu1  ;;  %v4174_v46 = vld [vmem:[%s9094_s0 + $0x3b8] sm:$0xf0] }
 0x395   :  { %v2448_v26 = vpop.f32.mrf.mxu2  ;;  %v8537_v5 = vpop.f32.mrf.mxu3 }
 0x396   :  { %v2449_v28 = vadd.f32 %v7918_v15, %v2448_v26  ;;  %4815 = vmatmul.msk.bf16.gmra.mxu1 %vm1499_vm0, %v4161_v29  ;;  %v2130_v27 = vpop.f32.mrf.mxu0 }
 0x397   :  { %v2131_v31 = vadd.f32 %v7918_v15, %v2130_v27  ;;  %v4678_v15 = vld [vmem:[%s9094_s0 + $0x7a8] sm:$0xf0] }
 0x398   :  { %v5532_v36 = vpop.eup %5531  ;;  %v3098_v14 = vadd.f32 %v8414_v20, %v2449_v28  ;;  %v4148_v20 = vld [vmem:[%s9094_s0 + $0x380] sm:$0xf]  ;;  %v4681_v43 = vor.u32 %v5130_v33, %v4678_v15 }
 0x399   :  { %v5534_v30 = vpop.eup %5533  ;;  %3659 = vst [vmem:[%s9096_s3 + $0x6e8] sm:$0xff] %v5532_v36  ;;  %v2780_v32 = vadd.f32 %v8451_v37, %v2131_v31  ;;  %v4999_v37 = vld [vmem:[%s9094_s0 + $0x384] sm:$0xf0]  ;;  %v4177_v36 = vor.u32 %v5004_v22, %v4174_v46 }
 0x39a   :  { %3532 = vst [vmem:[%s9096_s3 + $0x2f0] sm:$0xff] %v5534_v30  ;;  %5535 = vtanh.f32 %v3098_v14  ;;  %4880 = vmatmul.msk.bf16.gmra.mxu3 %vm1499_vm0, %v4681_v43  ;;  %v4149_v44 = vor.u32 %v4999_v37, %v4148_v20 }
 0x39b   :  { %5537 = vtanh.f32 %v2780_v32  ;;  %v8559_v38 = vpop.f32.mrf.mxu1 }
 0x39d   :  { %v2450_v48 = vpop.f32.mrf.mxu2  ;;  %v8581_v58 = vpop.f32.mrf.mxu3 }
 0x39e   :  { %v2451_v9 = vadd.f32 %v8571_v47, %v2450_v48  ;;  %v2133_v4 = vpop.f32.mrf.mxu0  ;;  %v4697_v48 = vor.u32 %v5134_v35, %v4694_v13 }
 0x39f   :  { %v2134_v52 = vadd.f32 %v8571_v47, %v2133_v4  ;;  %v5131_v4 = vld [vmem:[%s9094_s0 + $0x7a4] sm:$0xf0] }
 0x3a0   :  { %v5536_v55 = vpop.eup %5535  ;;  %v3100_v57 = vadd.f32 %v8429_v63, %v2451_v9  ;;  %v4676_v9 = vld [vmem:[%s9094_s0 + $0x7a0] sm:$0xf] }
 0x3a1   :  { %v5538_v56 = vpop.eup %5537  ;;  %3660 = vst [vmem:[%s9096_s3 + $0x6f0] sm:$0xff] %v5536_v55  ;;  %v2783_v6 = vadd.f32 %v8478_v42, %v2134_v52  ;;  %2172 = vmatmul.bf16.gmra.mxu0 %v4149_v44  ;;  %v4677_v55 = vor.u32 %v5131_v4, %v4676_v9  ;;  %v5138_v9 = vld [vmem:[%s9094_s0 + $0x7e4] sm:$0xf]  ;;  %v4710_v4 = vld [vmem:[%s9094_s0 + $0x7e8] sm:$0xf0] }
 0x3a2   :  { %3533 = vst [vmem:[%s9096_s3 + $0x2f8] sm:$0xff] %v5538_v56  ;;  %5539 = vtanh.f32 %v3100_v57  ;;  %2492 = vmatmul.bf16.gmra.mxu2 %v4661_v50  ;;  %v5006_v56 = vld [vmem:[%s9094_s0 + $0x3c4] sm:$0xf] }
 0x3a3   :  { %5541 = vtanh.f32 %v2783_v6  ;;  %v8591_v39 = vpop.f32.mrf.mxu1  ;;  %v4182_v6 = vld [vmem:[%s9094_s0 + $0x3c8] sm:$0xf0] }
 0x3a5   :  { %v2453_v59 = vpop.f32.mrf.mxu2  ;;  %v8596_v42 = vpop.f32.mrf.mxu3 }
 0x3a6   :  { %v2454_v63 = vadd.f32 %v8571_v47, %v2453_v59  ;;  %4816 = vmatmul.msk.bf16.gmra.mxu1 %vm1499_vm0, %v4169_v0  ;;  %v2135_v60 = vpop.f32.mrf.mxu0 }
 0x3a7   :  { %v2136_v62 = vadd.f32 %v8571_v47, %v2135_v60 }
 0x3a8   :  { %v5540_v54 = vpop.eup %5539  ;;  %v3103_v49 = vadd.f32 %v8468_v53, %v2454_v63  ;;  %v4156_v53 = vld [vmem:[%s9094_s0 + $0x390] sm:$0xf] }
 0x3a9   :  { %v5542_v1 = vpop.eup %5541  ;;  %3661 = vst [vmem:[%s9096_s3 + $0x6f8] sm:$0xff] %v5540_v54  ;;  %v2785_v2 = vadd.f32 %v8505_v7, %v2136_v62  ;;  %v5001_v7 = vld [vmem:[%s9094_s0 + $0x394] sm:$0xf0]  ;;  %v4185_v54 = vor.u32 %v5006_v56, %v4182_v6 }
 0x3aa   :  { %3534 = vst [vmem:[%s9096_s3 + $0x300] sm:$0xff] %v5542_v1  ;;  %5543 = vtanh.f32 %v3103_v49  ;;  %4881 = vmatmul.msk.bf16.gmra.mxu3 %vm1499_vm0, %v4689_v3  ;;  %v4157_v19 = vor.u32 %v5001_v7, %v4156_v53 }
 0x3ab   :  { %5545 = vtanh.f32 %v2785_v2  ;;  %v8618_v40 = vpop.f32.mrf.mxu1 }
 0x3ad   :  { %v2455_v11 = vpop.f32.mrf.mxu2  ;;  %v8635_v29 = vpop.f32.mrf.mxu3 }
 0x3ae   :  { %v2456_v17 = vadd.f32 %v8571_v47, %v2455_v11  ;;  %v2138_v41 = vpop.f32.mrf.mxu0  ;;  %v4705_v11 = vor.u32 %v5136_v16, %v4702_v18 }
 0x3af   :  { %v2139_v23 = vadd.f32 %v8571_v47, %v2138_v41  ;;  %v5133_v41 = vld [vmem:[%s9094_s0 + $0x7b4] sm:$0xf0] }
 0x3b0   :  { %v5544_v26 = vpop.eup %5543  ;;  %v3105_v28 = vadd.f32 %v8483_v34, %v2456_v17  ;;  %v4684_v17 = vld [vmem:[%s9094_s0 + $0x7b0] sm:$0xf] }
 0x3b1   :  { %v5546_v27 = vpop.eup %5545  ;;  %3662 = vst [vmem:[%s9096_s3 + $0x700] sm:$0xff] %v5544_v26  ;;  %v2788_v31 = vadd.f32 %v8532_v45, %v2139_v23  ;;  %2177 = vmatmul.bf16.gmra.mxu0 %v4157_v19  ;;  %v4685_v26 = vor.u32 %v5133_v41, %v4684_v17  ;;  %v4718_v17 = vld [vmem:[%s9094_s0 + $0x7f8] sm:$0xf0] }
 0x3b2   :  { %3535 = vst [vmem:[%s9096_s3 + $0x308] sm:$0xff] %v5546_v27  ;;  %5547 = vtanh.f32 %v3105_v28  ;;  %2497 = vmatmul.bf16.gmra.mxu2 %v4669_v21  ;;  %v5008_v27 = vld [vmem:[%s9094_s0 + $0x3d4] sm:$0xf] }
 0x3b3   :  { %5549 = vtanh.f32 %v2788_v31  ;;  %v8645_v14 = vpop.f32.mrf.mxu1  ;;  %v4190_v31 = vld [vmem:[%s9094_s0 + $0x3d8] sm:$0xf0] }
 0x3b5   :  { %v2458_v30 = vpop.f32.mrf.mxu2  ;;  %v8650_v45 = vpop.f32.mrf.mxu3 }
 0x3b6   :  { %v2459_v34 = vadd.f32 %v8571_v47, %v2458_v30  ;;  %4817 = vmatmul.msk.bf16.gmra.mxu1 %vm1499_vm0, %v4177_v36  ;;  %v2140_v32 = vpop.f32.mrf.mxu0 }
 0x3b7   :  { %v2141_v33 = vadd.f32 %v8571_v47, %v2140_v32 }
 0x3b8   :  { %v5548_v15 = vpop.eup %5547  ;;  %v3108_v20 = vadd.f32 %v8522_v25, %v2459_v34  ;;  %v4164_v25 = vld [vmem:[%s9094_s0 + $0x3a0] sm:$0xf] }
 0x3b9   :  { %v5550_v37 = vpop.eup %5549  ;;  %3663 = vst [vmem:[%s9096_s3 + $0x708] sm:$0xff] %v5548_v15  ;;  %v2790_v43 = vadd.f32 %v8559_v38, %v2141_v33  ;;  %v5003_v38 = vld [vmem:[%s9094_s0 + $0x3a4] sm:$0xf0]  ;;  %v4193_v15 = vor.u32 %v5008_v27, %v4190_v31 }
 0x3ba   :  { %3536 = vst [vmem:[%s9096_s3 + $0x310] sm:$0xff] %v5550_v37  ;;  %5551 = vtanh.f32 %v3108_v20  ;;  %4882 = vmatmul.msk.bf16.gmra.mxu3 %vm1499_vm0, %v4697_v48  ;;  %v4165_v52 = vor.u32 %v5003_v38, %v4164_v25 }
 0x3bb   :  { %5553 = vtanh.f32 %v2790_v43  ;;  %v8672_v44 = vpop.f32.mrf.mxu1 }
 0x3bd   :  { %v2460_v50 = vpop.f32.mrf.mxu2  ;;  %v8689_v0 = vpop.f32.mrf.mxu3 }
 0x3be   :  { %v2461_v51 = vadd.f32 %v8571_v47, %v2460_v50  ;;  %v2143_v12 = vpop.f32.mrf.mxu0  ;;  %v4713_v50 = vor.u32 %v5138_v9, %v4710_v4 }
 0x3bf   :  { %v2144_v57 = vadd.f32 %v8571_v47, %v2143_v12  ;;  %v5135_v12 = vld [vmem:[%s9094_s0 + $0x7c4] sm:$0xf0] }
 0x3c0   :  { %v5552_v59 = vpop.eup %5551  ;;  %v3110_v63 = vadd.f32 %v8537_v5, %v2461_v51  ;;  %v4692_v51 = vld [vmem:[%s9094_s0 + $0x7c0] sm:$0xf] }
 0x3c1   :  { %v5554_v60 = vpop.eup %5553  ;;  %3664 = vst [vmem:[%s9096_s3 + $0x710] sm:$0xff] %v5552_v59  ;;  %v2793_v62 = vadd.f32 %v8591_v39, %v2144_v57  ;;  %2182 = vmatmul.bf16.gmra.mxu0 %v4165_v52  ;;  %v4693_v59 = vor.u32 %v5135_v12, %v4692_v51  ;;  %v5139_v12 = vld [vmem:[%s9094_s0 + $0x7e4] sm:$0xf0] }
 0x3c2   :  { %3537 = vst [vmem:[%s9096_s3 + $0x318] sm:$0xff] %v5554_v60  ;;  %5555 = vtanh.f32 %v3110_v63  ;;  %2502 = vmatmul.bf16.gmra.mxu2 %v4677_v55  ;;  %v5010_v60 = vld [vmem:[%s9094_s0 + $0x3e4] sm:$0xf] }
 0x3c3   :  { %5557 = vtanh.f32 %v2793_v62  ;;  %v8699_v49 = vpop.f32.mrf.mxu1  ;;  %v4198_v62 = vld [vmem:[%s9094_s0 + $0x3e8] sm:$0xf0] }
 0x3c5   :  { %v2463_v1 = vpop.f32.mrf.mxu2  ;;  %v8704_v39 = vpop.f32.mrf.mxu3 }
 0x3c6   :  { %v2464_v5 = vadd.f32 %v8571_v47, %v2463_v1  ;;  %4818 = vmatmul.msk.bf16.gmra.mxu1 %vm1499_vm0, %v4185_v54  ;;  %v2145_v2 = vpop.f32.mrf.mxu0 }
 0x3c7   :  { %v2146_v8 = vadd.f32 %v8571_v47, %v2145_v2 }
 0x3c8   :  { %v5556_v61 = vpop.eup %5555  ;;  %v3113_v53 = vadd.f32 %v8581_v58, %v2464_v5  ;;  %v4172_v58 = vld [vmem:[%s9094_s0 + $0x3b0] sm:$0xf] }
 0x3c9   :  { %v5558_v7 = vpop.eup %5557  ;;  %3665 = vst [vmem:[%s9096_s3 + $0x718] sm:$0xff] %v5556_v61  ;;  %v2795_v3 = vadd.f32 %v8618_v40, %v2146_v8  ;;  %v5005_v40 = vld [vmem:[%s9094_s0 + $0x3b4] sm:$0xf0]  ;;  %v4201_v61 = vor.u32 %v5010_v60, %v4198_v62  ;;  %v5014_v60 = vld [vmem:[%s9094_s0 + $0x404] sm:$0xf] }
 0x3ca   :  { %3538 = vst [vmem:[%s9096_s3 + $0x320] sm:$0xff] %v5558_v7  ;;  %5559 = vtanh.f32 %v3113_v53  ;;  %4883 = vmatmul.msk.bf16.gmra.mxu3 %vm1499_vm0, %v4705_v11  ;;  %v4173_v23 = vor.u32 %v5005_v40, %v4172_v58  ;;  %v5140_v11 = vld [vmem:[%s9094_s0 + $0x7f4] sm:$0xf]  ;;  %v4214_v62 = vld [vmem:[%s9094_s0 + $0x408] sm:$0xf0] }
 0x3cb   :  { %5561 = vtanh.f32 %v2795_v3  ;;  %v8726_v19 = vpop.f32.mrf.mxu1  ;;  %v4721_v41 = vor.u32 %v5140_v11, %v4718_v17  ;;  %v4204_v17 = vld [vmem:[%s9094_s0 + $0x3f0] sm:$0xf] }
 0x3cd   :  { %v2465_v21 = vpop.f32.mrf.mxu2  ;;  %v8743_v36 = vpop.f32.mrf.mxu3 }
 0x3ce   :  { %v2466_v22 = vadd.f32 %v8571_v47, %v2465_v21  ;;  %v2148_v46 = vpop.f32.mrf.mxu0 }
 0x3cf   :  { %v2149_v28 = vadd.f32 %v8571_v47, %v2148_v46 }
 0x3d0   :  { %v5560_v30 = vpop.eup %5559  ;;  %v3115_v34 = vadd.f32 %v8596_v42, %v2466_v22  ;;  %v5137_v22 = vld [vmem:[%s9094_s0 + $0x7d4] sm:$0xf0] }
 0x3d1   :  { %v5562_v32 = vpop.eup %5561  ;;  %3666 = vst [vmem:[%s9096_s3 + $0x720] sm:$0xff] %v5560_v30  ;;  %v2798_v33 = vadd.f32 %v8645_v14, %v2149_v28  ;;  %2187 = vmatmul.bf16.gmra.mxu0 %v4173_v23  ;;  %v4700_v23 = vld [vmem:[%s9094_s0 + $0x7d0] sm:$0xf] }
 0x3d2   :  { %3539 = vst [vmem:[%s9096_s3 + $0x328] sm:$0xff] %v5562_v32  ;;  %5563 = vtanh.f32 %v3115_v34  ;;  %2507 = vmatmul.bf16.gmra.mxu2 %v4685_v26  ;;  %v4701_v30 = vor.u32 %v5137_v22, %v4700_v23  ;;  %v5012_v32 = vld [vmem:[%s9094_s0 + $0x3f4] sm:$0xf] }
 0x3d3   :  { %5565 = vtanh.f32 %v2798_v33  ;;  %v8753_v20 = vpop.f32.mrf.mxu1  ;;  %v4206_v33 = vld [vmem:[%s9094_s0 + $0x3f8] sm:$0xf0] }
 0x3d5   :  { %v2468_v37 = vpop.f32.mrf.mxu2  ;;  %v8758_v14 = vpop.f32.mrf.mxu3 }
 0x3d6   :  { %v2469_v42 = vadd.f32 %v8571_v47, %v2468_v37  ;;  %4819 = vmatmul.msk.bf16.gmra.mxu1 %vm1499_vm0, %v4193_v15  ;;  %v2150_v43 = vpop.f32.mrf.mxu0 }
 0x3d7   :  { %v2151_v35 = vadd.f32 %v8571_v47, %v2150_v43 }
 0x3d8   :  { %v5564_v13 = vpop.eup %5563  ;;  %v3118_v25 = vadd.f32 %v8635_v29, %v2469_v42  ;;  %v4180_v29 = vld [vmem:[%s9094_s0 + $0x3c0] sm:$0xf] }
 0x3d9   :  { %v5566_v38 = vpop.eup %5565  ;;  %3667 = vst [vmem:[%s9096_s3 + $0x728] sm:$0xff] %v5564_v13  ;;  %v2800_v48 = vadd.f32 %v8672_v44, %v2151_v35  ;;  %v5007_v44 = vld [vmem:[%s9094_s0 + $0x3c4] sm:$0xf0]  ;;  %v4209_v35 = vor.u32 %v5012_v32, %v4206_v33 }
 0x3da   :  { %3540 = vst [vmem:[%s9096_s3 + $0x330] sm:$0xff] %v5566_v38  ;;  %5567 = vtanh.f32 %v3118_v25  ;;  %4884 = vmatmul.msk.bf16.gmra.mxu3 %vm1499_vm0, %v4713_v50  ;;  %v4181_v57 = vor.u32 %v5007_v44, %v4180_v29  ;;  %v4196_v50 = vld [vmem:[%s9094_s0 + $0x3e0] sm:$0xf] }
 0x3db   :  { %5569 = vtanh.f32 %v2800_v48  ;;  %v8780_v52 = vpop.f32.mrf.mxu1 }
 0x3dd   :  { %v2470_v55 = vpop.f32.mrf.mxu2  ;;  %v8802_v8 = vpop.f32.mrf.mxu3 }
 0x3de   :  { %v2471_v56 = vadd.f32 %v8571_v47, %v2470_v55  ;;  %v2153_v6 = vpop.f32.mrf.mxu0 }
 0x3df   :  { %v2154_v63 = vadd.f32 %v8571_v47, %v2153_v6 }
 0x3e0   :  { %v5568_v54 = vpop.eup %5567  ;;  %v3120_v1 = vadd.f32 %v8650_v45, %v2471_v56 }
 0x3e1   :  { %v5570_v5 = vpop.eup %5569  ;;  %3668 = vst [vmem:[%s9096_s3 + $0x730] sm:$0xff] %v5568_v54  ;;  %v2803_v2 = vadd.f32 %v8699_v49, %v2154_v63  ;;  %2192 = vmatmul.bf16.gmra.mxu0 %v4181_v57 }
 0x3e2   :  { %3541 = vst [vmem:[%s9096_s3 + $0x338] sm:$0xff] %v5570_v5  ;;  %5571 = vtanh.f32 %v3120_v1  ;;  %2512 = vmatmul.bf16.gmra.mxu2 %v4693_v59 }
 0x3e3   :  { %5573 = vtanh.f32 %v2803_v2  ;;  %v8807_v53 = vpop.f32.mrf.mxu1 }
 0x3e5   :  { %v2473_v45 = vpop.f32.mrf.mxu2  ;;  %v8840_v46 = vpop.f32.mrf.mxu3 }
 0x3e6   :  { %v2474_v7 = vadd.f32 %v8571_v47, %v2473_v45  ;;  %4820 = vmatmul.msk.bf16.gmra.mxu1 %vm1499_vm0, %v4201_v61  ;;  %v2155_v3 = vpop.f32.mrf.mxu0  ;;  %v4217_v45 = vor.u32 %v5014_v60, %v4214_v62 }
 0x3e7   :  { %v2156_v49 = vadd.f32 %v8571_v47, %v2155_v3 }
 0x3e8   :  { %v5572_v16 = vpop.eup %5571  ;;  %v3123_v18 = vadd.f32 %v8689_v0, %v2474_v7  ;;  %v4188_v0 = vld [vmem:[%s9094_s0 + $0x3d0] sm:$0xf] }
 0x3e9   :  { %v5574_v58 = vpop.eup %5573  ;;  %3669 = vst [vmem:[%s9096_s3 + $0x738] sm:$0xff] %v5572_v16  ;;  %v2805_v40 = vadd.f32 %v8726_v19, %v2156_v49  ;;  %v5009_v19 = vld [vmem:[%s9094_s0 + $0x3d4] sm:$0xf0] }
 0x3ea   :  { %3542 = vst [vmem:[%s9096_s3 + $0x340] sm:$0xff] %v5574_v58  ;;  %5575 = vtanh.f32 %v3123_v18  ;;  %4885 = vmatmul.msk.bf16.gmra.mxu3 %vm1499_vm0, %v4721_v41  ;;  %v4189_v28 = vor.u32 %v5009_v19, %v4188_v0  ;;  %v4716_v19 = vld [vmem:[%s9094_s0 + $0x7f0] sm:$0xf]  ;;  %v5141_v41 = vld [vmem:[%s9094_s0 + $0x7f4] sm:$0xf0] }
 0x3eb   :  { %5577 = vtanh.f32 %v2805_v40  ;;  %v8832_v21 = vpop.f32.mrf.mxu1 }
 0x3ed   :  { %v2475_v26 = vpop.f32.mrf.mxu2 }
 0x3ee   :  { %v2476_v27 = vadd.f32 %v8571_v47, %v2475_v26  ;;  %v2158_v31 = vpop.f32.mrf.mxu0 }
 0x3ef   :  { %v2159_v34 = vadd.f32 %v8571_v47, %v2158_v31 }
 0x3f0   :  { %v5576_v15 = vpop.eup %5575  ;;  %v3125_v37 = vadd.f32 %v8704_v39, %v2476_v27  ;;  %v8861_v39 = vpop.f32.mrf.mxu3 }
 0x3f1   :  { %v5578_v42 = vpop.eup %5577  ;;  %3670 = vst [vmem:[%s9096_s3 + $0x740] sm:$0xff] %v5576_v15  ;;  %v2808_v43 = vadd.f32 %v8753_v20, %v2159_v34  ;;  %2197 = vmatmul.bf16.gmra.mxu0 %v4189_v28  ;;  %v4717_v28 = vor.u32 %v5141_v41, %v4716_v19 }
 0x3f2   :  { %3543 = vst [vmem:[%s9096_s3 + $0x348] sm:$0xff] %v5578_v42  ;;  %5579 = vtanh.f32 %v3125_v37  ;;  %2517 = vmatmul.bf16.gmra.mxu2 %v4701_v30 }
 0x3f3   :  { %5581 = vtanh.f32 %v2808_v43  ;;  %v8859_v13 = vpop.f32.mrf.mxu1 }
 0x3f5   :  { %v2478_v25 = vpop.f32.mrf.mxu2 }
 0x3f6   :  { %v2479_v38 = vadd.f32 %v8571_v47, %v2478_v25  ;;  %4821 = vmatmul.msk.bf16.gmra.mxu1 %vm1499_vm0, %v4209_v35  ;;  %v2160_v48 = vpop.f32.mrf.mxu0 }
 0x3f7   :  { %v2161_v20 = vadd.f32 %v8571_v47, %v2160_v48 }
 0x3f8   :  { %v5580_v9 = vpop.eup %5579  ;;  %v3128_v4 = vadd.f32 %v8743_v36, %v2479_v38  ;;  %v5011_v36 = vld [vmem:[%s9094_s0 + $0x3e4] sm:$0xf0]  ;;  %v8896_v54 = vpop.f32.mrf.mxu3 }
 0x3f9   :  { %v5582_v29 = vpop.eup %5581  ;;  %3671 = vst [vmem:[%s9096_s3 + $0x748] sm:$0xff] %v5580_v9  ;;  %v2810_v44 = vadd.f32 %v8780_v52, %v2161_v20  ;;  %v4708_v52 = vld [vmem:[%s9094_s0 + $0x7e0] sm:$0xf]  ;;  %v4197_v57 = vor.u32 %v5011_v36, %v4196_v50 }
 0x3fa   :  { %3544 = vst [vmem:[%s9096_s3 + $0x350] sm:$0xff] %v5582_v29  ;;  %5583 = vtanh.f32 %v3128_v4  ;;  %v4709_v59 = vor.u32 %v5139_v12, %v4708_v52 }
 0x3fb   :  { %5585 = vtanh.f32 %v2810_v44  ;;  %v8880_v51 = vpop.f32.mrf.mxu1 }
 0x3fd   :  { %v2480_v55 = vpop.f32.mrf.mxu2 }
 0x3fe   :  { %v2481_v56 = vadd.f32 %v8571_v47, %v2480_v55  ;;  %v2163_v6 = vpop.f32.mrf.mxu0 }
 0x3ff   :  { %v2164_v63 = vadd.f32 %v8571_v47, %v2163_v6 }
 0x400   :  { %v5584_v1 = vpop.eup %5583  ;;  %v3130_v5 = vadd.f32 %v8758_v14, %v2481_v56  ;;  %v3142_v11 = vpop.f32.mrf.mxu3 }
 0x401   :  { %v5586_v2 = vpop.eup %5585  ;;  %3672 = vst [vmem:[%s9096_s3 + $0x750] sm:$0xff] %v5584_v1  ;;  %v2813_v61 = vadd.f32 %v8807_v53, %v2164_v63  ;;  %2202 = vmatmul.bf16.gmra.mxu0 %v4197_v57 }
 0x402   :  { %3545 = vst [vmem:[%s9096_s3 + $0x358] sm:$0xff] %v5586_v2  ;;  %5587 = vtanh.f32 %v3130_v5  ;;  %2522 = vmatmul.bf16.gmra.mxu2 %v4709_v59 }
 0x403   :  { %5589 = vtanh.f32 %v2813_v61  ;;  %v2822_v7 = vpop.f32.mrf.mxu1 }
 0x405   :  { %v2483_v3 = vpop.f32.mrf.mxu2 }
 0x406   :  { %v2484_v14 = vadd.f32 %v8571_v47, %v2483_v3  ;;  %4822 = vmatmul.msk.bf16.gmra.mxu1 %vm1499_vm0, %v4217_v45  ;;  %v2165_v49 = vpop.f32.mrf.mxu0 }
 0x407   :  { %v2166_v16 = vadd.f32 %v8571_v47, %v2165_v49 }
 0x408   :  { %v5588_v18 = vpop.eup %5587  ;;  %v3133_v53 = vadd.f32 %v8802_v8, %v2484_v14  ;;  %v5013_v8 = vld [vmem:[%s9094_s0 + $0x3f4] sm:$0xf0]  ;;  %v3144_v15 = vpop.f32.mrf.mxu3 }
 0x409   :  { %v5590_v58 = vpop.eup %5589  ;;  %3673 = vst [vmem:[%s9096_s3 + $0x758] sm:$0xff] %v5588_v18  ;;  %v2815_v40 = vadd.f32 %v8832_v21, %v2166_v16  ;;  %v4205_v23 = vor.u32 %v5013_v8, %v4204_v17 }
 0x40a   :  { %3546 = vst [vmem:[%s9096_s3 + $0x360] sm:$0xff] %v5590_v58  ;;  %5591 = vtanh.f32 %v3133_v53 }
 0x40b   :  { %5593 = vtanh.f32 %v2815_v40  ;;  %v2824_v0 = vpop.f32.mrf.mxu1 }
 0x40d   :  { %v2485_v21 = vpop.f32.mrf.mxu2 }
 0x40e   :  { %v2486_v22 = vadd.f32 %v8571_v47, %v2485_v21  ;;  %v2168_v26 = vpop.f32.mrf.mxu0 }
 0x40f   :  { %v2169_v27 = vadd.f32 %v8571_v47, %v2168_v26 }
 0x410   :  { %v5592_v31 = vpop.eup %5591  ;;  %v3135_v30 = vadd.f32 %v8840_v46, %v2486_v22  ;;  %v3147_v9 = vpop.f32.mrf.mxu3 }
 0x411   :  { %v5594_v34 = vpop.eup %5593  ;;  %3674 = vst [vmem:[%s9096_s3 + $0x760] sm:$0xff] %v5592_v31  ;;  %v2818_v32 = vadd.f32 %v8859_v13, %v2169_v27  ;;  %2207 = vmatmul.bf16.gmra.mxu0 %v4205_v23 }
 0x412   :  { %3547 = vst [vmem:[%s9096_s3 + $0x368] sm:$0xff] %v5594_v34  ;;  %5595 = vtanh.f32 %v3135_v30  ;;  %2527 = vmatmul.bf16.gmra.mxu2 %v4717_v28 }
 0x413   :  { %5597 = vtanh.f32 %v2818_v32  ;;  %v2827_v33 = vpop.f32.mrf.mxu1 }
 0x415   :  { %v2488_v37 = vpop.f32.mrf.mxu2 }
 0x416   :  { %v2489_v46 = vadd.f32 %v8571_v47, %v2488_v37  ;;  %v2170_v42 = vpop.f32.mrf.mxu0 }
 0x417   :  { %v2171_v43 = vadd.f32 %v8571_v47, %v2170_v42 }
 0x418   :  { %v5596_v35 = vpop.eup %5595  ;;  %v3138_v25 = vadd.f32 %v8861_v39, %v2489_v46  ;;  %v3149_v6 = vpop.f32.mrf.mxu3 }
 0x419   :  { %v5598_v13 = vpop.eup %5597  ;;  %3675 = vst [vmem:[%s9096_s3 + $0x768] sm:$0xff] %v5596_v35  ;;  %v2820_v38 = vadd.f32 %v8880_v51, %v2171_v43 }
 0x41a   :  { %3548 = vst [vmem:[%s9096_s3 + $0x370] sm:$0xff] %v5598_v13  ;;  %5599 = vtanh.f32 %v3138_v25 }
 0x41b   :  { %5601 = vtanh.f32 %v2820_v38  ;;  %v2829_v48 = vpop.f32.mrf.mxu1 }
 0x41d   :  { %v2490_v20 = vpop.f32.mrf.mxu2 }
 0x41e   :  { %v2491_v4 = vadd.f32 %v8571_v47, %v2490_v20  ;;  %v2173_v29 = vpop.f32.mrf.mxu0 }
 0x41f   :  { %v2174_v39 = vadd.f32 %v8571_v47, %v2173_v29 }
 0x420   :  { %v5600_v44 = vpop.eup %5599  ;;  %v3140_v50 = vadd.f32 %v8896_v54, %v2491_v4  ;;  %v3152_v49 = vpop.f32.mrf.mxu3 }
 0x421   :  { %v5602_v36 = vpop.eup %5601  ;;  %3676 = vst [vmem:[%s9096_s3 + $0x770] sm:$0xff] %v5600_v44  ;;  %v2823_v51 = vadd.f32 %v2822_v7, %v2174_v39 }
 0x422   :  { %3549 = vst [vmem:[%s9096_s3 + $0x378] sm:$0xff] %v5602_v36  ;;  %5603 = vtanh.f32 %v3140_v50 }
 0x423   :  { %5605 = vtanh.f32 %v2823_v51  ;;  %v2832_v52 = vpop.f32.mrf.mxu1 }
 0x425   :  { %v2493_v12 = vpop.f32.mrf.mxu2 }
 0x426   :  { %v2494_v55 = vadd.f32 %v8571_v47, %v2493_v12  ;;  %v2175_v57 = vpop.f32.mrf.mxu0 }
 0x427   :  { %v2176_v56 = vadd.f32 %v8571_v47, %v2175_v57 }
 0x428   :  { %v5604_v59 = vpop.eup %5603  ;;  %v3143_v63 = vadd.f32 %v3142_v11, %v2494_v55  ;;  %v3154_v41 = vpop.f32.mrf.mxu3 }
 0x429   :  { %v5606_v60 = vpop.eup %5605  ;;  %3677 = vst [vmem:[%s9096_s3 + $0x778] sm:$0xff] %v5604_v59  ;;  %v2825_v62 = vadd.f32 %v2824_v0, %v2176_v56 }
 0x42a   :  { %3550 = vst [vmem:[%s9096_s3 + $0x380] sm:$0xff] %v5606_v60  ;;  %5607 = vtanh.f32 %v3143_v63 }
 0x42b   :  { %5609 = vtanh.f32 %v2825_v62  ;;  %v2834_v54 = vpop.f32.mrf.mxu1 }
 0x42d   :  { %v2495_v1 = vpop.f32.mrf.mxu2 }
 0x42e   :  { %v2496_v5 = vadd.f32 %v8571_v47, %v2495_v1  ;;  %v2178_v2 = vpop.f32.mrf.mxu0 }
 0x42f   :  { %v2179_v61 = vadd.f32 %v8571_v47, %v2178_v2 }
 0x430   :  { %v5608_v45 = vpop.eup %5607  ;;  %v3145_v7 = vadd.f32 %v3144_v15, %v2496_v5 }
 0x431   :  { %v5610_v3 = vpop.eup %5609  ;;  %3678 = vst [vmem:[%s9096_s3 + $0x780] sm:$0xff] %v5608_v45  ;;  %v2828_v14 = vadd.f32 %v2827_v33, %v2179_v61  ;;  %v3157_v33 = vpop.f32.mrf.mxu3 }
 0x432   :  { %3551 = vst [vmem:[%s9096_s3 + $0x388] sm:$0xff] %v5610_v3  ;;  %5611 = vtanh.f32 %v3145_v7 }
 0x433   :  { %5613 = vtanh.f32 %v2828_v14  ;;  %v2837_v16 = vpop.f32.mrf.mxu1 }
 0x435   :  { %v2498_v18 = vpop.f32.mrf.mxu2 }
 0x436   :  { %v2499_v53 = vadd.f32 %v8571_v47, %v2498_v18  ;;  %v2180_v58 = vpop.f32.mrf.mxu0 }
 0x437   :  { %v2181_v40 = vadd.f32 %v8571_v47, %v2180_v58 }
 0x438   :  { %v5612_v11 = vpop.eup %5611  ;;  %v3148_v17 = vadd.f32 %v3147_v9, %v2499_v53 }
 0x439   :  { %v5614_v8 = vpop.eup %5613  ;;  %3679 = vst [vmem:[%s9096_s3 + $0x788] sm:$0xff] %v5612_v11  ;;  %v2830_v0 = vadd.f32 %v2829_v48, %v2181_v40  ;;  %v3159_v4 = vpop.f32.mrf.mxu3 }
 0x43a   :  { %3552 = vst [vmem:[%s9096_s3 + $0x390] sm:$0xff] %v5614_v8  ;;  %5615 = vtanh.f32 %v3148_v17 }
 0x43b   :  { %5617 = vtanh.f32 %v2830_v0  ;;  %v2839_v19 = vpop.f32.mrf.mxu1 }
 0x43d   :  { %v2500_v21 = vpop.f32.mrf.mxu2 }
 0x43e   :  { %v2501_v23 = vadd.f32 %v8571_v47, %v2500_v21  ;;  %v2183_v22 = vpop.f32.mrf.mxu0 }
 0x43f   :  { %v2184_v26 = vadd.f32 %v8571_v47, %v2183_v22 }
 0x440   :  { %v5616_v28 = vpop.eup %5615  ;;  %v3150_v27 = vadd.f32 %v3149_v6, %v2501_v23 }
 0x441   :  { %v5618_v31 = vpop.eup %5617  ;;  %3680 = vst [vmem:[%s9096_s3 + $0x790] sm:$0xff] %v5616_v28  ;;  %v2833_v30 = vadd.f32 %v2832_v52, %v2184_v26  ;;  %v3162_v63 = vpop.f32.mrf.mxu3 }
 0x442   :  { %3553 = vst [vmem:[%s9096_s3 + $0x398] sm:$0xff] %v5618_v31  ;;  %5619 = vtanh.f32 %v3150_v27 }
 0x443   :  { %5621 = vtanh.f32 %v2833_v30  ;;  %v2842_v34 = vpop.f32.mrf.mxu1 }
 0x445   :  { %v2503_v32 = vpop.f32.mrf.mxu2 }
 0x446   :  { %v2504_v15 = vadd.f32 %v8571_v47, %v2503_v32  ;;  %v2185_v37 = vpop.f32.mrf.mxu0 }
 0x447   :  { %v2186_v46 = vadd.f32 %v8571_v47, %v2185_v37 }
 0x448   :  { %v5620_v42 = vpop.eup %5619  ;;  %v3153_v43 = vadd.f32 %v3152_v49, %v2504_v15 }
 0x449   :  { %v5622_v35 = vpop.eup %5621  ;;  %3681 = vst [vmem:[%s9096_s3 + $0x798] sm:$0xff] %v5620_v42  ;;  %v2835_v25 = vadd.f32 %v2834_v54, %v2186_v46  ;;  %v3164_v14 = vpop.f32.mrf.mxu3 }
 0x44a   :  { %3554 = vst [vmem:[%s9096_s3 + $0x3a0] sm:$0xff] %v5622_v35  ;;  %5623 = vtanh.f32 %v3153_v43 }
 0x44b   :  { %5625 = vtanh.f32 %v2835_v25  ;;  %v2844_v13 = vpop.f32.mrf.mxu1 }
 0x44d   :  { %v2505_v38 = vpop.f32.mrf.mxu2 }
 0x44e   :  { %v2506_v48 = vadd.f32 %v8571_v47, %v2505_v38  ;;  %v2188_v20 = vpop.f32.mrf.mxu0 }
 0x44f   :  { %v2189_v9 = vadd.f32 %v8571_v47, %v2188_v20 }
 0x450   :  { %v5624_v29 = vpop.eup %5623  ;;  %v3155_v39 = vadd.f32 %v3154_v41, %v2506_v48 }
 0x451   :  { %v5626_v44 = vpop.eup %5625  ;;  %3682 = vst [vmem:[%s9096_s3 + $0x7a0] sm:$0xff] %v5624_v29  ;;  %v2838_v50 = vadd.f32 %v2837_v16, %v2189_v9 }
 0x452   :  { %3555 = vst [vmem:[%s9096_s3 + $0x3a8] sm:$0xff] %v5626_v44  ;;  %5627 = vtanh.f32 %v3155_v39  ;;  %v2214_v44 = vadd.f32 %v8571_v47, %v5993_v10 }
 0x453   :  { %5629 = vtanh.f32 %v2838_v50  ;;  %v2847_v36 = vpop.f32.mrf.mxu1 }
 0x455   :  { %v2508_v51 = vpop.f32.mrf.mxu2 }
 0x456   :  { %v2509_v52 = vadd.f32 %v8571_v47, %v2508_v51  ;;  %v2190_v12 = vpop.f32.mrf.mxu0 }
 0x457   :  { %v2191_v55 = vadd.f32 %v8571_v47, %v2190_v12 }
 0x458   :  { %v5628_v57 = vpop.eup %5627  ;;  %v3158_v56 = vadd.f32 %v3157_v33, %v2509_v52  ;;  %v5677_v52 = vld [vmem:[%s9095_s2] ss:$0 sm:$0xff] }
 0x459   :  { %v5630_v6 = vpop.eup %5629  ;;  %3683 = vst [vmem:[%s9096_s3 + $0x7a8] sm:$0xff] %v5628_v57  ;;  %v2840_v59 = vadd.f32 %v2839_v19, %v2191_v55  ;;  %v3167_v19 = vpop.f32.mrf.mxu3 }
 0x45a   :  { %3556 = vst [vmem:[%s9096_s3 + $0x3b0] sm:$0xff] %v5630_v6  ;;  %5631 = vtanh.f32 %v3158_v56 }
 0x45b   :  { %5633 = vtanh.f32 %v2840_v59  ;;  %v2849_v60 = vpop.f32.mrf.mxu1  ;;  %v2216_v59 = vadd.f32 %v5677_v52, %v6023_v24 }
 0x45d   :  { %v2510_v62 = vpop.f32.mrf.mxu2 }
 0x45e   :  { %v2511_v54 = vadd.f32 %v8571_v47, %v2510_v62  ;;  %v2193_v1 = vpop.f32.mrf.mxu0 }
 0x45f   :  { %v2194_v5 = vadd.f32 %v8571_v47, %v2193_v1 }
 0x460   :  { %v5632_v2 = vpop.eup %5631  ;;  %v3160_v61 = vadd.f32 %v3159_v4, %v2511_v54 }
 0x461   :  { %v5634_v45 = vpop.eup %5633  ;;  %3684 = vst [vmem:[%s9096_s3 + $0x7b0] sm:$0xff] %v5632_v2  ;;  %v2843_v7 = vadd.f32 %v2842_v34, %v2194_v5  ;;  %v3169_v15 = vpop.f32.mrf.mxu3 }
 0x462   :  { %3557 = vst [vmem:[%s9096_s3 + $0x3b8] sm:$0xff] %v5634_v45  ;;  %5635 = vtanh.f32 %v3160_v61 }
 0x463   :  { %5637 = vtanh.f32 %v2843_v7  ;;  %v2852_v3 = vpop.f32.mrf.mxu1 }
 0x465   :  { %v2513_v49 = vpop.f32.mrf.mxu2 }
 0x466   :  { %v2514_v16 = vadd.f32 %v8571_v47, %v2513_v49  ;;  %v2195_v18 = vpop.f32.mrf.mxu0 }
 0x467   :  { %v2196_v53 = vadd.f32 %v8571_v47, %v2195_v18 }
 0x468   :  { %v5636_v58 = vpop.eup %5635  ;;  %v3163_v40 = vadd.f32 %v3162_v63, %v2514_v16 }
 0x469   :  { %v5638_v11 = vpop.eup %5637  ;;  %3685 = vst [vmem:[%s9096_s3 + $0x7b8] sm:$0xff] %v5636_v58  ;;  %v2845_v17 = vadd.f32 %v2844_v13, %v2196_v53  ;;  %v3172_v39 = vpop.f32.mrf.mxu3 }
 0x46a   :  { %3558 = vst [vmem:[%s9096_s3 + $0x3c0] sm:$0xff] %v5638_v11  ;;  %5639 = vtanh.f32 %v3163_v40 }
 0x46b   :  { %5641 = vtanh.f32 %v2845_v17  ;;  %v2854_v8 = vpop.f32.mrf.mxu1 }
 0x46d   :  { %v2515_v0 = vpop.f32.mrf.mxu2 }
 0x46e   :  { %v2516_v41 = vadd.f32 %v8571_v47, %v2515_v0  ;;  %v2198_v21 = vpop.f32.mrf.mxu0 }
 0x46f   :  { %v2199_v23 = vadd.f32 %v8571_v47, %v2198_v21 }
 0x470   :  { %v5640_v22 = vpop.eup %5639  ;;  %v3165_v26 = vadd.f32 %v3164_v14, %v2516_v41 }
 0x471   :  { %v5642_v28 = vpop.eup %5641  ;;  %3686 = vst [vmem:[%s9096_s3 + $0x7c0] sm:$0xff] %v5640_v22  ;;  %v2848_v27 = vadd.f32 %v2847_v36, %v2199_v23  ;;  %v3174_v63 = vpop.f32.mrf.mxu3 }
 0x472   :  { %3559 = vst [vmem:[%s9096_s3 + $0x3c8] sm:$0xff] %v5642_v28  ;;  %5643 = vtanh.f32 %v3165_v26 }
 0x473   :  { %5645 = vtanh.f32 %v2848_v27  ;;  %v2857_v31 = vpop.f32.mrf.mxu1 }
 0x475   :  { %v2518_v30 = vpop.f32.mrf.mxu2 }
 0x476   :  { %v2519_v34 = vadd.f32 %v8571_v47, %v2518_v30  ;;  %v2200_v32 = vpop.f32.mrf.mxu0 }
 0x477   :  { %v2201_v33 = vadd.f32 %v8571_v47, %v2200_v32 }
 0x478   :  { %v5644_v37 = vpop.eup %5643  ;;  %v3168_v46 = vadd.f32 %v3167_v19, %v2519_v34 }
 0x479   :  { %v5646_v42 = vpop.eup %5645  ;;  %3687 = vst [vmem:[%s9096_s3 + $0x7c8] sm:$0xff] %v5644_v37  ;;  %v2850_v43 = vadd.f32 %v2849_v60, %v2201_v33  ;;  %v3177_v49 = vpop.f32.mrf.mxu3 }
 0x47a   :  { %3560 = vst [vmem:[%s9096_s3 + $0x3d0] sm:$0xff] %v5646_v42  ;;  %5647 = vtanh.f32 %v3168_v46 }
 0x47b   :  { %5649 = vtanh.f32 %v2850_v43  ;;  %v2859_v35 = vpop.f32.mrf.mxu1 }
 0x47d   :  { %v2520_v25 = vpop.f32.mrf.mxu2 }
 0x47e   :  { %v2521_v13 = vadd.f32 %v8571_v47, %v2520_v25  ;;  %v2203_v38 = vpop.f32.mrf.mxu0 }
 0x47f   :  { %v2204_v48 = vadd.f32 %v8571_v47, %v2203_v38 }
 0x480   :  { %v5648_v20 = vpop.eup %5647  ;;  %v3170_v9 = vadd.f32 %v3169_v15, %v2521_v13 }
 0x481   :  { %v5650_v4 = vpop.eup %5649  ;;  %3688 = vst [vmem:[%s9096_s3 + $0x7d0] sm:$0xff] %v5648_v20  ;;  %v2853_v29 = vadd.f32 %v2852_v3, %v2204_v48  ;;  %v3179_v41 = vpop.f32.mrf.mxu3 }
 0x482   :  { %3561 = vst [vmem:[%s9096_s3 + $0x3d8] sm:$0xff] %v5650_v4  ;;  %5651 = vtanh.f32 %v3170_v9 }
 0x483   :  { %5653 = vtanh.f32 %v2853_v29  ;;  %v2862_v50 = vpop.f32.mrf.mxu1 }
 0x484   :  { %v2863_v36 = vadd.f32 %v2862_v50, %v2214_v44 }
 0x485   :  { %v2523_v51 = vpop.f32.mrf.mxu2 }
 0x486   :  { %5655 = vtanh.f32 %v2863_v36  ;;  %v2524_v12 = vadd.f32 %v5677_v52, %v2523_v51  ;;  %v2205_v55 = vpop.f32.mrf.mxu0 }
 0x487   :  { %v2206_v57 = vadd.f32 %v5677_v52, %v2205_v55 }
 0x488   :  { %v5652_v56 = vpop.eup %5651  ;;  %v3173_v6 = vadd.f32 %v3172_v39, %v2524_v12 }
 0x489   :  { %v5654_v10 = vpop.eup %5653  ;;  %3689 = vst [vmem:[%s9096_s3 + $0x7d8] sm:$0xff] %v5652_v56  ;;  %v2855_v47 = vadd.f32 %v2854_v8, %v2206_v57 }
 0x48a   :  { %3562 = vst [vmem:[%s9096_s3 + $0x3e0] sm:$0xff] %v5654_v10  ;;  %5657 = vtanh.f32 %v3173_v6 }
 0x48b   :  { %5659 = vtanh.f32 %v2855_v47  ;;  %v2864_v60 = vpop.f32.mrf.mxu1 }
 0x48c   :  { %v5656_v62 = vpop.eup %5655  ;;  %v2865_v54 = vadd.f32 %v2864_v60, %v2216_v59 }
 0x48d   :  { %3566 = vst [vmem:[%s9096_s3 + $0x400] sm:$0xff] %v5656_v62  ;;  %v2525_v1 = vpop.f32.mrf.mxu2 }
 0x48e   :  { %5661 = vtanh.f32 %v2865_v54  ;;  %v2526_v5 = vadd.f32 %v5677_v52, %v2525_v1  ;;  %v2208_v2 = vpop.f32.mrf.mxu0 }
 0x48f   :  { %v2209_v61 = vadd.f32 %v5677_v52, %v2208_v2 }
 0x490   :  { %v5658_v24 = vpop.eup %5657  ;;  %v3175_v45 = vadd.f32 %v3174_v63, %v2526_v5 }
 0x491   :  { %v5660_v7 = vpop.eup %5659  ;;  %3690 = vst [vmem:[%s9096_s3 + $0x7e0] sm:$0xff] %v5658_v24  ;;  %v2858_v3 = vadd.f32 %v2857_v31, %v2209_v61 }
 0x492   :  { %3563 = vst [vmem:[%s9096_s3 + $0x3e8] sm:$0xff] %v5660_v7  ;;  %5663 = vtanh.f32 %v3175_v45 }
 0x493   :  { %5665 = vtanh.f32 %v2858_v3 }
 0x494   :  { %v5662_v14 = vpop.eup %5661 }
 0x495   :  { %3567 = vst [vmem:[%s9096_s3 + $0x408] sm:$0xff] %v5662_v14  ;;  %v2528_v16 = vpop.f32.mrf.mxu2 }
 0x496   :  { %v2529_v18 = vadd.f32 %v5677_v52, %v2528_v16  ;;  %v2210_v53 = vpop.f32.mrf.mxu0 }
 0x497   :  { %v2211_v58 = vadd.f32 %v5677_v52, %v2210_v53 }
 0x498   :  { %v5664_v40 = vpop.eup %5663  ;;  %v3178_v11 = vadd.f32 %v3177_v49, %v2529_v18 }
 0x499   :  { %v5666_v17 = vpop.eup %5665  ;;  %3691 = vst [vmem:[%s9096_s3 + $0x7e8] sm:$0xff] %v5664_v40  ;;  %v2860_v8 = vadd.f32 %v2859_v35, %v2211_v58 }
 0x49a   :  { %3564 = vst [vmem:[%s9096_s3 + $0x3f0] sm:$0xff] %v5666_v17  ;;  %5667 = vtanh.f32 %v3178_v11 }
 0x49b   :  { %5669 = vtanh.f32 %v2860_v8 }
 0x49d   :  { %v2530_v0 = vpop.f32.mrf.mxu2 }
 0x49e   :  { %v2531_v19 = vadd.f32 %v5677_v52, %v2530_v0 }
 0x4a0   :  { %v5668_v21 = vpop.eup %5667  ;;  %v3180_v23 = vadd.f32 %v3179_v41, %v2531_v19 }
 0x4a1   :  { %v5670_v22 = vpop.eup %5669  ;;  %3692 = vst [vmem:[%s9096_s3 + $0x7f0] sm:$0xff] %v5668_v21 }
 0x4a2   :  { %3565 = vst [vmem:[%s9096_s3 + $0x3f8] sm:$0xff] %v5670_v22  ;;  %5671 = vtanh.f32 %v3180_v23 }
 0x4a8   :  { %v5672_v26 = vpop.eup %5671 }
 0x4a9   :  { %3693 = vst [vmem:[%s9096_s3 + $0x7f8] sm:$0xff] %v5672_v26 }

</bundles_post_ra>
